<compile_context>
chip_gen: v5e
topology: v5e:2x2
jax: 0.10.0
libtpu: 0.0.40
codegen_flags: <defaults>
</compile_context>

<pallas_src>
import functools

import jax
import jax.numpy as jnp
from jax.experimental import pallas as pl
from jax.experimental.pallas import tpu as pltpu


def skipgram_kernel(cidx_ref, tidx_ref,      # scalar-prefetch indices (SMEM)
                    emb0_hbm, emb1_hbm,      # embedding tables, left in HBM
                    out_ref,                 # (TB, OUT_PAD) VMEM, lane-dense
                    cbuf, tbuf, sem,         # scratch: gathers + DMA sems
                    *, tb, n_tgt, out_pad):
    """out[b, k] = <layer0[center[b]], layer1rev[target[b, k]]>."""
    base = pl.program_id(0) * tb

    # ---- issue all row-gather DMAs for this batch tile (HBM -> VMEM) -------
    copies = []
    for b in range(tb):                                  # static unroll (tb small)
        ci = cidx_ref[base + b]
        cp = pltpu.make_async_copy(
            emb0_hbm.at[pl.ds(ci, 1), :], cbuf.at[pl.ds(b, 1), :], sem.at[0])
        cp.start()
        copies.append(cp)
        for j in range(n_tgt):
            ti = tidx_ref[base + b, j]
            cp = pltpu.make_async_copy(
                emb1_hbm.at[pl.ds(ti, 1), :], tbuf.at[b, pl.ds(j, 1), :],
                sem.at[1])
            cp.start()
            copies.append(cp)
    for cp in copies:
        cp.wait()

    # ---- score: multiply-reduce over hidden (VPU + lane reduce) ------------
    center = cbuf[...]                                       # (tb, H)
    targets = tbuf[...]                                      # (tb, K, H)
    scores = jnp.sum(center[:, None, :] * targets, axis=2)   # (tb, K) f32

    # ---- lane-dense store: pad K up to a multiple of 128 and write once ----
    pad = out_pad - n_tgt
    if pad > 0:
        scores = jnp.concatenate(
            [scores, jnp.zeros((tb, pad), jnp.float32)], axis=1)
    out_ref[...] = scores


def skipgram_forward(x, emb0, emb1, negative_size, key, *, tb=8):
    """Matches SkipGramNet.forward with corpusSmall=True semantics."""
    B = x.shape[0]
    V, H = emb0.shape
    y = x[:, 1:]                              # context indices (B, C)
    c = x[:, 0].astype(jnp.int32)             # center index    (B,)

    # Negative sampling (glue, plain JAX): uniform noise, zero the context
    # positions, take top-k indices -> `negative_size` negatives per row.
    # TODO(synk): torch RNG stream is not bit-reproducible in JAX; semantics match.
    n = jax.random.uniform(key, (B, V), dtype=jnp.float32)
    n = n.at[jnp.arange(B)[:, None], y].set(0.0)
    neg_idx = jax.lax.top_k(n, negative_size)[1].astype(jnp.int32)

    tgt = jnp.concatenate([y.astype(jnp.int32), neg_idx], axis=1)    # (B, K)
    K = tgt.shape[1]

    # Pad batch to a multiple of tb (tb kept a multiple of 8 => aligned blocks).
    B_pad = tb * ((B + tb - 1) // tb)
    if B_pad != B:
        c = jnp.concatenate([c, jnp.zeros((B_pad - B,), jnp.int32)])
        tgt = jnp.concatenate(
            [tgt, jnp.zeros((B_pad - B, K), jnp.int32)], axis=0)

    out_pad = 128 * ((K + 127) // 128)        # lane-dense output width

    kernel = functools.partial(skipgram_kernel, tb=tb, n_tgt=K, out_pad=out_pad)
    out = pl.pallas_call(
        kernel,
        out_shape=jax.ShapeDtypeStruct((B_pad, out_pad), jnp.float32),
        grid_spec=pltpu.PrefetchScalarGridSpec(
            num_scalar_prefetch=2,            # center idx, target idx -> SMEM
            grid=(B_pad // tb,),
            in_specs=[
                pl.BlockSpec(memory_space=pl.ANY),   # layer0 table stays in HBM
                pl.BlockSpec(memory_space=pl.ANY),   # layer1rev table stays in HBM
            ],
            out_specs=pl.BlockSpec((tb, out_pad), lambda i, cidx, tidx: (i, 0)),
            scratch_shapes=[
                pltpu.VMEM((tb, H), jnp.float32),     # gathered center rows
                pltpu.VMEM((tb, K, H), jnp.float32),  # gathered target rows
                pltpu.SemaphoreType.DMA((2,)),        # shared DMA sems
            ]),
        compiler_params=pltpu.CompilerParams(
            dimension_semantics=("parallel",)),       # v7x: batch split over TCs
    )(c, tgt, emb0, emb1)
    return out[:B, :K]


if __name__ == "__main__":
    corpus_size = 20
    hidden_size = 128                 # module default is 300; small + lane-friendly
    negative_size = 5
    batch = 16
    n_context = 4                     # x has shape (batch, 1 + n_context)

    key = jax.random.PRNGKey(0)
    k_e0, k_e1, k_x, k_neg = jax.random.split(key, 4)

    # nn.Embedding default init ~ N(0, 1), deterministic here via PRNGKey(0)
    emb0 = jax.random.normal(k_e0, (corpus_size, hidden_size), dtype=jnp.float32)
    emb1 = jax.random.normal(k_e1, (corpus_size, hidden_size), dtype=jnp.float32)

    x = jax.random.randint(k_x, (batch, 1 + n_context), 0, corpus_size,
                           dtype=jnp.int32)

    out = skipgram_forward(x, emb0, emb1, negative_size, k_neg)
    out = jax.block_until_ready(out)
    assert out.shape == (batch, n_context + negative_size)
    assert out.dtype == jnp.float32

    # Plain-JAX reference of the same forward pass (same negatives).
    y = x[:, 1:]
    center = emb0[x[:, 0]]                                           # (B, H)
    pos_ref = jnp.sum(center[:, None, :] * emb1[y], axis=2)          # (B, C)
    n = jax.random.uniform(k_neg, (batch, corpus_size), dtype=jnp.float32)
    n = n.at[jnp.arange(batch)[:, None], y].set(0.0)
    neg_idx = jax.lax.top_k(n, negative_size)[1]
    neg_ref = jnp.sum(center[:, None, :] * emb1[neg_idx], axis=2)    # (B, NEG)
    ref = jnp.concatenate([pos_ref, neg_ref], axis=1)
    assert jnp.allclose(out, ref, atol=1e-5, rtol=1e-5)

    print("KERNEL_OK")
</pallas_src>

<mosaic_0001>
module attributes {stable_mosaic.version = 11 : i64} {
  func.func @skipgram_kernel(%arg0: i32, %arg1: memref<16xi32, #tpu.memory_space<smem>>, %arg2: memref<16x9xi32, #tpu.memory_space<smem>>, %arg3: memref<20x128xf32, #tpu.memory_space<any>>, %arg4: memref<20x128xf32, #tpu.memory_space<any>>, %arg5: memref<8x128xf32, #tpu.memory_space<vmem>>, %arg6: memref<8x128xf32, #tpu.memory_space<vmem>>, %arg7: memref<8x9x128xf32, #tpu.memory_space<vmem>>, %arg8: memref<2x!tpu.dma_semaphore, #tpu.memory_space<semaphore_mem>>) attributes {dimension_semantics = [#tpu.dimension_semantics<parallel>], iteration_bounds = array<i64: 2>, scalar_prefetch = 2 : i64, scratch_operands = 3 : i64, tpu.core_type = #tpu.core_type<tc>, window_params = [{}, {}, {transform_indices = @transform_2, window_bounds = array<i64: 8, 128>}]} {
    %c8_i32 = arith.constant 8 : i32
    %0 = arith.muli %arg0, %c8_i32 : i32
    %c0_i32 = arith.constant 0 : i32
    %1 = arith.addi %0, %c0_i32 : i32
    %2 = arith.index_cast %1 : i32 to index
    %3 = memref.load %arg1[%2] : memref<16xi32, #tpu.memory_space<smem>>
    %c0_i32_0 = arith.constant 0 : i32
    %c0_i32_1 = arith.constant 0 : i32
    %4 = tpu.memref_slice %arg3[%3, %c0_i32_1] : memref<20x128xf32, #tpu.memory_space<any>> -> memref<1x128xf32, #tpu.memory_space<any>>
    %c0_i32_2 = arith.constant 0 : i32
    %c0_i32_3 = arith.constant 0 : i32
    %5 = tpu.memref_slice %arg6[%c0_i32_2, %c0_i32_3] : memref<8x128xf32, #tpu.memory_space<vmem>> -> memref<1x128xf32, #tpu.memory_space<vmem>>
    %6 = tpu.memref_slice %arg8[%c0_i32_0] : memref<2x!tpu.dma_semaphore, #tpu.memory_space<semaphore_mem>> -> memref<1x!tpu.dma_semaphore, #tpu.memory_space<semaphore_mem>>
    %7 = tpu.memref_squeeze %6 : memref<1x!tpu.dma_semaphore, #tpu.memory_space<semaphore_mem>> -> memref<!tpu.dma_semaphore, #tpu.memory_space<semaphore_mem>>
    tpu.enqueue_dma source(%4 : memref<1x128xf32, #tpu.memory_space<any>>) target(%5 : memref<1x128xf32, #tpu.memory_space<vmem>>) target_semaphore(%7 : memref<!tpu.dma_semaphore, #tpu.memory_space<semaphore_mem>>)
    %c0_i32_4 = arith.constant 0 : i32
    %8 = arith.addi %0, %c0_i32_4 : i32
    %9 = arith.index_cast %8 : i32 to index
    %c0 = arith.constant 0 : index
    %10 = memref.load %arg2[%9, %c0] : memref<16x9xi32, #tpu.memory_space<smem>>
    %c0_i32_5 = arith.constant 0 : i32
    %c1_i32 = arith.constant 1 : i32
    %c0_i32_6 = arith.constant 0 : i32
    %11 = tpu.memref_slice %arg4[%10, %c0_i32_6] : memref<20x128xf32, #tpu.memory_space<any>> -> memref<1x128xf32, #tpu.memory_space<any>>
    %c0_i32_7 = arith.constant 0 : i32
    %c0_i32_8 = arith.constant 0 : i32
    %12 = tpu.memref_slice %arg7[%c0_i32_5, %c0_i32_7, %c0_i32_8] : memref<8x9x128xf32, #tpu.memory_space<vmem>> -> memref<1x1x128xf32, #tpu.memory_space<vmem>>
    %13 = tpu.memref_squeeze %12 : memref<1x1x128xf32, #tpu.memory_space<vmem>> -> memref<1x128xf32, #tpu.memory_space<vmem>>
    %14 = tpu.memref_slice %arg8[%c1_i32] : memref<2x!tpu.dma_semaphore, #tpu.memory_space<semaphore_mem>> -> memref<1x!tpu.dma_semaphore, #tpu.memory_space<semaphore_mem>>
    %15 = tpu.memref_squeeze %14 : memref<1x!tpu.dma_semaphore, #tpu.memory_space<semaphore_mem>> -> memref<!tpu.dma_semaphore, #tpu.memory_space<semaphore_mem>>
    tpu.enqueue_dma source(%11 : memref<1x128xf32, #tpu.memory_space<any>>) target(%13 : memref<1x128xf32, #tpu.memory_space<vmem>>) target_semaphore(%15 : memref<!tpu.dma_semaphore, #tpu.memory_space<semaphore_mem>>)
    %c0_i32_9 = arith.constant 0 : i32
    %16 = arith.addi %0, %c0_i32_9 : i32
    %17 = arith.index_cast %16 : i32 to index
    %c1 = arith.constant 1 : index
    %18 = memref.load %arg2[%17, %c1] : memref<16x9xi32, #tpu.memory_space<smem>>
    %c0_i32_10 = arith.constant 0 : i32
    %c1_i32_11 = arith.constant 1 : i32
    %c0_i32_12 = arith.constant 0 : i32
    %19 = tpu.memref_slice %arg4[%18, %c0_i32_12] : memref<20x128xf32, #tpu.memory_space<any>> -> memref<1x128xf32, #tpu.memory_space<any>>
    %c1_i32_13 = arith.constant 1 : i32
    %c0_i32_14 = arith.constant 0 : i32
    %20 = tpu.memref_slice %arg7[%c0_i32_10, %c1_i32_13, %c0_i32_14] : memref<8x9x128xf32, #tpu.memory_space<vmem>> -> memref<1x1x128xf32, #tpu.memory_space<vmem>>
    %21 = tpu.memref_squeeze %20 : memref<1x1x128xf32, #tpu.memory_space<vmem>> -> memref<1x128xf32, #tpu.memory_space<vmem>>
    %22 = tpu.memref_slice %arg8[%c1_i32_11] : memref<2x!tpu.dma_semaphore, #tpu.memory_space<semaphore_mem>> -> memref<1x!tpu.dma_semaphore, #tpu.memory_space<semaphore_mem>>
    %23 = tpu.memref_squeeze %22 : memref<1x!tpu.dma_semaphore, #tpu.memory_space<semaphore_mem>> -> memref<!tpu.dma_semaphore, #tpu.memory_space<semaphore_mem>>
    tpu.enqueue_dma source(%19 : memref<1x128xf32, #tpu.memory_space<any>>) target(%21 : memref<1x128xf32, #tpu.memory_space<vmem>>) target_semaphore(%23 : memref<!tpu.dma_semaphore, #tpu.memory_space<semaphore_mem>>)
    %c0_i32_15 = arith.constant 0 : i32
    %24 = arith.addi %0, %c0_i32_15 : i32
    %25 = arith.index_cast %24 : i32 to index
    %c2 = arith.constant 2 : index
    %26 = memref.load %arg2[%25, %c2] : memref<16x9xi32, #tpu.memory_space<smem>>
    %c0_i32_16 = arith.constant 0 : i32
    %c1_i32_17 = arith.constant 1 : i32
    %c0_i32_18 = arith.constant 0 : i32
    %27 = tpu.memref_slice %arg4[%26, %c0_i32_18] : memref<20x128xf32, #tpu.memory_space<any>> -> memref<1x128xf32, #tpu.memory_space<any>>
    %c2_i32 = arith.constant 2 : i32
    %c0_i32_19 = arith.constant 0 : i32
    %28 = tpu.memref_slice %arg7[%c0_i32_16, %c2_i32, %c0_i32_19] : memref<8x9x128xf32, #tpu.memory_space<vmem>> -> memref<1x1x128xf32, #tpu.memory_space<vmem>>
    %29 = tpu.memref_squeeze %28 : memref<1x1x128xf32, #tpu.memory_space<vmem>> -> memref<1x128xf32, #tpu.memory_space<vmem>>
    %30 = tpu.memref_slice %arg8[%c1_i32_17] : memref<2x!tpu.dma_semaphore, #tpu.memory_space<semaphore_mem>> -> memref<1x!tpu.dma_semaphore, #tpu.memory_space<semaphore_mem>>
    %31 = tpu.memref_squeeze %30 : memref<1x!tpu.dma_semaphore, #tpu.memory_space<semaphore_mem>> -> memref<!tpu.dma_semaphore, #tpu.memory_space<semaphore_mem>>
    tpu.enqueue_dma source(%27 : memref<1x128xf32, #tpu.memory_space<any>>) target(%29 : memref<1x128xf32, #tpu.memory_space<vmem>>) target_semaphore(%31 : memref<!tpu.dma_semaphore, #tpu.memory_space<semaphore_mem>>)
    %c0_i32_20 = arith.constant 0 : i32
    %32 = arith.addi %0, %c0_i32_20 : i32
    %33 = arith.index_cast %32 : i32 to index
    %c3 = arith.constant 3 : index
    %34 = memref.load %arg2[%33, %c3] : memref<16x9xi32, #tpu.memory_space<smem>>
    %c0_i32_21 = arith.constant 0 : i32
    %c1_i32_22 = arith.constant 1 : i32
    %c0_i32_23 = arith.constant 0 : i32
    %35 = tpu.memref_slice %arg4[%34, %c0_i32_23] : memref<20x128xf32, #tpu.memory_space<any>> -> memref<1x128xf32, #tpu.memory_space<any>>
    %c3_i32 = arith.constant 3 : i32
    %c0_i32_24 = arith.constant 0 : i32
    %36 = tpu.memref_slice %arg7[%c0_i32_21, %c3_i32, %c0_i32_24] : memref<8x9x128xf32, #tpu.memory_space<vmem>> -> memref<1x1x128xf32, #tpu.memory_space<vmem>>
    %37 = tpu.memref_squeeze %36 : memref<1x1x128xf32, #tpu.memory_space<vmem>> -> memref<1x128xf32, #tpu.memory_space<vmem>>
    %38 = tpu.memref_slice %arg8[%c1_i32_22] : memref<2x!tpu.dma_semaphore, #tpu.memory_space<semaphore_mem>> -> memref<1x!tpu.dma_semaphore, #tpu.memory_space<semaphore_mem>>
    %39 = tpu.memref_squeeze %38 : memref<1x!tpu.dma_semaphore, #tpu.memory_space<semaphore_mem>> -> memref<!tpu.dma_semaphore, #tpu.memory_space<semaphore_mem>>
    tpu.enqueue_dma source(%35 : memref<1x128xf32, #tpu.memory_space<any>>) target(%37 : memref<1x128xf32, #tpu.memory_space<vmem>>) target_semaphore(%39 : memref<!tpu.dma_semaphore, #tpu.memory_space<semaphore_mem>>)
    %c0_i32_25 = arith.constant 0 : i32
    %40 = arith.addi %0, %c0_i32_25 : i32
    %41 = arith.index_cast %40 : i32 to index
    %c4 = arith.constant 4 : index
    %42 = memref.load %arg2[%41, %c4] : memref<16x9xi32, #tpu.memory_space<smem>>
    %c0_i32_26 = arith.constant 0 : i32
    %c1_i32_27 = arith.constant 1 : i32
    %c0_i32_28 = arith.constant 0 : i32
    %43 = tpu.memref_slice %arg4[%42, %c0_i32_28] : memref<20x128xf32, #tpu.memory_space<any>> -> memref<1x128xf32, #tpu.memory_space<any>>
    %c4_i32 = arith.constant 4 : i32
    %c0_i32_29 = arith.constant 0 : i32
    %44 = tpu.memref_slice %arg7[%c0_i32_26, %c4_i32, %c0_i32_29] : memref<8x9x128xf32, #tpu.memory_space<vmem>> -> memref<1x1x128xf32, #tpu.memory_space<vmem>>
    %45 = tpu.memref_squeeze %44 : memref<1x1x128xf32, #tpu.memory_space<vmem>> -> memref<1x128xf32, #tpu.memory_space<vmem>>
    %46 = tpu.memref_slice %arg8[%c1_i32_27] : memref<2x!tpu.dma_semaphore, #tpu.memory_space<semaphore_mem>> -> memref<1x!tpu.dma_semaphore, #tpu.memory_space<semaphore_mem>>
    %47 = tpu.memref_squeeze %46 : memref<1x!tpu.dma_semaphore, #tpu.memory_space<semaphore_mem>> -> memref<!tpu.dma_semaphore, #tpu.memory_space<semaphore_mem>>
    tpu.enqueue_dma source(%43 : memref<1x128xf32, #tpu.memory_space<any>>) target(%45 : memref<1x128xf32, #tpu.memory_space<vmem>>) target_semaphore(%47 : memref<!tpu.dma_semaphore, #tpu.memory_space<semaphore_mem>>)
    %c0_i32_30 = arith.constant 0 : i32
    %48 = arith.addi %0, %c0_i32_30 : i32
    %49 = arith.index_cast %48 : i32 to index
    %c5 = arith.constant 5 : index
    %50 = memref.load %arg2[%49, %c5] : memref<16x9xi32, #tpu.memory_space<smem>>
    %c0_i32_31 = arith.constant 0 : i32
    %c1_i32_32 = arith.constant 1 : i32
    %c0_i32_33 = arith.constant 0 : i32
    %51 = tpu.memref_slice %arg4[%50, %c0_i32_33] : memref<20x128xf32, #tpu.memory_space<any>> -> memref<1x128xf32, #tpu.memory_space<any>>
    %c5_i32 = arith.constant 5 : i32
    %c0_i32_34 = arith.constant 0 : i32
    %52 = tpu.memref_slice %arg7[%c0_i32_31, %c5_i32, %c0_i32_34] : memref<8x9x128xf32, #tpu.memory_space<vmem>> -> memref<1x1x128xf32, #tpu.memory_space<vmem>>
    %53 = tpu.memref_squeeze %52 : memref<1x1x128xf32, #tpu.memory_space<vmem>> -> memref<1x128xf32, #tpu.memory_space<vmem>>
    %54 = tpu.memref_slice %arg8[%c1_i32_32] : memref<2x!tpu.dma_semaphore, #tpu.memory_space<semaphore_mem>> -> memref<1x!tpu.dma_semaphore, #tpu.memory_space<semaphore_mem>>
    %55 = tpu.memref_squeeze %54 : memref<1x!tpu.dma_semaphore, #tpu.memory_space<semaphore_mem>> -> memref<!tpu.dma_semaphore, #tpu.memory_space<semaphore_mem>>
    tpu.enqueue_dma source(%51 : memref<1x128xf32, #tpu.memory_space<any>>) target(%53 : memref<1x128xf32, #tpu.memory_space<vmem>>) target_semaphore(%55 : memref<!tpu.dma_semaphore, #tpu.memory_space<semaphore_mem>>)
    %c0_i32_35 = arith.constant 0 : i32
    %56 = arith.addi %0, %c0_i32_35 : i32
    %57 = arith.index_cast %56 : i32 to index
    %c6 = arith.constant 6 : index
    %58 = memref.load %arg2[%57, %c6] : memref<16x9xi32, #tpu.memory_space<smem>>
    %c0_i32_36 = arith.constant 0 : i32
    %c1_i32_37 = arith.constant 1 : i32
    %c0_i32_38 = arith.constant 0 : i32
    %59 = tpu.memref_slice %arg4[%58, %c0_i32_38] : memref<20x128xf32, #tpu.memory_space<any>> -> memref<1x128xf32, #tpu.memory_space<any>>
    %c6_i32 = arith.constant 6 : i32
    %c0_i32_39 = arith.constant 0 : i32
    %60 = tpu.memref_slice %arg7[%c0_i32_36, %c6_i32, %c0_i32_39] : memref<8x9x128xf32, #tpu.memory_space<vmem>> -> memref<1x1x128xf32, #tpu.memory_space<vmem>>
    %61 = tpu.memref_squeeze %60 : memref<1x1x128xf32, #tpu.memory_space<vmem>> -> memref<1x128xf32, #tpu.memory_space<vmem>>
    %62 = tpu.memref_slice %arg8[%c1_i32_37] : memref<2x!tpu.dma_semaphore, #tpu.memory_space<semaphore_mem>> -> memref<1x!tpu.dma_semaphore, #tpu.memory_space<semaphore_mem>>
    %63 = tpu.memref_squeeze %62 : memref<1x!tpu.dma_semaphore, #tpu.memory_space<semaphore_mem>> -> memref<!tpu.dma_semaphore, #tpu.memory_space<semaphore_mem>>
    tpu.enqueue_dma source(%59 : memref<1x128xf32, #tpu.memory_space<any>>) target(%61 : memref<1x128xf32, #tpu.memory_space<vmem>>) target_semaphore(%63 : memref<!tpu.dma_semaphore, #tpu.memory_space<semaphore_mem>>)
    %c0_i32_40 = arith.constant 0 : i32
    %64 = arith.addi %0, %c0_i32_40 : i32
    %65 = arith.index_cast %64 : i32 to index
    %c7 = arith.constant 7 : index
    %66 = memref.load %arg2[%65, %c7] : memref<16x9xi32, #tpu.memory_space<smem>>
    %c0_i32_41 = arith.constant 0 : i32
    %c1_i32_42 = arith.constant 1 : i32
    %c0_i32_43 = arith.constant 0 : i32
    %67 = tpu.memref_slice %arg4[%66, %c0_i32_43] : memref<20x128xf32, #tpu.memory_space<any>> -> memref<1x128xf32, #tpu.memory_space<any>>
    %c7_i32 = arith.constant 7 : i32
    %c0_i32_44 = arith.constant 0 : i32
    %68 = tpu.memref_slice %arg7[%c0_i32_41, %c7_i32, %c0_i32_44] : memref<8x9x128xf32, #tpu.memory_space<vmem>> -> memref<1x1x128xf32, #tpu.memory_space<vmem>>
    %69 = tpu.memref_squeeze %68 : memref<1x1x128xf32, #tpu.memory_space<vmem>> -> memref<1x128xf32, #tpu.memory_space<vmem>>
    %70 = tpu.memref_slice %arg8[%c1_i32_42] : memref<2x!tpu.dma_semaphore, #tpu.memory_space<semaphore_mem>> -> memref<1x!tpu.dma_semaphore, #tpu.memory_space<semaphore_mem>>
    %71 = tpu.memref_squeeze %70 : memref<1x!tpu.dma_semaphore, #tpu.memory_space<semaphore_mem>> -> memref<!tpu.dma_semaphore, #tpu.memory_space<semaphore_mem>>
    tpu.enqueue_dma source(%67 : memref<1x128xf32, #tpu.memory_space<any>>) target(%69 : memref<1x128xf32, #tpu.memory_space<vmem>>) target_semaphore(%71 : memref<!tpu.dma_semaphore, #tpu.memory_space<semaphore_mem>>)
    %c0_i32_45 = arith.constant 0 : i32
    %72 = arith.addi %0, %c0_i32_45 : i32
    %73 = arith.index_cast %72 : i32 to index
    %c8 = arith.constant 8 : index
    %74 = memref.load %arg2[%73, %c8] : memref<16x9xi32, #tpu.memory_space<smem>>
    %c0_i32_46 = arith.constant 0 : i32
    %c1_i32_47 = arith.constant 1 : i32
    %c0_i32_48 = arith.constant 0 : i32
    %75 = tpu.memref_slice %arg4[%74, %c0_i32_48] : memref<20x128xf32, #tpu.memory_space<any>> -> memref<1x128xf32, #tpu.memory_space<any>>
    %c8_i32_49 = arith.constant 8 : i32
    %c0_i32_50 = arith.constant 0 : i32
    %76 = tpu.memref_slice %arg7[%c0_i32_46, %c8_i32_49, %c0_i32_50] : memref<8x9x128xf32, #tpu.memory_space<vmem>> -> memref<1x1x128xf32, #tpu.memory_space<vmem>>
    %77 = tpu.memref_squeeze %76 : memref<1x1x128xf32, #tpu.memory_space<vmem>> -> memref<1x128xf32, #tpu.memory_space<vmem>>
    %78 = tpu.memref_slice %arg8[%c1_i32_47] : memref<2x!tpu.dma_semaphore, #tpu.memory_space<semaphore_mem>> -> memref<1x!tpu.dma_semaphore, #tpu.memory_space<semaphore_mem>>
    %79 = tpu.memref_squeeze %78 : memref<1x!tpu.dma_semaphore, #tpu.memory_space<semaphore_mem>> -> memref<!tpu.dma_semaphore, #tpu.memory_space<semaphore_mem>>
    tpu.enqueue_dma source(%75 : memref<1x128xf32, #tpu.memory_space<any>>) target(%77 : memref<1x128xf32, #tpu.memory_space<vmem>>) target_semaphore(%79 : memref<!tpu.dma_semaphore, #tpu.memory_space<semaphore_mem>>)
    %c1_i32_51 = arith.constant 1 : i32
    %80 = arith.addi %0, %c1_i32_51 : i32
    %81 = arith.index_cast %80 : i32 to index
    %82 = memref.load %arg1[%81] : memref<16xi32, #tpu.memory_space<smem>>
    %c0_i32_52 = arith.constant 0 : i32
    %c0_i32_53 = arith.constant 0 : i32
    %83 = tpu.memref_slice %arg3[%82, %c0_i32_53] : memref<20x128xf32, #tpu.memory_space<any>> -> memref<1x128xf32, #tpu.memory_space<any>>
    %c1_i32_54 = arith.constant 1 : i32
    %c0_i32_55 = arith.constant 0 : i32
    %84 = tpu.memref_slice %arg6[%c1_i32_54, %c0_i32_55] : memref<8x128xf32, #tpu.memory_space<vmem>> -> memref<1x128xf32, #tpu.memory_space<vmem>>
    %85 = tpu.memref_slice %arg8[%c0_i32_52] : memref<2x!tpu.dma_semaphore, #tpu.memory_space<semaphore_mem>> -> memref<1x!tpu.dma_semaphore, #tpu.memory_space<semaphore_mem>>
    %86 = tpu.memref_squeeze %85 : memref<1x!tpu.dma_semaphore, #tpu.memory_space<semaphore_mem>> -> memref<!tpu.dma_semaphore, #tpu.memory_space<semaphore_mem>>
    tpu.enqueue_dma source(%83 : memref<1x128xf32, #tpu.memory_space<any>>) target(%84 : memref<1x128xf32, #tpu.memory_space<vmem>>) target_semaphore(%86 : memref<!tpu.dma_semaphore, #tpu.memory_space<semaphore_mem>>)
    %c1_i32_56 = arith.constant 1 : i32
    %87 = arith.addi %0, %c1_i32_56 : i32
    %88 = arith.index_cast %87 : i32 to index
    %c0_57 = arith.constant 0 : index
    %89 = memref.load %arg2[%88, %c0_57] : memref<16x9xi32, #tpu.memory_space<smem>>
    %c1_i32_58 = arith.constant 1 : i32
    %c1_i32_59 = arith.constant 1 : i32
    %c0_i32_60 = arith.constant 0 : i32
    %90 = tpu.memref_slice %arg4[%89, %c0_i32_60] : memref<20x128xf32, #tpu.memory_space<any>> -> memref<1x128xf32, #tpu.memory_space<any>>
    %c0_i32_61 = arith.constant 0 : i32
    %c0_i32_62 = arith.constant 0 : i32
    %91 = tpu.memref_slice %arg7[%c1_i32_58, %c0_i32_61, %c0_i32_62] : memref<8x9x128xf32, #tpu.memory_space<vmem>> -> memref<1x1x128xf32, #tpu.memory_space<vmem>>
    %92 = tpu.memref_squeeze %91 : memref<1x1x128xf32, #tpu.memory_space<vmem>> -> memref<1x128xf32, #tpu.memory_space<vmem>>
    %93 = tpu.memref_slice %arg8[%c1_i32_59] : memref<2x!tpu.dma_semaphore, #tpu.memory_space<semaphore_mem>> -> memref<1x!tpu.dma_semaphore, #tpu.memory_space<semaphore_mem>>
    %94 = tpu.memref_squeeze %93 : memref<1x!tpu.dma_semaphore, #tpu.memory_space<semaphore_mem>> -> memref<!tpu.dma_semaphore, #tpu.memory_space<semaphore_mem>>
    tpu.enqueue_dma source(%90 : memref<1x128xf32, #tpu.memory_space<any>>) target(%92 : memref<1x128xf32, #tpu.memory_space<vmem>>) target_semaphore(%94 : memref<!tpu.dma_semaphore, #tpu.memory_space<semaphore_mem>>)
    %c1_i32_63 = arith.constant 1 : i32
    %95 = arith.addi %0, %c1_i32_63 : i32
    %96 = arith.index_cast %95 : i32 to index
    %c1_64 = arith.constant 1 : index
    %97 = memref.load %arg2[%96, %c1_64] : memref<16x9xi32, #tpu.memory_space<smem>>
    %c1_i32_65 = arith.constant 1 : i32
    %c1_i32_66 = arith.constant 1 : i32
    %c0_i32_67 = arith.constant 0 : i32
    %98 = tpu.memref_slice %arg4[%97, %c0_i32_67] : memref<20x128xf32, #tpu.memory_space<any>> -> memref<1x128xf32, #tpu.memory_space<any>>
    %c1_i32_68 = arith.constant 1 : i32
    %c0_i32_69 = arith.constant 0 : i32
    %99 = tpu.memref_slice %arg7[%c1_i32_65, %c1_i32_68, %c0_i32_69] : memref<8x9x128xf32, #tpu.memory_space<vmem>> -> memref<1x1x128xf32, #tpu.memory_space<vmem>>
    %100 = tpu.memref_squeeze %99 : memref<1x1x128xf32, #tpu.memory_space<vmem>> -> memref<1x128xf32, #tpu.memory_space<vmem>>
    %101 = tpu.memref_slice %arg8[%c1_i32_66] : memref<2x!tpu.dma_semaphore, #tpu.memory_space<semaphore_mem>> -> memref<1x!tpu.dma_semaphore, #tpu.memory_space<semaphore_mem>>
    %102 = tpu.memref_squeeze %101 : memref<1x!tpu.dma_semaphore, #tpu.memory_space<semaphore_mem>> -> memref<!tpu.dma_semaphore, #tpu.memory_space<semaphore_mem>>
    tpu.enqueue_dma source(%98 : memref<1x128xf32, #tpu.memory_space<any>>) target(%100 : memref<1x128xf32, #tpu.memory_space<vmem>>) target_semaphore(%102 : memref<!tpu.dma_semaphore, #tpu.memory_space<semaphore_mem>>)
    %c1_i32_70 = arith.constant 1 : i32
    %103 = arith.addi %0, %c1_i32_70 : i32
    %104 = arith.index_cast %103 : i32 to index
    %c2_71 = arith.constant 2 : index
    %105 = memref.load %arg2[%104, %c2_71] : memref<16x9xi32, #tpu.memory_space<smem>>
    %c1_i32_72 = arith.constant 1 : i32
    %c1_i32_73 = arith.constant 1 : i32
    %c0_i32_74 = arith.constant 0 : i32
    %106 = tpu.memref_slice %arg4[%105, %c0_i32_74] : memref<20x128xf32, #tpu.memory_space<any>> -> memref<1x128xf32, #tpu.memory_space<any>>
    %c2_i32_75 = arith.constant 2 : i32
    %c0_i32_76 = arith.constant 0 : i32
    %107 = tpu.memref_slice %arg7[%c1_i32_72, %c2_i32_75, %c0_i32_76] : memref<8x9x128xf32, #tpu.memory_space<vmem>> -> memref<1x1x128xf32, #tpu.memory_space<vmem>>
    %108 = tpu.memref_squeeze %107 : memref<1x1x128xf32, #tpu.memory_space<vmem>> -> memref<1x128xf32, #tpu.memory_space<vmem>>
    %109 = tpu.memref_slice %arg8[%c1_i32_73] : memref<2x!tpu.dma_semaphore, #tpu.memory_space<semaphore_mem>> -> memref<1x!tpu.dma_semaphore, #tpu.memory_space<semaphore_mem>>
    %110 = tpu.memref_squeeze %109 : memref<1x!tpu.dma_semaphore, #tpu.memory_space<semaphore_mem>> -> memref<!tpu.dma_semaphore, #tpu.memory_space<semaphore_mem>>
    tpu.enqueue_dma source(%106 : memref<1x128xf32, #tpu.memory_space<any>>) target(%108 : memref<1x128xf32, #tpu.memory_space<vmem>>) target_semaphore(%110 : memref<!tpu.dma_semaphore, #tpu.memory_space<semaphore_mem>>)
    %c1_i32_77 = arith.constant 1 : i32
    %111 = arith.addi %0, %c1_i32_77 : i32
    %112 = arith.index_cast %111 : i32 to index
    %c3_78 = arith.constant 3 : index
    %113 = memref.load %arg2[%112, %c3_78] : memref<16x9xi32, #tpu.memory_space<smem>>
    %c1_i32_79 = arith.constant 1 : i32
    %c1_i32_80 = arith.constant 1 : i32
    %c0_i32_81 = arith.constant 0 : i32
    %114 = tpu.memref_slice %arg4[%113, %c0_i32_81] : memref<20x128xf32, #tpu.memory_space<any>> -> memref<1x128xf32, #tpu.memory_space<any>>
    %c3_i32_82 = arith.constant 3 : i32
    %c0_i32_83 = arith.constant 0 : i32
    %115 = tpu.memref_slice %arg7[%c1_i32_79, %c3_i32_82, %c0_i32_83] : memref<8x9x128xf32, #tpu.memory_space<vmem>> -> memref<1x1x128xf32, #tpu.memory_space<vmem>>
    %116 = tpu.memref_squeeze %115 : memref<1x1x128xf32, #tpu.memory_space<vmem>> -> memref<1x128xf32, #tpu.memory_space<vmem>>
    %117 = tpu.memref_slice %arg8[%c1_i32_80] : memref<2x!tpu.dma_semaphore, #tpu.memory_space<semaphore_mem>> -> memref<1x!tpu.dma_semaphore, #tpu.memory_space<semaphore_mem>>
    %118 = tpu.memref_squeeze %117 : memref<1x!tpu.dma_semaphore, #tpu.memory_space<semaphore_mem>> -> memref<!tpu.dma_semaphore, #tpu.memory_space<semaphore_mem>>
    tpu.enqueue_dma source(%114 : memref<1x128xf32, #tpu.memory_space<any>>) target(%116 : memref<1x128xf32, #tpu.memory_space<vmem>>) target_semaphore(%118 : memref<!tpu.dma_semaphore, #tpu.memory_space<semaphore_mem>>)
    %c1_i32_84 = arith.constant 1 : i32
    %119 = arith.addi %0, %c1_i32_84 : i32
    %120 = arith.index_cast %119 : i32 to index
    %c4_85 = arith.constant 4 : index
    %121 = memref.load %arg2[%120, %c4_85] : memref<16x9xi32, #tpu.memory_space<smem>>
    %c1_i32_86 = arith.constant 1 : i32
    %c1_i32_87 = arith.constant 1 : i32
    %c0_i32_88 = arith.constant 0 : i32
    %122 = tpu.memref_slice %arg4[%121, %c0_i32_88] : memref<20x128xf32, #tpu.memory_space<any>> -> memref<1x128xf32, #tpu.memory_space<any>>
    %c4_i32_89 = arith.constant 4 : i32
    %c0_i32_90 = arith.constant 0 : i32
    %123 = tpu.memref_slice %arg7[%c1_i32_86, %c4_i32_89, %c0_i32_90] : memref<8x9x128xf32, #tpu.memory_space<vmem>> -> memref<1x1x128xf32, #tpu.memory_space<vmem>>
    %124 = tpu.memref_squeeze %123 : memref<1x1x128xf32, #tpu.memory_space<vmem>> -> memref<1x128xf32, #tpu.memory_space<vmem>>
    %125 = tpu.memref_slice %arg8[%c1_i32_87] : memref<2x!tpu.dma_semaphore, #tpu.memory_space<semaphore_mem>> -> memref<1x!tpu.dma_semaphore, #tpu.memory_space<semaphore_mem>>
    %126 = tpu.memref_squeeze %125 : memref<1x!tpu.dma_semaphore, #tpu.memory_space<semaphore_mem>> -> memref<!tpu.dma_semaphore, #tpu.memory_space<semaphore_mem>>
    tpu.enqueue_dma source(%122 : memref<1x128xf32, #tpu.memory_space<any>>) target(%124 : memref<1x128xf32, #tpu.memory_space<vmem>>) target_semaphore(%126 : memref<!tpu.dma_semaphore, #tpu.memory_space<semaphore_mem>>)
    %c1_i32_91 = arith.constant 1 : i32
    %127 = arith.addi %0, %c1_i32_91 : i32
    %128 = arith.index_cast %127 : i32 to index
    %c5_92 = arith.constant 5 : index
    %129 = memref.load %arg2[%128, %c5_92] : memref<16x9xi32, #tpu.memory_space<smem>>
    %c1_i32_93 = arith.constant 1 : i32
    %c1_i32_94 = arith.constant 1 : i32
    %c0_i32_95 = arith.constant 0 : i32
    %130 = tpu.memref_slice %arg4[%129, %c0_i32_95] : memref<20x128xf32, #tpu.memory_space<any>> -> memref<1x128xf32, #tpu.memory_space<any>>
    %c5_i32_96 = arith.constant 5 : i32
    %c0_i32_97 = arith.constant 0 : i32
    %131 = tpu.memref_slice %arg7[%c1_i32_93, %c5_i32_96, %c0_i32_97] : memref<8x9x128xf32, #tpu.memory_space<vmem>> -> memref<1x1x128xf32, #tpu.memory_space<vmem>>
    %132 = tpu.memref_squeeze %131 : memref<1x1x128xf32, #tpu.memory_space<vmem>> -> memref<1x128xf32, #tpu.memory_space<vmem>>
    %133 = tpu.memref_slice %arg8[%c1_i32_94] : memref<2x!tpu.dma_semaphore, #tpu.memory_space<semaphore_mem>> -> memref<1x!tpu.dma_semaphore, #tpu.memory_space<semaphore_mem>>
    %134 = tpu.memref_squeeze %133 : memref<1x!tpu.dma_semaphore, #tpu.memory_space<semaphore_mem>> -> memref<!tpu.dma_semaphore, #tpu.memory_space<semaphore_mem>>
    tpu.enqueue_dma source(%130 : memref<1x128xf32, #tpu.memory_space<any>>) target(%132 : memref<1x128xf32, #tpu.memory_space<vmem>>) target_semaphore(%134 : memref<!tpu.dma_semaphore, #tpu.memory_space<semaphore_mem>>)
    %c1_i32_98 = arith.constant 1 : i32
    %135 = arith.addi %0, %c1_i32_98 : i32
    %136 = arith.index_cast %135 : i32 to index
    %c6_99 = arith.constant 6 : index
    %137 = memref.load %arg2[%136, %c6_99] : memref<16x9xi32, #tpu.memory_space<smem>>
    %c1_i32_100 = arith.constant 1 : i32
    %c1_i32_101 = arith.constant 1 : i32
    %c0_i32_102 = arith.constant 0 : i32
    %138 = tpu.memref_slice %arg4[%137, %c0_i32_102] : memref<20x128xf32, #tpu.memory_space<any>> -> memref<1x128xf32, #tpu.memory_space<any>>
    %c6_i32_103 = arith.constant 6 : i32
    %c0_i32_104 = arith.constant 0 : i32
    %139 = tpu.memref_slice %arg7[%c1_i32_100, %c6_i32_103, %c0_i32_104] : memref<8x9x128xf32, #tpu.memory_space<vmem>> -> memref<1x1x128xf32, #tpu.memory_space<vmem>>
    %140 = tpu.memref_squeeze %139 : memref<1x1x128xf32, #tpu.memory_space<vmem>> -> memref<1x128xf32, #tpu.memory_space<vmem>>
    %141 = tpu.memref_slice %arg8[%c1_i32_101] : memref<2x!tpu.dma_semaphore, #tpu.memory_space<semaphore_mem>> -> memref<1x!tpu.dma_semaphore, #tpu.memory_space<semaphore_mem>>
    %142 = tpu.memref_squeeze %141 : memref<1x!tpu.dma_semaphore, #tpu.memory_space<semaphore_mem>> -> memref<!tpu.dma_semaphore, #tpu.memory_space<semaphore_mem>>
    tpu.enqueue_dma source(%138 : memref<1x128xf32, #tpu.memory_space<any>>) target(%140 : memref<1x128xf32, #tpu.memory_space<vmem>>) target_semaphore(%142 : memref<!tpu.dma_semaphore, #tpu.memory_space<semaphore_mem>>)
    %c1_i32_105 = arith.constant 1 : i32
    %143 = arith.addi %0, %c1_i32_105 : i32
    %144 = arith.index_cast %143 : i32 to index
    %c7_106 = arith.constant 7 : index
    %145 = memref.load %arg2[%144, %c7_106] : memref<16x9xi32, #tpu.memory_space<smem>>
    %c1_i32_107 = arith.constant 1 : i32
    %c1_i32_108 = arith.constant 1 : i32
    %c0_i32_109 = arith.constant 0 : i32
    %146 = tpu.memref_slice %arg4[%145, %c0_i32_109] : memref<20x128xf32, #tpu.memory_space<any>> -> memref<1x128xf32, #tpu.memory_space<any>>
    %c7_i32_110 = arith.constant 7 : i32
    %c0_i32_111 = arith.constant 0 : i32
    %147 = tpu.memref_slice %arg7[%c1_i32_107, %c7_i32_110, %c0_i32_111] : memref<8x9x128xf32, #tpu.memory_space<vmem>> -> memref<1x1x128xf32, #tpu.memory_space<vmem>>
    %148 = tpu.memref_squeeze %147 : memref<1x1x128xf32, #tpu.memory_space<vmem>> -> memref<1x128xf32, #tpu.memory_space<vmem>>
    %149 = tpu.memref_slice %arg8[%c1_i32_108] : memref<2x!tpu.dma_semaphore, #tpu.memory_space<semaphore_mem>> -> memref<1x!tpu.dma_semaphore, #tpu.memory_space<semaphore_mem>>
    %150 = tpu.memref_squeeze %149 : memref<1x!tpu.dma_semaphore, #tpu.memory_space<semaphore_mem>> -> memref<!tpu.dma_semaphore, #tpu.memory_space<semaphore_mem>>
    tpu.enqueue_dma source(%146 : memref<1x128xf32, #tpu.memory_space<any>>) target(%148 : memref<1x128xf32, #tpu.memory_space<vmem>>) target_semaphore(%150 : memref<!tpu.dma_semaphore, #tpu.memory_space<semaphore_mem>>)
    %c1_i32_112 = arith.constant 1 : i32
    %151 = arith.addi %0, %c1_i32_112 : i32
    %152 = arith.index_cast %151 : i32 to index
    %c8_113 = arith.constant 8 : index
    %153 = memref.load %arg2[%152, %c8_113] : memref<16x9xi32, #tpu.memory_space<smem>>
    %c1_i32_114 = arith.constant 1 : i32
    %c1_i32_115 = arith.constant 1 : i32
    %c0_i32_116 = arith.constant 0 : i32
    %154 = tpu.memref_slice %arg4[%153, %c0_i32_116] : memref<20x128xf32, #tpu.memory_space<any>> -> memref<1x128xf32, #tpu.memory_space<any>>
    %c8_i32_117 = arith.constant 8 : i32
    %c0_i32_118 = arith.constant 0 : i32
    %155 = tpu.memref_slice %arg7[%c1_i32_114, %c8_i32_117, %c0_i32_118] : memref<8x9x128xf32, #tpu.memory_space<vmem>> -> memref<1x1x128xf32, #tpu.memory_space<vmem>>
    %156 = tpu.memref_squeeze %155 : memref<1x1x128xf32, #tpu.memory_space<vmem>> -> memref<1x128xf32, #tpu.memory_space<vmem>>
    %157 = tpu.memref_slice %arg8[%c1_i32_115] : memref<2x!tpu.dma_semaphore, #tpu.memory_space<semaphore_mem>> -> memref<1x!tpu.dma_semaphore, #tpu.memory_space<semaphore_mem>>
    %158 = tpu.memref_squeeze %157 : memref<1x!tpu.dma_semaphore, #tpu.memory_space<semaphore_mem>> -> memref<!tpu.dma_semaphore, #tpu.memory_space<semaphore_mem>>
    tpu.enqueue_dma source(%154 : memref<1x128xf32, #tpu.memory_space<any>>) target(%156 : memref<1x128xf32, #tpu.memory_space<vmem>>) target_semaphore(%158 : memref<!tpu.dma_semaphore, #tpu.memory_space<semaphore_mem>>)
    %c2_i32_119 = arith.constant 2 : i32
    %159 = arith.addi %0, %c2_i32_119 : i32
    %160 = arith.index_cast %159 : i32 to index
    %161 = memref.load %arg1[%160] : memref<16xi32, #tpu.memory_space<smem>>
    %c0_i32_120 = arith.constant 0 : i32
    %c0_i32_121 = arith.constant 0 : i32
    %162 = tpu.memref_slice %arg3[%161, %c0_i32_121] : memref<20x128xf32, #tpu.memory_space<any>> -> memref<1x128xf32, #tpu.memory_space<any>>
    %c2_i32_122 = arith.constant 2 : i32
    %c0_i32_123 = arith.constant 0 : i32
    %163 = tpu.memref_slice %arg6[%c2_i32_122, %c0_i32_123] : memref<8x128xf32, #tpu.memory_space<vmem>> -> memref<1x128xf32, #tpu.memory_space<vmem>>
    %164 = tpu.memref_slice %arg8[%c0_i32_120] : memref<2x!tpu.dma_semaphore, #tpu.memory_space<semaphore_mem>> -> memref<1x!tpu.dma_semaphore, #tpu.memory_space<semaphore_mem>>
    %165 = tpu.memref_squeeze %164 : memref<1x!tpu.dma_semaphore, #tpu.memory_space<semaphore_mem>> -> memref<!tpu.dma_semaphore, #tpu.memory_space<semaphore_mem>>
    tpu.enqueue_dma source(%162 : memref<1x128xf32, #tpu.memory_space<any>>) target(%163 : memref<1x128xf32, #tpu.memory_space<vmem>>) target_semaphore(%165 : memref<!tpu.dma_semaphore, #tpu.memory_space<semaphore_mem>>)
    %c2_i32_124 = arith.constant 2 : i32
    %166 = arith.addi %0, %c2_i32_124 : i32
    %167 = arith.index_cast %166 : i32 to index
    %c0_125 = arith.constant 0 : index
    %168 = memref.load %arg2[%167, %c0_125] : memref<16x9xi32, #tpu.memory_space<smem>>
    %c2_i32_126 = arith.constant 2 : i32
    %c1_i32_127 = arith.constant 1 : i32
    %c0_i32_128 = arith.constant 0 : i32
    %169 = tpu.memref_slice %arg4[%168, %c0_i32_128] : memref<20x128xf32, #tpu.memory_space<any>> -> memref<1x128xf32, #tpu.memory_space<any>>
    %c0_i32_129 = arith.constant 0 : i32
    %c0_i32_130 = arith.constant 0 : i32
    %170 = tpu.memref_slice %arg7[%c2_i32_126, %c0_i32_129, %c0_i32_130] : memref<8x9x128xf32, #tpu.memory_space<vmem>> -> memref<1x1x128xf32, #tpu.memory_space<vmem>>
    %171 = tpu.memref_squeeze %170 : memref<1x1x128xf32, #tpu.memory_space<vmem>> -> memref<1x128xf32, #tpu.memory_space<vmem>>
    %172 = tpu.memref_slice %arg8[%c1_i32_127] : memref<2x!tpu.dma_semaphore, #tpu.memory_space<semaphore_mem>> -> memref<1x!tpu.dma_semaphore, #tpu.memory_space<semaphore_mem>>
    %173 = tpu.memref_squeeze %172 : memref<1x!tpu.dma_semaphore, #tpu.memory_space<semaphore_mem>> -> memref<!tpu.dma_semaphore, #tpu.memory_space<semaphore_mem>>
    tpu.enqueue_dma source(%169 : memref<1x128xf32, #tpu.memory_space<any>>) target(%171 : memref<1x128xf32, #tpu.memory_space<vmem>>) target_semaphore(%173 : memref<!tpu.dma_semaphore, #tpu.memory_space<semaphore_mem>>)
    %c2_i32_131 = arith.constant 2 : i32
    %174 = arith.addi %0, %c2_i32_131 : i32
    %175 = arith.index_cast %174 : i32 to index
    %c1_132 = arith.constant 1 : index
    %176 = memref.load %arg2[%175, %c1_132] : memref<16x9xi32, #tpu.memory_space<smem>>
    %c2_i32_133 = arith.constant 2 : i32
    %c1_i32_134 = arith.constant 1 : i32
    %c0_i32_135 = arith.constant 0 : i32
    %177 = tpu.memref_slice %arg4[%176, %c0_i32_135] : memref<20x128xf32, #tpu.memory_space<any>> -> memref<1x128xf32, #tpu.memory_space<any>>
    %c1_i32_136 = arith.constant 1 : i32
    %c0_i32_137 = arith.constant 0 : i32
    %178 = tpu.memref_slice %arg7[%c2_i32_133, %c1_i32_136, %c0_i32_137] : memref<8x9x128xf32, #tpu.memory_space<vmem>> -> memref<1x1x128xf32, #tpu.memory_space<vmem>>
    %179 = tpu.memref_squeeze %178 : memref<1x1x128xf32, #tpu.memory_space<vmem>> -> memref<1x128xf32, #tpu.memory_space<vmem>>
    %180 = tpu.memref_slice %arg8[%c1_i32_134] : memref<2x!tpu.dma_semaphore, #tpu.memory_space<semaphore_mem>> -> memref<1x!tpu.dma_semaphore, #tpu.memory_space<semaphore_mem>>
    %181 = tpu.memref_squeeze %180 : memref<1x!tpu.dma_semaphore, #tpu.memory_space<semaphore_mem>> -> memref<!tpu.dma_semaphore, #tpu.memory_space<semaphore_mem>>
    tpu.enqueue_dma source(%177 : memref<1x128xf32, #tpu.memory_space<any>>) target(%179 : memref<1x128xf32, #tpu.memory_space<vmem>>) target_semaphore(%181 : memref<!tpu.dma_semaphore, #tpu.memory_space<semaphore_mem>>)
    %c2_i32_138 = arith.constant 2 : i32
    %182 = arith.addi %0, %c2_i32_138 : i32
    %183 = arith.index_cast %182 : i32 to index
    %c2_139 = arith.constant 2 : index
    %184 = memref.load %arg2[%183, %c2_139] : memref<16x9xi32, #tpu.memory_space<smem>>
    %c2_i32_140 = arith.constant 2 : i32
    %c1_i32_141 = arith.constant 1 : i32
    %c0_i32_142 = arith.constant 0 : i32
    %185 = tpu.memref_slice %arg4[%184, %c0_i32_142] : memref<20x128xf32, #tpu.memory_space<any>> -> memref<1x128xf32, #tpu.memory_space<any>>
    %c2_i32_143 = arith.constant 2 : i32
    %c0_i32_144 = arith.constant 0 : i32
    %186 = tpu.memref_slice %arg7[%c2_i32_140, %c2_i32_143, %c0_i32_144] : memref<8x9x128xf32, #tpu.memory_space<vmem>> -> memref<1x1x128xf32, #tpu.memory_space<vmem>>
    %187 = tpu.memref_squeeze %186 : memref<1x1x128xf32, #tpu.memory_space<vmem>> -> memref<1x128xf32, #tpu.memory_space<vmem>>
    %188 = tpu.memref_slice %arg8[%c1_i32_141] : memref<2x!tpu.dma_semaphore, #tpu.memory_space<semaphore_mem>> -> memref<1x!tpu.dma_semaphore, #tpu.memory_space<semaphore_mem>>
    %189 = tpu.memref_squeeze %188 : memref<1x!tpu.dma_semaphore, #tpu.memory_space<semaphore_mem>> -> memref<!tpu.dma_semaphore, #tpu.memory_space<semaphore_mem>>
    tpu.enqueue_dma source(%185 : memref<1x128xf32, #tpu.memory_space<any>>) target(%187 : memref<1x128xf32, #tpu.memory_space<vmem>>) target_semaphore(%189 : memref<!tpu.dma_semaphore, #tpu.memory_space<semaphore_mem>>)
    %c2_i32_145 = arith.constant 2 : i32
    %190 = arith.addi %0, %c2_i32_145 : i32
    %191 = arith.index_cast %190 : i32 to index
    %c3_146 = arith.constant 3 : index
    %192 = memref.load %arg2[%191, %c3_146] : memref<16x9xi32, #tpu.memory_space<smem>>
    %c2_i32_147 = arith.constant 2 : i32
    %c1_i32_148 = arith.constant 1 : i32
    %c0_i32_149 = arith.constant 0 : i32
    %193 = tpu.memref_slice %arg4[%192, %c0_i32_149] : memref<20x128xf32, #tpu.memory_space<any>> -> memref<1x128xf32, #tpu.memory_space<any>>
    %c3_i32_150 = arith.constant 3 : i32
    %c0_i32_151 = arith.constant 0 : i32
    %194 = tpu.memref_slice %arg7[%c2_i32_147, %c3_i32_150, %c0_i32_151] : memref<8x9x128xf32, #tpu.memory_space<vmem>> -> memref<1x1x128xf32, #tpu.memory_space<vmem>>
    %195 = tpu.memref_squeeze %194 : memref<1x1x128xf32, #tpu.memory_space<vmem>> -> memref<1x128xf32, #tpu.memory_space<vmem>>
    %196 = tpu.memref_slice %arg8[%c1_i32_148] : memref<2x!tpu.dma_semaphore, #tpu.memory_space<semaphore_mem>> -> memref<1x!tpu.dma_semaphore, #tpu.memory_space<semaphore_mem>>
    %197 = tpu.memref_squeeze %196 : memref<1x!tpu.dma_semaphore, #tpu.memory_space<semaphore_mem>> -> memref<!tpu.dma_semaphore, #tpu.memory_space<semaphore_mem>>
    tpu.enqueue_dma source(%193 : memref<1x128xf32, #tpu.memory_space<any>>) target(%195 : memref<1x128xf32, #tpu.memory_space<vmem>>) target_semaphore(%197 : memref<!tpu.dma_semaphore, #tpu.memory_space<semaphore_mem>>)
    %c2_i32_152 = arith.constant 2 : i32
    %198 = arith.addi %0, %c2_i32_152 : i32
    %199 = arith.index_cast %198 : i32 to index
    %c4_153 = arith.constant 4 : index
    %200 = memref.load %arg2[%199, %c4_153] : memref<16x9xi32, #tpu.memory_space<smem>>
    %c2_i32_154 = arith.constant 2 : i32
    %c1_i32_155 = arith.constant 1 : i32
    %c0_i32_156 = arith.constant 0 : i32
    %201 = tpu.memref_slice %arg4[%200, %c0_i32_156] : memref<20x128xf32, #tpu.memory_space<any>> -> memref<1x128xf32, #tpu.memory_space<any>>
    %c4_i32_157 = arith.constant 4 : i32
    %c0_i32_158 = arith.constant 0 : i32
    %202 = tpu.memref_slice %arg7[%c2_i32_154, %c4_i32_157, %c0_i32_158] : memref<8x9x128xf32, #tpu.memory_space<vmem>> -> memref<1x1x128xf32, #tpu.memory_space<vmem>>
    %203 = tpu.memref_squeeze %202 : memref<1x1x128xf32, #tpu.memory_space<vmem>> -> memref<1x128xf32, #tpu.memory_space<vmem>>
    %204 = tpu.memref_slice %arg8[%c1_i32_155] : memref<2x!tpu.dma_semaphore, #tpu.memory_space<semaphore_mem>> -> memref<1x!tpu.dma_semaphore, #tpu.memory_space<semaphore_mem>>
    %205 = tpu.memref_squeeze %204 : memref<1x!tpu.dma_semaphore, #tpu.memory_space<semaphore_mem>> -> memref<!tpu.dma_semaphore, #tpu.memory_space<semaphore_mem>>
    tpu.enqueue_dma source(%201 : memref<1x128xf32, #tpu.memory_space<any>>) target(%203 : memref<1x128xf32, #tpu.memory_space<vmem>>) target_semaphore(%205 : memref<!tpu.dma_semaphore, #tpu.memory_space<semaphore_mem>>)
    %c2_i32_159 = arith.constant 2 : i32
    %206 = arith.addi %0, %c2_i32_159 : i32
    %207 = arith.index_cast %206 : i32 to index
    %c5_160 = arith.constant 5 : index
    %208 = memref.load %arg2[%207, %c5_160] : memref<16x9xi32, #tpu.memory_space<smem>>
    %c2_i32_161 = arith.constant 2 : i32
    %c1_i32_162 = arith.constant 1 : i32
    %c0_i32_163 = arith.constant 0 : i32
    %209 = tpu.memref_slice %arg4[%208, %c0_i32_163] : memref<20x128xf32, #tpu.memory_space<any>> -> memref<1x128xf32, #tpu.memory_space<any>>
    %c5_i32_164 = arith.constant 5 : i32
    %c0_i32_165 = arith.constant 0 : i32
    %210 = tpu.memref_slice %arg7[%c2_i32_161, %c5_i32_164, %c0_i32_165] : memref<8x9x128xf32, #tpu.memory_space<vmem>> -> memref<1x1x128xf32, #tpu.memory_space<vmem>>
    %211 = tpu.memref_squeeze %210 : memref<1x1x128xf32, #tpu.memory_space<vmem>> -> memref<1x128xf32, #tpu.memory_space<vmem>>
    %212 = tpu.memref_slice %arg8[%c1_i32_162] : memref<2x!tpu.dma_semaphore, #tpu.memory_space<semaphore_mem>> -> memref<1x!tpu.dma_semaphore, #tpu.memory_space<semaphore_mem>>
    %213 = tpu.memref_squeeze %212 : memref<1x!tpu.dma_semaphore, #tpu.memory_space<semaphore_mem>> -> memref<!tpu.dma_semaphore, #tpu.memory_space<semaphore_mem>>
    tpu.enqueue_dma source(%209 : memref<1x128xf32, #tpu.memory_space<any>>) target(%211 : memref<1x128xf32, #tpu.memory_space<vmem>>) target_semaphore(%213 : memref<!tpu.dma_semaphore, #tpu.memory_space<semaphore_mem>>)
    %c2_i32_166 = arith.constant 2 : i32
    %214 = arith.addi %0, %c2_i32_166 : i32
    %215 = arith.index_cast %214 : i32 to index
    %c6_167 = arith.constant 6 : index
    %216 = memref.load %arg2[%215, %c6_167] : memref<16x9xi32, #tpu.memory_space<smem>>
    %c2_i32_168 = arith.constant 2 : i32
    %c1_i32_169 = arith.constant 1 : i32
    %c0_i32_170 = arith.constant 0 : i32
    %217 = tpu.memref_slice %arg4[%216, %c0_i32_170] : memref<20x128xf32, #tpu.memory_space<any>> -> memref<1x128xf32, #tpu.memory_space<any>>
    %c6_i32_171 = arith.constant 6 : i32
    %c0_i32_172 = arith.constant 0 : i32
    %218 = tpu.memref_slice %arg7[%c2_i32_168, %c6_i32_171, %c0_i32_172] : memref<8x9x128xf32, #tpu.memory_space<vmem>> -> memref<1x1x128xf32, #tpu.memory_space<vmem>>
    %219 = tpu.memref_squeeze %218 : memref<1x1x128xf32, #tpu.memory_space<vmem>> -> memref<1x128xf32, #tpu.memory_space<vmem>>
    %220 = tpu.memref_slice %arg8[%c1_i32_169] : memref<2x!tpu.dma_semaphore, #tpu.memory_space<semaphore_mem>> -> memref<1x!tpu.dma_semaphore, #tpu.memory_space<semaphore_mem>>
    %221 = tpu.memref_squeeze %220 : memref<1x!tpu.dma_semaphore, #tpu.memory_space<semaphore_mem>> -> memref<!tpu.dma_semaphore, #tpu.memory_space<semaphore_mem>>
    tpu.enqueue_dma source(%217 : memref<1x128xf32, #tpu.memory_space<any>>) target(%219 : memref<1x128xf32, #tpu.memory_space<vmem>>) target_semaphore(%221 : memref<!tpu.dma_semaphore, #tpu.memory_space<semaphore_mem>>)
    %c2_i32_173 = arith.constant 2 : i32
    %222 = arith.addi %0, %c2_i32_173 : i32
    %223 = arith.index_cast %222 : i32 to index
    %c7_174 = arith.constant 7 : index
    %224 = memref.load %arg2[%223, %c7_174] : memref<16x9xi32, #tpu.memory_space<smem>>
    %c2_i32_175 = arith.constant 2 : i32
    %c1_i32_176 = arith.constant 1 : i32
    %c0_i32_177 = arith.constant 0 : i32
    %225 = tpu.memref_slice %arg4[%224, %c0_i32_177] : memref<20x128xf32, #tpu.memory_space<any>> -> memref<1x128xf32, #tpu.memory_space<any>>
    %c7_i32_178 = arith.constant 7 : i32
    %c0_i32_179 = arith.constant 0 : i32
    %226 = tpu.memref_slice %arg7[%c2_i32_175, %c7_i32_178, %c0_i32_179] : memref<8x9x128xf32, #tpu.memory_space<vmem>> -> memref<1x1x128xf32, #tpu.memory_space<vmem>>
    %227 = tpu.memref_squeeze %226 : memref<1x1x128xf32, #tpu.memory_space<vmem>> -> memref<1x128xf32, #tpu.memory_space<vmem>>
    %228 = tpu.memref_slice %arg8[%c1_i32_176] : memref<2x!tpu.dma_semaphore, #tpu.memory_space<semaphore_mem>> -> memref<1x!tpu.dma_semaphore, #tpu.memory_space<semaphore_mem>>
    %229 = tpu.memref_squeeze %228 : memref<1x!tpu.dma_semaphore, #tpu.memory_space<semaphore_mem>> -> memref<!tpu.dma_semaphore, #tpu.memory_space<semaphore_mem>>
    tpu.enqueue_dma source(%225 : memref<1x128xf32, #tpu.memory_space<any>>) target(%227 : memref<1x128xf32, #tpu.memory_space<vmem>>) target_semaphore(%229 : memref<!tpu.dma_semaphore, #tpu.memory_space<semaphore_mem>>)
    %c2_i32_180 = arith.constant 2 : i32
    %230 = arith.addi %0, %c2_i32_180 : i32
    %231 = arith.index_cast %230 : i32 to index
    %c8_181 = arith.constant 8 : index
    %232 = memref.load %arg2[%231, %c8_181] : memref<16x9xi32, #tpu.memory_space<smem>>
    %c2_i32_182 = arith.constant 2 : i32
    %c1_i32_183 = arith.constant 1 : i32
    %c0_i32_184 = arith.constant 0 : i32
    %233 = tpu.memref_slice %arg4[%232, %c0_i32_184] : memref<20x128xf32, #tpu.memory_space<any>> -> memref<1x128xf32, #tpu.memory_space<any>>
    %c8_i32_185 = arith.constant 8 : i32
    %c0_i32_186 = arith.constant 0 : i32
    %234 = tpu.memref_slice %arg7[%c2_i32_182, %c8_i32_185, %c0_i32_186] : memref<8x9x128xf32, #tpu.memory_space<vmem>> -> memref<1x1x128xf32, #tpu.memory_space<vmem>>
    %235 = tpu.memref_squeeze %234 : memref<1x1x128xf32, #tpu.memory_space<vmem>> -> memref<1x128xf32, #tpu.memory_space<vmem>>
    %236 = tpu.memref_slice %arg8[%c1_i32_183] : memref<2x!tpu.dma_semaphore, #tpu.memory_space<semaphore_mem>> -> memref<1x!tpu.dma_semaphore, #tpu.memory_space<semaphore_mem>>
    %237 = tpu.memref_squeeze %236 : memref<1x!tpu.dma_semaphore, #tpu.memory_space<semaphore_mem>> -> memref<!tpu.dma_semaphore, #tpu.memory_space<semaphore_mem>>
    tpu.enqueue_dma source(%233 : memref<1x128xf32, #tpu.memory_space<any>>) target(%235 : memref<1x128xf32, #tpu.memory_space<vmem>>) target_semaphore(%237 : memref<!tpu.dma_semaphore, #tpu.memory_space<semaphore_mem>>)
    %c3_i32_187 = arith.constant 3 : i32
    %238 = arith.addi %0, %c3_i32_187 : i32
    %239 = arith.index_cast %238 : i32 to index
    %240 = memref.load %arg1[%239] : memref<16xi32, #tpu.memory_space<smem>>
    %c0_i32_188 = arith.constant 0 : i32
    %c0_i32_189 = arith.constant 0 : i32
    %241 = tpu.memref_slice %arg3[%240, %c0_i32_189] : memref<20x128xf32, #tpu.memory_space<any>> -> memref<1x128xf32, #tpu.memory_space<any>>
    %c3_i32_190 = arith.constant 3 : i32
    %c0_i32_191 = arith.constant 0 : i32
    %242 = tpu.memref_slice %arg6[%c3_i32_190, %c0_i32_191] : memref<8x128xf32, #tpu.memory_space<vmem>> -> memref<1x128xf32, #tpu.memory_space<vmem>>
    %243 = tpu.memref_slice %arg8[%c0_i32_188] : memref<2x!tpu.dma_semaphore, #tpu.memory_space<semaphore_mem>> -> memref<1x!tpu.dma_semaphore, #tpu.memory_space<semaphore_mem>>
    %244 = tpu.memref_squeeze %243 : memref<1x!tpu.dma_semaphore, #tpu.memory_space<semaphore_mem>> -> memref<!tpu.dma_semaphore, #tpu.memory_space<semaphore_mem>>
    tpu.enqueue_dma source(%241 : memref<1x128xf32, #tpu.memory_space<any>>) target(%242 : memref<1x128xf32, #tpu.memory_space<vmem>>) target_semaphore(%244 : memref<!tpu.dma_semaphore, #tpu.memory_space<semaphore_mem>>)
    %c3_i32_192 = arith.constant 3 : i32
    %245 = arith.addi %0, %c3_i32_192 : i32
    %246 = arith.index_cast %245 : i32 to index
    %c0_193 = arith.constant 0 : index
    %247 = memref.load %arg2[%246, %c0_193] : memref<16x9xi32, #tpu.memory_space<smem>>
    %c3_i32_194 = arith.constant 3 : i32
    %c1_i32_195 = arith.constant 1 : i32
    %c0_i32_196 = arith.constant 0 : i32
    %248 = tpu.memref_slice %arg4[%247, %c0_i32_196] : memref<20x128xf32, #tpu.memory_space<any>> -> memref<1x128xf32, #tpu.memory_space<any>>
    %c0_i32_197 = arith.constant 0 : i32
    %c0_i32_198 = arith.constant 0 : i32
    %249 = tpu.memref_slice %arg7[%c3_i32_194, %c0_i32_197, %c0_i32_198] : memref<8x9x128xf32, #tpu.memory_space<vmem>> -> memref<1x1x128xf32, #tpu.memory_space<vmem>>
    %250 = tpu.memref_squeeze %249 : memref<1x1x128xf32, #tpu.memory_space<vmem>> -> memref<1x128xf32, #tpu.memory_space<vmem>>
    %251 = tpu.memref_slice %arg8[%c1_i32_195] : memref<2x!tpu.dma_semaphore, #tpu.memory_space<semaphore_mem>> -> memref<1x!tpu.dma_semaphore, #tpu.memory_space<semaphore_mem>>
    %252 = tpu.memref_squeeze %251 : memref<1x!tpu.dma_semaphore, #tpu.memory_space<semaphore_mem>> -> memref<!tpu.dma_semaphore, #tpu.memory_space<semaphore_mem>>
    tpu.enqueue_dma source(%248 : memref<1x128xf32, #tpu.memory_space<any>>) target(%250 : memref<1x128xf32, #tpu.memory_space<vmem>>) target_semaphore(%252 : memref<!tpu.dma_semaphore, #tpu.memory_space<semaphore_mem>>)
    %c3_i32_199 = arith.constant 3 : i32
    %253 = arith.addi %0, %c3_i32_199 : i32
    %254 = arith.index_cast %253 : i32 to index
    %c1_200 = arith.constant 1 : index
    %255 = memref.load %arg2[%254, %c1_200] : memref<16x9xi32, #tpu.memory_space<smem>>
    %c3_i32_201 = arith.constant 3 : i32
    %c1_i32_202 = arith.constant 1 : i32
    %c0_i32_203 = arith.constant 0 : i32
    %256 = tpu.memref_slice %arg4[%255, %c0_i32_203] : memref<20x128xf32, #tpu.memory_space<any>> -> memref<1x128xf32, #tpu.memory_space<any>>
    %c1_i32_204 = arith.constant 1 : i32
    %c0_i32_205 = arith.constant 0 : i32
    %257 = tpu.memref_slice %arg7[%c3_i32_201, %c1_i32_204, %c0_i32_205] : memref<8x9x128xf32, #tpu.memory_space<vmem>> -> memref<1x1x128xf32, #tpu.memory_space<vmem>>
    %258 = tpu.memref_squeeze %257 : memref<1x1x128xf32, #tpu.memory_space<vmem>> -> memref<1x128xf32, #tpu.memory_space<vmem>>
    %259 = tpu.memref_slice %arg8[%c1_i32_202] : memref<2x!tpu.dma_semaphore, #tpu.memory_space<semaphore_mem>> -> memref<1x!tpu.dma_semaphore, #tpu.memory_space<semaphore_mem>>
    %260 = tpu.memref_squeeze %259 : memref<1x!tpu.dma_semaphore, #tpu.memory_space<semaphore_mem>> -> memref<!tpu.dma_semaphore, #tpu.memory_space<semaphore_mem>>
    tpu.enqueue_dma source(%256 : memref<1x128xf32, #tpu.memory_space<any>>) target(%258 : memref<1x128xf32, #tpu.memory_space<vmem>>) target_semaphore(%260 : memref<!tpu.dma_semaphore, #tpu.memory_space<semaphore_mem>>)
    %c3_i32_206 = arith.constant 3 : i32
    %261 = arith.addi %0, %c3_i32_206 : i32
    %262 = arith.index_cast %261 : i32 to index
    %c2_207 = arith.constant 2 : index
    %263 = memref.load %arg2[%262, %c2_207] : memref<16x9xi32, #tpu.memory_space<smem>>
    %c3_i32_208 = arith.constant 3 : i32
    %c1_i32_209 = arith.constant 1 : i32
    %c0_i32_210 = arith.constant 0 : i32
    %264 = tpu.memref_slice %arg4[%263, %c0_i32_210] : memref<20x128xf32, #tpu.memory_space<any>> -> memref<1x128xf32, #tpu.memory_space<any>>
    %c2_i32_211 = arith.constant 2 : i32
    %c0_i32_212 = arith.constant 0 : i32
    %265 = tpu.memref_slice %arg7[%c3_i32_208, %c2_i32_211, %c0_i32_212] : memref<8x9x128xf32, #tpu.memory_space<vmem>> -> memref<1x1x128xf32, #tpu.memory_space<vmem>>
    %266 = tpu.memref_squeeze %265 : memref<1x1x128xf32, #tpu.memory_space<vmem>> -> memref<1x128xf32, #tpu.memory_space<vmem>>
    %267 = tpu.memref_slice %arg8[%c1_i32_209] : memref<2x!tpu.dma_semaphore, #tpu.memory_space<semaphore_mem>> -> memref<1x!tpu.dma_semaphore, #tpu.memory_space<semaphore_mem>>
    %268 = tpu.memref_squeeze %267 : memref<1x!tpu.dma_semaphore, #tpu.memory_space<semaphore_mem>> -> memref<!tpu.dma_semaphore, #tpu.memory_space<semaphore_mem>>
    tpu.enqueue_dma source(%264 : memref<1x128xf32, #tpu.memory_space<any>>) target(%266 : memref<1x128xf32, #tpu.memory_space<vmem>>) target_semaphore(%268 : memref<!tpu.dma_semaphore, #tpu.memory_space<semaphore_mem>>)
    %c3_i32_213 = arith.constant 3 : i32
    %269 = arith.addi %0, %c3_i32_213 : i32
    %270 = arith.index_cast %269 : i32 to index
    %c3_214 = arith.constant 3 : index
    %271 = memref.load %arg2[%270, %c3_214] : memref<16x9xi32, #tpu.memory_space<smem>>
    %c3_i32_215 = arith.constant 3 : i32
    %c1_i32_216 = arith.constant 1 : i32
    %c0_i32_217 = arith.constant 0 : i32
    %272 = tpu.memref_slice %arg4[%271, %c0_i32_217] : memref<20x128xf32, #tpu.memory_space<any>> -> memref<1x128xf32, #tpu.memory_space<any>>
    %c3_i32_218 = arith.constant 3 : i32
    %c0_i32_219 = arith.constant 0 : i32
    %273 = tpu.memref_slice %arg7[%c3_i32_215, %c3_i32_218, %c0_i32_219] : memref<8x9x128xf32, #tpu.memory_space<vmem>> -> memref<1x1x128xf32, #tpu.memory_space<vmem>>
    %274 = tpu.memref_squeeze %273 : memref<1x1x128xf32, #tpu.memory_space<vmem>> -> memref<1x128xf32, #tpu.memory_space<vmem>>
    %275 = tpu.memref_slice %arg8[%c1_i32_216] : memref<2x!tpu.dma_semaphore, #tpu.memory_space<semaphore_mem>> -> memref<1x!tpu.dma_semaphore, #tpu.memory_space<semaphore_mem>>
    %276 = tpu.memref_squeeze %275 : memref<1x!tpu.dma_semaphore, #tpu.memory_space<semaphore_mem>> -> memref<!tpu.dma_semaphore, #tpu.memory_space<semaphore_mem>>
    tpu.enqueue_dma source(%272 : memref<1x128xf32, #tpu.memory_space<any>>) target(%274 : memref<1x128xf32, #tpu.memory_space<vmem>>) target_semaphore(%276 : memref<!tpu.dma_semaphore, #tpu.memory_space<semaphore_mem>>)
    %c3_i32_220 = arith.constant 3 : i32
    %277 = arith.addi %0, %c3_i32_220 : i32
    %278 = arith.index_cast %277 : i32 to index
    %c4_221 = arith.constant 4 : index
    %279 = memref.load %arg2[%278, %c4_221] : memref<16x9xi32, #tpu.memory_space<smem>>
    %c3_i32_222 = arith.constant 3 : i32
    %c1_i32_223 = arith.constant 1 : i32
    %c0_i32_224 = arith.constant 0 : i32
    %280 = tpu.memref_slice %arg4[%279, %c0_i32_224] : memref<20x128xf32, #tpu.memory_space<any>> -> memref<1x128xf32, #tpu.memory_space<any>>
    %c4_i32_225 = arith.constant 4 : i32
    %c0_i32_226 = arith.constant 0 : i32
    %281 = tpu.memref_slice %arg7[%c3_i32_222, %c4_i32_225, %c0_i32_226] : memref<8x9x128xf32, #tpu.memory_space<vmem>> -> memref<1x1x128xf32, #tpu.memory_space<vmem>>
    %282 = tpu.memref_squeeze %281 : memref<1x1x128xf32, #tpu.memory_space<vmem>> -> memref<1x128xf32, #tpu.memory_space<vmem>>
    %283 = tpu.memref_slice %arg8[%c1_i32_223] : memref<2x!tpu.dma_semaphore, #tpu.memory_space<semaphore_mem>> -> memref<1x!tpu.dma_semaphore, #tpu.memory_space<semaphore_mem>>
    %284 = tpu.memref_squeeze %283 : memref<1x!tpu.dma_semaphore, #tpu.memory_space<semaphore_mem>> -> memref<!tpu.dma_semaphore, #tpu.memory_space<semaphore_mem>>
    tpu.enqueue_dma source(%280 : memref<1x128xf32, #tpu.memory_space<any>>) target(%282 : memref<1x128xf32, #tpu.memory_space<vmem>>) target_semaphore(%284 : memref<!tpu.dma_semaphore, #tpu.memory_space<semaphore_mem>>)
    %c3_i32_227 = arith.constant 3 : i32
    %285 = arith.addi %0, %c3_i32_227 : i32
    %286 = arith.index_cast %285 : i32 to index
    %c5_228 = arith.constant 5 : index
    %287 = memref.load %arg2[%286, %c5_228] : memref<16x9xi32, #tpu.memory_space<smem>>
    %c3_i32_229 = arith.constant 3 : i32
    %c1_i32_230 = arith.constant 1 : i32
    %c0_i32_231 = arith.constant 0 : i32
    %288 = tpu.memref_slice %arg4[%287, %c0_i32_231] : memref<20x128xf32, #tpu.memory_space<any>> -> memref<1x128xf32, #tpu.memory_space<any>>
    %c5_i32_232 = arith.constant 5 : i32
    %c0_i32_233 = arith.constant 0 : i32
    %289 = tpu.memref_slice %arg7[%c3_i32_229, %c5_i32_232, %c0_i32_233] : memref<8x9x128xf32, #tpu.memory_space<vmem>> -> memref<1x1x128xf32, #tpu.memory_space<vmem>>
    %290 = tpu.memref_squeeze %289 : memref<1x1x128xf32, #tpu.memory_space<vmem>> -> memref<1x128xf32, #tpu.memory_space<vmem>>
    %291 = tpu.memref_slice %arg8[%c1_i32_230] : memref<2x!tpu.dma_semaphore, #tpu.memory_space<semaphore_mem>> -> memref<1x!tpu.dma_semaphore, #tpu.memory_space<semaphore_mem>>
    %292 = tpu.memref_squeeze %291 : memref<1x!tpu.dma_semaphore, #tpu.memory_space<semaphore_mem>> -> memref<!tpu.dma_semaphore, #tpu.memory_space<semaphore_mem>>
    tpu.enqueue_dma source(%288 : memref<1x128xf32, #tpu.memory_space<any>>) target(%290 : memref<1x128xf32, #tpu.memory_space<vmem>>) target_semaphore(%292 : memref<!tpu.dma_semaphore, #tpu.memory_space<semaphore_mem>>)
    %c3_i32_234 = arith.constant 3 : i32
    %293 = arith.addi %0, %c3_i32_234 : i32
    %294 = arith.index_cast %293 : i32 to index
    %c6_235 = arith.constant 6 : index
    %295 = memref.load %arg2[%294, %c6_235] : memref<16x9xi32, #tpu.memory_space<smem>>
    %c3_i32_236 = arith.constant 3 : i32
    %c1_i32_237 = arith.constant 1 : i32
    %c0_i32_238 = arith.constant 0 : i32
    %296 = tpu.memref_slice %arg4[%295, %c0_i32_238] : memref<20x128xf32, #tpu.memory_space<any>> -> memref<1x128xf32, #tpu.memory_space<any>>
    %c6_i32_239 = arith.constant 6 : i32
    %c0_i32_240 = arith.constant 0 : i32
    %297 = tpu.memref_slice %arg7[%c3_i32_236, %c6_i32_239, %c0_i32_240] : memref<8x9x128xf32, #tpu.memory_space<vmem>> -> memref<1x1x128xf32, #tpu.memory_space<vmem>>
    %298 = tpu.memref_squeeze %297 : memref<1x1x128xf32, #tpu.memory_space<vmem>> -> memref<1x128xf32, #tpu.memory_space<vmem>>
    %299 = tpu.memref_slice %arg8[%c1_i32_237] : memref<2x!tpu.dma_semaphore, #tpu.memory_space<semaphore_mem>> -> memref<1x!tpu.dma_semaphore, #tpu.memory_space<semaphore_mem>>
    %300 = tpu.memref_squeeze %299 : memref<1x!tpu.dma_semaphore, #tpu.memory_space<semaphore_mem>> -> memref<!tpu.dma_semaphore, #tpu.memory_space<semaphore_mem>>
    tpu.enqueue_dma source(%296 : memref<1x128xf32, #tpu.memory_space<any>>) target(%298 : memref<1x128xf32, #tpu.memory_space<vmem>>) target_semaphore(%300 : memref<!tpu.dma_semaphore, #tpu.memory_space<semaphore_mem>>)
    %c3_i32_241 = arith.constant 3 : i32
    %301 = arith.addi %0, %c3_i32_241 : i32
    %302 = arith.index_cast %301 : i32 to index
    %c7_242 = arith.constant 7 : index
    %303 = memref.load %arg2[%302, %c7_242] : memref<16x9xi32, #tpu.memory_space<smem>>
    %c3_i32_243 = arith.constant 3 : i32
    %c1_i32_244 = arith.constant 1 : i32
    %c0_i32_245 = arith.constant 0 : i32
    %304 = tpu.memref_slice %arg4[%303, %c0_i32_245] : memref<20x128xf32, #tpu.memory_space<any>> -> memref<1x128xf32, #tpu.memory_space<any>>
    %c7_i32_246 = arith.constant 7 : i32
    %c0_i32_247 = arith.constant 0 : i32
    %305 = tpu.memref_slice %arg7[%c3_i32_243, %c7_i32_246, %c0_i32_247] : memref<8x9x128xf32, #tpu.memory_space<vmem>> -> memref<1x1x128xf32, #tpu.memory_space<vmem>>
    %306 = tpu.memref_squeeze %305 : memref<1x1x128xf32, #tpu.memory_space<vmem>> -> memref<1x128xf32, #tpu.memory_space<vmem>>
    %307 = tpu.memref_slice %arg8[%c1_i32_244] : memref<2x!tpu.dma_semaphore, #tpu.memory_space<semaphore_mem>> -> memref<1x!tpu.dma_semaphore, #tpu.memory_space<semaphore_mem>>
    %308 = tpu.memref_squeeze %307 : memref<1x!tpu.dma_semaphore, #tpu.memory_space<semaphore_mem>> -> memref<!tpu.dma_semaphore, #tpu.memory_space<semaphore_mem>>
    tpu.enqueue_dma source(%304 : memref<1x128xf32, #tpu.memory_space<any>>) target(%306 : memref<1x128xf32, #tpu.memory_space<vmem>>) target_semaphore(%308 : memref<!tpu.dma_semaphore, #tpu.memory_space<semaphore_mem>>)
    %c3_i32_248 = arith.constant 3 : i32
    %309 = arith.addi %0, %c3_i32_248 : i32
    %310 = arith.index_cast %309 : i32 to index
    %c8_249 = arith.constant 8 : index
    %311 = memref.load %arg2[%310, %c8_249] : memref<16x9xi32, #tpu.memory_space<smem>>
    %c3_i32_250 = arith.constant 3 : i32
    %c1_i32_251 = arith.constant 1 : i32
    %c0_i32_252 = arith.constant 0 : i32
    %312 = tpu.memref_slice %arg4[%311, %c0_i32_252] : memref<20x128xf32, #tpu.memory_space<any>> -> memref<1x128xf32, #tpu.memory_space<any>>
    %c8_i32_253 = arith.constant 8 : i32
    %c0_i32_254 = arith.constant 0 : i32
    %313 = tpu.memref_slice %arg7[%c3_i32_250, %c8_i32_253, %c0_i32_254] : memref<8x9x128xf32, #tpu.memory_space<vmem>> -> memref<1x1x128xf32, #tpu.memory_space<vmem>>
    %314 = tpu.memref_squeeze %313 : memref<1x1x128xf32, #tpu.memory_space<vmem>> -> memref<1x128xf32, #tpu.memory_space<vmem>>
    %315 = tpu.memref_slice %arg8[%c1_i32_251] : memref<2x!tpu.dma_semaphore, #tpu.memory_space<semaphore_mem>> -> memref<1x!tpu.dma_semaphore, #tpu.memory_space<semaphore_mem>>
    %316 = tpu.memref_squeeze %315 : memref<1x!tpu.dma_semaphore, #tpu.memory_space<semaphore_mem>> -> memref<!tpu.dma_semaphore, #tpu.memory_space<semaphore_mem>>
    tpu.enqueue_dma source(%312 : memref<1x128xf32, #tpu.memory_space<any>>) target(%314 : memref<1x128xf32, #tpu.memory_space<vmem>>) target_semaphore(%316 : memref<!tpu.dma_semaphore, #tpu.memory_space<semaphore_mem>>)
    %c4_i32_255 = arith.constant 4 : i32
    %317 = arith.addi %0, %c4_i32_255 : i32
    %318 = arith.index_cast %317 : i32 to index
    %319 = memref.load %arg1[%318] : memref<16xi32, #tpu.memory_space<smem>>
    %c0_i32_256 = arith.constant 0 : i32
    %c0_i32_257 = arith.constant 0 : i32
    %320 = tpu.memref_slice %arg3[%319, %c0_i32_257] : memref<20x128xf32, #tpu.memory_space<any>> -> memref<1x128xf32, #tpu.memory_space<any>>
    %c4_i32_258 = arith.constant 4 : i32
    %c0_i32_259 = arith.constant 0 : i32
    %321 = tpu.memref_slice %arg6[%c4_i32_258, %c0_i32_259] : memref<8x128xf32, #tpu.memory_space<vmem>> -> memref<1x128xf32, #tpu.memory_space<vmem>>
    %322 = tpu.memref_slice %arg8[%c0_i32_256] : memref<2x!tpu.dma_semaphore, #tpu.memory_space<semaphore_mem>> -> memref<1x!tpu.dma_semaphore, #tpu.memory_space<semaphore_mem>>
    %323 = tpu.memref_squeeze %322 : memref<1x!tpu.dma_semaphore, #tpu.memory_space<semaphore_mem>> -> memref<!tpu.dma_semaphore, #tpu.memory_space<semaphore_mem>>
    tpu.enqueue_dma source(%320 : memref<1x128xf32, #tpu.memory_space<any>>) target(%321 : memref<1x128xf32, #tpu.memory_space<vmem>>) target_semaphore(%323 : memref<!tpu.dma_semaphore, #tpu.memory_space<semaphore_mem>>)
    %c4_i32_260 = arith.constant 4 : i32
    %324 = arith.addi %0, %c4_i32_260 : i32
    %325 = arith.index_cast %324 : i32 to index
    %c0_261 = arith.constant 0 : index
    %326 = memref.load %arg2[%325, %c0_261] : memref<16x9xi32, #tpu.memory_space<smem>>
    %c4_i32_262 = arith.constant 4 : i32
    %c1_i32_263 = arith.constant 1 : i32
    %c0_i32_264 = arith.constant 0 : i32
    %327 = tpu.memref_slice %arg4[%326, %c0_i32_264] : memref<20x128xf32, #tpu.memory_space<any>> -> memref<1x128xf32, #tpu.memory_space<any>>
    %c0_i32_265 = arith.constant 0 : i32
    %c0_i32_266 = arith.constant 0 : i32
    %328 = tpu.memref_slice %arg7[%c4_i32_262, %c0_i32_265, %c0_i32_266] : memref<8x9x128xf32, #tpu.memory_space<vmem>> -> memref<1x1x128xf32, #tpu.memory_space<vmem>>
    %329 = tpu.memref_squeeze %328 : memref<1x1x128xf32, #tpu.memory_space<vmem>> -> memref<1x128xf32, #tpu.memory_space<vmem>>
    %330 = tpu.memref_slice %arg8[%c1_i32_263] : memref<2x!tpu.dma_semaphore, #tpu.memory_space<semaphore_mem>> -> memref<1x!tpu.dma_semaphore, #tpu.memory_space<semaphore_mem>>
    %331 = tpu.memref_squeeze %330 : memref<1x!tpu.dma_semaphore, #tpu.memory_space<semaphore_mem>> -> memref<!tpu.dma_semaphore, #tpu.memory_space<semaphore_mem>>
    tpu.enqueue_dma source(%327 : memref<1x128xf32, #tpu.memory_space<any>>) target(%329 : memref<1x128xf32, #tpu.memory_space<vmem>>) target_semaphore(%331 : memref<!tpu.dma_semaphore, #tpu.memory_space<semaphore_mem>>)
    %c4_i32_267 = arith.constant 4 : i32
    %332 = arith.addi %0, %c4_i32_267 : i32
    %333 = arith.index_cast %332 : i32 to index
    %c1_268 = arith.constant 1 : index
    %334 = memref.load %arg2[%333, %c1_268] : memref<16x9xi32, #tpu.memory_space<smem>>
    %c4_i32_269 = arith.constant 4 : i32
    %c1_i32_270 = arith.constant 1 : i32
    %c0_i32_271 = arith.constant 0 : i32
    %335 = tpu.memref_slice %arg4[%334, %c0_i32_271] : memref<20x128xf32, #tpu.memory_space<any>> -> memref<1x128xf32, #tpu.memory_space<any>>
    %c1_i32_272 = arith.constant 1 : i32
    %c0_i32_273 = arith.constant 0 : i32
    %336 = tpu.memref_slice %arg7[%c4_i32_269, %c1_i32_272, %c0_i32_273] : memref<8x9x128xf32, #tpu.memory_space<vmem>> -> memref<1x1x128xf32, #tpu.memory_space<vmem>>
    %337 = tpu.memref_squeeze %336 : memref<1x1x128xf32, #tpu.memory_space<vmem>> -> memref<1x128xf32, #tpu.memory_space<vmem>>
    %338 = tpu.memref_slice %arg8[%c1_i32_270] : memref<2x!tpu.dma_semaphore, #tpu.memory_space<semaphore_mem>> -> memref<1x!tpu.dma_semaphore, #tpu.memory_space<semaphore_mem>>
    %339 = tpu.memref_squeeze %338 : memref<1x!tpu.dma_semaphore, #tpu.memory_space<semaphore_mem>> -> memref<!tpu.dma_semaphore, #tpu.memory_space<semaphore_mem>>
    tpu.enqueue_dma source(%335 : memref<1x128xf32, #tpu.memory_space<any>>) target(%337 : memref<1x128xf32, #tpu.memory_space<vmem>>) target_semaphore(%339 : memref<!tpu.dma_semaphore, #tpu.memory_space<semaphore_mem>>)
    %c4_i32_274 = arith.constant 4 : i32
    %340 = arith.addi %0, %c4_i32_274 : i32
    %341 = arith.index_cast %340 : i32 to index
    %c2_275 = arith.constant 2 : index
    %342 = memref.load %arg2[%341, %c2_275] : memref<16x9xi32, #tpu.memory_space<smem>>
    %c4_i32_276 = arith.constant 4 : i32
    %c1_i32_277 = arith.constant 1 : i32
    %c0_i32_278 = arith.constant 0 : i32
    %343 = tpu.memref_slice %arg4[%342, %c0_i32_278] : memref<20x128xf32, #tpu.memory_space<any>> -> memref<1x128xf32, #tpu.memory_space<any>>
    %c2_i32_279 = arith.constant 2 : i32
    %c0_i32_280 = arith.constant 0 : i32
    %344 = tpu.memref_slice %arg7[%c4_i32_276, %c2_i32_279, %c0_i32_280] : memref<8x9x128xf32, #tpu.memory_space<vmem>> -> memref<1x1x128xf32, #tpu.memory_space<vmem>>
    %345 = tpu.memref_squeeze %344 : memref<1x1x128xf32, #tpu.memory_space<vmem>> -> memref<1x128xf32, #tpu.memory_space<vmem>>
    %346 = tpu.memref_slice %arg8[%c1_i32_277] : memref<2x!tpu.dma_semaphore, #tpu.memory_space<semaphore_mem>> -> memref<1x!tpu.dma_semaphore, #tpu.memory_space<semaphore_mem>>
    %347 = tpu.memref_squeeze %346 : memref<1x!tpu.dma_semaphore, #tpu.memory_space<semaphore_mem>> -> memref<!tpu.dma_semaphore, #tpu.memory_space<semaphore_mem>>
    tpu.enqueue_dma source(%343 : memref<1x128xf32, #tpu.memory_space<any>>) target(%345 : memref<1x128xf32, #tpu.memory_space<vmem>>) target_semaphore(%347 : memref<!tpu.dma_semaphore, #tpu.memory_space<semaphore_mem>>)
    %c4_i32_281 = arith.constant 4 : i32
    %348 = arith.addi %0, %c4_i32_281 : i32
    %349 = arith.index_cast %348 : i32 to index
    %c3_282 = arith.constant 3 : index
    %350 = memref.load %arg2[%349, %c3_282] : memref<16x9xi32, #tpu.memory_space<smem>>
    %c4_i32_283 = arith.constant 4 : i32
    %c1_i32_284 = arith.constant 1 : i32
    %c0_i32_285 = arith.constant 0 : i32
    %351 = tpu.memref_slice %arg4[%350, %c0_i32_285] : memref<20x128xf32, #tpu.memory_space<any>> -> memref<1x128xf32, #tpu.memory_space<any>>
    %c3_i32_286 = arith.constant 3 : i32
    %c0_i32_287 = arith.constant 0 : i32
    %352 = tpu.memref_slice %arg7[%c4_i32_283, %c3_i32_286, %c0_i32_287] : memref<8x9x128xf32, #tpu.memory_space<vmem>> -> memref<1x1x128xf32, #tpu.memory_space<vmem>>
    %353 = tpu.memref_squeeze %352 : memref<1x1x128xf32, #tpu.memory_space<vmem>> -> memref<1x128xf32, #tpu.memory_space<vmem>>
    %354 = tpu.memref_slice %arg8[%c1_i32_284] : memref<2x!tpu.dma_semaphore, #tpu.memory_space<semaphore_mem>> -> memref<1x!tpu.dma_semaphore, #tpu.memory_space<semaphore_mem>>
    %355 = tpu.memref_squeeze %354 : memref<1x!tpu.dma_semaphore, #tpu.memory_space<semaphore_mem>> -> memref<!tpu.dma_semaphore, #tpu.memory_space<semaphore_mem>>
    tpu.enqueue_dma source(%351 : memref<1x128xf32, #tpu.memory_space<any>>) target(%353 : memref<1x128xf32, #tpu.memory_space<vmem>>) target_semaphore(%355 : memref<!tpu.dma_semaphore, #tpu.memory_space<semaphore_mem>>)
    %c4_i32_288 = arith.constant 4 : i32
    %356 = arith.addi %0, %c4_i32_288 : i32
    %357 = arith.index_cast %356 : i32 to index
    %c4_289 = arith.constant 4 : index
    %358 = memref.load %arg2[%357, %c4_289] : memref<16x9xi32, #tpu.memory_space<smem>>
    %c4_i32_290 = arith.constant 4 : i32
    %c1_i32_291 = arith.constant 1 : i32
    %c0_i32_292 = arith.constant 0 : i32
    %359 = tpu.memref_slice %arg4[%358, %c0_i32_292] : memref<20x128xf32, #tpu.memory_space<any>> -> memref<1x128xf32, #tpu.memory_space<any>>
    %c4_i32_293 = arith.constant 4 : i32
    %c0_i32_294 = arith.constant 0 : i32
    %360 = tpu.memref_slice %arg7[%c4_i32_290, %c4_i32_293, %c0_i32_294] : memref<8x9x128xf32, #tpu.memory_space<vmem>> -> memref<1x1x128xf32, #tpu.memory_space<vmem>>
    %361 = tpu.memref_squeeze %360 : memref<1x1x128xf32, #tpu.memory_space<vmem>> -> memref<1x128xf32, #tpu.memory_space<vmem>>
    %362 = tpu.memref_slice %arg8[%c1_i32_291] : memref<2x!tpu.dma_semaphore, #tpu.memory_space<semaphore_mem>> -> memref<1x!tpu.dma_semaphore, #tpu.memory_space<semaphore_mem>>
    %363 = tpu.memref_squeeze %362 : memref<1x!tpu.dma_semaphore, #tpu.memory_space<semaphore_mem>> -> memref<!tpu.dma_semaphore, #tpu.memory_space<semaphore_mem>>
    tpu.enqueue_dma source(%359 : memref<1x128xf32, #tpu.memory_space<any>>) target(%361 : memref<1x128xf32, #tpu.memory_space<vmem>>) target_semaphore(%363 : memref<!tpu.dma_semaphore, #tpu.memory_space<semaphore_mem>>)
    %c4_i32_295 = arith.constant 4 : i32
    %364 = arith.addi %0, %c4_i32_295 : i32
    %365 = arith.index_cast %364 : i32 to index
    %c5_296 = arith.constant 5 : index
    %366 = memref.load %arg2[%365, %c5_296] : memref<16x9xi32, #tpu.memory_space<smem>>
    %c4_i32_297 = arith.constant 4 : i32
    %c1_i32_298 = arith.constant 1 : i32
    %c0_i32_299 = arith.constant 0 : i32
    %367 = tpu.memref_slice %arg4[%366, %c0_i32_299] : memref<20x128xf32, #tpu.memory_space<any>> -> memref<1x128xf32, #tpu.memory_space<any>>
    %c5_i32_300 = arith.constant 5 : i32
    %c0_i32_301 = arith.constant 0 : i32
    %368 = tpu.memref_slice %arg7[%c4_i32_297, %c5_i32_300, %c0_i32_301] : memref<8x9x128xf32, #tpu.memory_space<vmem>> -> memref<1x1x128xf32, #tpu.memory_space<vmem>>
    %369 = tpu.memref_squeeze %368 : memref<1x1x128xf32, #tpu.memory_space<vmem>> -> memref<1x128xf32, #tpu.memory_space<vmem>>
    %370 = tpu.memref_slice %arg8[%c1_i32_298] : memref<2x!tpu.dma_semaphore, #tpu.memory_space<semaphore_mem>> -> memref<1x!tpu.dma_semaphore, #tpu.memory_space<semaphore_mem>>
    %371 = tpu.memref_squeeze %370 : memref<1x!tpu.dma_semaphore, #tpu.memory_space<semaphore_mem>> -> memref<!tpu.dma_semaphore, #tpu.memory_space<semaphore_mem>>
    tpu.enqueue_dma source(%367 : memref<1x128xf32, #tpu.memory_space<any>>) target(%369 : memref<1x128xf32, #tpu.memory_space<vmem>>) target_semaphore(%371 : memref<!tpu.dma_semaphore, #tpu.memory_space<semaphore_mem>>)
    %c4_i32_302 = arith.constant 4 : i32
    %372 = arith.addi %0, %c4_i32_302 : i32
    %373 = arith.index_cast %372 : i32 to index
    %c6_303 = arith.constant 6 : index
    %374 = memref.load %arg2[%373, %c6_303] : memref<16x9xi32, #tpu.memory_space<smem>>
    %c4_i32_304 = arith.constant 4 : i32
    %c1_i32_305 = arith.constant 1 : i32
    %c0_i32_306 = arith.constant 0 : i32
    %375 = tpu.memref_slice %arg4[%374, %c0_i32_306] : memref<20x128xf32, #tpu.memory_space<any>> -> memref<1x128xf32, #tpu.memory_space<any>>
    %c6_i32_307 = arith.constant 6 : i32
    %c0_i32_308 = arith.constant 0 : i32
    %376 = tpu.memref_slice %arg7[%c4_i32_304, %c6_i32_307, %c0_i32_308] : memref<8x9x128xf32, #tpu.memory_space<vmem>> -> memref<1x1x128xf32, #tpu.memory_space<vmem>>
    %377 = tpu.memref_squeeze %376 : memref<1x1x128xf32, #tpu.memory_space<vmem>> -> memref<1x128xf32, #tpu.memory_space<vmem>>
    %378 = tpu.memref_slice %arg8[%c1_i32_305] : memref<2x!tpu.dma_semaphore, #tpu.memory_space<semaphore_mem>> -> memref<1x!tpu.dma_semaphore, #tpu.memory_space<semaphore_mem>>
    %379 = tpu.memref_squeeze %378 : memref<1x!tpu.dma_semaphore, #tpu.memory_space<semaphore_mem>> -> memref<!tpu.dma_semaphore, #tpu.memory_space<semaphore_mem>>
    tpu.enqueue_dma source(%375 : memref<1x128xf32, #tpu.memory_space<any>>) target(%377 : memref<1x128xf32, #tpu.memory_space<vmem>>) target_semaphore(%379 : memref<!tpu.dma_semaphore, #tpu.memory_space<semaphore_mem>>)
    %c4_i32_309 = arith.constant 4 : i32
    %380 = arith.addi %0, %c4_i32_309 : i32
    %381 = arith.index_cast %380 : i32 to index
    %c7_310 = arith.constant 7 : index
    %382 = memref.load %arg2[%381, %c7_310] : memref<16x9xi32, #tpu.memory_space<smem>>
    %c4_i32_311 = arith.constant 4 : i32
    %c1_i32_312 = arith.constant 1 : i32
    %c0_i32_313 = arith.constant 0 : i32
    %383 = tpu.memref_slice %arg4[%382, %c0_i32_313] : memref<20x128xf32, #tpu.memory_space<any>> -> memref<1x128xf32, #tpu.memory_space<any>>
    %c7_i32_314 = arith.constant 7 : i32
    %c0_i32_315 = arith.constant 0 : i32
    %384 = tpu.memref_slice %arg7[%c4_i32_311, %c7_i32_314, %c0_i32_315] : memref<8x9x128xf32, #tpu.memory_space<vmem>> -> memref<1x1x128xf32, #tpu.memory_space<vmem>>
    %385 = tpu.memref_squeeze %384 : memref<1x1x128xf32, #tpu.memory_space<vmem>> -> memref<1x128xf32, #tpu.memory_space<vmem>>
    %386 = tpu.memref_slice %arg8[%c1_i32_312] : memref<2x!tpu.dma_semaphore, #tpu.memory_space<semaphore_mem>> -> memref<1x!tpu.dma_semaphore, #tpu.memory_space<semaphore_mem>>
    %387 = tpu.memref_squeeze %386 : memref<1x!tpu.dma_semaphore, #tpu.memory_space<semaphore_mem>> -> memref<!tpu.dma_semaphore, #tpu.memory_space<semaphore_mem>>
    tpu.enqueue_dma source(%383 : memref<1x128xf32, #tpu.memory_space<any>>) target(%385 : memref<1x128xf32, #tpu.memory_space<vmem>>) target_semaphore(%387 : memref<!tpu.dma_semaphore, #tpu.memory_space<semaphore_mem>>)
    %c4_i32_316 = arith.constant 4 : i32
    %388 = arith.addi %0, %c4_i32_316 : i32
    %389 = arith.index_cast %388 : i32 to index
    %c8_317 = arith.constant 8 : index
    %390 = memref.load %arg2[%389, %c8_317] : memref<16x9xi32, #tpu.memory_space<smem>>
    %c4_i32_318 = arith.constant 4 : i32
    %c1_i32_319 = arith.constant 1 : i32
    %c0_i32_320 = arith.constant 0 : i32
    %391 = tpu.memref_slice %arg4[%390, %c0_i32_320] : memref<20x128xf32, #tpu.memory_space<any>> -> memref<1x128xf32, #tpu.memory_space<any>>
    %c8_i32_321 = arith.constant 8 : i32
    %c0_i32_322 = arith.constant 0 : i32
    %392 = tpu.memref_slice %arg7[%c4_i32_318, %c8_i32_321, %c0_i32_322] : memref<8x9x128xf32, #tpu.memory_space<vmem>> -> memref<1x1x128xf32, #tpu.memory_space<vmem>>
    %393 = tpu.memref_squeeze %392 : memref<1x1x128xf32, #tpu.memory_space<vmem>> -> memref<1x128xf32, #tpu.memory_space<vmem>>
    %394 = tpu.memref_slice %arg8[%c1_i32_319] : memref<2x!tpu.dma_semaphore, #tpu.memory_space<semaphore_mem>> -> memref<1x!tpu.dma_semaphore, #tpu.memory_space<semaphore_mem>>
    %395 = tpu.memref_squeeze %394 : memref<1x!tpu.dma_semaphore, #tpu.memory_space<semaphore_mem>> -> memref<!tpu.dma_semaphore, #tpu.memory_space<semaphore_mem>>
    tpu.enqueue_dma source(%391 : memref<1x128xf32, #tpu.memory_space<any>>) target(%393 : memref<1x128xf32, #tpu.memory_space<vmem>>) target_semaphore(%395 : memref<!tpu.dma_semaphore, #tpu.memory_space<semaphore_mem>>)
    %c5_i32_323 = arith.constant 5 : i32
    %396 = arith.addi %0, %c5_i32_323 : i32
    %397 = arith.index_cast %396 : i32 to index
    %398 = memref.load %arg1[%397] : memref<16xi32, #tpu.memory_space<smem>>
    %c0_i32_324 = arith.constant 0 : i32
    %c0_i32_325 = arith.constant 0 : i32
    %399 = tpu.memref_slice %arg3[%398, %c0_i32_325] : memref<20x128xf32, #tpu.memory_space<any>> -> memref<1x128xf32, #tpu.memory_space<any>>
    %c5_i32_326 = arith.constant 5 : i32
    %c0_i32_327 = arith.constant 0 : i32
    %400 = tpu.memref_slice %arg6[%c5_i32_326, %c0_i32_327] : memref<8x128xf32, #tpu.memory_space<vmem>> -> memref<1x128xf32, #tpu.memory_space<vmem>>
    %401 = tpu.memref_slice %arg8[%c0_i32_324] : memref<2x!tpu.dma_semaphore, #tpu.memory_space<semaphore_mem>> -> memref<1x!tpu.dma_semaphore, #tpu.memory_space<semaphore_mem>>
    %402 = tpu.memref_squeeze %401 : memref<1x!tpu.dma_semaphore, #tpu.memory_space<semaphore_mem>> -> memref<!tpu.dma_semaphore, #tpu.memory_space<semaphore_mem>>
    tpu.enqueue_dma source(%399 : memref<1x128xf32, #tpu.memory_space<any>>) target(%400 : memref<1x128xf32, #tpu.memory_space<vmem>>) target_semaphore(%402 : memref<!tpu.dma_semaphore, #tpu.memory_space<semaphore_mem>>)
    %c5_i32_328 = arith.constant 5 : i32
    %403 = arith.addi %0, %c5_i32_328 : i32
    %404 = arith.index_cast %403 : i32 to index
    %c0_329 = arith.constant 0 : index
    %405 = memref.load %arg2[%404, %c0_329] : memref<16x9xi32, #tpu.memory_space<smem>>
    %c5_i32_330 = arith.constant 5 : i32
    %c1_i32_331 = arith.constant 1 : i32
    %c0_i32_332 = arith.constant 0 : i32
    %406 = tpu.memref_slice %arg4[%405, %c0_i32_332] : memref<20x128xf32, #tpu.memory_space<any>> -> memref<1x128xf32, #tpu.memory_space<any>>
    %c0_i32_333 = arith.constant 0 : i32
    %c0_i32_334 = arith.constant 0 : i32
    %407 = tpu.memref_slice %arg7[%c5_i32_330, %c0_i32_333, %c0_i32_334] : memref<8x9x128xf32, #tpu.memory_space<vmem>> -> memref<1x1x128xf32, #tpu.memory_space<vmem>>
    %408 = tpu.memref_squeeze %407 : memref<1x1x128xf32, #tpu.memory_space<vmem>> -> memref<1x128xf32, #tpu.memory_space<vmem>>
    %409 = tpu.memref_slice %arg8[%c1_i32_331] : memref<2x!tpu.dma_semaphore, #tpu.memory_space<semaphore_mem>> -> memref<1x!tpu.dma_semaphore, #tpu.memory_space<semaphore_mem>>
    %410 = tpu.memref_squeeze %409 : memref<1x!tpu.dma_semaphore, #tpu.memory_space<semaphore_mem>> -> memref<!tpu.dma_semaphore, #tpu.memory_space<semaphore_mem>>
    tpu.enqueue_dma source(%406 : memref<1x128xf32, #tpu.memory_space<any>>) target(%408 : memref<1x128xf32, #tpu.memory_space<vmem>>) target_semaphore(%410 : memref<!tpu.dma_semaphore, #tpu.memory_space<semaphore_mem>>)
    %c5_i32_335 = arith.constant 5 : i32
    %411 = arith.addi %0, %c5_i32_335 : i32
    %412 = arith.index_cast %411 : i32 to index
    %c1_336 = arith.constant 1 : index
    %413 = memref.load %arg2[%412, %c1_336] : memref<16x9xi32, #tpu.memory_space<smem>>
    %c5_i32_337 = arith.constant 5 : i32
    %c1_i32_338 = arith.constant 1 : i32
    %c0_i32_339 = arith.constant 0 : i32
    %414 = tpu.memref_slice %arg4[%413, %c0_i32_339] : memref<20x128xf32, #tpu.memory_space<any>> -> memref<1x128xf32, #tpu.memory_space<any>>
    %c1_i32_340 = arith.constant 1 : i32
    %c0_i32_341 = arith.constant 0 : i32
    %415 = tpu.memref_slice %arg7[%c5_i32_337, %c1_i32_340, %c0_i32_341] : memref<8x9x128xf32, #tpu.memory_space<vmem>> -> memref<1x1x128xf32, #tpu.memory_space<vmem>>
    %416 = tpu.memref_squeeze %415 : memref<1x1x128xf32, #tpu.memory_space<vmem>> -> memref<1x128xf32, #tpu.memory_space<vmem>>
    %417 = tpu.memref_slice %arg8[%c1_i32_338] : memref<2x!tpu.dma_semaphore, #tpu.memory_space<semaphore_mem>> -> memref<1x!tpu.dma_semaphore, #tpu.memory_space<semaphore_mem>>
    %418 = tpu.memref_squeeze %417 : memref<1x!tpu.dma_semaphore, #tpu.memory_space<semaphore_mem>> -> memref<!tpu.dma_semaphore, #tpu.memory_space<semaphore_mem>>
    tpu.enqueue_dma source(%414 : memref<1x128xf32, #tpu.memory_space<any>>) target(%416 : memref<1x128xf32, #tpu.memory_space<vmem>>) target_semaphore(%418 : memref<!tpu.dma_semaphore, #tpu.memory_space<semaphore_mem>>)
    %c5_i32_342 = arith.constant 5 : i32
    %419 = arith.addi %0, %c5_i32_342 : i32
    %420 = arith.index_cast %419 : i32 to index
    %c2_343 = arith.constant 2 : index
    %421 = memref.load %arg2[%420, %c2_343] : memref<16x9xi32, #tpu.memory_space<smem>>
    %c5_i32_344 = arith.constant 5 : i32
    %c1_i32_345 = arith.constant 1 : i32
    %c0_i32_346 = arith.constant 0 : i32
    %422 = tpu.memref_slice %arg4[%421, %c0_i32_346] : memref<20x128xf32, #tpu.memory_space<any>> -> memref<1x128xf32, #tpu.memory_space<any>>
    %c2_i32_347 = arith.constant 2 : i32
    %c0_i32_348 = arith.constant 0 : i32
    %423 = tpu.memref_slice %arg7[%c5_i32_344, %c2_i32_347, %c0_i32_348] : memref<8x9x128xf32, #tpu.memory_space<vmem>> -> memref<1x1x128xf32, #tpu.memory_space<vmem>>
    %424 = tpu.memref_squeeze %423 : memref<1x1x128xf32, #tpu.memory_space<vmem>> -> memref<1x128xf32, #tpu.memory_space<vmem>>
    %425 = tpu.memref_slice %arg8[%c1_i32_345] : memref<2x!tpu.dma_semaphore, #tpu.memory_space<semaphore_mem>> -> memref<1x!tpu.dma_semaphore, #tpu.memory_space<semaphore_mem>>
    %426 = tpu.memref_squeeze %425 : memref<1x!tpu.dma_semaphore, #tpu.memory_space<semaphore_mem>> -> memref<!tpu.dma_semaphore, #tpu.memory_space<semaphore_mem>>
    tpu.enqueue_dma source(%422 : memref<1x128xf32, #tpu.memory_space<any>>) target(%424 : memref<1x128xf32, #tpu.memory_space<vmem>>) target_semaphore(%426 : memref<!tpu.dma_semaphore, #tpu.memory_space<semaphore_mem>>)
    %c5_i32_349 = arith.constant 5 : i32
    %427 = arith.addi %0, %c5_i32_349 : i32
    %428 = arith.index_cast %427 : i32 to index
    %c3_350 = arith.constant 3 : index
    %429 = memref.load %arg2[%428, %c3_350] : memref<16x9xi32, #tpu.memory_space<smem>>
    %c5_i32_351 = arith.constant 5 : i32
    %c1_i32_352 = arith.constant 1 : i32
    %c0_i32_353 = arith.constant 0 : i32
    %430 = tpu.memref_slice %arg4[%429, %c0_i32_353] : memref<20x128xf32, #tpu.memory_space<any>> -> memref<1x128xf32, #tpu.memory_space<any>>
    %c3_i32_354 = arith.constant 3 : i32
    %c0_i32_355 = arith.constant 0 : i32
    %431 = tpu.memref_slice %arg7[%c5_i32_351, %c3_i32_354, %c0_i32_355] : memref<8x9x128xf32, #tpu.memory_space<vmem>> -> memref<1x1x128xf32, #tpu.memory_space<vmem>>
    %432 = tpu.memref_squeeze %431 : memref<1x1x128xf32, #tpu.memory_space<vmem>> -> memref<1x128xf32, #tpu.memory_space<vmem>>
    %433 = tpu.memref_slice %arg8[%c1_i32_352] : memref<2x!tpu.dma_semaphore, #tpu.memory_space<semaphore_mem>> -> memref<1x!tpu.dma_semaphore, #tpu.memory_space<semaphore_mem>>
    %434 = tpu.memref_squeeze %433 : memref<1x!tpu.dma_semaphore, #tpu.memory_space<semaphore_mem>> -> memref<!tpu.dma_semaphore, #tpu.memory_space<semaphore_mem>>
    tpu.enqueue_dma source(%430 : memref<1x128xf32, #tpu.memory_space<any>>) target(%432 : memref<1x128xf32, #tpu.memory_space<vmem>>) target_semaphore(%434 : memref<!tpu.dma_semaphore, #tpu.memory_space<semaphore_mem>>)
    %c5_i32_356 = arith.constant 5 : i32
    %435 = arith.addi %0, %c5_i32_356 : i32
    %436 = arith.index_cast %435 : i32 to index
    %c4_357 = arith.constant 4 : index
    %437 = memref.load %arg2[%436, %c4_357] : memref<16x9xi32, #tpu.memory_space<smem>>
    %c5_i32_358 = arith.constant 5 : i32
    %c1_i32_359 = arith.constant 1 : i32
    %c0_i32_360 = arith.constant 0 : i32
    %438 = tpu.memref_slice %arg4[%437, %c0_i32_360] : memref<20x128xf32, #tpu.memory_space<any>> -> memref<1x128xf32, #tpu.memory_space<any>>
    %c4_i32_361 = arith.constant 4 : i32
    %c0_i32_362 = arith.constant 0 : i32
    %439 = tpu.memref_slice %arg7[%c5_i32_358, %c4_i32_361, %c0_i32_362] : memref<8x9x128xf32, #tpu.memory_space<vmem>> -> memref<1x1x128xf32, #tpu.memory_space<vmem>>
    %440 = tpu.memref_squeeze %439 : memref<1x1x128xf32, #tpu.memory_space<vmem>> -> memref<1x128xf32, #tpu.memory_space<vmem>>
    %441 = tpu.memref_slice %arg8[%c1_i32_359] : memref<2x!tpu.dma_semaphore, #tpu.memory_space<semaphore_mem>> -> memref<1x!tpu.dma_semaphore, #tpu.memory_space<semaphore_mem>>
    %442 = tpu.memref_squeeze %441 : memref<1x!tpu.dma_semaphore, #tpu.memory_space<semaphore_mem>> -> memref<!tpu.dma_semaphore, #tpu.memory_space<semaphore_mem>>
    tpu.enqueue_dma source(%438 : memref<1x128xf32, #tpu.memory_space<any>>) target(%440 : memref<1x128xf32, #tpu.memory_space<vmem>>) target_semaphore(%442 : memref<!tpu.dma_semaphore, #tpu.memory_space<semaphore_mem>>)
    %c5_i32_363 = arith.constant 5 : i32
    %443 = arith.addi %0, %c5_i32_363 : i32
    %444 = arith.index_cast %443 : i32 to index
    %c5_364 = arith.constant 5 : index
    %445 = memref.load %arg2[%444, %c5_364] : memref<16x9xi32, #tpu.memory_space<smem>>
    %c5_i32_365 = arith.constant 5 : i32
    %c1_i32_366 = arith.constant 1 : i32
    %c0_i32_367 = arith.constant 0 : i32
    %446 = tpu.memref_slice %arg4[%445, %c0_i32_367] : memref<20x128xf32, #tpu.memory_space<any>> -> memref<1x128xf32, #tpu.memory_space<any>>
    %c5_i32_368 = arith.constant 5 : i32
    %c0_i32_369 = arith.constant 0 : i32
    %447 = tpu.memref_slice %arg7[%c5_i32_365, %c5_i32_368, %c0_i32_369] : memref<8x9x128xf32, #tpu.memory_space<vmem>> -> memref<1x1x128xf32, #tpu.memory_space<vmem>>
    %448 = tpu.memref_squeeze %447 : memref<1x1x128xf32, #tpu.memory_space<vmem>> -> memref<1x128xf32, #tpu.memory_space<vmem>>
    %449 = tpu.memref_slice %arg8[%c1_i32_366] : memref<2x!tpu.dma_semaphore, #tpu.memory_space<semaphore_mem>> -> memref<1x!tpu.dma_semaphore, #tpu.memory_space<semaphore_mem>>
    %450 = tpu.memref_squeeze %449 : memref<1x!tpu.dma_semaphore, #tpu.memory_space<semaphore_mem>> -> memref<!tpu.dma_semaphore, #tpu.memory_space<semaphore_mem>>
    tpu.enqueue_dma source(%446 : memref<1x128xf32, #tpu.memory_space<any>>) target(%448 : memref<1x128xf32, #tpu.memory_space<vmem>>) target_semaphore(%450 : memref<!tpu.dma_semaphore, #tpu.memory_space<semaphore_mem>>)
    %c5_i32_370 = arith.constant 5 : i32
    %451 = arith.addi %0, %c5_i32_370 : i32
    %452 = arith.index_cast %451 : i32 to index
    %c6_371 = arith.constant 6 : index
    %453 = memref.load %arg2[%452, %c6_371] : memref<16x9xi32, #tpu.memory_space<smem>>
    %c5_i32_372 = arith.constant 5 : i32
    %c1_i32_373 = arith.constant 1 : i32
    %c0_i32_374 = arith.constant 0 : i32
    %454 = tpu.memref_slice %arg4[%453, %c0_i32_374] : memref<20x128xf32, #tpu.memory_space<any>> -> memref<1x128xf32, #tpu.memory_space<any>>
    %c6_i32_375 = arith.constant 6 : i32
    %c0_i32_376 = arith.constant 0 : i32
    %455 = tpu.memref_slice %arg7[%c5_i32_372, %c6_i32_375, %c0_i32_376] : memref<8x9x128xf32, #tpu.memory_space<vmem>> -> memref<1x1x128xf32, #tpu.memory_space<vmem>>
    %456 = tpu.memref_squeeze %455 : memref<1x1x128xf32, #tpu.memory_space<vmem>> -> memref<1x128xf32, #tpu.memory_space<vmem>>
    %457 = tpu.memref_slice %arg8[%c1_i32_373] : memref<2x!tpu.dma_semaphore, #tpu.memory_space<semaphore_mem>> -> memref<1x!tpu.dma_semaphore, #tpu.memory_space<semaphore_mem>>
    %458 = tpu.memref_squeeze %457 : memref<1x!tpu.dma_semaphore, #tpu.memory_space<semaphore_mem>> -> memref<!tpu.dma_semaphore, #tpu.memory_space<semaphore_mem>>
    tpu.enqueue_dma source(%454 : memref<1x128xf32, #tpu.memory_space<any>>) target(%456 : memref<1x128xf32, #tpu.memory_space<vmem>>) target_semaphore(%458 : memref<!tpu.dma_semaphore, #tpu.memory_space<semaphore_mem>>)
    %c5_i32_377 = arith.constant 5 : i32
    %459 = arith.addi %0, %c5_i32_377 : i32
    %460 = arith.index_cast %459 : i32 to index
    %c7_378 = arith.constant 7 : index
    %461 = memref.load %arg2[%460, %c7_378] : memref<16x9xi32, #tpu.memory_space<smem>>
    %c5_i32_379 = arith.constant 5 : i32
    %c1_i32_380 = arith.constant 1 : i32
    %c0_i32_381 = arith.constant 0 : i32
    %462 = tpu.memref_slice %arg4[%461, %c0_i32_381] : memref<20x128xf32, #tpu.memory_space<any>> -> memref<1x128xf32, #tpu.memory_space<any>>
    %c7_i32_382 = arith.constant 7 : i32
    %c0_i32_383 = arith.constant 0 : i32
    %463 = tpu.memref_slice %arg7[%c5_i32_379, %c7_i32_382, %c0_i32_383] : memref<8x9x128xf32, #tpu.memory_space<vmem>> -> memref<1x1x128xf32, #tpu.memory_space<vmem>>
    %464 = tpu.memref_squeeze %463 : memref<1x1x128xf32, #tpu.memory_space<vmem>> -> memref<1x128xf32, #tpu.memory_space<vmem>>
    %465 = tpu.memref_slice %arg8[%c1_i32_380] : memref<2x!tpu.dma_semaphore, #tpu.memory_space<semaphore_mem>> -> memref<1x!tpu.dma_semaphore, #tpu.memory_space<semaphore_mem>>
    %466 = tpu.memref_squeeze %465 : memref<1x!tpu.dma_semaphore, #tpu.memory_space<semaphore_mem>> -> memref<!tpu.dma_semaphore, #tpu.memory_space<semaphore_mem>>
    tpu.enqueue_dma source(%462 : memref<1x128xf32, #tpu.memory_space<any>>) target(%464 : memref<1x128xf32, #tpu.memory_space<vmem>>) target_semaphore(%466 : memref<!tpu.dma_semaphore, #tpu.memory_space<semaphore_mem>>)
    %c5_i32_384 = arith.constant 5 : i32
    %467 = arith.addi %0, %c5_i32_384 : i32
    %468 = arith.index_cast %467 : i32 to index
    %c8_385 = arith.constant 8 : index
    %469 = memref.load %arg2[%468, %c8_385] : memref<16x9xi32, #tpu.memory_space<smem>>
    %c5_i32_386 = arith.constant 5 : i32
    %c1_i32_387 = arith.constant 1 : i32
    %c0_i32_388 = arith.constant 0 : i32
    %470 = tpu.memref_slice %arg4[%469, %c0_i32_388] : memref<20x128xf32, #tpu.memory_space<any>> -> memref<1x128xf32, #tpu.memory_space<any>>
    %c8_i32_389 = arith.constant 8 : i32
    %c0_i32_390 = arith.constant 0 : i32
    %471 = tpu.memref_slice %arg7[%c5_i32_386, %c8_i32_389, %c0_i32_390] : memref<8x9x128xf32, #tpu.memory_space<vmem>> -> memref<1x1x128xf32, #tpu.memory_space<vmem>>
    %472 = tpu.memref_squeeze %471 : memref<1x1x128xf32, #tpu.memory_space<vmem>> -> memref<1x128xf32, #tpu.memory_space<vmem>>
    %473 = tpu.memref_slice %arg8[%c1_i32_387] : memref<2x!tpu.dma_semaphore, #tpu.memory_space<semaphore_mem>> -> memref<1x!tpu.dma_semaphore, #tpu.memory_space<semaphore_mem>>
    %474 = tpu.memref_squeeze %473 : memref<1x!tpu.dma_semaphore, #tpu.memory_space<semaphore_mem>> -> memref<!tpu.dma_semaphore, #tpu.memory_space<semaphore_mem>>
    tpu.enqueue_dma source(%470 : memref<1x128xf32, #tpu.memory_space<any>>) target(%472 : memref<1x128xf32, #tpu.memory_space<vmem>>) target_semaphore(%474 : memref<!tpu.dma_semaphore, #tpu.memory_space<semaphore_mem>>)
    %c6_i32_391 = arith.constant 6 : i32
    %475 = arith.addi %0, %c6_i32_391 : i32
    %476 = arith.index_cast %475 : i32 to index
    %477 = memref.load %arg1[%476] : memref<16xi32, #tpu.memory_space<smem>>
    %c0_i32_392 = arith.constant 0 : i32
    %c0_i32_393 = arith.constant 0 : i32
    %478 = tpu.memref_slice %arg3[%477, %c0_i32_393] : memref<20x128xf32, #tpu.memory_space<any>> -> memref<1x128xf32, #tpu.memory_space<any>>
    %c6_i32_394 = arith.constant 6 : i32
    %c0_i32_395 = arith.constant 0 : i32
    %479 = tpu.memref_slice %arg6[%c6_i32_394, %c0_i32_395] : memref<8x128xf32, #tpu.memory_space<vmem>> -> memref<1x128xf32, #tpu.memory_space<vmem>>
    %480 = tpu.memref_slice %arg8[%c0_i32_392] : memref<2x!tpu.dma_semaphore, #tpu.memory_space<semaphore_mem>> -> memref<1x!tpu.dma_semaphore, #tpu.memory_space<semaphore_mem>>
    %481 = tpu.memref_squeeze %480 : memref<1x!tpu.dma_semaphore, #tpu.memory_space<semaphore_mem>> -> memref<!tpu.dma_semaphore, #tpu.memory_space<semaphore_mem>>
    tpu.enqueue_dma source(%478 : memref<1x128xf32, #tpu.memory_space<any>>) target(%479 : memref<1x128xf32, #tpu.memory_space<vmem>>) target_semaphore(%481 : memref<!tpu.dma_semaphore, #tpu.memory_space<semaphore_mem>>)
    %c6_i32_396 = arith.constant 6 : i32
    %482 = arith.addi %0, %c6_i32_396 : i32
    %483 = arith.index_cast %482 : i32 to index
    %c0_397 = arith.constant 0 : index
    %484 = memref.load %arg2[%483, %c0_397] : memref<16x9xi32, #tpu.memory_space<smem>>
    %c6_i32_398 = arith.constant 6 : i32
    %c1_i32_399 = arith.constant 1 : i32
    %c0_i32_400 = arith.constant 0 : i32
    %485 = tpu.memref_slice %arg4[%484, %c0_i32_400] : memref<20x128xf32, #tpu.memory_space<any>> -> memref<1x128xf32, #tpu.memory_space<any>>
    %c0_i32_401 = arith.constant 0 : i32
    %c0_i32_402 = arith.constant 0 : i32
    %486 = tpu.memref_slice %arg7[%c6_i32_398, %c0_i32_401, %c0_i32_402] : memref<8x9x128xf32, #tpu.memory_space<vmem>> -> memref<1x1x128xf32, #tpu.memory_space<vmem>>
    %487 = tpu.memref_squeeze %486 : memref<1x1x128xf32, #tpu.memory_space<vmem>> -> memref<1x128xf32, #tpu.memory_space<vmem>>
    %488 = tpu.memref_slice %arg8[%c1_i32_399] : memref<2x!tpu.dma_semaphore, #tpu.memory_space<semaphore_mem>> -> memref<1x!tpu.dma_semaphore, #tpu.memory_space<semaphore_mem>>
    %489 = tpu.memref_squeeze %488 : memref<1x!tpu.dma_semaphore, #tpu.memory_space<semaphore_mem>> -> memref<!tpu.dma_semaphore, #tpu.memory_space<semaphore_mem>>
    tpu.enqueue_dma source(%485 : memref<1x128xf32, #tpu.memory_space<any>>) target(%487 : memref<1x128xf32, #tpu.memory_space<vmem>>) target_semaphore(%489 : memref<!tpu.dma_semaphore, #tpu.memory_space<semaphore_mem>>)
    %c6_i32_403 = arith.constant 6 : i32
    %490 = arith.addi %0, %c6_i32_403 : i32
    %491 = arith.index_cast %490 : i32 to index
    %c1_404 = arith.constant 1 : index
    %492 = memref.load %arg2[%491, %c1_404] : memref<16x9xi32, #tpu.memory_space<smem>>
    %c6_i32_405 = arith.constant 6 : i32
    %c1_i32_406 = arith.constant 1 : i32
    %c0_i32_407 = arith.constant 0 : i32
    %493 = tpu.memref_slice %arg4[%492, %c0_i32_407] : memref<20x128xf32, #tpu.memory_space<any>> -> memref<1x128xf32, #tpu.memory_space<any>>
    %c1_i32_408 = arith.constant 1 : i32
    %c0_i32_409 = arith.constant 0 : i32
    %494 = tpu.memref_slice %arg7[%c6_i32_405, %c1_i32_408, %c0_i32_409] : memref<8x9x128xf32, #tpu.memory_space<vmem>> -> memref<1x1x128xf32, #tpu.memory_space<vmem>>
    %495 = tpu.memref_squeeze %494 : memref<1x1x128xf32, #tpu.memory_space<vmem>> -> memref<1x128xf32, #tpu.memory_space<vmem>>
    %496 = tpu.memref_slice %arg8[%c1_i32_406] : memref<2x!tpu.dma_semaphore, #tpu.memory_space<semaphore_mem>> -> memref<1x!tpu.dma_semaphore, #tpu.memory_space<semaphore_mem>>
    %497 = tpu.memref_squeeze %496 : memref<1x!tpu.dma_semaphore, #tpu.memory_space<semaphore_mem>> -> memref<!tpu.dma_semaphore, #tpu.memory_space<semaphore_mem>>
    tpu.enqueue_dma source(%493 : memref<1x128xf32, #tpu.memory_space<any>>) target(%495 : memref<1x128xf32, #tpu.memory_space<vmem>>) target_semaphore(%497 : memref<!tpu.dma_semaphore, #tpu.memory_space<semaphore_mem>>)
    %c6_i32_410 = arith.constant 6 : i32
    %498 = arith.addi %0, %c6_i32_410 : i32
    %499 = arith.index_cast %498 : i32 to index
    %c2_411 = arith.constant 2 : index
    %500 = memref.load %arg2[%499, %c2_411] : memref<16x9xi32, #tpu.memory_space<smem>>
    %c6_i32_412 = arith.constant 6 : i32
    %c1_i32_413 = arith.constant 1 : i32
    %c0_i32_414 = arith.constant 0 : i32
    %501 = tpu.memref_slice %arg4[%500, %c0_i32_414] : memref<20x128xf32, #tpu.memory_space<any>> -> memref<1x128xf32, #tpu.memory_space<any>>
    %c2_i32_415 = arith.constant 2 : i32
    %c0_i32_416 = arith.constant 0 : i32
    %502 = tpu.memref_slice %arg7[%c6_i32_412, %c2_i32_415, %c0_i32_416] : memref<8x9x128xf32, #tpu.memory_space<vmem>> -> memref<1x1x128xf32, #tpu.memory_space<vmem>>
    %503 = tpu.memref_squeeze %502 : memref<1x1x128xf32, #tpu.memory_space<vmem>> -> memref<1x128xf32, #tpu.memory_space<vmem>>
    %504 = tpu.memref_slice %arg8[%c1_i32_413] : memref<2x!tpu.dma_semaphore, #tpu.memory_space<semaphore_mem>> -> memref<1x!tpu.dma_semaphore, #tpu.memory_space<semaphore_mem>>
    %505 = tpu.memref_squeeze %504 : memref<1x!tpu.dma_semaphore, #tpu.memory_space<semaphore_mem>> -> memref<!tpu.dma_semaphore, #tpu.memory_space<semaphore_mem>>
    tpu.enqueue_dma source(%501 : memref<1x128xf32, #tpu.memory_space<any>>) target(%503 : memref<1x128xf32, #tpu.memory_space<vmem>>) target_semaphore(%505 : memref<!tpu.dma_semaphore, #tpu.memory_space<semaphore_mem>>)
    %c6_i32_417 = arith.constant 6 : i32
    %506 = arith.addi %0, %c6_i32_417 : i32
    %507 = arith.index_cast %506 : i32 to index
    %c3_418 = arith.constant 3 : index
    %508 = memref.load %arg2[%507, %c3_418] : memref<16x9xi32, #tpu.memory_space<smem>>
    %c6_i32_419 = arith.constant 6 : i32
    %c1_i32_420 = arith.constant 1 : i32
    %c0_i32_421 = arith.constant 0 : i32
    %509 = tpu.memref_slice %arg4[%508, %c0_i32_421] : memref<20x128xf32, #tpu.memory_space<any>> -> memref<1x128xf32, #tpu.memory_space<any>>
    %c3_i32_422 = arith.constant 3 : i32
    %c0_i32_423 = arith.constant 0 : i32
    %510 = tpu.memref_slice %arg7[%c6_i32_419, %c3_i32_422, %c0_i32_423] : memref<8x9x128xf32, #tpu.memory_space<vmem>> -> memref<1x1x128xf32, #tpu.memory_space<vmem>>
    %511 = tpu.memref_squeeze %510 : memref<1x1x128xf32, #tpu.memory_space<vmem>> -> memref<1x128xf32, #tpu.memory_space<vmem>>
    %512 = tpu.memref_slice %arg8[%c1_i32_420] : memref<2x!tpu.dma_semaphore, #tpu.memory_space<semaphore_mem>> -> memref<1x!tpu.dma_semaphore, #tpu.memory_space<semaphore_mem>>
    %513 = tpu.memref_squeeze %512 : memref<1x!tpu.dma_semaphore, #tpu.memory_space<semaphore_mem>> -> memref<!tpu.dma_semaphore, #tpu.memory_space<semaphore_mem>>
    tpu.enqueue_dma source(%509 : memref<1x128xf32, #tpu.memory_space<any>>) target(%511 : memref<1x128xf32, #tpu.memory_space<vmem>>) target_semaphore(%513 : memref<!tpu.dma_semaphore, #tpu.memory_space<semaphore_mem>>)
    %c6_i32_424 = arith.constant 6 : i32
    %514 = arith.addi %0, %c6_i32_424 : i32
    %515 = arith.index_cast %514 : i32 to index
    %c4_425 = arith.constant 4 : index
    %516 = memref.load %arg2[%515, %c4_425] : memref<16x9xi32, #tpu.memory_space<smem>>
    %c6_i32_426 = arith.constant 6 : i32
    %c1_i32_427 = arith.constant 1 : i32
    %c0_i32_428 = arith.constant 0 : i32
    %517 = tpu.memref_slice %arg4[%516, %c0_i32_428] : memref<20x128xf32, #tpu.memory_space<any>> -> memref<1x128xf32, #tpu.memory_space<any>>
    %c4_i32_429 = arith.constant 4 : i32
    %c0_i32_430 = arith.constant 0 : i32
    %518 = tpu.memref_slice %arg7[%c6_i32_426, %c4_i32_429, %c0_i32_430] : memref<8x9x128xf32, #tpu.memory_space<vmem>> -> memref<1x1x128xf32, #tpu.memory_space<vmem>>
    %519 = tpu.memref_squeeze %518 : memref<1x1x128xf32, #tpu.memory_space<vmem>> -> memref<1x128xf32, #tpu.memory_space<vmem>>
    %520 = tpu.memref_slice %arg8[%c1_i32_427] : memref<2x!tpu.dma_semaphore, #tpu.memory_space<semaphore_mem>> -> memref<1x!tpu.dma_semaphore, #tpu.memory_space<semaphore_mem>>
    %521 = tpu.memref_squeeze %520 : memref<1x!tpu.dma_semaphore, #tpu.memory_space<semaphore_mem>> -> memref<!tpu.dma_semaphore, #tpu.memory_space<semaphore_mem>>
    tpu.enqueue_dma source(%517 : memref<1x128xf32, #tpu.memory_space<any>>) target(%519 : memref<1x128xf32, #tpu.memory_space<vmem>>) target_semaphore(%521 : memref<!tpu.dma_semaphore, #tpu.memory_space<semaphore_mem>>)
    %c6_i32_431 = arith.constant 6 : i32
    %522 = arith.addi %0, %c6_i32_431 : i32
    %523 = arith.index_cast %522 : i32 to index
    %c5_432 = arith.constant 5 : index
    %524 = memref.load %arg2[%523, %c5_432] : memref<16x9xi32, #tpu.memory_space<smem>>
    %c6_i32_433 = arith.constant 6 : i32
    %c1_i32_434 = arith.constant 1 : i32
    %c0_i32_435 = arith.constant 0 : i32
    %525 = tpu.memref_slice %arg4[%524, %c0_i32_435] : memref<20x128xf32, #tpu.memory_space<any>> -> memref<1x128xf32, #tpu.memory_space<any>>
    %c5_i32_436 = arith.constant 5 : i32
    %c0_i32_437 = arith.constant 0 : i32
    %526 = tpu.memref_slice %arg7[%c6_i32_433, %c5_i32_436, %c0_i32_437] : memref<8x9x128xf32, #tpu.memory_space<vmem>> -> memref<1x1x128xf32, #tpu.memory_space<vmem>>
    %527 = tpu.memref_squeeze %526 : memref<1x1x128xf32, #tpu.memory_space<vmem>> -> memref<1x128xf32, #tpu.memory_space<vmem>>
    %528 = tpu.memref_slice %arg8[%c1_i32_434] : memref<2x!tpu.dma_semaphore, #tpu.memory_space<semaphore_mem>> -> memref<1x!tpu.dma_semaphore, #tpu.memory_space<semaphore_mem>>
    %529 = tpu.memref_squeeze %528 : memref<1x!tpu.dma_semaphore, #tpu.memory_space<semaphore_mem>> -> memref<!tpu.dma_semaphore, #tpu.memory_space<semaphore_mem>>
    tpu.enqueue_dma source(%525 : memref<1x128xf32, #tpu.memory_space<any>>) target(%527 : memref<1x128xf32, #tpu.memory_space<vmem>>) target_semaphore(%529 : memref<!tpu.dma_semaphore, #tpu.memory_space<semaphore_mem>>)
    %c6_i32_438 = arith.constant 6 : i32
    %530 = arith.addi %0, %c6_i32_438 : i32
    %531 = arith.index_cast %530 : i32 to index
    %c6_439 = arith.constant 6 : index
    %532 = memref.load %arg2[%531, %c6_439] : memref<16x9xi32, #tpu.memory_space<smem>>
    %c6_i32_440 = arith.constant 6 : i32
    %c1_i32_441 = arith.constant 1 : i32
    %c0_i32_442 = arith.constant 0 : i32
    %533 = tpu.memref_slice %arg4[%532, %c0_i32_442] : memref<20x128xf32, #tpu.memory_space<any>> -> memref<1x128xf32, #tpu.memory_space<any>>
    %c6_i32_443 = arith.constant 6 : i32
    %c0_i32_444 = arith.constant 0 : i32
    %534 = tpu.memref_slice %arg7[%c6_i32_440, %c6_i32_443, %c0_i32_444] : memref<8x9x128xf32, #tpu.memory_space<vmem>> -> memref<1x1x128xf32, #tpu.memory_space<vmem>>
    %535 = tpu.memref_squeeze %534 : memref<1x1x128xf32, #tpu.memory_space<vmem>> -> memref<1x128xf32, #tpu.memory_space<vmem>>
    %536 = tpu.memref_slice %arg8[%c1_i32_441] : memref<2x!tpu.dma_semaphore, #tpu.memory_space<semaphore_mem>> -> memref<1x!tpu.dma_semaphore, #tpu.memory_space<semaphore_mem>>
    %537 = tpu.memref_squeeze %536 : memref<1x!tpu.dma_semaphore, #tpu.memory_space<semaphore_mem>> -> memref<!tpu.dma_semaphore, #tpu.memory_space<semaphore_mem>>
    tpu.enqueue_dma source(%533 : memref<1x128xf32, #tpu.memory_space<any>>) target(%535 : memref<1x128xf32, #tpu.memory_space<vmem>>) target_semaphore(%537 : memref<!tpu.dma_semaphore, #tpu.memory_space<semaphore_mem>>)
    %c6_i32_445 = arith.constant 6 : i32
    %538 = arith.addi %0, %c6_i32_445 : i32
    %539 = arith.index_cast %538 : i32 to index
    %c7_446 = arith.constant 7 : index
    %540 = memref.load %arg2[%539, %c7_446] : memref<16x9xi32, #tpu.memory_space<smem>>
    %c6_i32_447 = arith.constant 6 : i32
    %c1_i32_448 = arith.constant 1 : i32
    %c0_i32_449 = arith.constant 0 : i32
    %541 = tpu.memref_slice %arg4[%540, %c0_i32_449] : memref<20x128xf32, #tpu.memory_space<any>> -> memref<1x128xf32, #tpu.memory_space<any>>
    %c7_i32_450 = arith.constant 7 : i32
    %c0_i32_451 = arith.constant 0 : i32
    %542 = tpu.memref_slice %arg7[%c6_i32_447, %c7_i32_450, %c0_i32_451] : memref<8x9x128xf32, #tpu.memory_space<vmem>> -> memref<1x1x128xf32, #tpu.memory_space<vmem>>
    %543 = tpu.memref_squeeze %542 : memref<1x1x128xf32, #tpu.memory_space<vmem>> -> memref<1x128xf32, #tpu.memory_space<vmem>>
    %544 = tpu.memref_slice %arg8[%c1_i32_448] : memref<2x!tpu.dma_semaphore, #tpu.memory_space<semaphore_mem>> -> memref<1x!tpu.dma_semaphore, #tpu.memory_space<semaphore_mem>>
    %545 = tpu.memref_squeeze %544 : memref<1x!tpu.dma_semaphore, #tpu.memory_space<semaphore_mem>> -> memref<!tpu.dma_semaphore, #tpu.memory_space<semaphore_mem>>
    tpu.enqueue_dma source(%541 : memref<1x128xf32, #tpu.memory_space<any>>) target(%543 : memref<1x128xf32, #tpu.memory_space<vmem>>) target_semaphore(%545 : memref<!tpu.dma_semaphore, #tpu.memory_space<semaphore_mem>>)
    %c6_i32_452 = arith.constant 6 : i32
    %546 = arith.addi %0, %c6_i32_452 : i32
    %547 = arith.index_cast %546 : i32 to index
    %c8_453 = arith.constant 8 : index
    %548 = memref.load %arg2[%547, %c8_453] : memref<16x9xi32, #tpu.memory_space<smem>>
    %c6_i32_454 = arith.constant 6 : i32
    %c1_i32_455 = arith.constant 1 : i32
    %c0_i32_456 = arith.constant 0 : i32
    %549 = tpu.memref_slice %arg4[%548, %c0_i32_456] : memref<20x128xf32, #tpu.memory_space<any>> -> memref<1x128xf32, #tpu.memory_space<any>>
    %c8_i32_457 = arith.constant 8 : i32
    %c0_i32_458 = arith.constant 0 : i32
    %550 = tpu.memref_slice %arg7[%c6_i32_454, %c8_i32_457, %c0_i32_458] : memref<8x9x128xf32, #tpu.memory_space<vmem>> -> memref<1x1x128xf32, #tpu.memory_space<vmem>>
    %551 = tpu.memref_squeeze %550 : memref<1x1x128xf32, #tpu.memory_space<vmem>> -> memref<1x128xf32, #tpu.memory_space<vmem>>
    %552 = tpu.memref_slice %arg8[%c1_i32_455] : memref<2x!tpu.dma_semaphore, #tpu.memory_space<semaphore_mem>> -> memref<1x!tpu.dma_semaphore, #tpu.memory_space<semaphore_mem>>
    %553 = tpu.memref_squeeze %552 : memref<1x!tpu.dma_semaphore, #tpu.memory_space<semaphore_mem>> -> memref<!tpu.dma_semaphore, #tpu.memory_space<semaphore_mem>>
    tpu.enqueue_dma source(%549 : memref<1x128xf32, #tpu.memory_space<any>>) target(%551 : memref<1x128xf32, #tpu.memory_space<vmem>>) target_semaphore(%553 : memref<!tpu.dma_semaphore, #tpu.memory_space<semaphore_mem>>)
    %c7_i32_459 = arith.constant 7 : i32
    %554 = arith.addi %0, %c7_i32_459 : i32
    %555 = arith.index_cast %554 : i32 to index
    %556 = memref.load %arg1[%555] : memref<16xi32, #tpu.memory_space<smem>>
    %c0_i32_460 = arith.constant 0 : i32
    %c0_i32_461 = arith.constant 0 : i32
    %557 = tpu.memref_slice %arg3[%556, %c0_i32_461] : memref<20x128xf32, #tpu.memory_space<any>> -> memref<1x128xf32, #tpu.memory_space<any>>
    %c7_i32_462 = arith.constant 7 : i32
    %c0_i32_463 = arith.constant 0 : i32
    %558 = tpu.memref_slice %arg6[%c7_i32_462, %c0_i32_463] : memref<8x128xf32, #tpu.memory_space<vmem>> -> memref<1x128xf32, #tpu.memory_space<vmem>>
    %559 = tpu.memref_slice %arg8[%c0_i32_460] : memref<2x!tpu.dma_semaphore, #tpu.memory_space<semaphore_mem>> -> memref<1x!tpu.dma_semaphore, #tpu.memory_space<semaphore_mem>>
    %560 = tpu.memref_squeeze %559 : memref<1x!tpu.dma_semaphore, #tpu.memory_space<semaphore_mem>> -> memref<!tpu.dma_semaphore, #tpu.memory_space<semaphore_mem>>
    tpu.enqueue_dma source(%557 : memref<1x128xf32, #tpu.memory_space<any>>) target(%558 : memref<1x128xf32, #tpu.memory_space<vmem>>) target_semaphore(%560 : memref<!tpu.dma_semaphore, #tpu.memory_space<semaphore_mem>>)
    %c7_i32_464 = arith.constant 7 : i32
    %561 = arith.addi %0, %c7_i32_464 : i32
    %562 = arith.index_cast %561 : i32 to index
    %c0_465 = arith.constant 0 : index
    %563 = memref.load %arg2[%562, %c0_465] : memref<16x9xi32, #tpu.memory_space<smem>>
    %c7_i32_466 = arith.constant 7 : i32
    %c1_i32_467 = arith.constant 1 : i32
    %c0_i32_468 = arith.constant 0 : i32
    %564 = tpu.memref_slice %arg4[%563, %c0_i32_468] : memref<20x128xf32, #tpu.memory_space<any>> -> memref<1x128xf32, #tpu.memory_space<any>>
    %c0_i32_469 = arith.constant 0 : i32
    %c0_i32_470 = arith.constant 0 : i32
    %565 = tpu.memref_slice %arg7[%c7_i32_466, %c0_i32_469, %c0_i32_470] : memref<8x9x128xf32, #tpu.memory_space<vmem>> -> memref<1x1x128xf32, #tpu.memory_space<vmem>>
    %566 = tpu.memref_squeeze %565 : memref<1x1x128xf32, #tpu.memory_space<vmem>> -> memref<1x128xf32, #tpu.memory_space<vmem>>
    %567 = tpu.memref_slice %arg8[%c1_i32_467] : memref<2x!tpu.dma_semaphore, #tpu.memory_space<semaphore_mem>> -> memref<1x!tpu.dma_semaphore, #tpu.memory_space<semaphore_mem>>
    %568 = tpu.memref_squeeze %567 : memref<1x!tpu.dma_semaphore, #tpu.memory_space<semaphore_mem>> -> memref<!tpu.dma_semaphore, #tpu.memory_space<semaphore_mem>>
    tpu.enqueue_dma source(%564 : memref<1x128xf32, #tpu.memory_space<any>>) target(%566 : memref<1x128xf32, #tpu.memory_space<vmem>>) target_semaphore(%568 : memref<!tpu.dma_semaphore, #tpu.memory_space<semaphore_mem>>)
    %c7_i32_471 = arith.constant 7 : i32
    %569 = arith.addi %0, %c7_i32_471 : i32
    %570 = arith.index_cast %569 : i32 to index
    %c1_472 = arith.constant 1 : index
    %571 = memref.load %arg2[%570, %c1_472] : memref<16x9xi32, #tpu.memory_space<smem>>
    %c7_i32_473 = arith.constant 7 : i32
    %c1_i32_474 = arith.constant 1 : i32
    %c0_i32_475 = arith.constant 0 : i32
    %572 = tpu.memref_slice %arg4[%571, %c0_i32_475] : memref<20x128xf32, #tpu.memory_space<any>> -> memref<1x128xf32, #tpu.memory_space<any>>
    %c1_i32_476 = arith.constant 1 : i32
    %c0_i32_477 = arith.constant 0 : i32
    %573 = tpu.memref_slice %arg7[%c7_i32_473, %c1_i32_476, %c0_i32_477] : memref<8x9x128xf32, #tpu.memory_space<vmem>> -> memref<1x1x128xf32, #tpu.memory_space<vmem>>
    %574 = tpu.memref_squeeze %573 : memref<1x1x128xf32, #tpu.memory_space<vmem>> -> memref<1x128xf32, #tpu.memory_space<vmem>>
    %575 = tpu.memref_slice %arg8[%c1_i32_474] : memref<2x!tpu.dma_semaphore, #tpu.memory_space<semaphore_mem>> -> memref<1x!tpu.dma_semaphore, #tpu.memory_space<semaphore_mem>>
    %576 = tpu.memref_squeeze %575 : memref<1x!tpu.dma_semaphore, #tpu.memory_space<semaphore_mem>> -> memref<!tpu.dma_semaphore, #tpu.memory_space<semaphore_mem>>
    tpu.enqueue_dma source(%572 : memref<1x128xf32, #tpu.memory_space<any>>) target(%574 : memref<1x128xf32, #tpu.memory_space<vmem>>) target_semaphore(%576 : memref<!tpu.dma_semaphore, #tpu.memory_space<semaphore_mem>>)
    %c7_i32_478 = arith.constant 7 : i32
    %577 = arith.addi %0, %c7_i32_478 : i32
    %578 = arith.index_cast %577 : i32 to index
    %c2_479 = arith.constant 2 : index
    %579 = memref.load %arg2[%578, %c2_479] : memref<16x9xi32, #tpu.memory_space<smem>>
    %c7_i32_480 = arith.constant 7 : i32
    %c1_i32_481 = arith.constant 1 : i32
    %c0_i32_482 = arith.constant 0 : i32
    %580 = tpu.memref_slice %arg4[%579, %c0_i32_482] : memref<20x128xf32, #tpu.memory_space<any>> -> memref<1x128xf32, #tpu.memory_space<any>>
    %c2_i32_483 = arith.constant 2 : i32
    %c0_i32_484 = arith.constant 0 : i32
    %581 = tpu.memref_slice %arg7[%c7_i32_480, %c2_i32_483, %c0_i32_484] : memref<8x9x128xf32, #tpu.memory_space<vmem>> -> memref<1x1x128xf32, #tpu.memory_space<vmem>>
    %582 = tpu.memref_squeeze %581 : memref<1x1x128xf32, #tpu.memory_space<vmem>> -> memref<1x128xf32, #tpu.memory_space<vmem>>
    %583 = tpu.memref_slice %arg8[%c1_i32_481] : memref<2x!tpu.dma_semaphore, #tpu.memory_space<semaphore_mem>> -> memref<1x!tpu.dma_semaphore, #tpu.memory_space<semaphore_mem>>
    %584 = tpu.memref_squeeze %583 : memref<1x!tpu.dma_semaphore, #tpu.memory_space<semaphore_mem>> -> memref<!tpu.dma_semaphore, #tpu.memory_space<semaphore_mem>>
    tpu.enqueue_dma source(%580 : memref<1x128xf32, #tpu.memory_space<any>>) target(%582 : memref<1x128xf32, #tpu.memory_space<vmem>>) target_semaphore(%584 : memref<!tpu.dma_semaphore, #tpu.memory_space<semaphore_mem>>)
    %c7_i32_485 = arith.constant 7 : i32
    %585 = arith.addi %0, %c7_i32_485 : i32
    %586 = arith.index_cast %585 : i32 to index
    %c3_486 = arith.constant 3 : index
    %587 = memref.load %arg2[%586, %c3_486] : memref<16x9xi32, #tpu.memory_space<smem>>
    %c7_i32_487 = arith.constant 7 : i32
    %c1_i32_488 = arith.constant 1 : i32
    %c0_i32_489 = arith.constant 0 : i32
    %588 = tpu.memref_slice %arg4[%587, %c0_i32_489] : memref<20x128xf32, #tpu.memory_space<any>> -> memref<1x128xf32, #tpu.memory_space<any>>
    %c3_i32_490 = arith.constant 3 : i32
    %c0_i32_491 = arith.constant 0 : i32
    %589 = tpu.memref_slice %arg7[%c7_i32_487, %c3_i32_490, %c0_i32_491] : memref<8x9x128xf32, #tpu.memory_space<vmem>> -> memref<1x1x128xf32, #tpu.memory_space<vmem>>
    %590 = tpu.memref_squeeze %589 : memref<1x1x128xf32, #tpu.memory_space<vmem>> -> memref<1x128xf32, #tpu.memory_space<vmem>>
    %591 = tpu.memref_slice %arg8[%c1_i32_488] : memref<2x!tpu.dma_semaphore, #tpu.memory_space<semaphore_mem>> -> memref<1x!tpu.dma_semaphore, #tpu.memory_space<semaphore_mem>>
    %592 = tpu.memref_squeeze %591 : memref<1x!tpu.dma_semaphore, #tpu.memory_space<semaphore_mem>> -> memref<!tpu.dma_semaphore, #tpu.memory_space<semaphore_mem>>
    tpu.enqueue_dma source(%588 : memref<1x128xf32, #tpu.memory_space<any>>) target(%590 : memref<1x128xf32, #tpu.memory_space<vmem>>) target_semaphore(%592 : memref<!tpu.dma_semaphore, #tpu.memory_space<semaphore_mem>>)
    %c7_i32_492 = arith.constant 7 : i32
    %593 = arith.addi %0, %c7_i32_492 : i32
    %594 = arith.index_cast %593 : i32 to index
    %c4_493 = arith.constant 4 : index
    %595 = memref.load %arg2[%594, %c4_493] : memref<16x9xi32, #tpu.memory_space<smem>>
    %c7_i32_494 = arith.constant 7 : i32
    %c1_i32_495 = arith.constant 1 : i32
    %c0_i32_496 = arith.constant 0 : i32
    %596 = tpu.memref_slice %arg4[%595, %c0_i32_496] : memref<20x128xf32, #tpu.memory_space<any>> -> memref<1x128xf32, #tpu.memory_space<any>>
    %c4_i32_497 = arith.constant 4 : i32
    %c0_i32_498 = arith.constant 0 : i32
    %597 = tpu.memref_slice %arg7[%c7_i32_494, %c4_i32_497, %c0_i32_498] : memref<8x9x128xf32, #tpu.memory_space<vmem>> -> memref<1x1x128xf32, #tpu.memory_space<vmem>>
    %598 = tpu.memref_squeeze %597 : memref<1x1x128xf32, #tpu.memory_space<vmem>> -> memref<1x128xf32, #tpu.memory_space<vmem>>
    %599 = tpu.memref_slice %arg8[%c1_i32_495] : memref<2x!tpu.dma_semaphore, #tpu.memory_space<semaphore_mem>> -> memref<1x!tpu.dma_semaphore, #tpu.memory_space<semaphore_mem>>
    %600 = tpu.memref_squeeze %599 : memref<1x!tpu.dma_semaphore, #tpu.memory_space<semaphore_mem>> -> memref<!tpu.dma_semaphore, #tpu.memory_space<semaphore_mem>>
    tpu.enqueue_dma source(%596 : memref<1x128xf32, #tpu.memory_space<any>>) target(%598 : memref<1x128xf32, #tpu.memory_space<vmem>>) target_semaphore(%600 : memref<!tpu.dma_semaphore, #tpu.memory_space<semaphore_mem>>)
    %c7_i32_499 = arith.constant 7 : i32
    %601 = arith.addi %0, %c7_i32_499 : i32
    %602 = arith.index_cast %601 : i32 to index
    %c5_500 = arith.constant 5 : index
    %603 = memref.load %arg2[%602, %c5_500] : memref<16x9xi32, #tpu.memory_space<smem>>
    %c7_i32_501 = arith.constant 7 : i32
    %c1_i32_502 = arith.constant 1 : i32
    %c0_i32_503 = arith.constant 0 : i32
    %604 = tpu.memref_slice %arg4[%603, %c0_i32_503] : memref<20x128xf32, #tpu.memory_space<any>> -> memref<1x128xf32, #tpu.memory_space<any>>
    %c5_i32_504 = arith.constant 5 : i32
    %c0_i32_505 = arith.constant 0 : i32
    %605 = tpu.memref_slice %arg7[%c7_i32_501, %c5_i32_504, %c0_i32_505] : memref<8x9x128xf32, #tpu.memory_space<vmem>> -> memref<1x1x128xf32, #tpu.memory_space<vmem>>
    %606 = tpu.memref_squeeze %605 : memref<1x1x128xf32, #tpu.memory_space<vmem>> -> memref<1x128xf32, #tpu.memory_space<vmem>>
    %607 = tpu.memref_slice %arg8[%c1_i32_502] : memref<2x!tpu.dma_semaphore, #tpu.memory_space<semaphore_mem>> -> memref<1x!tpu.dma_semaphore, #tpu.memory_space<semaphore_mem>>
    %608 = tpu.memref_squeeze %607 : memref<1x!tpu.dma_semaphore, #tpu.memory_space<semaphore_mem>> -> memref<!tpu.dma_semaphore, #tpu.memory_space<semaphore_mem>>
    tpu.enqueue_dma source(%604 : memref<1x128xf32, #tpu.memory_space<any>>) target(%606 : memref<1x128xf32, #tpu.memory_space<vmem>>) target_semaphore(%608 : memref<!tpu.dma_semaphore, #tpu.memory_space<semaphore_mem>>)
    %c7_i32_506 = arith.constant 7 : i32
    %609 = arith.addi %0, %c7_i32_506 : i32
    %610 = arith.index_cast %609 : i32 to index
    %c6_507 = arith.constant 6 : index
    %611 = memref.load %arg2[%610, %c6_507] : memref<16x9xi32, #tpu.memory_space<smem>>
    %c7_i32_508 = arith.constant 7 : i32
    %c1_i32_509 = arith.constant 1 : i32
    %c0_i32_510 = arith.constant 0 : i32
    %612 = tpu.memref_slice %arg4[%611, %c0_i32_510] : memref<20x128xf32, #tpu.memory_space<any>> -> memref<1x128xf32, #tpu.memory_space<any>>
    %c6_i32_511 = arith.constant 6 : i32
    %c0_i32_512 = arith.constant 0 : i32
    %613 = tpu.memref_slice %arg7[%c7_i32_508, %c6_i32_511, %c0_i32_512] : memref<8x9x128xf32, #tpu.memory_space<vmem>> -> memref<1x1x128xf32, #tpu.memory_space<vmem>>
    %614 = tpu.memref_squeeze %613 : memref<1x1x128xf32, #tpu.memory_space<vmem>> -> memref<1x128xf32, #tpu.memory_space<vmem>>
    %615 = tpu.memref_slice %arg8[%c1_i32_509] : memref<2x!tpu.dma_semaphore, #tpu.memory_space<semaphore_mem>> -> memref<1x!tpu.dma_semaphore, #tpu.memory_space<semaphore_mem>>
    %616 = tpu.memref_squeeze %615 : memref<1x!tpu.dma_semaphore, #tpu.memory_space<semaphore_mem>> -> memref<!tpu.dma_semaphore, #tpu.memory_space<semaphore_mem>>
    tpu.enqueue_dma source(%612 : memref<1x128xf32, #tpu.memory_space<any>>) target(%614 : memref<1x128xf32, #tpu.memory_space<vmem>>) target_semaphore(%616 : memref<!tpu.dma_semaphore, #tpu.memory_space<semaphore_mem>>)
    %c7_i32_513 = arith.constant 7 : i32
    %617 = arith.addi %0, %c7_i32_513 : i32
    %618 = arith.index_cast %617 : i32 to index
    %c7_514 = arith.constant 7 : index
    %619 = memref.load %arg2[%618, %c7_514] : memref<16x9xi32, #tpu.memory_space<smem>>
    %c7_i32_515 = arith.constant 7 : i32
    %c1_i32_516 = arith.constant 1 : i32
    %c0_i32_517 = arith.constant 0 : i32
    %620 = tpu.memref_slice %arg4[%619, %c0_i32_517] : memref<20x128xf32, #tpu.memory_space<any>> -> memref<1x128xf32, #tpu.memory_space<any>>
    %c7_i32_518 = arith.constant 7 : i32
    %c0_i32_519 = arith.constant 0 : i32
    %621 = tpu.memref_slice %arg7[%c7_i32_515, %c7_i32_518, %c0_i32_519] : memref<8x9x128xf32, #tpu.memory_space<vmem>> -> memref<1x1x128xf32, #tpu.memory_space<vmem>>
    %622 = tpu.memref_squeeze %621 : memref<1x1x128xf32, #tpu.memory_space<vmem>> -> memref<1x128xf32, #tpu.memory_space<vmem>>
    %623 = tpu.memref_slice %arg8[%c1_i32_516] : memref<2x!tpu.dma_semaphore, #tpu.memory_space<semaphore_mem>> -> memref<1x!tpu.dma_semaphore, #tpu.memory_space<semaphore_mem>>
    %624 = tpu.memref_squeeze %623 : memref<1x!tpu.dma_semaphore, #tpu.memory_space<semaphore_mem>> -> memref<!tpu.dma_semaphore, #tpu.memory_space<semaphore_mem>>
    tpu.enqueue_dma source(%620 : memref<1x128xf32, #tpu.memory_space<any>>) target(%622 : memref<1x128xf32, #tpu.memory_space<vmem>>) target_semaphore(%624 : memref<!tpu.dma_semaphore, #tpu.memory_space<semaphore_mem>>)
    %c7_i32_520 = arith.constant 7 : i32
    %625 = arith.addi %0, %c7_i32_520 : i32
    %626 = arith.index_cast %625 : i32 to index
    %c8_521 = arith.constant 8 : index
    %627 = memref.load %arg2[%626, %c8_521] : memref<16x9xi32, #tpu.memory_space<smem>>
    %c7_i32_522 = arith.constant 7 : i32
    %c1_i32_523 = arith.constant 1 : i32
    %c0_i32_524 = arith.constant 0 : i32
    %628 = tpu.memref_slice %arg4[%627, %c0_i32_524] : memref<20x128xf32, #tpu.memory_space<any>> -> memref<1x128xf32, #tpu.memory_space<any>>
    %c8_i32_525 = arith.constant 8 : i32
    %c0_i32_526 = arith.constant 0 : i32
    %629 = tpu.memref_slice %arg7[%c7_i32_522, %c8_i32_525, %c0_i32_526] : memref<8x9x128xf32, #tpu.memory_space<vmem>> -> memref<1x1x128xf32, #tpu.memory_space<vmem>>
    %630 = tpu.memref_squeeze %629 : memref<1x1x128xf32, #tpu.memory_space<vmem>> -> memref<1x128xf32, #tpu.memory_space<vmem>>
    %631 = tpu.memref_slice %arg8[%c1_i32_523] : memref<2x!tpu.dma_semaphore, #tpu.memory_space<semaphore_mem>> -> memref<1x!tpu.dma_semaphore, #tpu.memory_space<semaphore_mem>>
    %632 = tpu.memref_squeeze %631 : memref<1x!tpu.dma_semaphore, #tpu.memory_space<semaphore_mem>> -> memref<!tpu.dma_semaphore, #tpu.memory_space<semaphore_mem>>
    tpu.enqueue_dma source(%628 : memref<1x128xf32, #tpu.memory_space<any>>) target(%630 : memref<1x128xf32, #tpu.memory_space<vmem>>) target_semaphore(%632 : memref<!tpu.dma_semaphore, #tpu.memory_space<semaphore_mem>>)
    %c0_i32_527 = arith.constant 0 : i32
    %c0_i32_528 = arith.constant 0 : i32
    %633 = tpu.memref_slice %arg3[%3, %c0_i32_528] : memref<20x128xf32, #tpu.memory_space<any>> -> memref<1x128xf32, #tpu.memory_space<any>>
    %c0_i32_529 = arith.constant 0 : i32
    %c0_i32_530 = arith.constant 0 : i32
    %634 = tpu.memref_slice %arg6[%c0_i32_529, %c0_i32_530] : memref<8x128xf32, #tpu.memory_space<vmem>> -> memref<1x128xf32, #tpu.memory_space<vmem>>
    %635 = tpu.memref_slice %arg8[%c0_i32_527] : memref<2x!tpu.dma_semaphore, #tpu.memory_space<semaphore_mem>> -> memref<1x!tpu.dma_semaphore, #tpu.memory_space<semaphore_mem>>
    %636 = tpu.memref_squeeze %635 : memref<1x!tpu.dma_semaphore, #tpu.memory_space<semaphore_mem>> -> memref<!tpu.dma_semaphore, #tpu.memory_space<semaphore_mem>>
    tpu.wait_dma2 semaphore(%636 : memref<!tpu.dma_semaphore, #tpu.memory_space<semaphore_mem>>) src(%633 : memref<1x128xf32, #tpu.memory_space<any>>) dst(%634 : memref<1x128xf32, #tpu.memory_space<vmem>>)
    %c0_i32_531 = arith.constant 0 : i32
    %c1_i32_532 = arith.constant 1 : i32
    %c0_i32_533 = arith.constant 0 : i32
    %637 = tpu.memref_slice %arg4[%10, %c0_i32_533] : memref<20x128xf32, #tpu.memory_space<any>> -> memref<1x128xf32, #tpu.memory_space<any>>
    %c0_i32_534 = arith.constant 0 : i32
    %c0_i32_535 = arith.constant 0 : i32
    %638 = tpu.memref_slice %arg7[%c0_i32_531, %c0_i32_534, %c0_i32_535] : memref<8x9x128xf32, #tpu.memory_space<vmem>> -> memref<1x1x128xf32, #tpu.memory_space<vmem>>
    %639 = tpu.memref_squeeze %638 : memref<1x1x128xf32, #tpu.memory_space<vmem>> -> memref<1x128xf32, #tpu.memory_space<vmem>>
    %640 = tpu.memref_slice %arg8[%c1_i32_532] : memref<2x!tpu.dma_semaphore, #tpu.memory_space<semaphore_mem>> -> memref<1x!tpu.dma_semaphore, #tpu.memory_space<semaphore_mem>>
    %641 = tpu.memref_squeeze %640 : memref<1x!tpu.dma_semaphore, #tpu.memory_space<semaphore_mem>> -> memref<!tpu.dma_semaphore, #tpu.memory_space<semaphore_mem>>
    tpu.wait_dma2 semaphore(%641 : memref<!tpu.dma_semaphore, #tpu.memory_space<semaphore_mem>>) src(%637 : memref<1x128xf32, #tpu.memory_space<any>>) dst(%639 : memref<1x128xf32, #tpu.memory_space<vmem>>)
    %c0_i32_536 = arith.constant 0 : i32
    %c1_i32_537 = arith.constant 1 : i32
    %c0_i32_538 = arith.constant 0 : i32
    %642 = tpu.memref_slice %arg4[%18, %c0_i32_538] : memref<20x128xf32, #tpu.memory_space<any>> -> memref<1x128xf32, #tpu.memory_space<any>>
    %c1_i32_539 = arith.constant 1 : i32
    %c0_i32_540 = arith.constant 0 : i32
    %643 = tpu.memref_slice %arg7[%c0_i32_536, %c1_i32_539, %c0_i32_540] : memref<8x9x128xf32, #tpu.memory_space<vmem>> -> memref<1x1x128xf32, #tpu.memory_space<vmem>>
    %644 = tpu.memref_squeeze %643 : memref<1x1x128xf32, #tpu.memory_space<vmem>> -> memref<1x128xf32, #tpu.memory_space<vmem>>
    %645 = tpu.memref_slice %arg8[%c1_i32_537] : memref<2x!tpu.dma_semaphore, #tpu.memory_space<semaphore_mem>> -> memref<1x!tpu.dma_semaphore, #tpu.memory_space<semaphore_mem>>
    %646 = tpu.memref_squeeze %645 : memref<1x!tpu.dma_semaphore, #tpu.memory_space<semaphore_mem>> -> memref<!tpu.dma_semaphore, #tpu.memory_space<semaphore_mem>>
    tpu.wait_dma2 semaphore(%646 : memref<!tpu.dma_semaphore, #tpu.memory_space<semaphore_mem>>) src(%642 : memref<1x128xf32, #tpu.memory_space<any>>) dst(%644 : memref<1x128xf32, #tpu.memory_space<vmem>>)
    %c0_i32_541 = arith.constant 0 : i32
    %c1_i32_542 = arith.constant 1 : i32
    %c0_i32_543 = arith.constant 0 : i32
    %647 = tpu.memref_slice %arg4[%26, %c0_i32_543] : memref<20x128xf32, #tpu.memory_space<any>> -> memref<1x128xf32, #tpu.memory_space<any>>
    %c2_i32_544 = arith.constant 2 : i32
    %c0_i32_545 = arith.constant 0 : i32
    %648 = tpu.memref_slice %arg7[%c0_i32_541, %c2_i32_544, %c0_i32_545] : memref<8x9x128xf32, #tpu.memory_space<vmem>> -> memref<1x1x128xf32, #tpu.memory_space<vmem>>
    %649 = tpu.memref_squeeze %648 : memref<1x1x128xf32, #tpu.memory_space<vmem>> -> memref<1x128xf32, #tpu.memory_space<vmem>>
    %650 = tpu.memref_slice %arg8[%c1_i32_542] : memref<2x!tpu.dma_semaphore, #tpu.memory_space<semaphore_mem>> -> memref<1x!tpu.dma_semaphore, #tpu.memory_space<semaphore_mem>>
    %651 = tpu.memref_squeeze %650 : memref<1x!tpu.dma_semaphore, #tpu.memory_space<semaphore_mem>> -> memref<!tpu.dma_semaphore, #tpu.memory_space<semaphore_mem>>
    tpu.wait_dma2 semaphore(%651 : memref<!tpu.dma_semaphore, #tpu.memory_space<semaphore_mem>>) src(%647 : memref<1x128xf32, #tpu.memory_space<any>>) dst(%649 : memref<1x128xf32, #tpu.memory_space<vmem>>)
    %c0_i32_546 = arith.constant 0 : i32
    %c1_i32_547 = arith.constant 1 : i32
    %c0_i32_548 = arith.constant 0 : i32
    %652 = tpu.memref_slice %arg4[%34, %c0_i32_548] : memref<20x128xf32, #tpu.memory_space<any>> -> memref<1x128xf32, #tpu.memory_space<any>>
    %c3_i32_549 = arith.constant 3 : i32
    %c0_i32_550 = arith.constant 0 : i32
    %653 = tpu.memref_slice %arg7[%c0_i32_546, %c3_i32_549, %c0_i32_550] : memref<8x9x128xf32, #tpu.memory_space<vmem>> -> memref<1x1x128xf32, #tpu.memory_space<vmem>>
    %654 = tpu.memref_squeeze %653 : memref<1x1x128xf32, #tpu.memory_space<vmem>> -> memref<1x128xf32, #tpu.memory_space<vmem>>
    %655 = tpu.memref_slice %arg8[%c1_i32_547] : memref<2x!tpu.dma_semaphore, #tpu.memory_space<semaphore_mem>> -> memref<1x!tpu.dma_semaphore, #tpu.memory_space<semaphore_mem>>
    %656 = tpu.memref_squeeze %655 : memref<1x!tpu.dma_semaphore, #tpu.memory_space<semaphore_mem>> -> memref<!tpu.dma_semaphore, #tpu.memory_space<semaphore_mem>>
    tpu.wait_dma2 semaphore(%656 : memref<!tpu.dma_semaphore, #tpu.memory_space<semaphore_mem>>) src(%652 : memref<1x128xf32, #tpu.memory_space<any>>) dst(%654 : memref<1x128xf32, #tpu.memory_space<vmem>>)
    %c0_i32_551 = arith.constant 0 : i32
    %c1_i32_552 = arith.constant 1 : i32
    %c0_i32_553 = arith.constant 0 : i32
    %657 = tpu.memref_slice %arg4[%42, %c0_i32_553] : memref<20x128xf32, #tpu.memory_space<any>> -> memref<1x128xf32, #tpu.memory_space<any>>
    %c4_i32_554 = arith.constant 4 : i32
    %c0_i32_555 = arith.constant 0 : i32
    %658 = tpu.memref_slice %arg7[%c0_i32_551, %c4_i32_554, %c0_i32_555] : memref<8x9x128xf32, #tpu.memory_space<vmem>> -> memref<1x1x128xf32, #tpu.memory_space<vmem>>
    %659 = tpu.memref_squeeze %658 : memref<1x1x128xf32, #tpu.memory_space<vmem>> -> memref<1x128xf32, #tpu.memory_space<vmem>>
    %660 = tpu.memref_slice %arg8[%c1_i32_552] : memref<2x!tpu.dma_semaphore, #tpu.memory_space<semaphore_mem>> -> memref<1x!tpu.dma_semaphore, #tpu.memory_space<semaphore_mem>>
    %661 = tpu.memref_squeeze %660 : memref<1x!tpu.dma_semaphore, #tpu.memory_space<semaphore_mem>> -> memref<!tpu.dma_semaphore, #tpu.memory_space<semaphore_mem>>
    tpu.wait_dma2 semaphore(%661 : memref<!tpu.dma_semaphore, #tpu.memory_space<semaphore_mem>>) src(%657 : memref<1x128xf32, #tpu.memory_space<any>>) dst(%659 : memref<1x128xf32, #tpu.memory_space<vmem>>)
    %c0_i32_556 = arith.constant 0 : i32
    %c1_i32_557 = arith.constant 1 : i32
    %c0_i32_558 = arith.constant 0 : i32
    %662 = tpu.memref_slice %arg4[%50, %c0_i32_558] : memref<20x128xf32, #tpu.memory_space<any>> -> memref<1x128xf32, #tpu.memory_space<any>>
    %c5_i32_559 = arith.constant 5 : i32
    %c0_i32_560 = arith.constant 0 : i32
    %663 = tpu.memref_slice %arg7[%c0_i32_556, %c5_i32_559, %c0_i32_560] : memref<8x9x128xf32, #tpu.memory_space<vmem>> -> memref<1x1x128xf32, #tpu.memory_space<vmem>>
    %664 = tpu.memref_squeeze %663 : memref<1x1x128xf32, #tpu.memory_space<vmem>> -> memref<1x128xf32, #tpu.memory_space<vmem>>
    %665 = tpu.memref_slice %arg8[%c1_i32_557] : memref<2x!tpu.dma_semaphore, #tpu.memory_space<semaphore_mem>> -> memref<1x!tpu.dma_semaphore, #tpu.memory_space<semaphore_mem>>
    %666 = tpu.memref_squeeze %665 : memref<1x!tpu.dma_semaphore, #tpu.memory_space<semaphore_mem>> -> memref<!tpu.dma_semaphore, #tpu.memory_space<semaphore_mem>>
    tpu.wait_dma2 semaphore(%666 : memref<!tpu.dma_semaphore, #tpu.memory_space<semaphore_mem>>) src(%662 : memref<1x128xf32, #tpu.memory_space<any>>) dst(%664 : memref<1x128xf32, #tpu.memory_space<vmem>>)
    %c0_i32_561 = arith.constant 0 : i32
    %c1_i32_562 = arith.constant 1 : i32
    %c0_i32_563 = arith.constant 0 : i32
    %667 = tpu.memref_slice %arg4[%58, %c0_i32_563] : memref<20x128xf32, #tpu.memory_space<any>> -> memref<1x128xf32, #tpu.memory_space<any>>
    %c6_i32_564 = arith.constant 6 : i32
    %c0_i32_565 = arith.constant 0 : i32
    %668 = tpu.memref_slice %arg7[%c0_i32_561, %c6_i32_564, %c0_i32_565] : memref<8x9x128xf32, #tpu.memory_space<vmem>> -> memref<1x1x128xf32, #tpu.memory_space<vmem>>
    %669 = tpu.memref_squeeze %668 : memref<1x1x128xf32, #tpu.memory_space<vmem>> -> memref<1x128xf32, #tpu.memory_space<vmem>>
    %670 = tpu.memref_slice %arg8[%c1_i32_562] : memref<2x!tpu.dma_semaphore, #tpu.memory_space<semaphore_mem>> -> memref<1x!tpu.dma_semaphore, #tpu.memory_space<semaphore_mem>>
    %671 = tpu.memref_squeeze %670 : memref<1x!tpu.dma_semaphore, #tpu.memory_space<semaphore_mem>> -> memref<!tpu.dma_semaphore, #tpu.memory_space<semaphore_mem>>
    tpu.wait_dma2 semaphore(%671 : memref<!tpu.dma_semaphore, #tpu.memory_space<semaphore_mem>>) src(%667 : memref<1x128xf32, #tpu.memory_space<any>>) dst(%669 : memref<1x128xf32, #tpu.memory_space<vmem>>)
    %c0_i32_566 = arith.constant 0 : i32
    %c1_i32_567 = arith.constant 1 : i32
    %c0_i32_568 = arith.constant 0 : i32
    %672 = tpu.memref_slice %arg4[%66, %c0_i32_568] : memref<20x128xf32, #tpu.memory_space<any>> -> memref<1x128xf32, #tpu.memory_space<any>>
    %c7_i32_569 = arith.constant 7 : i32
    %c0_i32_570 = arith.constant 0 : i32
    %673 = tpu.memref_slice %arg7[%c0_i32_566, %c7_i32_569, %c0_i32_570] : memref<8x9x128xf32, #tpu.memory_space<vmem>> -> memref<1x1x128xf32, #tpu.memory_space<vmem>>
    %674 = tpu.memref_squeeze %673 : memref<1x1x128xf32, #tpu.memory_space<vmem>> -> memref<1x128xf32, #tpu.memory_space<vmem>>
    %675 = tpu.memref_slice %arg8[%c1_i32_567] : memref<2x!tpu.dma_semaphore, #tpu.memory_space<semaphore_mem>> -> memref<1x!tpu.dma_semaphore, #tpu.memory_space<semaphore_mem>>
    %676 = tpu.memref_squeeze %675 : memref<1x!tpu.dma_semaphore, #tpu.memory_space<semaphore_mem>> -> memref<!tpu.dma_semaphore, #tpu.memory_space<semaphore_mem>>
    tpu.wait_dma2 semaphore(%676 : memref<!tpu.dma_semaphore, #tpu.memory_space<semaphore_mem>>) src(%672 : memref<1x128xf32, #tpu.memory_space<any>>) dst(%674 : memref<1x128xf32, #tpu.memory_space<vmem>>)
    %c0_i32_571 = arith.constant 0 : i32
    %c1_i32_572 = arith.constant 1 : i32
    %c0_i32_573 = arith.constant 0 : i32
    %677 = tpu.memref_slice %arg4[%74, %c0_i32_573] : memref<20x128xf32, #tpu.memory_space<any>> -> memref<1x128xf32, #tpu.memory_space<any>>
    %c8_i32_574 = arith.constant 8 : i32
    %c0_i32_575 = arith.constant 0 : i32
    %678 = tpu.memref_slice %arg7[%c0_i32_571, %c8_i32_574, %c0_i32_575] : memref<8x9x128xf32, #tpu.memory_space<vmem>> -> memref<1x1x128xf32, #tpu.memory_space<vmem>>
    %679 = tpu.memref_squeeze %678 : memref<1x1x128xf32, #tpu.memory_space<vmem>> -> memref<1x128xf32, #tpu.memory_space<vmem>>
    %680 = tpu.memref_slice %arg8[%c1_i32_572] : memref<2x!tpu.dma_semaphore, #tpu.memory_space<semaphore_mem>> -> memref<1x!tpu.dma_semaphore, #tpu.memory_space<semaphore_mem>>
    %681 = tpu.memref_squeeze %680 : memref<1x!tpu.dma_semaphore, #tpu.memory_space<semaphore_mem>> -> memref<!tpu.dma_semaphore, #tpu.memory_space<semaphore_mem>>
    tpu.wait_dma2 semaphore(%681 : memref<!tpu.dma_semaphore, #tpu.memory_space<semaphore_mem>>) src(%677 : memref<1x128xf32, #tpu.memory_space<any>>) dst(%679 : memref<1x128xf32, #tpu.memory_space<vmem>>)
    %c0_i32_576 = arith.constant 0 : i32
    %c0_i32_577 = arith.constant 0 : i32
    %682 = tpu.memref_slice %arg3[%82, %c0_i32_577] : memref<20x128xf32, #tpu.memory_space<any>> -> memref<1x128xf32, #tpu.memory_space<any>>
    %c1_i32_578 = arith.constant 1 : i32
    %c0_i32_579 = arith.constant 0 : i32
    %683 = tpu.memref_slice %arg6[%c1_i32_578, %c0_i32_579] : memref<8x128xf32, #tpu.memory_space<vmem>> -> memref<1x128xf32, #tpu.memory_space<vmem>>
    %684 = tpu.memref_slice %arg8[%c0_i32_576] : memref<2x!tpu.dma_semaphore, #tpu.memory_space<semaphore_mem>> -> memref<1x!tpu.dma_semaphore, #tpu.memory_space<semaphore_mem>>
    %685 = tpu.memref_squeeze %684 : memref<1x!tpu.dma_semaphore, #tpu.memory_space<semaphore_mem>> -> memref<!tpu.dma_semaphore, #tpu.memory_space<semaphore_mem>>
    tpu.wait_dma2 semaphore(%685 : memref<!tpu.dma_semaphore, #tpu.memory_space<semaphore_mem>>) src(%682 : memref<1x128xf32, #tpu.memory_space<any>>) dst(%683 : memref<1x128xf32, #tpu.memory_space<vmem>>)
    %c1_i32_580 = arith.constant 1 : i32
    %c1_i32_581 = arith.constant 1 : i32
    %c0_i32_582 = arith.constant 0 : i32
    %686 = tpu.memref_slice %arg4[%89, %c0_i32_582] : memref<20x128xf32, #tpu.memory_space<any>> -> memref<1x128xf32, #tpu.memory_space<any>>
    %c0_i32_583 = arith.constant 0 : i32
    %c0_i32_584 = arith.constant 0 : i32
    %687 = tpu.memref_slice %arg7[%c1_i32_580, %c0_i32_583, %c0_i32_584] : memref<8x9x128xf32, #tpu.memory_space<vmem>> -> memref<1x1x128xf32, #tpu.memory_space<vmem>>
    %688 = tpu.memref_squeeze %687 : memref<1x1x128xf32, #tpu.memory_space<vmem>> -> memref<1x128xf32, #tpu.memory_space<vmem>>
    %689 = tpu.memref_slice %arg8[%c1_i32_581] : memref<2x!tpu.dma_semaphore, #tpu.memory_space<semaphore_mem>> -> memref<1x!tpu.dma_semaphore, #tpu.memory_space<semaphore_mem>>
    %690 = tpu.memref_squeeze %689 : memref<1x!tpu.dma_semaphore, #tpu.memory_space<semaphore_mem>> -> memref<!tpu.dma_semaphore, #tpu.memory_space<semaphore_mem>>
    tpu.wait_dma2 semaphore(%690 : memref<!tpu.dma_semaphore, #tpu.memory_space<semaphore_mem>>) src(%686 : memref<1x128xf32, #tpu.memory_space<any>>) dst(%688 : memref<1x128xf32, #tpu.memory_space<vmem>>)
    %c1_i32_585 = arith.constant 1 : i32
    %c1_i32_586 = arith.constant 1 : i32
    %c0_i32_587 = arith.constant 0 : i32
    %691 = tpu.memref_slice %arg4[%97, %c0_i32_587] : memref<20x128xf32, #tpu.memory_space<any>> -> memref<1x128xf32, #tpu.memory_space<any>>
    %c1_i32_588 = arith.constant 1 : i32
    %c0_i32_589 = arith.constant 0 : i32
    %692 = tpu.memref_slice %arg7[%c1_i32_585, %c1_i32_588, %c0_i32_589] : memref<8x9x128xf32, #tpu.memory_space<vmem>> -> memref<1x1x128xf32, #tpu.memory_space<vmem>>
    %693 = tpu.memref_squeeze %692 : memref<1x1x128xf32, #tpu.memory_space<vmem>> -> memref<1x128xf32, #tpu.memory_space<vmem>>
    %694 = tpu.memref_slice %arg8[%c1_i32_586] : memref<2x!tpu.dma_semaphore, #tpu.memory_space<semaphore_mem>> -> memref<1x!tpu.dma_semaphore, #tpu.memory_space<semaphore_mem>>
    %695 = tpu.memref_squeeze %694 : memref<1x!tpu.dma_semaphore, #tpu.memory_space<semaphore_mem>> -> memref<!tpu.dma_semaphore, #tpu.memory_space<semaphore_mem>>
    tpu.wait_dma2 semaphore(%695 : memref<!tpu.dma_semaphore, #tpu.memory_space<semaphore_mem>>) src(%691 : memref<1x128xf32, #tpu.memory_space<any>>) dst(%693 : memref<1x128xf32, #tpu.memory_space<vmem>>)
    %c1_i32_590 = arith.constant 1 : i32
    %c1_i32_591 = arith.constant 1 : i32
    %c0_i32_592 = arith.constant 0 : i32
    %696 = tpu.memref_slice %arg4[%105, %c0_i32_592] : memref<20x128xf32, #tpu.memory_space<any>> -> memref<1x128xf32, #tpu.memory_space<any>>
    %c2_i32_593 = arith.constant 2 : i32
    %c0_i32_594 = arith.constant 0 : i32
    %697 = tpu.memref_slice %arg7[%c1_i32_590, %c2_i32_593, %c0_i32_594] : memref<8x9x128xf32, #tpu.memory_space<vmem>> -> memref<1x1x128xf32, #tpu.memory_space<vmem>>
    %698 = tpu.memref_squeeze %697 : memref<1x1x128xf32, #tpu.memory_space<vmem>> -> memref<1x128xf32, #tpu.memory_space<vmem>>
    %699 = tpu.memref_slice %arg8[%c1_i32_591] : memref<2x!tpu.dma_semaphore, #tpu.memory_space<semaphore_mem>> -> memref<1x!tpu.dma_semaphore, #tpu.memory_space<semaphore_mem>>
    %700 = tpu.memref_squeeze %699 : memref<1x!tpu.dma_semaphore, #tpu.memory_space<semaphore_mem>> -> memref<!tpu.dma_semaphore, #tpu.memory_space<semaphore_mem>>
    tpu.wait_dma2 semaphore(%700 : memref<!tpu.dma_semaphore, #tpu.memory_space<semaphore_mem>>) src(%696 : memref<1x128xf32, #tpu.memory_space<any>>) dst(%698 : memref<1x128xf32, #tpu.memory_space<vmem>>)
    %c1_i32_595 = arith.constant 1 : i32
    %c1_i32_596 = arith.constant 1 : i32
    %c0_i32_597 = arith.constant 0 : i32
    %701 = tpu.memref_slice %arg4[%113, %c0_i32_597] : memref<20x128xf32, #tpu.memory_space<any>> -> memref<1x128xf32, #tpu.memory_space<any>>
    %c3_i32_598 = arith.constant 3 : i32
    %c0_i32_599 = arith.constant 0 : i32
    %702 = tpu.memref_slice %arg7[%c1_i32_595, %c3_i32_598, %c0_i32_599] : memref<8x9x128xf32, #tpu.memory_space<vmem>> -> memref<1x1x128xf32, #tpu.memory_space<vmem>>
    %703 = tpu.memref_squeeze %702 : memref<1x1x128xf32, #tpu.memory_space<vmem>> -> memref<1x128xf32, #tpu.memory_space<vmem>>
    %704 = tpu.memref_slice %arg8[%c1_i32_596] : memref<2x!tpu.dma_semaphore, #tpu.memory_space<semaphore_mem>> -> memref<1x!tpu.dma_semaphore, #tpu.memory_space<semaphore_mem>>
    %705 = tpu.memref_squeeze %704 : memref<1x!tpu.dma_semaphore, #tpu.memory_space<semaphore_mem>> -> memref<!tpu.dma_semaphore, #tpu.memory_space<semaphore_mem>>
    tpu.wait_dma2 semaphore(%705 : memref<!tpu.dma_semaphore, #tpu.memory_space<semaphore_mem>>) src(%701 : memref<1x128xf32, #tpu.memory_space<any>>) dst(%703 : memref<1x128xf32, #tpu.memory_space<vmem>>)
    %c1_i32_600 = arith.constant 1 : i32
    %c1_i32_601 = arith.constant 1 : i32
    %c0_i32_602 = arith.constant 0 : i32
    %706 = tpu.memref_slice %arg4[%121, %c0_i32_602] : memref<20x128xf32, #tpu.memory_space<any>> -> memref<1x128xf32, #tpu.memory_space<any>>
    %c4_i32_603 = arith.constant 4 : i32
    %c0_i32_604 = arith.constant 0 : i32
    %707 = tpu.memref_slice %arg7[%c1_i32_600, %c4_i32_603, %c0_i32_604] : memref<8x9x128xf32, #tpu.memory_space<vmem>> -> memref<1x1x128xf32, #tpu.memory_space<vmem>>
    %708 = tpu.memref_squeeze %707 : memref<1x1x128xf32, #tpu.memory_space<vmem>> -> memref<1x128xf32, #tpu.memory_space<vmem>>
    %709 = tpu.memref_slice %arg8[%c1_i32_601] : memref<2x!tpu.dma_semaphore, #tpu.memory_space<semaphore_mem>> -> memref<1x!tpu.dma_semaphore, #tpu.memory_space<semaphore_mem>>
    %710 = tpu.memref_squeeze %709 : memref<1x!tpu.dma_semaphore, #tpu.memory_space<semaphore_mem>> -> memref<!tpu.dma_semaphore, #tpu.memory_space<semaphore_mem>>
    tpu.wait_dma2 semaphore(%710 : memref<!tpu.dma_semaphore, #tpu.memory_space<semaphore_mem>>) src(%706 : memref<1x128xf32, #tpu.memory_space<any>>) dst(%708 : memref<1x128xf32, #tpu.memory_space<vmem>>)
    %c1_i32_605 = arith.constant 1 : i32
    %c1_i32_606 = arith.constant 1 : i32
    %c0_i32_607 = arith.constant 0 : i32
    %711 = tpu.memref_slice %arg4[%129, %c0_i32_607] : memref<20x128xf32, #tpu.memory_space<any>> -> memref<1x128xf32, #tpu.memory_space<any>>
    %c5_i32_608 = arith.constant 5 : i32
    %c0_i32_609 = arith.constant 0 : i32
    %712 = tpu.memref_slice %arg7[%c1_i32_605, %c5_i32_608, %c0_i32_609] : memref<8x9x128xf32, #tpu.memory_space<vmem>> -> memref<1x1x128xf32, #tpu.memory_space<vmem>>
    %713 = tpu.memref_squeeze %712 : memref<1x1x128xf32, #tpu.memory_space<vmem>> -> memref<1x128xf32, #tpu.memory_space<vmem>>
    %714 = tpu.memref_slice %arg8[%c1_i32_606] : memref<2x!tpu.dma_semaphore, #tpu.memory_space<semaphore_mem>> -> memref<1x!tpu.dma_semaphore, #tpu.memory_space<semaphore_mem>>
    %715 = tpu.memref_squeeze %714 : memref<1x!tpu.dma_semaphore, #tpu.memory_space<semaphore_mem>> -> memref<!tpu.dma_semaphore, #tpu.memory_space<semaphore_mem>>
    tpu.wait_dma2 semaphore(%715 : memref<!tpu.dma_semaphore, #tpu.memory_space<semaphore_mem>>) src(%711 : memref<1x128xf32, #tpu.memory_space<any>>) dst(%713 : memref<1x128xf32, #tpu.memory_space<vmem>>)
    %c1_i32_610 = arith.constant 1 : i32
    %c1_i32_611 = arith.constant 1 : i32
    %c0_i32_612 = arith.constant 0 : i32
    %716 = tpu.memref_slice %arg4[%137, %c0_i32_612] : memref<20x128xf32, #tpu.memory_space<any>> -> memref<1x128xf32, #tpu.memory_space<any>>
    %c6_i32_613 = arith.constant 6 : i32
    %c0_i32_614 = arith.constant 0 : i32
    %717 = tpu.memref_slice %arg7[%c1_i32_610, %c6_i32_613, %c0_i32_614] : memref<8x9x128xf32, #tpu.memory_space<vmem>> -> memref<1x1x128xf32, #tpu.memory_space<vmem>>
    %718 = tpu.memref_squeeze %717 : memref<1x1x128xf32, #tpu.memory_space<vmem>> -> memref<1x128xf32, #tpu.memory_space<vmem>>
    %719 = tpu.memref_slice %arg8[%c1_i32_611] : memref<2x!tpu.dma_semaphore, #tpu.memory_space<semaphore_mem>> -> memref<1x!tpu.dma_semaphore, #tpu.memory_space<semaphore_mem>>
    %720 = tpu.memref_squeeze %719 : memref<1x!tpu.dma_semaphore, #tpu.memory_space<semaphore_mem>> -> memref<!tpu.dma_semaphore, #tpu.memory_space<semaphore_mem>>
    tpu.wait_dma2 semaphore(%720 : memref<!tpu.dma_semaphore, #tpu.memory_space<semaphore_mem>>) src(%716 : memref<1x128xf32, #tpu.memory_space<any>>) dst(%718 : memref<1x128xf32, #tpu.memory_space<vmem>>)
    %c1_i32_615 = arith.constant 1 : i32
    %c1_i32_616 = arith.constant 1 : i32
    %c0_i32_617 = arith.constant 0 : i32
    %721 = tpu.memref_slice %arg4[%145, %c0_i32_617] : memref<20x128xf32, #tpu.memory_space<any>> -> memref<1x128xf32, #tpu.memory_space<any>>
    %c7_i32_618 = arith.constant 7 : i32
    %c0_i32_619 = arith.constant 0 : i32
    %722 = tpu.memref_slice %arg7[%c1_i32_615, %c7_i32_618, %c0_i32_619] : memref<8x9x128xf32, #tpu.memory_space<vmem>> -> memref<1x1x128xf32, #tpu.memory_space<vmem>>
    %723 = tpu.memref_squeeze %722 : memref<1x1x128xf32, #tpu.memory_space<vmem>> -> memref<1x128xf32, #tpu.memory_space<vmem>>
    %724 = tpu.memref_slice %arg8[%c1_i32_616] : memref<2x!tpu.dma_semaphore, #tpu.memory_space<semaphore_mem>> -> memref<1x!tpu.dma_semaphore, #tpu.memory_space<semaphore_mem>>
    %725 = tpu.memref_squeeze %724 : memref<1x!tpu.dma_semaphore, #tpu.memory_space<semaphore_mem>> -> memref<!tpu.dma_semaphore, #tpu.memory_space<semaphore_mem>>
    tpu.wait_dma2 semaphore(%725 : memref<!tpu.dma_semaphore, #tpu.memory_space<semaphore_mem>>) src(%721 : memref<1x128xf32, #tpu.memory_space<any>>) dst(%723 : memref<1x128xf32, #tpu.memory_space<vmem>>)
    %c1_i32_620 = arith.constant 1 : i32
    %c1_i32_621 = arith.constant 1 : i32
    %c0_i32_622 = arith.constant 0 : i32
    %726 = tpu.memref_slice %arg4[%153, %c0_i32_622] : memref<20x128xf32, #tpu.memory_space<any>> -> memref<1x128xf32, #tpu.memory_space<any>>
    %c8_i32_623 = arith.constant 8 : i32
    %c0_i32_624 = arith.constant 0 : i32
    %727 = tpu.memref_slice %arg7[%c1_i32_620, %c8_i32_623, %c0_i32_624] : memref<8x9x128xf32, #tpu.memory_space<vmem>> -> memref<1x1x128xf32, #tpu.memory_space<vmem>>
    %728 = tpu.memref_squeeze %727 : memref<1x1x128xf32, #tpu.memory_space<vmem>> -> memref<1x128xf32, #tpu.memory_space<vmem>>
    %729 = tpu.memref_slice %arg8[%c1_i32_621] : memref<2x!tpu.dma_semaphore, #tpu.memory_space<semaphore_mem>> -> memref<1x!tpu.dma_semaphore, #tpu.memory_space<semaphore_mem>>
    %730 = tpu.memref_squeeze %729 : memref<1x!tpu.dma_semaphore, #tpu.memory_space<semaphore_mem>> -> memref<!tpu.dma_semaphore, #tpu.memory_space<semaphore_mem>>
    tpu.wait_dma2 semaphore(%730 : memref<!tpu.dma_semaphore, #tpu.memory_space<semaphore_mem>>) src(%726 : memref<1x128xf32, #tpu.memory_space<any>>) dst(%728 : memref<1x128xf32, #tpu.memory_space<vmem>>)
    %c0_i32_625 = arith.constant 0 : i32
    %c0_i32_626 = arith.constant 0 : i32
    %731 = tpu.memref_slice %arg3[%161, %c0_i32_626] : memref<20x128xf32, #tpu.memory_space<any>> -> memref<1x128xf32, #tpu.memory_space<any>>
    %c2_i32_627 = arith.constant 2 : i32
    %c0_i32_628 = arith.constant 0 : i32
    %732 = tpu.memref_slice %arg6[%c2_i32_627, %c0_i32_628] : memref<8x128xf32, #tpu.memory_space<vmem>> -> memref<1x128xf32, #tpu.memory_space<vmem>>
    %733 = tpu.memref_slice %arg8[%c0_i32_625] : memref<2x!tpu.dma_semaphore, #tpu.memory_space<semaphore_mem>> -> memref<1x!tpu.dma_semaphore, #tpu.memory_space<semaphore_mem>>
    %734 = tpu.memref_squeeze %733 : memref<1x!tpu.dma_semaphore, #tpu.memory_space<semaphore_mem>> -> memref<!tpu.dma_semaphore, #tpu.memory_space<semaphore_mem>>
    tpu.wait_dma2 semaphore(%734 : memref<!tpu.dma_semaphore, #tpu.memory_space<semaphore_mem>>) src(%731 : memref<1x128xf32, #tpu.memory_space<any>>) dst(%732 : memref<1x128xf32, #tpu.memory_space<vmem>>)
    %c2_i32_629 = arith.constant 2 : i32
    %c1_i32_630 = arith.constant 1 : i32
    %c0_i32_631 = arith.constant 0 : i32
    %735 = tpu.memref_slice %arg4[%168, %c0_i32_631] : memref<20x128xf32, #tpu.memory_space<any>> -> memref<1x128xf32, #tpu.memory_space<any>>
    %c0_i32_632 = arith.constant 0 : i32
    %c0_i32_633 = arith.constant 0 : i32
    %736 = tpu.memref_slice %arg7[%c2_i32_629, %c0_i32_632, %c0_i32_633] : memref<8x9x128xf32, #tpu.memory_space<vmem>> -> memref<1x1x128xf32, #tpu.memory_space<vmem>>
    %737 = tpu.memref_squeeze %736 : memref<1x1x128xf32, #tpu.memory_space<vmem>> -> memref<1x128xf32, #tpu.memory_space<vmem>>
    %738 = tpu.memref_slice %arg8[%c1_i32_630] : memref<2x!tpu.dma_semaphore, #tpu.memory_space<semaphore_mem>> -> memref<1x!tpu.dma_semaphore, #tpu.memory_space<semaphore_mem>>
    %739 = tpu.memref_squeeze %738 : memref<1x!tpu.dma_semaphore, #tpu.memory_space<semaphore_mem>> -> memref<!tpu.dma_semaphore, #tpu.memory_space<semaphore_mem>>
    tpu.wait_dma2 semaphore(%739 : memref<!tpu.dma_semaphore, #tpu.memory_space<semaphore_mem>>) src(%735 : memref<1x128xf32, #tpu.memory_space<any>>) dst(%737 : memref<1x128xf32, #tpu.memory_space<vmem>>)
    %c2_i32_634 = arith.constant 2 : i32
    %c1_i32_635 = arith.constant 1 : i32
    %c0_i32_636 = arith.constant 0 : i32
    %740 = tpu.memref_slice %arg4[%176, %c0_i32_636] : memref<20x128xf32, #tpu.memory_space<any>> -> memref<1x128xf32, #tpu.memory_space<any>>
    %c1_i32_637 = arith.constant 1 : i32
    %c0_i32_638 = arith.constant 0 : i32
    %741 = tpu.memref_slice %arg7[%c2_i32_634, %c1_i32_637, %c0_i32_638] : memref<8x9x128xf32, #tpu.memory_space<vmem>> -> memref<1x1x128xf32, #tpu.memory_space<vmem>>
    %742 = tpu.memref_squeeze %741 : memref<1x1x128xf32, #tpu.memory_space<vmem>> -> memref<1x128xf32, #tpu.memory_space<vmem>>
    %743 = tpu.memref_slice %arg8[%c1_i32_635] : memref<2x!tpu.dma_semaphore, #tpu.memory_space<semaphore_mem>> -> memref<1x!tpu.dma_semaphore, #tpu.memory_space<semaphore_mem>>
    %744 = tpu.memref_squeeze %743 : memref<1x!tpu.dma_semaphore, #tpu.memory_space<semaphore_mem>> -> memref<!tpu.dma_semaphore, #tpu.memory_space<semaphore_mem>>
    tpu.wait_dma2 semaphore(%744 : memref<!tpu.dma_semaphore, #tpu.memory_space<semaphore_mem>>) src(%740 : memref<1x128xf32, #tpu.memory_space<any>>) dst(%742 : memref<1x128xf32, #tpu.memory_space<vmem>>)
    %c2_i32_639 = arith.constant 2 : i32
    %c1_i32_640 = arith.constant 1 : i32
    %c0_i32_641 = arith.constant 0 : i32
    %745 = tpu.memref_slice %arg4[%184, %c0_i32_641] : memref<20x128xf32, #tpu.memory_space<any>> -> memref<1x128xf32, #tpu.memory_space<any>>
    %c2_i32_642 = arith.constant 2 : i32
    %c0_i32_643 = arith.constant 0 : i32
    %746 = tpu.memref_slice %arg7[%c2_i32_639, %c2_i32_642, %c0_i32_643] : memref<8x9x128xf32, #tpu.memory_space<vmem>> -> memref<1x1x128xf32, #tpu.memory_space<vmem>>
    %747 = tpu.memref_squeeze %746 : memref<1x1x128xf32, #tpu.memory_space<vmem>> -> memref<1x128xf32, #tpu.memory_space<vmem>>
    %748 = tpu.memref_slice %arg8[%c1_i32_640] : memref<2x!tpu.dma_semaphore, #tpu.memory_space<semaphore_mem>> -> memref<1x!tpu.dma_semaphore, #tpu.memory_space<semaphore_mem>>
    %749 = tpu.memref_squeeze %748 : memref<1x!tpu.dma_semaphore, #tpu.memory_space<semaphore_mem>> -> memref<!tpu.dma_semaphore, #tpu.memory_space<semaphore_mem>>
    tpu.wait_dma2 semaphore(%749 : memref<!tpu.dma_semaphore, #tpu.memory_space<semaphore_mem>>) src(%745 : memref<1x128xf32, #tpu.memory_space<any>>) dst(%747 : memref<1x128xf32, #tpu.memory_space<vmem>>)
    %c2_i32_644 = arith.constant 2 : i32
    %c1_i32_645 = arith.constant 1 : i32
    %c0_i32_646 = arith.constant 0 : i32
    %750 = tpu.memref_slice %arg4[%192, %c0_i32_646] : memref<20x128xf32, #tpu.memory_space<any>> -> memref<1x128xf32, #tpu.memory_space<any>>
    %c3_i32_647 = arith.constant 3 : i32
    %c0_i32_648 = arith.constant 0 : i32
    %751 = tpu.memref_slice %arg7[%c2_i32_644, %c3_i32_647, %c0_i32_648] : memref<8x9x128xf32, #tpu.memory_space<vmem>> -> memref<1x1x128xf32, #tpu.memory_space<vmem>>
    %752 = tpu.memref_squeeze %751 : memref<1x1x128xf32, #tpu.memory_space<vmem>> -> memref<1x128xf32, #tpu.memory_space<vmem>>
    %753 = tpu.memref_slice %arg8[%c1_i32_645] : memref<2x!tpu.dma_semaphore, #tpu.memory_space<semaphore_mem>> -> memref<1x!tpu.dma_semaphore, #tpu.memory_space<semaphore_mem>>
    %754 = tpu.memref_squeeze %753 : memref<1x!tpu.dma_semaphore, #tpu.memory_space<semaphore_mem>> -> memref<!tpu.dma_semaphore, #tpu.memory_space<semaphore_mem>>
    tpu.wait_dma2 semaphore(%754 : memref<!tpu.dma_semaphore, #tpu.memory_space<semaphore_mem>>) src(%750 : memref<1x128xf32, #tpu.memory_space<any>>) dst(%752 : memref<1x128xf32, #tpu.memory_space<vmem>>)
    %c2_i32_649 = arith.constant 2 : i32
    %c1_i32_650 = arith.constant 1 : i32
    %c0_i32_651 = arith.constant 0 : i32
    %755 = tpu.memref_slice %arg4[%200, %c0_i32_651] : memref<20x128xf32, #tpu.memory_space<any>> -> memref<1x128xf32, #tpu.memory_space<any>>
    %c4_i32_652 = arith.constant 4 : i32
    %c0_i32_653 = arith.constant 0 : i32
    %756 = tpu.memref_slice %arg7[%c2_i32_649, %c4_i32_652, %c0_i32_653] : memref<8x9x128xf32, #tpu.memory_space<vmem>> -> memref<1x1x128xf32, #tpu.memory_space<vmem>>
    %757 = tpu.memref_squeeze %756 : memref<1x1x128xf32, #tpu.memory_space<vmem>> -> memref<1x128xf32, #tpu.memory_space<vmem>>
    %758 = tpu.memref_slice %arg8[%c1_i32_650] : memref<2x!tpu.dma_semaphore, #tpu.memory_space<semaphore_mem>> -> memref<1x!tpu.dma_semaphore, #tpu.memory_space<semaphore_mem>>
    %759 = tpu.memref_squeeze %758 : memref<1x!tpu.dma_semaphore, #tpu.memory_space<semaphore_mem>> -> memref<!tpu.dma_semaphore, #tpu.memory_space<semaphore_mem>>
    tpu.wait_dma2 semaphore(%759 : memref<!tpu.dma_semaphore, #tpu.memory_space<semaphore_mem>>) src(%755 : memref<1x128xf32, #tpu.memory_space<any>>) dst(%757 : memref<1x128xf32, #tpu.memory_space<vmem>>)
    %c2_i32_654 = arith.constant 2 : i32
    %c1_i32_655 = arith.constant 1 : i32
    %c0_i32_656 = arith.constant 0 : i32
    %760 = tpu.memref_slice %arg4[%208, %c0_i32_656] : memref<20x128xf32, #tpu.memory_space<any>> -> memref<1x128xf32, #tpu.memory_space<any>>
    %c5_i32_657 = arith.constant 5 : i32
    %c0_i32_658 = arith.constant 0 : i32
    %761 = tpu.memref_slice %arg7[%c2_i32_654, %c5_i32_657, %c0_i32_658] : memref<8x9x128xf32, #tpu.memory_space<vmem>> -> memref<1x1x128xf32, #tpu.memory_space<vmem>>
    %762 = tpu.memref_squeeze %761 : memref<1x1x128xf32, #tpu.memory_space<vmem>> -> memref<1x128xf32, #tpu.memory_space<vmem>>
    %763 = tpu.memref_slice %arg8[%c1_i32_655] : memref<2x!tpu.dma_semaphore, #tpu.memory_space<semaphore_mem>> -> memref<1x!tpu.dma_semaphore, #tpu.memory_space<semaphore_mem>>
    %764 = tpu.memref_squeeze %763 : memref<1x!tpu.dma_semaphore, #tpu.memory_space<semaphore_mem>> -> memref<!tpu.dma_semaphore, #tpu.memory_space<semaphore_mem>>
    tpu.wait_dma2 semaphore(%764 : memref<!tpu.dma_semaphore, #tpu.memory_space<semaphore_mem>>) src(%760 : memref<1x128xf32, #tpu.memory_space<any>>) dst(%762 : memref<1x128xf32, #tpu.memory_space<vmem>>)
    %c2_i32_659 = arith.constant 2 : i32
    %c1_i32_660 = arith.constant 1 : i32
    %c0_i32_661 = arith.constant 0 : i32
    %765 = tpu.memref_slice %arg4[%216, %c0_i32_661] : memref<20x128xf32, #tpu.memory_space<any>> -> memref<1x128xf32, #tpu.memory_space<any>>
    %c6_i32_662 = arith.constant 6 : i32
    %c0_i32_663 = arith.constant 0 : i32
    %766 = tpu.memref_slice %arg7[%c2_i32_659, %c6_i32_662, %c0_i32_663] : memref<8x9x128xf32, #tpu.memory_space<vmem>> -> memref<1x1x128xf32, #tpu.memory_space<vmem>>
    %767 = tpu.memref_squeeze %766 : memref<1x1x128xf32, #tpu.memory_space<vmem>> -> memref<1x128xf32, #tpu.memory_space<vmem>>
    %768 = tpu.memref_slice %arg8[%c1_i32_660] : memref<2x!tpu.dma_semaphore, #tpu.memory_space<semaphore_mem>> -> memref<1x!tpu.dma_semaphore, #tpu.memory_space<semaphore_mem>>
    %769 = tpu.memref_squeeze %768 : memref<1x!tpu.dma_semaphore, #tpu.memory_space<semaphore_mem>> -> memref<!tpu.dma_semaphore, #tpu.memory_space<semaphore_mem>>
    tpu.wait_dma2 semaphore(%769 : memref<!tpu.dma_semaphore, #tpu.memory_space<semaphore_mem>>) src(%765 : memref<1x128xf32, #tpu.memory_space<any>>) dst(%767 : memref<1x128xf32, #tpu.memory_space<vmem>>)
    %c2_i32_664 = arith.constant 2 : i32
    %c1_i32_665 = arith.constant 1 : i32
    %c0_i32_666 = arith.constant 0 : i32
    %770 = tpu.memref_slice %arg4[%224, %c0_i32_666] : memref<20x128xf32, #tpu.memory_space<any>> -> memref<1x128xf32, #tpu.memory_space<any>>
    %c7_i32_667 = arith.constant 7 : i32
    %c0_i32_668 = arith.constant 0 : i32
    %771 = tpu.memref_slice %arg7[%c2_i32_664, %c7_i32_667, %c0_i32_668] : memref<8x9x128xf32, #tpu.memory_space<vmem>> -> memref<1x1x128xf32, #tpu.memory_space<vmem>>
    %772 = tpu.memref_squeeze %771 : memref<1x1x128xf32, #tpu.memory_space<vmem>> -> memref<1x128xf32, #tpu.memory_space<vmem>>
    %773 = tpu.memref_slice %arg8[%c1_i32_665] : memref<2x!tpu.dma_semaphore, #tpu.memory_space<semaphore_mem>> -> memref<1x!tpu.dma_semaphore, #tpu.memory_space<semaphore_mem>>
    %774 = tpu.memref_squeeze %773 : memref<1x!tpu.dma_semaphore, #tpu.memory_space<semaphore_mem>> -> memref<!tpu.dma_semaphore, #tpu.memory_space<semaphore_mem>>
    tpu.wait_dma2 semaphore(%774 : memref<!tpu.dma_semaphore, #tpu.memory_space<semaphore_mem>>) src(%770 : memref<1x128xf32, #tpu.memory_space<any>>) dst(%772 : memref<1x128xf32, #tpu.memory_space<vmem>>)
    %c2_i32_669 = arith.constant 2 : i32
    %c1_i32_670 = arith.constant 1 : i32
    %c0_i32_671 = arith.constant 0 : i32
    %775 = tpu.memref_slice %arg4[%232, %c0_i32_671] : memref<20x128xf32, #tpu.memory_space<any>> -> memref<1x128xf32, #tpu.memory_space<any>>
    %c8_i32_672 = arith.constant 8 : i32
    %c0_i32_673 = arith.constant 0 : i32
    %776 = tpu.memref_slice %arg7[%c2_i32_669, %c8_i32_672, %c0_i32_673] : memref<8x9x128xf32, #tpu.memory_space<vmem>> -> memref<1x1x128xf32, #tpu.memory_space<vmem>>
    %777 = tpu.memref_squeeze %776 : memref<1x1x128xf32, #tpu.memory_space<vmem>> -> memref<1x128xf32, #tpu.memory_space<vmem>>
    %778 = tpu.memref_slice %arg8[%c1_i32_670] : memref<2x!tpu.dma_semaphore, #tpu.memory_space<semaphore_mem>> -> memref<1x!tpu.dma_semaphore, #tpu.memory_space<semaphore_mem>>
    %779 = tpu.memref_squeeze %778 : memref<1x!tpu.dma_semaphore, #tpu.memory_space<semaphore_mem>> -> memref<!tpu.dma_semaphore, #tpu.memory_space<semaphore_mem>>
    tpu.wait_dma2 semaphore(%779 : memref<!tpu.dma_semaphore, #tpu.memory_space<semaphore_mem>>) src(%775 : memref<1x128xf32, #tpu.memory_space<any>>) dst(%777 : memref<1x128xf32, #tpu.memory_space<vmem>>)
    %c0_i32_674 = arith.constant 0 : i32
    %c0_i32_675 = arith.constant 0 : i32
    %780 = tpu.memref_slice %arg3[%240, %c0_i32_675] : memref<20x128xf32, #tpu.memory_space<any>> -> memref<1x128xf32, #tpu.memory_space<any>>
    %c3_i32_676 = arith.constant 3 : i32
    %c0_i32_677 = arith.constant 0 : i32
    %781 = tpu.memref_slice %arg6[%c3_i32_676, %c0_i32_677] : memref<8x128xf32, #tpu.memory_space<vmem>> -> memref<1x128xf32, #tpu.memory_space<vmem>>
    %782 = tpu.memref_slice %arg8[%c0_i32_674] : memref<2x!tpu.dma_semaphore, #tpu.memory_space<semaphore_mem>> -> memref<1x!tpu.dma_semaphore, #tpu.memory_space<semaphore_mem>>
    %783 = tpu.memref_squeeze %782 : memref<1x!tpu.dma_semaphore, #tpu.memory_space<semaphore_mem>> -> memref<!tpu.dma_semaphore, #tpu.memory_space<semaphore_mem>>
    tpu.wait_dma2 semaphore(%783 : memref<!tpu.dma_semaphore, #tpu.memory_space<semaphore_mem>>) src(%780 : memref<1x128xf32, #tpu.memory_space<any>>) dst(%781 : memref<1x128xf32, #tpu.memory_space<vmem>>)
    %c3_i32_678 = arith.constant 3 : i32
    %c1_i32_679 = arith.constant 1 : i32
    %c0_i32_680 = arith.constant 0 : i32
    %784 = tpu.memref_slice %arg4[%247, %c0_i32_680] : memref<20x128xf32, #tpu.memory_space<any>> -> memref<1x128xf32, #tpu.memory_space<any>>
    %c0_i32_681 = arith.constant 0 : i32
    %c0_i32_682 = arith.constant 0 : i32
    %785 = tpu.memref_slice %arg7[%c3_i32_678, %c0_i32_681, %c0_i32_682] : memref<8x9x128xf32, #tpu.memory_space<vmem>> -> memref<1x1x128xf32, #tpu.memory_space<vmem>>
    %786 = tpu.memref_squeeze %785 : memref<1x1x128xf32, #tpu.memory_space<vmem>> -> memref<1x128xf32, #tpu.memory_space<vmem>>
    %787 = tpu.memref_slice %arg8[%c1_i32_679] : memref<2x!tpu.dma_semaphore, #tpu.memory_space<semaphore_mem>> -> memref<1x!tpu.dma_semaphore, #tpu.memory_space<semaphore_mem>>
    %788 = tpu.memref_squeeze %787 : memref<1x!tpu.dma_semaphore, #tpu.memory_space<semaphore_mem>> -> memref<!tpu.dma_semaphore, #tpu.memory_space<semaphore_mem>>
    tpu.wait_dma2 semaphore(%788 : memref<!tpu.dma_semaphore, #tpu.memory_space<semaphore_mem>>) src(%784 : memref<1x128xf32, #tpu.memory_space<any>>) dst(%786 : memref<1x128xf32, #tpu.memory_space<vmem>>)
    %c3_i32_683 = arith.constant 3 : i32
    %c1_i32_684 = arith.constant 1 : i32
    %c0_i32_685 = arith.constant 0 : i32
    %789 = tpu.memref_slice %arg4[%255, %c0_i32_685] : memref<20x128xf32, #tpu.memory_space<any>> -> memref<1x128xf32, #tpu.memory_space<any>>
    %c1_i32_686 = arith.constant 1 : i32
    %c0_i32_687 = arith.constant 0 : i32
    %790 = tpu.memref_slice %arg7[%c3_i32_683, %c1_i32_686, %c0_i32_687] : memref<8x9x128xf32, #tpu.memory_space<vmem>> -> memref<1x1x128xf32, #tpu.memory_space<vmem>>
    %791 = tpu.memref_squeeze %790 : memref<1x1x128xf32, #tpu.memory_space<vmem>> -> memref<1x128xf32, #tpu.memory_space<vmem>>
    %792 = tpu.memref_slice %arg8[%c1_i32_684] : memref<2x!tpu.dma_semaphore, #tpu.memory_space<semaphore_mem>> -> memref<1x!tpu.dma_semaphore, #tpu.memory_space<semaphore_mem>>
    %793 = tpu.memref_squeeze %792 : memref<1x!tpu.dma_semaphore, #tpu.memory_space<semaphore_mem>> -> memref<!tpu.dma_semaphore, #tpu.memory_space<semaphore_mem>>
    tpu.wait_dma2 semaphore(%793 : memref<!tpu.dma_semaphore, #tpu.memory_space<semaphore_mem>>) src(%789 : memref<1x128xf32, #tpu.memory_space<any>>) dst(%791 : memref<1x128xf32, #tpu.memory_space<vmem>>)
    %c3_i32_688 = arith.constant 3 : i32
    %c1_i32_689 = arith.constant 1 : i32
    %c0_i32_690 = arith.constant 0 : i32
    %794 = tpu.memref_slice %arg4[%263, %c0_i32_690] : memref<20x128xf32, #tpu.memory_space<any>> -> memref<1x128xf32, #tpu.memory_space<any>>
    %c2_i32_691 = arith.constant 2 : i32
    %c0_i32_692 = arith.constant 0 : i32
    %795 = tpu.memref_slice %arg7[%c3_i32_688, %c2_i32_691, %c0_i32_692] : memref<8x9x128xf32, #tpu.memory_space<vmem>> -> memref<1x1x128xf32, #tpu.memory_space<vmem>>
    %796 = tpu.memref_squeeze %795 : memref<1x1x128xf32, #tpu.memory_space<vmem>> -> memref<1x128xf32, #tpu.memory_space<vmem>>
    %797 = tpu.memref_slice %arg8[%c1_i32_689] : memref<2x!tpu.dma_semaphore, #tpu.memory_space<semaphore_mem>> -> memref<1x!tpu.dma_semaphore, #tpu.memory_space<semaphore_mem>>
    %798 = tpu.memref_squeeze %797 : memref<1x!tpu.dma_semaphore, #tpu.memory_space<semaphore_mem>> -> memref<!tpu.dma_semaphore, #tpu.memory_space<semaphore_mem>>
    tpu.wait_dma2 semaphore(%798 : memref<!tpu.dma_semaphore, #tpu.memory_space<semaphore_mem>>) src(%794 : memref<1x128xf32, #tpu.memory_space<any>>) dst(%796 : memref<1x128xf32, #tpu.memory_space<vmem>>)
    %c3_i32_693 = arith.constant 3 : i32
    %c1_i32_694 = arith.constant 1 : i32
    %c0_i32_695 = arith.constant 0 : i32
    %799 = tpu.memref_slice %arg4[%271, %c0_i32_695] : memref<20x128xf32, #tpu.memory_space<any>> -> memref<1x128xf32, #tpu.memory_space<any>>
    %c3_i32_696 = arith.constant 3 : i32
    %c0_i32_697 = arith.constant 0 : i32
    %800 = tpu.memref_slice %arg7[%c3_i32_693, %c3_i32_696, %c0_i32_697] : memref<8x9x128xf32, #tpu.memory_space<vmem>> -> memref<1x1x128xf32, #tpu.memory_space<vmem>>
    %801 = tpu.memref_squeeze %800 : memref<1x1x128xf32, #tpu.memory_space<vmem>> -> memref<1x128xf32, #tpu.memory_space<vmem>>
    %802 = tpu.memref_slice %arg8[%c1_i32_694] : memref<2x!tpu.dma_semaphore, #tpu.memory_space<semaphore_mem>> -> memref<1x!tpu.dma_semaphore, #tpu.memory_space<semaphore_mem>>
    %803 = tpu.memref_squeeze %802 : memref<1x!tpu.dma_semaphore, #tpu.memory_space<semaphore_mem>> -> memref<!tpu.dma_semaphore, #tpu.memory_space<semaphore_mem>>
    tpu.wait_dma2 semaphore(%803 : memref<!tpu.dma_semaphore, #tpu.memory_space<semaphore_mem>>) src(%799 : memref<1x128xf32, #tpu.memory_space<any>>) dst(%801 : memref<1x128xf32, #tpu.memory_space<vmem>>)
    %c3_i32_698 = arith.constant 3 : i32
    %c1_i32_699 = arith.constant 1 : i32
    %c0_i32_700 = arith.constant 0 : i32
    %804 = tpu.memref_slice %arg4[%279, %c0_i32_700] : memref<20x128xf32, #tpu.memory_space<any>> -> memref<1x128xf32, #tpu.memory_space<any>>
    %c4_i32_701 = arith.constant 4 : i32
    %c0_i32_702 = arith.constant 0 : i32
    %805 = tpu.memref_slice %arg7[%c3_i32_698, %c4_i32_701, %c0_i32_702] : memref<8x9x128xf32, #tpu.memory_space<vmem>> -> memref<1x1x128xf32, #tpu.memory_space<vmem>>
    %806 = tpu.memref_squeeze %805 : memref<1x1x128xf32, #tpu.memory_space<vmem>> -> memref<1x128xf32, #tpu.memory_space<vmem>>
    %807 = tpu.memref_slice %arg8[%c1_i32_699] : memref<2x!tpu.dma_semaphore, #tpu.memory_space<semaphore_mem>> -> memref<1x!tpu.dma_semaphore, #tpu.memory_space<semaphore_mem>>
    %808 = tpu.memref_squeeze %807 : memref<1x!tpu.dma_semaphore, #tpu.memory_space<semaphore_mem>> -> memref<!tpu.dma_semaphore, #tpu.memory_space<semaphore_mem>>
    tpu.wait_dma2 semaphore(%808 : memref<!tpu.dma_semaphore, #tpu.memory_space<semaphore_mem>>) src(%804 : memref<1x128xf32, #tpu.memory_space<any>>) dst(%806 : memref<1x128xf32, #tpu.memory_space<vmem>>)
    %c3_i32_703 = arith.constant 3 : i32
    %c1_i32_704 = arith.constant 1 : i32
    %c0_i32_705 = arith.constant 0 : i32
    %809 = tpu.memref_slice %arg4[%287, %c0_i32_705] : memref<20x128xf32, #tpu.memory_space<any>> -> memref<1x128xf32, #tpu.memory_space<any>>
    %c5_i32_706 = arith.constant 5 : i32
    %c0_i32_707 = arith.constant 0 : i32
    %810 = tpu.memref_slice %arg7[%c3_i32_703, %c5_i32_706, %c0_i32_707] : memref<8x9x128xf32, #tpu.memory_space<vmem>> -> memref<1x1x128xf32, #tpu.memory_space<vmem>>
    %811 = tpu.memref_squeeze %810 : memref<1x1x128xf32, #tpu.memory_space<vmem>> -> memref<1x128xf32, #tpu.memory_space<vmem>>
    %812 = tpu.memref_slice %arg8[%c1_i32_704] : memref<2x!tpu.dma_semaphore, #tpu.memory_space<semaphore_mem>> -> memref<1x!tpu.dma_semaphore, #tpu.memory_space<semaphore_mem>>
    %813 = tpu.memref_squeeze %812 : memref<1x!tpu.dma_semaphore, #tpu.memory_space<semaphore_mem>> -> memref<!tpu.dma_semaphore, #tpu.memory_space<semaphore_mem>>
    tpu.wait_dma2 semaphore(%813 : memref<!tpu.dma_semaphore, #tpu.memory_space<semaphore_mem>>) src(%809 : memref<1x128xf32, #tpu.memory_space<any>>) dst(%811 : memref<1x128xf32, #tpu.memory_space<vmem>>)
    %c3_i32_708 = arith.constant 3 : i32
    %c1_i32_709 = arith.constant 1 : i32
    %c0_i32_710 = arith.constant 0 : i32
    %814 = tpu.memref_slice %arg4[%295, %c0_i32_710] : memref<20x128xf32, #tpu.memory_space<any>> -> memref<1x128xf32, #tpu.memory_space<any>>
    %c6_i32_711 = arith.constant 6 : i32
    %c0_i32_712 = arith.constant 0 : i32
    %815 = tpu.memref_slice %arg7[%c3_i32_708, %c6_i32_711, %c0_i32_712] : memref<8x9x128xf32, #tpu.memory_space<vmem>> -> memref<1x1x128xf32, #tpu.memory_space<vmem>>
    %816 = tpu.memref_squeeze %815 : memref<1x1x128xf32, #tpu.memory_space<vmem>> -> memref<1x128xf32, #tpu.memory_space<vmem>>
    %817 = tpu.memref_slice %arg8[%c1_i32_709] : memref<2x!tpu.dma_semaphore, #tpu.memory_space<semaphore_mem>> -> memref<1x!tpu.dma_semaphore, #tpu.memory_space<semaphore_mem>>
    %818 = tpu.memref_squeeze %817 : memref<1x!tpu.dma_semaphore, #tpu.memory_space<semaphore_mem>> -> memref<!tpu.dma_semaphore, #tpu.memory_space<semaphore_mem>>
    tpu.wait_dma2 semaphore(%818 : memref<!tpu.dma_semaphore, #tpu.memory_space<semaphore_mem>>) src(%814 : memref<1x128xf32, #tpu.memory_space<any>>) dst(%816 : memref<1x128xf32, #tpu.memory_space<vmem>>)
    %c3_i32_713 = arith.constant 3 : i32
    %c1_i32_714 = arith.constant 1 : i32
    %c0_i32_715 = arith.constant 0 : i32
    %819 = tpu.memref_slice %arg4[%303, %c0_i32_715] : memref<20x128xf32, #tpu.memory_space<any>> -> memref<1x128xf32, #tpu.memory_space<any>>
    %c7_i32_716 = arith.constant 7 : i32
    %c0_i32_717 = arith.constant 0 : i32
    %820 = tpu.memref_slice %arg7[%c3_i32_713, %c7_i32_716, %c0_i32_717] : memref<8x9x128xf32, #tpu.memory_space<vmem>> -> memref<1x1x128xf32, #tpu.memory_space<vmem>>
    %821 = tpu.memref_squeeze %820 : memref<1x1x128xf32, #tpu.memory_space<vmem>> -> memref<1x128xf32, #tpu.memory_space<vmem>>
    %822 = tpu.memref_slice %arg8[%c1_i32_714] : memref<2x!tpu.dma_semaphore, #tpu.memory_space<semaphore_mem>> -> memref<1x!tpu.dma_semaphore, #tpu.memory_space<semaphore_mem>>
    %823 = tpu.memref_squeeze %822 : memref<1x!tpu.dma_semaphore, #tpu.memory_space<semaphore_mem>> -> memref<!tpu.dma_semaphore, #tpu.memory_space<semaphore_mem>>
    tpu.wait_dma2 semaphore(%823 : memref<!tpu.dma_semaphore, #tpu.memory_space<semaphore_mem>>) src(%819 : memref<1x128xf32, #tpu.memory_space<any>>) dst(%821 : memref<1x128xf32, #tpu.memory_space<vmem>>)
    %c3_i32_718 = arith.constant 3 : i32
    %c1_i32_719 = arith.constant 1 : i32
    %c0_i32_720 = arith.constant 0 : i32
    %824 = tpu.memref_slice %arg4[%311, %c0_i32_720] : memref<20x128xf32, #tpu.memory_space<any>> -> memref<1x128xf32, #tpu.memory_space<any>>
    %c8_i32_721 = arith.constant 8 : i32
    %c0_i32_722 = arith.constant 0 : i32
    %825 = tpu.memref_slice %arg7[%c3_i32_718, %c8_i32_721, %c0_i32_722] : memref<8x9x128xf32, #tpu.memory_space<vmem>> -> memref<1x1x128xf32, #tpu.memory_space<vmem>>
    %826 = tpu.memref_squeeze %825 : memref<1x1x128xf32, #tpu.memory_space<vmem>> -> memref<1x128xf32, #tpu.memory_space<vmem>>
    %827 = tpu.memref_slice %arg8[%c1_i32_719] : memref<2x!tpu.dma_semaphore, #tpu.memory_space<semaphore_mem>> -> memref<1x!tpu.dma_semaphore, #tpu.memory_space<semaphore_mem>>
    %828 = tpu.memref_squeeze %827 : memref<1x!tpu.dma_semaphore, #tpu.memory_space<semaphore_mem>> -> memref<!tpu.dma_semaphore, #tpu.memory_space<semaphore_mem>>
    tpu.wait_dma2 semaphore(%828 : memref<!tpu.dma_semaphore, #tpu.memory_space<semaphore_mem>>) src(%824 : memref<1x128xf32, #tpu.memory_space<any>>) dst(%826 : memref<1x128xf32, #tpu.memory_space<vmem>>)
    %c0_i32_723 = arith.constant 0 : i32
    %c0_i32_724 = arith.constant 0 : i32
    %829 = tpu.memref_slice %arg3[%319, %c0_i32_724] : memref<20x128xf32, #tpu.memory_space<any>> -> memref<1x128xf32, #tpu.memory_space<any>>
    %c4_i32_725 = arith.constant 4 : i32
    %c0_i32_726 = arith.constant 0 : i32
    %830 = tpu.memref_slice %arg6[%c4_i32_725, %c0_i32_726] : memref<8x128xf32, #tpu.memory_space<vmem>> -> memref<1x128xf32, #tpu.memory_space<vmem>>
    %831 = tpu.memref_slice %arg8[%c0_i32_723] : memref<2x!tpu.dma_semaphore, #tpu.memory_space<semaphore_mem>> -> memref<1x!tpu.dma_semaphore, #tpu.memory_space<semaphore_mem>>
    %832 = tpu.memref_squeeze %831 : memref<1x!tpu.dma_semaphore, #tpu.memory_space<semaphore_mem>> -> memref<!tpu.dma_semaphore, #tpu.memory_space<semaphore_mem>>
    tpu.wait_dma2 semaphore(%832 : memref<!tpu.dma_semaphore, #tpu.memory_space<semaphore_mem>>) src(%829 : memref<1x128xf32, #tpu.memory_space<any>>) dst(%830 : memref<1x128xf32, #tpu.memory_space<vmem>>)
    %c4_i32_727 = arith.constant 4 : i32
    %c1_i32_728 = arith.constant 1 : i32
    %c0_i32_729 = arith.constant 0 : i32
    %833 = tpu.memref_slice %arg4[%326, %c0_i32_729] : memref<20x128xf32, #tpu.memory_space<any>> -> memref<1x128xf32, #tpu.memory_space<any>>
    %c0_i32_730 = arith.constant 0 : i32
    %c0_i32_731 = arith.constant 0 : i32
    %834 = tpu.memref_slice %arg7[%c4_i32_727, %c0_i32_730, %c0_i32_731] : memref<8x9x128xf32, #tpu.memory_space<vmem>> -> memref<1x1x128xf32, #tpu.memory_space<vmem>>
    %835 = tpu.memref_squeeze %834 : memref<1x1x128xf32, #tpu.memory_space<vmem>> -> memref<1x128xf32, #tpu.memory_space<vmem>>
    %836 = tpu.memref_slice %arg8[%c1_i32_728] : memref<2x!tpu.dma_semaphore, #tpu.memory_space<semaphore_mem>> -> memref<1x!tpu.dma_semaphore, #tpu.memory_space<semaphore_mem>>
    %837 = tpu.memref_squeeze %836 : memref<1x!tpu.dma_semaphore, #tpu.memory_space<semaphore_mem>> -> memref<!tpu.dma_semaphore, #tpu.memory_space<semaphore_mem>>
    tpu.wait_dma2 semaphore(%837 : memref<!tpu.dma_semaphore, #tpu.memory_space<semaphore_mem>>) src(%833 : memref<1x128xf32, #tpu.memory_space<any>>) dst(%835 : memref<1x128xf32, #tpu.memory_space<vmem>>)
    %c4_i32_732 = arith.constant 4 : i32
    %c1_i32_733 = arith.constant 1 : i32
    %c0_i32_734 = arith.constant 0 : i32
    %838 = tpu.memref_slice %arg4[%334, %c0_i32_734] : memref<20x128xf32, #tpu.memory_space<any>> -> memref<1x128xf32, #tpu.memory_space<any>>
    %c1_i32_735 = arith.constant 1 : i32
    %c0_i32_736 = arith.constant 0 : i32
    %839 = tpu.memref_slice %arg7[%c4_i32_732, %c1_i32_735, %c0_i32_736] : memref<8x9x128xf32, #tpu.memory_space<vmem>> -> memref<1x1x128xf32, #tpu.memory_space<vmem>>
    %840 = tpu.memref_squeeze %839 : memref<1x1x128xf32, #tpu.memory_space<vmem>> -> memref<1x128xf32, #tpu.memory_space<vmem>>
    %841 = tpu.memref_slice %arg8[%c1_i32_733] : memref<2x!tpu.dma_semaphore, #tpu.memory_space<semaphore_mem>> -> memref<1x!tpu.dma_semaphore, #tpu.memory_space<semaphore_mem>>
    %842 = tpu.memref_squeeze %841 : memref<1x!tpu.dma_semaphore, #tpu.memory_space<semaphore_mem>> -> memref<!tpu.dma_semaphore, #tpu.memory_space<semaphore_mem>>
    tpu.wait_dma2 semaphore(%842 : memref<!tpu.dma_semaphore, #tpu.memory_space<semaphore_mem>>) src(%838 : memref<1x128xf32, #tpu.memory_space<any>>) dst(%840 : memref<1x128xf32, #tpu.memory_space<vmem>>)
    %c4_i32_737 = arith.constant 4 : i32
    %c1_i32_738 = arith.constant 1 : i32
    %c0_i32_739 = arith.constant 0 : i32
    %843 = tpu.memref_slice %arg4[%342, %c0_i32_739] : memref<20x128xf32, #tpu.memory_space<any>> -> memref<1x128xf32, #tpu.memory_space<any>>
    %c2_i32_740 = arith.constant 2 : i32
    %c0_i32_741 = arith.constant 0 : i32
    %844 = tpu.memref_slice %arg7[%c4_i32_737, %c2_i32_740, %c0_i32_741] : memref<8x9x128xf32, #tpu.memory_space<vmem>> -> memref<1x1x128xf32, #tpu.memory_space<vmem>>
    %845 = tpu.memref_squeeze %844 : memref<1x1x128xf32, #tpu.memory_space<vmem>> -> memref<1x128xf32, #tpu.memory_space<vmem>>
    %846 = tpu.memref_slice %arg8[%c1_i32_738] : memref<2x!tpu.dma_semaphore, #tpu.memory_space<semaphore_mem>> -> memref<1x!tpu.dma_semaphore, #tpu.memory_space<semaphore_mem>>
    %847 = tpu.memref_squeeze %846 : memref<1x!tpu.dma_semaphore, #tpu.memory_space<semaphore_mem>> -> memref<!tpu.dma_semaphore, #tpu.memory_space<semaphore_mem>>
    tpu.wait_dma2 semaphore(%847 : memref<!tpu.dma_semaphore, #tpu.memory_space<semaphore_mem>>) src(%843 : memref<1x128xf32, #tpu.memory_space<any>>) dst(%845 : memref<1x128xf32, #tpu.memory_space<vmem>>)
    %c4_i32_742 = arith.constant 4 : i32
    %c1_i32_743 = arith.constant 1 : i32
    %c0_i32_744 = arith.constant 0 : i32
    %848 = tpu.memref_slice %arg4[%350, %c0_i32_744] : memref<20x128xf32, #tpu.memory_space<any>> -> memref<1x128xf32, #tpu.memory_space<any>>
    %c3_i32_745 = arith.constant 3 : i32
    %c0_i32_746 = arith.constant 0 : i32
    %849 = tpu.memref_slice %arg7[%c4_i32_742, %c3_i32_745, %c0_i32_746] : memref<8x9x128xf32, #tpu.memory_space<vmem>> -> memref<1x1x128xf32, #tpu.memory_space<vmem>>
    %850 = tpu.memref_squeeze %849 : memref<1x1x128xf32, #tpu.memory_space<vmem>> -> memref<1x128xf32, #tpu.memory_space<vmem>>
    %851 = tpu.memref_slice %arg8[%c1_i32_743] : memref<2x!tpu.dma_semaphore, #tpu.memory_space<semaphore_mem>> -> memref<1x!tpu.dma_semaphore, #tpu.memory_space<semaphore_mem>>
    %852 = tpu.memref_squeeze %851 : memref<1x!tpu.dma_semaphore, #tpu.memory_space<semaphore_mem>> -> memref<!tpu.dma_semaphore, #tpu.memory_space<semaphore_mem>>
    tpu.wait_dma2 semaphore(%852 : memref<!tpu.dma_semaphore, #tpu.memory_space<semaphore_mem>>) src(%848 : memref<1x128xf32, #tpu.memory_space<any>>) dst(%850 : memref<1x128xf32, #tpu.memory_space<vmem>>)
    %c4_i32_747 = arith.constant 4 : i32
    %c1_i32_748 = arith.constant 1 : i32
    %c0_i32_749 = arith.constant 0 : i32
    %853 = tpu.memref_slice %arg4[%358, %c0_i32_749] : memref<20x128xf32, #tpu.memory_space<any>> -> memref<1x128xf32, #tpu.memory_space<any>>
    %c4_i32_750 = arith.constant 4 : i32
    %c0_i32_751 = arith.constant 0 : i32
    %854 = tpu.memref_slice %arg7[%c4_i32_747, %c4_i32_750, %c0_i32_751] : memref<8x9x128xf32, #tpu.memory_space<vmem>> -> memref<1x1x128xf32, #tpu.memory_space<vmem>>
    %855 = tpu.memref_squeeze %854 : memref<1x1x128xf32, #tpu.memory_space<vmem>> -> memref<1x128xf32, #tpu.memory_space<vmem>>
    %856 = tpu.memref_slice %arg8[%c1_i32_748] : memref<2x!tpu.dma_semaphore, #tpu.memory_space<semaphore_mem>> -> memref<1x!tpu.dma_semaphore, #tpu.memory_space<semaphore_mem>>
    %857 = tpu.memref_squeeze %856 : memref<1x!tpu.dma_semaphore, #tpu.memory_space<semaphore_mem>> -> memref<!tpu.dma_semaphore, #tpu.memory_space<semaphore_mem>>
    tpu.wait_dma2 semaphore(%857 : memref<!tpu.dma_semaphore, #tpu.memory_space<semaphore_mem>>) src(%853 : memref<1x128xf32, #tpu.memory_space<any>>) dst(%855 : memref<1x128xf32, #tpu.memory_space<vmem>>)
    %c4_i32_752 = arith.constant 4 : i32
    %c1_i32_753 = arith.constant 1 : i32
    %c0_i32_754 = arith.constant 0 : i32
    %858 = tpu.memref_slice %arg4[%366, %c0_i32_754] : memref<20x128xf32, #tpu.memory_space<any>> -> memref<1x128xf32, #tpu.memory_space<any>>
    %c5_i32_755 = arith.constant 5 : i32
    %c0_i32_756 = arith.constant 0 : i32
    %859 = tpu.memref_slice %arg7[%c4_i32_752, %c5_i32_755, %c0_i32_756] : memref<8x9x128xf32, #tpu.memory_space<vmem>> -> memref<1x1x128xf32, #tpu.memory_space<vmem>>
    %860 = tpu.memref_squeeze %859 : memref<1x1x128xf32, #tpu.memory_space<vmem>> -> memref<1x128xf32, #tpu.memory_space<vmem>>
    %861 = tpu.memref_slice %arg8[%c1_i32_753] : memref<2x!tpu.dma_semaphore, #tpu.memory_space<semaphore_mem>> -> memref<1x!tpu.dma_semaphore, #tpu.memory_space<semaphore_mem>>
    %862 = tpu.memref_squeeze %861 : memref<1x!tpu.dma_semaphore, #tpu.memory_space<semaphore_mem>> -> memref<!tpu.dma_semaphore, #tpu.memory_space<semaphore_mem>>
    tpu.wait_dma2 semaphore(%862 : memref<!tpu.dma_semaphore, #tpu.memory_space<semaphore_mem>>) src(%858 : memref<1x128xf32, #tpu.memory_space<any>>) dst(%860 : memref<1x128xf32, #tpu.memory_space<vmem>>)
    %c4_i32_757 = arith.constant 4 : i32
    %c1_i32_758 = arith.constant 1 : i32
    %c0_i32_759 = arith.constant 0 : i32
    %863 = tpu.memref_slice %arg4[%374, %c0_i32_759] : memref<20x128xf32, #tpu.memory_space<any>> -> memref<1x128xf32, #tpu.memory_space<any>>
    %c6_i32_760 = arith.constant 6 : i32
    %c0_i32_761 = arith.constant 0 : i32
    %864 = tpu.memref_slice %arg7[%c4_i32_757, %c6_i32_760, %c0_i32_761] : memref<8x9x128xf32, #tpu.memory_space<vmem>> -> memref<1x1x128xf32, #tpu.memory_space<vmem>>
    %865 = tpu.memref_squeeze %864 : memref<1x1x128xf32, #tpu.memory_space<vmem>> -> memref<1x128xf32, #tpu.memory_space<vmem>>
    %866 = tpu.memref_slice %arg8[%c1_i32_758] : memref<2x!tpu.dma_semaphore, #tpu.memory_space<semaphore_mem>> -> memref<1x!tpu.dma_semaphore, #tpu.memory_space<semaphore_mem>>
    %867 = tpu.memref_squeeze %866 : memref<1x!tpu.dma_semaphore, #tpu.memory_space<semaphore_mem>> -> memref<!tpu.dma_semaphore, #tpu.memory_space<semaphore_mem>>
    tpu.wait_dma2 semaphore(%867 : memref<!tpu.dma_semaphore, #tpu.memory_space<semaphore_mem>>) src(%863 : memref<1x128xf32, #tpu.memory_space<any>>) dst(%865 : memref<1x128xf32, #tpu.memory_space<vmem>>)
    %c4_i32_762 = arith.constant 4 : i32
    %c1_i32_763 = arith.constant 1 : i32
    %c0_i32_764 = arith.constant 0 : i32
    %868 = tpu.memref_slice %arg4[%382, %c0_i32_764] : memref<20x128xf32, #tpu.memory_space<any>> -> memref<1x128xf32, #tpu.memory_space<any>>
    %c7_i32_765 = arith.constant 7 : i32
    %c0_i32_766 = arith.constant 0 : i32
    %869 = tpu.memref_slice %arg7[%c4_i32_762, %c7_i32_765, %c0_i32_766] : memref<8x9x128xf32, #tpu.memory_space<vmem>> -> memref<1x1x128xf32, #tpu.memory_space<vmem>>
    %870 = tpu.memref_squeeze %869 : memref<1x1x128xf32, #tpu.memory_space<vmem>> -> memref<1x128xf32, #tpu.memory_space<vmem>>
    %871 = tpu.memref_slice %arg8[%c1_i32_763] : memref<2x!tpu.dma_semaphore, #tpu.memory_space<semaphore_mem>> -> memref<1x!tpu.dma_semaphore, #tpu.memory_space<semaphore_mem>>
    %872 = tpu.memref_squeeze %871 : memref<1x!tpu.dma_semaphore, #tpu.memory_space<semaphore_mem>> -> memref<!tpu.dma_semaphore, #tpu.memory_space<semaphore_mem>>
    tpu.wait_dma2 semaphore(%872 : memref<!tpu.dma_semaphore, #tpu.memory_space<semaphore_mem>>) src(%868 : memref<1x128xf32, #tpu.memory_space<any>>) dst(%870 : memref<1x128xf32, #tpu.memory_space<vmem>>)
    %c4_i32_767 = arith.constant 4 : i32
    %c1_i32_768 = arith.constant 1 : i32
    %c0_i32_769 = arith.constant 0 : i32
    %873 = tpu.memref_slice %arg4[%390, %c0_i32_769] : memref<20x128xf32, #tpu.memory_space<any>> -> memref<1x128xf32, #tpu.memory_space<any>>
    %c8_i32_770 = arith.constant 8 : i32
    %c0_i32_771 = arith.constant 0 : i32
    %874 = tpu.memref_slice %arg7[%c4_i32_767, %c8_i32_770, %c0_i32_771] : memref<8x9x128xf32, #tpu.memory_space<vmem>> -> memref<1x1x128xf32, #tpu.memory_space<vmem>>
    %875 = tpu.memref_squeeze %874 : memref<1x1x128xf32, #tpu.memory_space<vmem>> -> memref<1x128xf32, #tpu.memory_space<vmem>>
    %876 = tpu.memref_slice %arg8[%c1_i32_768] : memref<2x!tpu.dma_semaphore, #tpu.memory_space<semaphore_mem>> -> memref<1x!tpu.dma_semaphore, #tpu.memory_space<semaphore_mem>>
    %877 = tpu.memref_squeeze %876 : memref<1x!tpu.dma_semaphore, #tpu.memory_space<semaphore_mem>> -> memref<!tpu.dma_semaphore, #tpu.memory_space<semaphore_mem>>
    tpu.wait_dma2 semaphore(%877 : memref<!tpu.dma_semaphore, #tpu.memory_space<semaphore_mem>>) src(%873 : memref<1x128xf32, #tpu.memory_space<any>>) dst(%875 : memref<1x128xf32, #tpu.memory_space<vmem>>)
    %c0_i32_772 = arith.constant 0 : i32
    %c0_i32_773 = arith.constant 0 : i32
    %878 = tpu.memref_slice %arg3[%398, %c0_i32_773] : memref<20x128xf32, #tpu.memory_space<any>> -> memref<1x128xf32, #tpu.memory_space<any>>
    %c5_i32_774 = arith.constant 5 : i32
    %c0_i32_775 = arith.constant 0 : i32
    %879 = tpu.memref_slice %arg6[%c5_i32_774, %c0_i32_775] : memref<8x128xf32, #tpu.memory_space<vmem>> -> memref<1x128xf32, #tpu.memory_space<vmem>>
    %880 = tpu.memref_slice %arg8[%c0_i32_772] : memref<2x!tpu.dma_semaphore, #tpu.memory_space<semaphore_mem>> -> memref<1x!tpu.dma_semaphore, #tpu.memory_space<semaphore_mem>>
    %881 = tpu.memref_squeeze %880 : memref<1x!tpu.dma_semaphore, #tpu.memory_space<semaphore_mem>> -> memref<!tpu.dma_semaphore, #tpu.memory_space<semaphore_mem>>
    tpu.wait_dma2 semaphore(%881 : memref<!tpu.dma_semaphore, #tpu.memory_space<semaphore_mem>>) src(%878 : memref<1x128xf32, #tpu.memory_space<any>>) dst(%879 : memref<1x128xf32, #tpu.memory_space<vmem>>)
    %c5_i32_776 = arith.constant 5 : i32
    %c1_i32_777 = arith.constant 1 : i32
    %c0_i32_778 = arith.constant 0 : i32
    %882 = tpu.memref_slice %arg4[%405, %c0_i32_778] : memref<20x128xf32, #tpu.memory_space<any>> -> memref<1x128xf32, #tpu.memory_space<any>>
    %c0_i32_779 = arith.constant 0 : i32
    %c0_i32_780 = arith.constant 0 : i32
    %883 = tpu.memref_slice %arg7[%c5_i32_776, %c0_i32_779, %c0_i32_780] : memref<8x9x128xf32, #tpu.memory_space<vmem>> -> memref<1x1x128xf32, #tpu.memory_space<vmem>>
    %884 = tpu.memref_squeeze %883 : memref<1x1x128xf32, #tpu.memory_space<vmem>> -> memref<1x128xf32, #tpu.memory_space<vmem>>
    %885 = tpu.memref_slice %arg8[%c1_i32_777] : memref<2x!tpu.dma_semaphore, #tpu.memory_space<semaphore_mem>> -> memref<1x!tpu.dma_semaphore, #tpu.memory_space<semaphore_mem>>
    %886 = tpu.memref_squeeze %885 : memref<1x!tpu.dma_semaphore, #tpu.memory_space<semaphore_mem>> -> memref<!tpu.dma_semaphore, #tpu.memory_space<semaphore_mem>>
    tpu.wait_dma2 semaphore(%886 : memref<!tpu.dma_semaphore, #tpu.memory_space<semaphore_mem>>) src(%882 : memref<1x128xf32, #tpu.memory_space<any>>) dst(%884 : memref<1x128xf32, #tpu.memory_space<vmem>>)
    %c5_i32_781 = arith.constant 5 : i32
    %c1_i32_782 = arith.constant 1 : i32
    %c0_i32_783 = arith.constant 0 : i32
    %887 = tpu.memref_slice %arg4[%413, %c0_i32_783] : memref<20x128xf32, #tpu.memory_space<any>> -> memref<1x128xf32, #tpu.memory_space<any>>
    %c1_i32_784 = arith.constant 1 : i32
    %c0_i32_785 = arith.constant 0 : i32
    %888 = tpu.memref_slice %arg7[%c5_i32_781, %c1_i32_784, %c0_i32_785] : memref<8x9x128xf32, #tpu.memory_space<vmem>> -> memref<1x1x128xf32, #tpu.memory_space<vmem>>
    %889 = tpu.memref_squeeze %888 : memref<1x1x128xf32, #tpu.memory_space<vmem>> -> memref<1x128xf32, #tpu.memory_space<vmem>>
    %890 = tpu.memref_slice %arg8[%c1_i32_782] : memref<2x!tpu.dma_semaphore, #tpu.memory_space<semaphore_mem>> -> memref<1x!tpu.dma_semaphore, #tpu.memory_space<semaphore_mem>>
    %891 = tpu.memref_squeeze %890 : memref<1x!tpu.dma_semaphore, #tpu.memory_space<semaphore_mem>> -> memref<!tpu.dma_semaphore, #tpu.memory_space<semaphore_mem>>
    tpu.wait_dma2 semaphore(%891 : memref<!tpu.dma_semaphore, #tpu.memory_space<semaphore_mem>>) src(%887 : memref<1x128xf32, #tpu.memory_space<any>>) dst(%889 : memref<1x128xf32, #tpu.memory_space<vmem>>)
    %c5_i32_786 = arith.constant 5 : i32
    %c1_i32_787 = arith.constant 1 : i32
    %c0_i32_788 = arith.constant 0 : i32
    %892 = tpu.memref_slice %arg4[%421, %c0_i32_788] : memref<20x128xf32, #tpu.memory_space<any>> -> memref<1x128xf32, #tpu.memory_space<any>>
    %c2_i32_789 = arith.constant 2 : i32
    %c0_i32_790 = arith.constant 0 : i32
    %893 = tpu.memref_slice %arg7[%c5_i32_786, %c2_i32_789, %c0_i32_790] : memref<8x9x128xf32, #tpu.memory_space<vmem>> -> memref<1x1x128xf32, #tpu.memory_space<vmem>>
    %894 = tpu.memref_squeeze %893 : memref<1x1x128xf32, #tpu.memory_space<vmem>> -> memref<1x128xf32, #tpu.memory_space<vmem>>
    %895 = tpu.memref_slice %arg8[%c1_i32_787] : memref<2x!tpu.dma_semaphore, #tpu.memory_space<semaphore_mem>> -> memref<1x!tpu.dma_semaphore, #tpu.memory_space<semaphore_mem>>
    %896 = tpu.memref_squeeze %895 : memref<1x!tpu.dma_semaphore, #tpu.memory_space<semaphore_mem>> -> memref<!tpu.dma_semaphore, #tpu.memory_space<semaphore_mem>>
    tpu.wait_dma2 semaphore(%896 : memref<!tpu.dma_semaphore, #tpu.memory_space<semaphore_mem>>) src(%892 : memref<1x128xf32, #tpu.memory_space<any>>) dst(%894 : memref<1x128xf32, #tpu.memory_space<vmem>>)
    %c5_i32_791 = arith.constant 5 : i32
    %c1_i32_792 = arith.constant 1 : i32
    %c0_i32_793 = arith.constant 0 : i32
    %897 = tpu.memref_slice %arg4[%429, %c0_i32_793] : memref<20x128xf32, #tpu.memory_space<any>> -> memref<1x128xf32, #tpu.memory_space<any>>
    %c3_i32_794 = arith.constant 3 : i32
    %c0_i32_795 = arith.constant 0 : i32
    %898 = tpu.memref_slice %arg7[%c5_i32_791, %c3_i32_794, %c0_i32_795] : memref<8x9x128xf32, #tpu.memory_space<vmem>> -> memref<1x1x128xf32, #tpu.memory_space<vmem>>
    %899 = tpu.memref_squeeze %898 : memref<1x1x128xf32, #tpu.memory_space<vmem>> -> memref<1x128xf32, #tpu.memory_space<vmem>>
    %900 = tpu.memref_slice %arg8[%c1_i32_792] : memref<2x!tpu.dma_semaphore, #tpu.memory_space<semaphore_mem>> -> memref<1x!tpu.dma_semaphore, #tpu.memory_space<semaphore_mem>>
    %901 = tpu.memref_squeeze %900 : memref<1x!tpu.dma_semaphore, #tpu.memory_space<semaphore_mem>> -> memref<!tpu.dma_semaphore, #tpu.memory_space<semaphore_mem>>
    tpu.wait_dma2 semaphore(%901 : memref<!tpu.dma_semaphore, #tpu.memory_space<semaphore_mem>>) src(%897 : memref<1x128xf32, #tpu.memory_space<any>>) dst(%899 : memref<1x128xf32, #tpu.memory_space<vmem>>)
    %c5_i32_796 = arith.constant 5 : i32
    %c1_i32_797 = arith.constant 1 : i32
    %c0_i32_798 = arith.constant 0 : i32
    %902 = tpu.memref_slice %arg4[%437, %c0_i32_798] : memref<20x128xf32, #tpu.memory_space<any>> -> memref<1x128xf32, #tpu.memory_space<any>>
    %c4_i32_799 = arith.constant 4 : i32
    %c0_i32_800 = arith.constant 0 : i32
    %903 = tpu.memref_slice %arg7[%c5_i32_796, %c4_i32_799, %c0_i32_800] : memref<8x9x128xf32, #tpu.memory_space<vmem>> -> memref<1x1x128xf32, #tpu.memory_space<vmem>>
    %904 = tpu.memref_squeeze %903 : memref<1x1x128xf32, #tpu.memory_space<vmem>> -> memref<1x128xf32, #tpu.memory_space<vmem>>
    %905 = tpu.memref_slice %arg8[%c1_i32_797] : memref<2x!tpu.dma_semaphore, #tpu.memory_space<semaphore_mem>> -> memref<1x!tpu.dma_semaphore, #tpu.memory_space<semaphore_mem>>
    %906 = tpu.memref_squeeze %905 : memref<1x!tpu.dma_semaphore, #tpu.memory_space<semaphore_mem>> -> memref<!tpu.dma_semaphore, #tpu.memory_space<semaphore_mem>>
    tpu.wait_dma2 semaphore(%906 : memref<!tpu.dma_semaphore, #tpu.memory_space<semaphore_mem>>) src(%902 : memref<1x128xf32, #tpu.memory_space<any>>) dst(%904 : memref<1x128xf32, #tpu.memory_space<vmem>>)
    %c5_i32_801 = arith.constant 5 : i32
    %c1_i32_802 = arith.constant 1 : i32
    %c0_i32_803 = arith.constant 0 : i32
    %907 = tpu.memref_slice %arg4[%445, %c0_i32_803] : memref<20x128xf32, #tpu.memory_space<any>> -> memref<1x128xf32, #tpu.memory_space<any>>
    %c5_i32_804 = arith.constant 5 : i32
    %c0_i32_805 = arith.constant 0 : i32
    %908 = tpu.memref_slice %arg7[%c5_i32_801, %c5_i32_804, %c0_i32_805] : memref<8x9x128xf32, #tpu.memory_space<vmem>> -> memref<1x1x128xf32, #tpu.memory_space<vmem>>
    %909 = tpu.memref_squeeze %908 : memref<1x1x128xf32, #tpu.memory_space<vmem>> -> memref<1x128xf32, #tpu.memory_space<vmem>>
    %910 = tpu.memref_slice %arg8[%c1_i32_802] : memref<2x!tpu.dma_semaphore, #tpu.memory_space<semaphore_mem>> -> memref<1x!tpu.dma_semaphore, #tpu.memory_space<semaphore_mem>>
    %911 = tpu.memref_squeeze %910 : memref<1x!tpu.dma_semaphore, #tpu.memory_space<semaphore_mem>> -> memref<!tpu.dma_semaphore, #tpu.memory_space<semaphore_mem>>
    tpu.wait_dma2 semaphore(%911 : memref<!tpu.dma_semaphore, #tpu.memory_space<semaphore_mem>>) src(%907 : memref<1x128xf32, #tpu.memory_space<any>>) dst(%909 : memref<1x128xf32, #tpu.memory_space<vmem>>)
    %c5_i32_806 = arith.constant 5 : i32
    %c1_i32_807 = arith.constant 1 : i32
    %c0_i32_808 = arith.constant 0 : i32
    %912 = tpu.memref_slice %arg4[%453, %c0_i32_808] : memref<20x128xf32, #tpu.memory_space<any>> -> memref<1x128xf32, #tpu.memory_space<any>>
    %c6_i32_809 = arith.constant 6 : i32
    %c0_i32_810 = arith.constant 0 : i32
    %913 = tpu.memref_slice %arg7[%c5_i32_806, %c6_i32_809, %c0_i32_810] : memref<8x9x128xf32, #tpu.memory_space<vmem>> -> memref<1x1x128xf32, #tpu.memory_space<vmem>>
    %914 = tpu.memref_squeeze %913 : memref<1x1x128xf32, #tpu.memory_space<vmem>> -> memref<1x128xf32, #tpu.memory_space<vmem>>
    %915 = tpu.memref_slice %arg8[%c1_i32_807] : memref<2x!tpu.dma_semaphore, #tpu.memory_space<semaphore_mem>> -> memref<1x!tpu.dma_semaphore, #tpu.memory_space<semaphore_mem>>
    %916 = tpu.memref_squeeze %915 : memref<1x!tpu.dma_semaphore, #tpu.memory_space<semaphore_mem>> -> memref<!tpu.dma_semaphore, #tpu.memory_space<semaphore_mem>>
    tpu.wait_dma2 semaphore(%916 : memref<!tpu.dma_semaphore, #tpu.memory_space<semaphore_mem>>) src(%912 : memref<1x128xf32, #tpu.memory_space<any>>) dst(%914 : memref<1x128xf32, #tpu.memory_space<vmem>>)
    %c5_i32_811 = arith.constant 5 : i32
    %c1_i32_812 = arith.constant 1 : i32
    %c0_i32_813 = arith.constant 0 : i32
    %917 = tpu.memref_slice %arg4[%461, %c0_i32_813] : memref<20x128xf32, #tpu.memory_space<any>> -> memref<1x128xf32, #tpu.memory_space<any>>
    %c7_i32_814 = arith.constant 7 : i32
    %c0_i32_815 = arith.constant 0 : i32
    %918 = tpu.memref_slice %arg7[%c5_i32_811, %c7_i32_814, %c0_i32_815] : memref<8x9x128xf32, #tpu.memory_space<vmem>> -> memref<1x1x128xf32, #tpu.memory_space<vmem>>
    %919 = tpu.memref_squeeze %918 : memref<1x1x128xf32, #tpu.memory_space<vmem>> -> memref<1x128xf32, #tpu.memory_space<vmem>>
    %920 = tpu.memref_slice %arg8[%c1_i32_812] : memref<2x!tpu.dma_semaphore, #tpu.memory_space<semaphore_mem>> -> memref<1x!tpu.dma_semaphore, #tpu.memory_space<semaphore_mem>>
    %921 = tpu.memref_squeeze %920 : memref<1x!tpu.dma_semaphore, #tpu.memory_space<semaphore_mem>> -> memref<!tpu.dma_semaphore, #tpu.memory_space<semaphore_mem>>
    tpu.wait_dma2 semaphore(%921 : memref<!tpu.dma_semaphore, #tpu.memory_space<semaphore_mem>>) src(%917 : memref<1x128xf32, #tpu.memory_space<any>>) dst(%919 : memref<1x128xf32, #tpu.memory_space<vmem>>)
    %c5_i32_816 = arith.constant 5 : i32
    %c1_i32_817 = arith.constant 1 : i32
    %c0_i32_818 = arith.constant 0 : i32
    %922 = tpu.memref_slice %arg4[%469, %c0_i32_818] : memref<20x128xf32, #tpu.memory_space<any>> -> memref<1x128xf32, #tpu.memory_space<any>>
    %c8_i32_819 = arith.constant 8 : i32
    %c0_i32_820 = arith.constant 0 : i32
    %923 = tpu.memref_slice %arg7[%c5_i32_816, %c8_i32_819, %c0_i32_820] : memref<8x9x128xf32, #tpu.memory_space<vmem>> -> memref<1x1x128xf32, #tpu.memory_space<vmem>>
    %924 = tpu.memref_squeeze %923 : memref<1x1x128xf32, #tpu.memory_space<vmem>> -> memref<1x128xf32, #tpu.memory_space<vmem>>
    %925 = tpu.memref_slice %arg8[%c1_i32_817] : memref<2x!tpu.dma_semaphore, #tpu.memory_space<semaphore_mem>> -> memref<1x!tpu.dma_semaphore, #tpu.memory_space<semaphore_mem>>
    %926 = tpu.memref_squeeze %925 : memref<1x!tpu.dma_semaphore, #tpu.memory_space<semaphore_mem>> -> memref<!tpu.dma_semaphore, #tpu.memory_space<semaphore_mem>>
    tpu.wait_dma2 semaphore(%926 : memref<!tpu.dma_semaphore, #tpu.memory_space<semaphore_mem>>) src(%922 : memref<1x128xf32, #tpu.memory_space<any>>) dst(%924 : memref<1x128xf32, #tpu.memory_space<vmem>>)
    %c0_i32_821 = arith.constant 0 : i32
    %c0_i32_822 = arith.constant 0 : i32
    %927 = tpu.memref_slice %arg3[%477, %c0_i32_822] : memref<20x128xf32, #tpu.memory_space<any>> -> memref<1x128xf32, #tpu.memory_space<any>>
    %c6_i32_823 = arith.constant 6 : i32
    %c0_i32_824 = arith.constant 0 : i32
    %928 = tpu.memref_slice %arg6[%c6_i32_823, %c0_i32_824] : memref<8x128xf32, #tpu.memory_space<vmem>> -> memref<1x128xf32, #tpu.memory_space<vmem>>
    %929 = tpu.memref_slice %arg8[%c0_i32_821] : memref<2x!tpu.dma_semaphore, #tpu.memory_space<semaphore_mem>> -> memref<1x!tpu.dma_semaphore, #tpu.memory_space<semaphore_mem>>
    %930 = tpu.memref_squeeze %929 : memref<1x!tpu.dma_semaphore, #tpu.memory_space<semaphore_mem>> -> memref<!tpu.dma_semaphore, #tpu.memory_space<semaphore_mem>>
    tpu.wait_dma2 semaphore(%930 : memref<!tpu.dma_semaphore, #tpu.memory_space<semaphore_mem>>) src(%927 : memref<1x128xf32, #tpu.memory_space<any>>) dst(%928 : memref<1x128xf32, #tpu.memory_space<vmem>>)
    %c6_i32_825 = arith.constant 6 : i32
    %c1_i32_826 = arith.constant 1 : i32
    %c0_i32_827 = arith.constant 0 : i32
    %931 = tpu.memref_slice %arg4[%484, %c0_i32_827] : memref<20x128xf32, #tpu.memory_space<any>> -> memref<1x128xf32, #tpu.memory_space<any>>
    %c0_i32_828 = arith.constant 0 : i32
    %c0_i32_829 = arith.constant 0 : i32
    %932 = tpu.memref_slice %arg7[%c6_i32_825, %c0_i32_828, %c0_i32_829] : memref<8x9x128xf32, #tpu.memory_space<vmem>> -> memref<1x1x128xf32, #tpu.memory_space<vmem>>
    %933 = tpu.memref_squeeze %932 : memref<1x1x128xf32, #tpu.memory_space<vmem>> -> memref<1x128xf32, #tpu.memory_space<vmem>>
    %934 = tpu.memref_slice %arg8[%c1_i32_826] : memref<2x!tpu.dma_semaphore, #tpu.memory_space<semaphore_mem>> -> memref<1x!tpu.dma_semaphore, #tpu.memory_space<semaphore_mem>>
    %935 = tpu.memref_squeeze %934 : memref<1x!tpu.dma_semaphore, #tpu.memory_space<semaphore_mem>> -> memref<!tpu.dma_semaphore, #tpu.memory_space<semaphore_mem>>
    tpu.wait_dma2 semaphore(%935 : memref<!tpu.dma_semaphore, #tpu.memory_space<semaphore_mem>>) src(%931 : memref<1x128xf32, #tpu.memory_space<any>>) dst(%933 : memref<1x128xf32, #tpu.memory_space<vmem>>)
    %c6_i32_830 = arith.constant 6 : i32
    %c1_i32_831 = arith.constant 1 : i32
    %c0_i32_832 = arith.constant 0 : i32
    %936 = tpu.memref_slice %arg4[%492, %c0_i32_832] : memref<20x128xf32, #tpu.memory_space<any>> -> memref<1x128xf32, #tpu.memory_space<any>>
    %c1_i32_833 = arith.constant 1 : i32
    %c0_i32_834 = arith.constant 0 : i32
    %937 = tpu.memref_slice %arg7[%c6_i32_830, %c1_i32_833, %c0_i32_834] : memref<8x9x128xf32, #tpu.memory_space<vmem>> -> memref<1x1x128xf32, #tpu.memory_space<vmem>>
    %938 = tpu.memref_squeeze %937 : memref<1x1x128xf32, #tpu.memory_space<vmem>> -> memref<1x128xf32, #tpu.memory_space<vmem>>
    %939 = tpu.memref_slice %arg8[%c1_i32_831] : memref<2x!tpu.dma_semaphore, #tpu.memory_space<semaphore_mem>> -> memref<1x!tpu.dma_semaphore, #tpu.memory_space<semaphore_mem>>
    %940 = tpu.memref_squeeze %939 : memref<1x!tpu.dma_semaphore, #tpu.memory_space<semaphore_mem>> -> memref<!tpu.dma_semaphore, #tpu.memory_space<semaphore_mem>>
    tpu.wait_dma2 semaphore(%940 : memref<!tpu.dma_semaphore, #tpu.memory_space<semaphore_mem>>) src(%936 : memref<1x128xf32, #tpu.memory_space<any>>) dst(%938 : memref<1x128xf32, #tpu.memory_space<vmem>>)
    %c6_i32_835 = arith.constant 6 : i32
    %c1_i32_836 = arith.constant 1 : i32
    %c0_i32_837 = arith.constant 0 : i32
    %941 = tpu.memref_slice %arg4[%500, %c0_i32_837] : memref<20x128xf32, #tpu.memory_space<any>> -> memref<1x128xf32, #tpu.memory_space<any>>
    %c2_i32_838 = arith.constant 2 : i32
    %c0_i32_839 = arith.constant 0 : i32
    %942 = tpu.memref_slice %arg7[%c6_i32_835, %c2_i32_838, %c0_i32_839] : memref<8x9x128xf32, #tpu.memory_space<vmem>> -> memref<1x1x128xf32, #tpu.memory_space<vmem>>
    %943 = tpu.memref_squeeze %942 : memref<1x1x128xf32, #tpu.memory_space<vmem>> -> memref<1x128xf32, #tpu.memory_space<vmem>>
    %944 = tpu.memref_slice %arg8[%c1_i32_836] : memref<2x!tpu.dma_semaphore, #tpu.memory_space<semaphore_mem>> -> memref<1x!tpu.dma_semaphore, #tpu.memory_space<semaphore_mem>>
    %945 = tpu.memref_squeeze %944 : memref<1x!tpu.dma_semaphore, #tpu.memory_space<semaphore_mem>> -> memref<!tpu.dma_semaphore, #tpu.memory_space<semaphore_mem>>
    tpu.wait_dma2 semaphore(%945 : memref<!tpu.dma_semaphore, #tpu.memory_space<semaphore_mem>>) src(%941 : memref<1x128xf32, #tpu.memory_space<any>>) dst(%943 : memref<1x128xf32, #tpu.memory_space<vmem>>)
    %c6_i32_840 = arith.constant 6 : i32
    %c1_i32_841 = arith.constant 1 : i32
    %c0_i32_842 = arith.constant 0 : i32
    %946 = tpu.memref_slice %arg4[%508, %c0_i32_842] : memref<20x128xf32, #tpu.memory_space<any>> -> memref<1x128xf32, #tpu.memory_space<any>>
    %c3_i32_843 = arith.constant 3 : i32
    %c0_i32_844 = arith.constant 0 : i32
    %947 = tpu.memref_slice %arg7[%c6_i32_840, %c3_i32_843, %c0_i32_844] : memref<8x9x128xf32, #tpu.memory_space<vmem>> -> memref<1x1x128xf32, #tpu.memory_space<vmem>>
    %948 = tpu.memref_squeeze %947 : memref<1x1x128xf32, #tpu.memory_space<vmem>> -> memref<1x128xf32, #tpu.memory_space<vmem>>
    %949 = tpu.memref_slice %arg8[%c1_i32_841] : memref<2x!tpu.dma_semaphore, #tpu.memory_space<semaphore_mem>> -> memref<1x!tpu.dma_semaphore, #tpu.memory_space<semaphore_mem>>
    %950 = tpu.memref_squeeze %949 : memref<1x!tpu.dma_semaphore, #tpu.memory_space<semaphore_mem>> -> memref<!tpu.dma_semaphore, #tpu.memory_space<semaphore_mem>>
    tpu.wait_dma2 semaphore(%950 : memref<!tpu.dma_semaphore, #tpu.memory_space<semaphore_mem>>) src(%946 : memref<1x128xf32, #tpu.memory_space<any>>) dst(%948 : memref<1x128xf32, #tpu.memory_space<vmem>>)
    %c6_i32_845 = arith.constant 6 : i32
    %c1_i32_846 = arith.constant 1 : i32
    %c0_i32_847 = arith.constant 0 : i32
    %951 = tpu.memref_slice %arg4[%516, %c0_i32_847] : memref<20x128xf32, #tpu.memory_space<any>> -> memref<1x128xf32, #tpu.memory_space<any>>
    %c4_i32_848 = arith.constant 4 : i32
    %c0_i32_849 = arith.constant 0 : i32
    %952 = tpu.memref_slice %arg7[%c6_i32_845, %c4_i32_848, %c0_i32_849] : memref<8x9x128xf32, #tpu.memory_space<vmem>> -> memref<1x1x128xf32, #tpu.memory_space<vmem>>
    %953 = tpu.memref_squeeze %952 : memref<1x1x128xf32, #tpu.memory_space<vmem>> -> memref<1x128xf32, #tpu.memory_space<vmem>>
    %954 = tpu.memref_slice %arg8[%c1_i32_846] : memref<2x!tpu.dma_semaphore, #tpu.memory_space<semaphore_mem>> -> memref<1x!tpu.dma_semaphore, #tpu.memory_space<semaphore_mem>>
    %955 = tpu.memref_squeeze %954 : memref<1x!tpu.dma_semaphore, #tpu.memory_space<semaphore_mem>> -> memref<!tpu.dma_semaphore, #tpu.memory_space<semaphore_mem>>
    tpu.wait_dma2 semaphore(%955 : memref<!tpu.dma_semaphore, #tpu.memory_space<semaphore_mem>>) src(%951 : memref<1x128xf32, #tpu.memory_space<any>>) dst(%953 : memref<1x128xf32, #tpu.memory_space<vmem>>)
    %c6_i32_850 = arith.constant 6 : i32
    %c1_i32_851 = arith.constant 1 : i32
    %c0_i32_852 = arith.constant 0 : i32
    %956 = tpu.memref_slice %arg4[%524, %c0_i32_852] : memref<20x128xf32, #tpu.memory_space<any>> -> memref<1x128xf32, #tpu.memory_space<any>>
    %c5_i32_853 = arith.constant 5 : i32
    %c0_i32_854 = arith.constant 0 : i32
    %957 = tpu.memref_slice %arg7[%c6_i32_850, %c5_i32_853, %c0_i32_854] : memref<8x9x128xf32, #tpu.memory_space<vmem>> -> memref<1x1x128xf32, #tpu.memory_space<vmem>>
    %958 = tpu.memref_squeeze %957 : memref<1x1x128xf32, #tpu.memory_space<vmem>> -> memref<1x128xf32, #tpu.memory_space<vmem>>
    %959 = tpu.memref_slice %arg8[%c1_i32_851] : memref<2x!tpu.dma_semaphore, #tpu.memory_space<semaphore_mem>> -> memref<1x!tpu.dma_semaphore, #tpu.memory_space<semaphore_mem>>
    %960 = tpu.memref_squeeze %959 : memref<1x!tpu.dma_semaphore, #tpu.memory_space<semaphore_mem>> -> memref<!tpu.dma_semaphore, #tpu.memory_space<semaphore_mem>>
    tpu.wait_dma2 semaphore(%960 : memref<!tpu.dma_semaphore, #tpu.memory_space<semaphore_mem>>) src(%956 : memref<1x128xf32, #tpu.memory_space<any>>) dst(%958 : memref<1x128xf32, #tpu.memory_space<vmem>>)
    %c6_i32_855 = arith.constant 6 : i32
    %c1_i32_856 = arith.constant 1 : i32
    %c0_i32_857 = arith.constant 0 : i32
    %961 = tpu.memref_slice %arg4[%532, %c0_i32_857] : memref<20x128xf32, #tpu.memory_space<any>> -> memref<1x128xf32, #tpu.memory_space<any>>
    %c6_i32_858 = arith.constant 6 : i32
    %c0_i32_859 = arith.constant 0 : i32
    %962 = tpu.memref_slice %arg7[%c6_i32_855, %c6_i32_858, %c0_i32_859] : memref<8x9x128xf32, #tpu.memory_space<vmem>> -> memref<1x1x128xf32, #tpu.memory_space<vmem>>
    %963 = tpu.memref_squeeze %962 : memref<1x1x128xf32, #tpu.memory_space<vmem>> -> memref<1x128xf32, #tpu.memory_space<vmem>>
    %964 = tpu.memref_slice %arg8[%c1_i32_856] : memref<2x!tpu.dma_semaphore, #tpu.memory_space<semaphore_mem>> -> memref<1x!tpu.dma_semaphore, #tpu.memory_space<semaphore_mem>>
    %965 = tpu.memref_squeeze %964 : memref<1x!tpu.dma_semaphore, #tpu.memory_space<semaphore_mem>> -> memref<!tpu.dma_semaphore, #tpu.memory_space<semaphore_mem>>
    tpu.wait_dma2 semaphore(%965 : memref<!tpu.dma_semaphore, #tpu.memory_space<semaphore_mem>>) src(%961 : memref<1x128xf32, #tpu.memory_space<any>>) dst(%963 : memref<1x128xf32, #tpu.memory_space<vmem>>)
    %c6_i32_860 = arith.constant 6 : i32
    %c1_i32_861 = arith.constant 1 : i32
    %c0_i32_862 = arith.constant 0 : i32
    %966 = tpu.memref_slice %arg4[%540, %c0_i32_862] : memref<20x128xf32, #tpu.memory_space<any>> -> memref<1x128xf32, #tpu.memory_space<any>>
    %c7_i32_863 = arith.constant 7 : i32
    %c0_i32_864 = arith.constant 0 : i32
    %967 = tpu.memref_slice %arg7[%c6_i32_860, %c7_i32_863, %c0_i32_864] : memref<8x9x128xf32, #tpu.memory_space<vmem>> -> memref<1x1x128xf32, #tpu.memory_space<vmem>>
    %968 = tpu.memref_squeeze %967 : memref<1x1x128xf32, #tpu.memory_space<vmem>> -> memref<1x128xf32, #tpu.memory_space<vmem>>
    %969 = tpu.memref_slice %arg8[%c1_i32_861] : memref<2x!tpu.dma_semaphore, #tpu.memory_space<semaphore_mem>> -> memref<1x!tpu.dma_semaphore, #tpu.memory_space<semaphore_mem>>
    %970 = tpu.memref_squeeze %969 : memref<1x!tpu.dma_semaphore, #tpu.memory_space<semaphore_mem>> -> memref<!tpu.dma_semaphore, #tpu.memory_space<semaphore_mem>>
    tpu.wait_dma2 semaphore(%970 : memref<!tpu.dma_semaphore, #tpu.memory_space<semaphore_mem>>) src(%966 : memref<1x128xf32, #tpu.memory_space<any>>) dst(%968 : memref<1x128xf32, #tpu.memory_space<vmem>>)
    %c6_i32_865 = arith.constant 6 : i32
    %c1_i32_866 = arith.constant 1 : i32
    %c0_i32_867 = arith.constant 0 : i32
    %971 = tpu.memref_slice %arg4[%548, %c0_i32_867] : memref<20x128xf32, #tpu.memory_space<any>> -> memref<1x128xf32, #tpu.memory_space<any>>
    %c8_i32_868 = arith.constant 8 : i32
    %c0_i32_869 = arith.constant 0 : i32
    %972 = tpu.memref_slice %arg7[%c6_i32_865, %c8_i32_868, %c0_i32_869] : memref<8x9x128xf32, #tpu.memory_space<vmem>> -> memref<1x1x128xf32, #tpu.memory_space<vmem>>
    %973 = tpu.memref_squeeze %972 : memref<1x1x128xf32, #tpu.memory_space<vmem>> -> memref<1x128xf32, #tpu.memory_space<vmem>>
    %974 = tpu.memref_slice %arg8[%c1_i32_866] : memref<2x!tpu.dma_semaphore, #tpu.memory_space<semaphore_mem>> -> memref<1x!tpu.dma_semaphore, #tpu.memory_space<semaphore_mem>>
    %975 = tpu.memref_squeeze %974 : memref<1x!tpu.dma_semaphore, #tpu.memory_space<semaphore_mem>> -> memref<!tpu.dma_semaphore, #tpu.memory_space<semaphore_mem>>
    tpu.wait_dma2 semaphore(%975 : memref<!tpu.dma_semaphore, #tpu.memory_space<semaphore_mem>>) src(%971 : memref<1x128xf32, #tpu.memory_space<any>>) dst(%973 : memref<1x128xf32, #tpu.memory_space<vmem>>)
    %c0_i32_870 = arith.constant 0 : i32
    %c0_i32_871 = arith.constant 0 : i32
    %976 = tpu.memref_slice %arg3[%556, %c0_i32_871] : memref<20x128xf32, #tpu.memory_space<any>> -> memref<1x128xf32, #tpu.memory_space<any>>
    %c7_i32_872 = arith.constant 7 : i32
    %c0_i32_873 = arith.constant 0 : i32
    %977 = tpu.memref_slice %arg6[%c7_i32_872, %c0_i32_873] : memref<8x128xf32, #tpu.memory_space<vmem>> -> memref<1x128xf32, #tpu.memory_space<vmem>>
    %978 = tpu.memref_slice %arg8[%c0_i32_870] : memref<2x!tpu.dma_semaphore, #tpu.memory_space<semaphore_mem>> -> memref<1x!tpu.dma_semaphore, #tpu.memory_space<semaphore_mem>>
    %979 = tpu.memref_squeeze %978 : memref<1x!tpu.dma_semaphore, #tpu.memory_space<semaphore_mem>> -> memref<!tpu.dma_semaphore, #tpu.memory_space<semaphore_mem>>
    tpu.wait_dma2 semaphore(%979 : memref<!tpu.dma_semaphore, #tpu.memory_space<semaphore_mem>>) src(%976 : memref<1x128xf32, #tpu.memory_space<any>>) dst(%977 : memref<1x128xf32, #tpu.memory_space<vmem>>)
    %c7_i32_874 = arith.constant 7 : i32
    %c1_i32_875 = arith.constant 1 : i32
    %c0_i32_876 = arith.constant 0 : i32
    %980 = tpu.memref_slice %arg4[%563, %c0_i32_876] : memref<20x128xf32, #tpu.memory_space<any>> -> memref<1x128xf32, #tpu.memory_space<any>>
    %c0_i32_877 = arith.constant 0 : i32
    %c0_i32_878 = arith.constant 0 : i32
    %981 = tpu.memref_slice %arg7[%c7_i32_874, %c0_i32_877, %c0_i32_878] : memref<8x9x128xf32, #tpu.memory_space<vmem>> -> memref<1x1x128xf32, #tpu.memory_space<vmem>>
    %982 = tpu.memref_squeeze %981 : memref<1x1x128xf32, #tpu.memory_space<vmem>> -> memref<1x128xf32, #tpu.memory_space<vmem>>
    %983 = tpu.memref_slice %arg8[%c1_i32_875] : memref<2x!tpu.dma_semaphore, #tpu.memory_space<semaphore_mem>> -> memref<1x!tpu.dma_semaphore, #tpu.memory_space<semaphore_mem>>
    %984 = tpu.memref_squeeze %983 : memref<1x!tpu.dma_semaphore, #tpu.memory_space<semaphore_mem>> -> memref<!tpu.dma_semaphore, #tpu.memory_space<semaphore_mem>>
    tpu.wait_dma2 semaphore(%984 : memref<!tpu.dma_semaphore, #tpu.memory_space<semaphore_mem>>) src(%980 : memref<1x128xf32, #tpu.memory_space<any>>) dst(%982 : memref<1x128xf32, #tpu.memory_space<vmem>>)
    %c7_i32_879 = arith.constant 7 : i32
    %c1_i32_880 = arith.constant 1 : i32
    %c0_i32_881 = arith.constant 0 : i32
    %985 = tpu.memref_slice %arg4[%571, %c0_i32_881] : memref<20x128xf32, #tpu.memory_space<any>> -> memref<1x128xf32, #tpu.memory_space<any>>
    %c1_i32_882 = arith.constant 1 : i32
    %c0_i32_883 = arith.constant 0 : i32
    %986 = tpu.memref_slice %arg7[%c7_i32_879, %c1_i32_882, %c0_i32_883] : memref<8x9x128xf32, #tpu.memory_space<vmem>> -> memref<1x1x128xf32, #tpu.memory_space<vmem>>
    %987 = tpu.memref_squeeze %986 : memref<1x1x128xf32, #tpu.memory_space<vmem>> -> memref<1x128xf32, #tpu.memory_space<vmem>>
    %988 = tpu.memref_slice %arg8[%c1_i32_880] : memref<2x!tpu.dma_semaphore, #tpu.memory_space<semaphore_mem>> -> memref<1x!tpu.dma_semaphore, #tpu.memory_space<semaphore_mem>>
    %989 = tpu.memref_squeeze %988 : memref<1x!tpu.dma_semaphore, #tpu.memory_space<semaphore_mem>> -> memref<!tpu.dma_semaphore, #tpu.memory_space<semaphore_mem>>
    tpu.wait_dma2 semaphore(%989 : memref<!tpu.dma_semaphore, #tpu.memory_space<semaphore_mem>>) src(%985 : memref<1x128xf32, #tpu.memory_space<any>>) dst(%987 : memref<1x128xf32, #tpu.memory_space<vmem>>)
    %c7_i32_884 = arith.constant 7 : i32
    %c1_i32_885 = arith.constant 1 : i32
    %c0_i32_886 = arith.constant 0 : i32
    %990 = tpu.memref_slice %arg4[%579, %c0_i32_886] : memref<20x128xf32, #tpu.memory_space<any>> -> memref<1x128xf32, #tpu.memory_space<any>>
    %c2_i32_887 = arith.constant 2 : i32
    %c0_i32_888 = arith.constant 0 : i32
    %991 = tpu.memref_slice %arg7[%c7_i32_884, %c2_i32_887, %c0_i32_888] : memref<8x9x128xf32, #tpu.memory_space<vmem>> -> memref<1x1x128xf32, #tpu.memory_space<vmem>>
    %992 = tpu.memref_squeeze %991 : memref<1x1x128xf32, #tpu.memory_space<vmem>> -> memref<1x128xf32, #tpu.memory_space<vmem>>
    %993 = tpu.memref_slice %arg8[%c1_i32_885] : memref<2x!tpu.dma_semaphore, #tpu.memory_space<semaphore_mem>> -> memref<1x!tpu.dma_semaphore, #tpu.memory_space<semaphore_mem>>
    %994 = tpu.memref_squeeze %993 : memref<1x!tpu.dma_semaphore, #tpu.memory_space<semaphore_mem>> -> memref<!tpu.dma_semaphore, #tpu.memory_space<semaphore_mem>>
    tpu.wait_dma2 semaphore(%994 : memref<!tpu.dma_semaphore, #tpu.memory_space<semaphore_mem>>) src(%990 : memref<1x128xf32, #tpu.memory_space<any>>) dst(%992 : memref<1x128xf32, #tpu.memory_space<vmem>>)
    %c7_i32_889 = arith.constant 7 : i32
    %c1_i32_890 = arith.constant 1 : i32
    %c0_i32_891 = arith.constant 0 : i32
    %995 = tpu.memref_slice %arg4[%587, %c0_i32_891] : memref<20x128xf32, #tpu.memory_space<any>> -> memref<1x128xf32, #tpu.memory_space<any>>
    %c3_i32_892 = arith.constant 3 : i32
    %c0_i32_893 = arith.constant 0 : i32
    %996 = tpu.memref_slice %arg7[%c7_i32_889, %c3_i32_892, %c0_i32_893] : memref<8x9x128xf32, #tpu.memory_space<vmem>> -> memref<1x1x128xf32, #tpu.memory_space<vmem>>
    %997 = tpu.memref_squeeze %996 : memref<1x1x128xf32, #tpu.memory_space<vmem>> -> memref<1x128xf32, #tpu.memory_space<vmem>>
    %998 = tpu.memref_slice %arg8[%c1_i32_890] : memref<2x!tpu.dma_semaphore, #tpu.memory_space<semaphore_mem>> -> memref<1x!tpu.dma_semaphore, #tpu.memory_space<semaphore_mem>>
    %999 = tpu.memref_squeeze %998 : memref<1x!tpu.dma_semaphore, #tpu.memory_space<semaphore_mem>> -> memref<!tpu.dma_semaphore, #tpu.memory_space<semaphore_mem>>
    tpu.wait_dma2 semaphore(%999 : memref<!tpu.dma_semaphore, #tpu.memory_space<semaphore_mem>>) src(%995 : memref<1x128xf32, #tpu.memory_space<any>>) dst(%997 : memref<1x128xf32, #tpu.memory_space<vmem>>)
    %c7_i32_894 = arith.constant 7 : i32
    %c1_i32_895 = arith.constant 1 : i32
    %c0_i32_896 = arith.constant 0 : i32
    %1000 = tpu.memref_slice %arg4[%595, %c0_i32_896] : memref<20x128xf32, #tpu.memory_space<any>> -> memref<1x128xf32, #tpu.memory_space<any>>
    %c4_i32_897 = arith.constant 4 : i32
    %c0_i32_898 = arith.constant 0 : i32
    %1001 = tpu.memref_slice %arg7[%c7_i32_894, %c4_i32_897, %c0_i32_898] : memref<8x9x128xf32, #tpu.memory_space<vmem>> -> memref<1x1x128xf32, #tpu.memory_space<vmem>>
    %1002 = tpu.memref_squeeze %1001 : memref<1x1x128xf32, #tpu.memory_space<vmem>> -> memref<1x128xf32, #tpu.memory_space<vmem>>
    %1003 = tpu.memref_slice %arg8[%c1_i32_895] : memref<2x!tpu.dma_semaphore, #tpu.memory_space<semaphore_mem>> -> memref<1x!tpu.dma_semaphore, #tpu.memory_space<semaphore_mem>>
    %1004 = tpu.memref_squeeze %1003 : memref<1x!tpu.dma_semaphore, #tpu.memory_space<semaphore_mem>> -> memref<!tpu.dma_semaphore, #tpu.memory_space<semaphore_mem>>
    tpu.wait_dma2 semaphore(%1004 : memref<!tpu.dma_semaphore, #tpu.memory_space<semaphore_mem>>) src(%1000 : memref<1x128xf32, #tpu.memory_space<any>>) dst(%1002 : memref<1x128xf32, #tpu.memory_space<vmem>>)
    %c7_i32_899 = arith.constant 7 : i32
    %c1_i32_900 = arith.constant 1 : i32
    %c0_i32_901 = arith.constant 0 : i32
    %1005 = tpu.memref_slice %arg4[%603, %c0_i32_901] : memref<20x128xf32, #tpu.memory_space<any>> -> memref<1x128xf32, #tpu.memory_space<any>>
    %c5_i32_902 = arith.constant 5 : i32
    %c0_i32_903 = arith.constant 0 : i32
    %1006 = tpu.memref_slice %arg7[%c7_i32_899, %c5_i32_902, %c0_i32_903] : memref<8x9x128xf32, #tpu.memory_space<vmem>> -> memref<1x1x128xf32, #tpu.memory_space<vmem>>
    %1007 = tpu.memref_squeeze %1006 : memref<1x1x128xf32, #tpu.memory_space<vmem>> -> memref<1x128xf32, #tpu.memory_space<vmem>>
    %1008 = tpu.memref_slice %arg8[%c1_i32_900] : memref<2x!tpu.dma_semaphore, #tpu.memory_space<semaphore_mem>> -> memref<1x!tpu.dma_semaphore, #tpu.memory_space<semaphore_mem>>
    %1009 = tpu.memref_squeeze %1008 : memref<1x!tpu.dma_semaphore, #tpu.memory_space<semaphore_mem>> -> memref<!tpu.dma_semaphore, #tpu.memory_space<semaphore_mem>>
    tpu.wait_dma2 semaphore(%1009 : memref<!tpu.dma_semaphore, #tpu.memory_space<semaphore_mem>>) src(%1005 : memref<1x128xf32, #tpu.memory_space<any>>) dst(%1007 : memref<1x128xf32, #tpu.memory_space<vmem>>)
    %c7_i32_904 = arith.constant 7 : i32
    %c1_i32_905 = arith.constant 1 : i32
    %c0_i32_906 = arith.constant 0 : i32
    %1010 = tpu.memref_slice %arg4[%611, %c0_i32_906] : memref<20x128xf32, #tpu.memory_space<any>> -> memref<1x128xf32, #tpu.memory_space<any>>
    %c6_i32_907 = arith.constant 6 : i32
    %c0_i32_908 = arith.constant 0 : i32
    %1011 = tpu.memref_slice %arg7[%c7_i32_904, %c6_i32_907, %c0_i32_908] : memref<8x9x128xf32, #tpu.memory_space<vmem>> -> memref<1x1x128xf32, #tpu.memory_space<vmem>>
    %1012 = tpu.memref_squeeze %1011 : memref<1x1x128xf32, #tpu.memory_space<vmem>> -> memref<1x128xf32, #tpu.memory_space<vmem>>
    %1013 = tpu.memref_slice %arg8[%c1_i32_905] : memref<2x!tpu.dma_semaphore, #tpu.memory_space<semaphore_mem>> -> memref<1x!tpu.dma_semaphore, #tpu.memory_space<semaphore_mem>>
    %1014 = tpu.memref_squeeze %1013 : memref<1x!tpu.dma_semaphore, #tpu.memory_space<semaphore_mem>> -> memref<!tpu.dma_semaphore, #tpu.memory_space<semaphore_mem>>
    tpu.wait_dma2 semaphore(%1014 : memref<!tpu.dma_semaphore, #tpu.memory_space<semaphore_mem>>) src(%1010 : memref<1x128xf32, #tpu.memory_space<any>>) dst(%1012 : memref<1x128xf32, #tpu.memory_space<vmem>>)
    %c7_i32_909 = arith.constant 7 : i32
    %c1_i32_910 = arith.constant 1 : i32
    %c0_i32_911 = arith.constant 0 : i32
    %1015 = tpu.memref_slice %arg4[%619, %c0_i32_911] : memref<20x128xf32, #tpu.memory_space<any>> -> memref<1x128xf32, #tpu.memory_space<any>>
    %c7_i32_912 = arith.constant 7 : i32
    %c0_i32_913 = arith.constant 0 : i32
    %1016 = tpu.memref_slice %arg7[%c7_i32_909, %c7_i32_912, %c0_i32_913] : memref<8x9x128xf32, #tpu.memory_space<vmem>> -> memref<1x1x128xf32, #tpu.memory_space<vmem>>
    %1017 = tpu.memref_squeeze %1016 : memref<1x1x128xf32, #tpu.memory_space<vmem>> -> memref<1x128xf32, #tpu.memory_space<vmem>>
    %1018 = tpu.memref_slice %arg8[%c1_i32_910] : memref<2x!tpu.dma_semaphore, #tpu.memory_space<semaphore_mem>> -> memref<1x!tpu.dma_semaphore, #tpu.memory_space<semaphore_mem>>
    %1019 = tpu.memref_squeeze %1018 : memref<1x!tpu.dma_semaphore, #tpu.memory_space<semaphore_mem>> -> memref<!tpu.dma_semaphore, #tpu.memory_space<semaphore_mem>>
    tpu.wait_dma2 semaphore(%1019 : memref<!tpu.dma_semaphore, #tpu.memory_space<semaphore_mem>>) src(%1015 : memref<1x128xf32, #tpu.memory_space<any>>) dst(%1017 : memref<1x128xf32, #tpu.memory_space<vmem>>)
    %c7_i32_914 = arith.constant 7 : i32
    %c1_i32_915 = arith.constant 1 : i32
    %c0_i32_916 = arith.constant 0 : i32
    %1020 = tpu.memref_slice %arg4[%627, %c0_i32_916] : memref<20x128xf32, #tpu.memory_space<any>> -> memref<1x128xf32, #tpu.memory_space<any>>
    %c8_i32_917 = arith.constant 8 : i32
    %c0_i32_918 = arith.constant 0 : i32
    %1021 = tpu.memref_slice %arg7[%c7_i32_914, %c8_i32_917, %c0_i32_918] : memref<8x9x128xf32, #tpu.memory_space<vmem>> -> memref<1x1x128xf32, #tpu.memory_space<vmem>>
    %1022 = tpu.memref_squeeze %1021 : memref<1x1x128xf32, #tpu.memory_space<vmem>> -> memref<1x128xf32, #tpu.memory_space<vmem>>
    %1023 = tpu.memref_slice %arg8[%c1_i32_915] : memref<2x!tpu.dma_semaphore, #tpu.memory_space<semaphore_mem>> -> memref<1x!tpu.dma_semaphore, #tpu.memory_space<semaphore_mem>>
    %1024 = tpu.memref_squeeze %1023 : memref<1x!tpu.dma_semaphore, #tpu.memory_space<semaphore_mem>> -> memref<!tpu.dma_semaphore, #tpu.memory_space<semaphore_mem>>
    tpu.wait_dma2 semaphore(%1024 : memref<!tpu.dma_semaphore, #tpu.memory_space<semaphore_mem>>) src(%1020 : memref<1x128xf32, #tpu.memory_space<any>>) dst(%1022 : memref<1x128xf32, #tpu.memory_space<vmem>>)
    %c0_919 = arith.constant 0 : index
    %c0_920 = arith.constant 0 : index
    %1025 = vector.load %arg6[%c0_919, %c0_920] : memref<8x128xf32, #tpu.memory_space<vmem>>, vector<8x128xf32>
    %c0_921 = arith.constant 0 : index
    %c0_922 = arith.constant 0 : index
    %c0_923 = arith.constant 0 : index
    %1026 = vector.load %arg7[%c0_921, %c0_922, %c0_923] : memref<8x9x128xf32, #tpu.memory_space<vmem>>, vector<8x9x128xf32>
    %1027 = vector.shape_cast %1025 : vector<8x128xf32> to vector<8x1x128xf32>
    %1028 = vector.broadcast %1027 : vector<8x1x128xf32> to vector<8x9x128xf32>
    %1029 = arith.mulf %1028, %1026 : vector<8x9x128xf32>
    %cst = arith.constant dense<0.000000e+00> : vector<8x9xf32>
    %1030 = vector.multi_reduction <add>, %1029, %cst [2] : vector<8x9x128xf32> to vector<8x9xf32>
    %cst_924 = arith.constant 0.000000e+00 : f32
    %1031 = vector.broadcast %cst_924 : f32 to vector<8x119xf32>
    %1032 = tpu.concatenate %1030, %1031 in 1 : vector<8x9xf32>, vector<8x119xf32> -> vector<8x128xf32>
    %c0_925 = arith.constant 0 : index
    %c0_926 = arith.constant 0 : index
    %1033 = vector.load %arg5[%c0_925, %c0_926] : memref<8x128xf32, #tpu.memory_space<vmem>>, vector<8x128xf32>
    tpu.vector_store %arg5[%c0_925, %c0_926], %1032 {strides = array<i32>} : memref<8x128xf32, #tpu.memory_space<vmem>>, vector<8x128xf32>,
    return
  }
  func.func @transform_2(%arg0: i32, %arg1: memref<16xi32, #tpu.memory_space<smem>>, %arg2: memref<16x9xi32, #tpu.memory_space<smem>>) -> (i32, i32) {
    %c0_i32 = arith.constant 0 : i32
    %c0_i32_0 = arith.constant 0 : i32
    return %arg0, %c0_i32 : i32, i32
  }
}

</mosaic_0001>

<bundles_post_ra>
// kernel: tpu_custom_call.1
= control target key start
LH: loop header
LB: loop body
LE: loop exit
PB: predicated region body
PF: predicated region fallthrough
CT: control target
= control target key end

     0   :  { %s4083_s21 = smov [#allocation6]   ;;  %s4084_s22 = smov [#allocation7]   ;;  %s5227_s0 = inlined_call_operand.hbm [shape: s32[16], index: 0, kind: input, shape index: {}]   ;;  %s5228_s2 = inlined_call_operand.hbm [shape: f32[20,128], index: 2, kind: input, shape index: {}]   ;;  %s5229_s3 = inlined_call_operand.hbm [shape: f32[20,128], index: 3, kind: input, shape index: {}]   ;;  %s5230_s4 = inlined_call_operand.hbm [shape: f32[16,128], index: 4, kind: output, shape index: {}]   ;;  %s5231_s1 = inlined_call_operand.hbm [shape: s32[16,9], index: 1, kind: input, shape index: {}]  }
   0x1   :  { %s10_s17 = sshll.u32 %s5227_s0, 4  ;;  %s15_s20 = sshll.u32 %s5231_s1, 4  ;;  %s11_s17 = int_to_ptr.hbm [resolvable:$true] %s10_s17  ;;  %s16_s20 = int_to_ptr.hbm [resolvable:$true] %s15_s20 }
   0x2   :  { %13 = dma.hbm_to_smem %s11_s17, 16, %s4083_s21, [#allocation5] }
   0x3   :  { %18 = dma.hbm_to_smem %s16_s20, 256, %s4084_s22, [#allocation5] }
   0x4   :  { %4033 = dma.done.wait [#allocation5], 272 }
   0x5   :  { %4034 = vsyncadd [#allocation5], 4294967024 }
   0x6   :  { %21 = sfence }
   0x7   :  { %22 = vsyncpa [#allocation9], 0 }
   0x8   :  { %24 = vsyncpa [#allocation9 + $0x1], 0  ;;  %s4196_s23 = smov 0   ;;  %s4198_s24 = smov 0  }
   0x9   :  { %s4200_s0 = smov 0  }
   0xa LB: > { %s1895_s1 = sadd.s32 4294967295, %s4081_s0   ;;  %s4213_s25 = sadd.s32 1, %s4081_s0   ;;  %s4081_s0 = sphi %s4200_s0, %s5316_s0   ;;  %s4077_s24 = sphi %s4198_s24, %s5319_s24   ;;  %s4073_s23 = sphi %s4196_s23, %s5318_s23  }
   0xb   : > { %5254 = sst [smem:[#allocation190_spill]] %s4213_s25  ;;  %s33_s26 = ssub.s32 %s4081_s0, %s4213_s25 }
   0xc   : > { %s36_s27 = sadd.s32 1, %s4077_s24  ;;  %p34_p0 = scmp.eq.s32.totalorder %s33_s26, 0 }
   0xd   : > { %p1896_p1 = scmp.ne.s32.totalorder %s33_s26, 0  ;;  %p40_p2 = scmp.eq.s32.totalorder %s4081_s0, 1 }
   0xe   : > { %p45_p3 = scmp.ne.s32.totalorder %s4077_s24, %s4073_s23  ;;  %p46_p5 = scmp.eq.s32.totalorder %s1895_s1, 1 }
   0xf   : > { %s4222_s28 = scalar_select %p34_p0, %s4077_s24, %s36_s27  }
  0x10   : > { %p4224_p4 = por %p1896_p1, %p40_p2  ;;  %p4228_p6 = por %p46_p5, %p45_p3 }
  0x11   : > { %5255 = sst [smem:[#allocation191_spill]] %s4222_s28  ;;  %p1897_p7 = scmp.ge.s32.totalorder %s4081_s0, 2 }
  0x13   : > { %55 = sbr.rel (%p1897_p7) target bundleno = 1289 (0x509), region = 12 }
  0x18   : > { %s5232_s5 = sand.u32 1, %s4077_s24   ;;  %s4235_s6 = sshll.u32 %s4081_s0, 3 }
  0x19   : > { %s4239_s7 = sshll.u32 %s5232_s5, 3  ;;  %s64_s8 = sld [smem:[#allocation6 + %s4235_s6]] }
  0x1a   : > { %s4085_s9 = smov [#allocation2]   ;;  %s4243_s11 = sshll.u32 %s4081_s0, 10 }
  0x1b   : > { %s75_s10 = sshll.u32 %s4085_s9, 4  ;;  %s80_s12 = sld [smem:[#allocation7 + %s4243_s11]]  ;;  %s76_s10 = int_to_ptr.vmem [resolvable:$true] %s75_s10 }
  0x1c   : > { %s96_s13 = sadd.s32 1, %s4243_s11  ;;  %s4086_s14 = smov [#allocation3]  }
  0x1d   : > { %s4247_s15 = sshll.u32 %s4086_s14, 4  ;;  %s97_s16 = sld [smem:[#allocation7 + %s96_s13]] }
  0x1e   : > { %5258 = sst [smem:[#allocation192_spill]] %s4247_s15  ;;  %s4087_s21 = smov [#allocation3 + $0x1]  }
  0x1f   : > { %s65_s19 = scalar_lea.hbm %s5228_s2, %s64_s8  ;;  %s4253_s22 = sshll.u32 %s4087_s21, 4  ;;  %s110_s22 = int_to_ptr.vmem [resolvable:$true] %s4253_s22 }
  0x20   : > { %s73_s20 = sshll.u32 %s65_s19, 4  ;;  %s4258_s14 = scalar_lea.hbm %s5228_s2, 24  ;;  %s74_s20 = int_to_ptr.hbm [resolvable:$true] %s73_s20 }
  0x21   : > { %s2073_s1 = sshra.s32 %s74_s20, 4  ;;  %s2074_s1 = int_to_ptr.hbm [resolvable:$true] %s2073_s1 }
  0x22   : > { %s2075_s26 = scalar_lea.hbm %s2074_s1, 1  ;;  %p2078_p9 = scmp.lt.s32.totalorder %s2074_s1, %s5228_s2 }
  0x23   : > { %p2076_p8 = scmp.ne.s32.totalorder %s2074_s1, %s2075_s26  ;;  %p2079_p10 = scmp.lt.s32.totalorder %s4258_s14, %s2075_s26 }
  0x25   : > { %p2080_p11 = por %p2079_p10, %p2078_p9 }
  0x27   : > { %p2081_p12 = pnand %p2080_p11, %p2076_p8 }
  0x29   : > { %2084 = shalt.err (!%p2081_p12)  }
  0x2a   : > { %78 = dma.hbm_to_vmem [thread:$0]  %s74_s20, 16, %s76_s10, [#allocation4] }
  0x2b   : > { %s81_s18 = scalar_lea.hbm %s5229_s3, %s80_s12  ;;  %s98_s9 = scalar_lea.hbm %s5229_s3, %s97_s16 }
  0x2c   : > { %s90_s19 = sshll.u32 %s81_s18, 4  ;;  %s107_s5 = sshll.u32 %s98_s9, 4  ;;  %s91_s19 = int_to_ptr.hbm [resolvable:$true] %s90_s19  ;;  %s108_s5 = int_to_ptr.hbm [resolvable:$true] %s107_s5 }
  0x2d   : > { %s2097_s13 = sshra.s32 %s91_s19, 4  ;;  %s4274_s10 = scalar_lea.hbm %s5229_s3, 24  ;;  %s2098_s13 = int_to_ptr.hbm [resolvable:$true] %s2097_s13 }
  0x2e   : > { %s2099_s1 = scalar_lea.hbm %s2098_s13, 1  ;;  %p2102_p0 = scmp.lt.s32.totalorder %s2098_s13, %s5229_s3 }
  0x2f   : > { %p2100_p13 = scmp.ne.s32.totalorder %s2098_s13, %s2099_s1  ;;  %p2103_p1 = scmp.lt.s32.totalorder %s4274_s10, %s2099_s1 }
  0x31   : > { %p2104_p2 = por %p2103_p1, %p2102_p0 }
  0x33   : > { %p2105_p3 = pnand %p2104_p2, %p2100_p13 }
  0x35   : > { %2108 = shalt.err (!%p2105_p3)  }
  0x36   : > { %s5259_s12 = sld [smem:[#allocation192_spill]]  ;;  %s113_s17 = sadd.s32 2, %s4243_s11 }
  0x37   : > { %s2121_s18 = sshra.s32 %s108_s5, 4  ;;  %s2122_s18 = int_to_ptr.hbm [resolvable:$true] %s2121_s18 }
  0x38   : > { %s2123_s15 = scalar_lea.hbm %s2122_s18, 1  ;;  %p2126_p7 = scmp.lt.s32.totalorder %s2122_s18, %s5229_s3 }
  0x39   : > { %p2124_p5 = scmp.ne.s32.totalorder %s2122_s18, %s2123_s15  ;;  %p2127_p8 = scmp.lt.s32.totalorder %s4274_s10, %s2123_s15 }
  0x3b   : > { %p2128_p9 = por %p2127_p8, %p2126_p7 }
  0x3c   : > { %s5260_s16 = int_to_ptr.vmem [resolvable:$true] %s5259_s12 }
  0x3d   : > { %95 = dma.hbm_to_vmem [thread:$0]  %s91_s19, 16, %s5260_s16, [#allocation4 + $0x1] }
  0x3e   : > { %p2129_p10 = pnand %p2128_p9, %p2124_p5 }
  0x40   : > { %2132 = shalt.err (!%p2129_p10)  }
  0x41   : > { %112 = dma.hbm_to_vmem [thread:$0]  %s108_s5, 16, %s110_s22, [#allocation4 + $0x1] }
  0x42   : > { %s114_s9 = sld [smem:[#allocation7 + %s113_s17]]  ;;  %s4088_s13 = smov [#allocation3 + $0x2]  }
  0x43   : > { %s126_s19 = sshll.u32 %s4088_s13, 4  ;;  %s130_s1 = sadd.s32 3, %s4243_s11  ;;  %s127_s19 = int_to_ptr.vmem [resolvable:$true] %s126_s19 }
  0x44   : > { %s131_s26 = sld [smem:[#allocation7 + %s130_s1]]  ;;  %s147_s20 = sadd.s32 4, %s4243_s11 }
  0x45   : > { %s4089_s8 = smov [#allocation3 + $0x3]   ;;  %s148_s16 = sld [smem:[#allocation7 + %s147_s20]] }
  0x46   : > { %s4289_s12 = sshll.u32 %s4089_s8, 4  ;;  %s4090_s5 = smov [#allocation3 + $0x4]  }
  0x47   : > { %5261 = sst [smem:[#allocation192_spill]] %s4289_s12  ;;  %s4295_s21 = sshll.u32 %s4090_s5, 4  ;;  %s161_s21 = int_to_ptr.vmem [resolvable:$true] %s4295_s21 }
  0x48   : > { %s115_s22 = scalar_lea.hbm %s5229_s3, %s114_s9 }
  0x49   : > { %s124_s17 = sshll.u32 %s115_s22, 4  ;;  %s125_s17 = int_to_ptr.hbm [resolvable:$true] %s124_s17 }
  0x4a   : > { %s132_s1 = scalar_lea.hbm %s5229_s3, %s131_s26  ;;  %s2145_s8 = sshra.s32 %s125_s17, 4  ;;  %s2146_s8 = int_to_ptr.hbm [resolvable:$true] %s2145_s8 }
  0x4b   : > { %s2147_s28 = scalar_lea.hbm %s2146_s8, 1  ;;  %p2150_p12 = scmp.lt.s32.totalorder %s2146_s8, %s5229_s3 }
  0x4c   : > { %p2148_p11 = scmp.ne.s32.totalorder %s2146_s8, %s2147_s28  ;;  %p2151_p13 = scmp.lt.s32.totalorder %s4274_s10, %s2147_s28 }
  0x4e   : > { %p2152_p0 = por %p2151_p13, %p2150_p12 }
  0x50   : > { %p2153_p1 = pnand %p2152_p0, %p2148_p11 }
  0x52   : > { %2156 = shalt.err (!%p2153_p1)  }
  0x53   : > { %129 = dma.hbm_to_vmem [thread:$0]  %s125_s17, 16, %s127_s19, [#allocation4 + $0x1] }
  0x54   : > { %s141_s9 = sshll.u32 %s132_s1, 4  ;;  %s149_s22 = scalar_lea.hbm %s5229_s3, %s148_s16  ;;  %s142_s9 = int_to_ptr.hbm [resolvable:$true] %s141_s9 }
  0x55   : > { %s158_s26 = sshll.u32 %s149_s22, 4  ;;  %s2169_s5 = sshra.s32 %s142_s9, 4  ;;  %s2170_s5 = int_to_ptr.hbm [resolvable:$true] %s2169_s5  ;;  %s159_s26 = int_to_ptr.hbm [resolvable:$true] %s158_s26 }
  0x56   : > { %s2171_s27 = scalar_lea.hbm %s2170_s5, 1  ;;  %p2174_p3 = scmp.lt.s32.totalorder %s2170_s5, %s5229_s3 }
  0x57   : > { %p2172_p2 = scmp.ne.s32.totalorder %s2170_s5, %s2171_s27  ;;  %p2175_p5 = scmp.lt.s32.totalorder %s4274_s10, %s2171_s27 }
  0x59   : > { %p2176_p7 = por %p2175_p5, %p2174_p3 }
  0x5b   : > { %p2177_p8 = pnand %p2176_p7, %p2172_p2 }
  0x5d   : > { %2180 = shalt.err (!%p2177_p8)  }
  0x5e   : > { %s5262_s28 = sld [smem:[#allocation192_spill]]  ;;  %s164_s16 = sadd.s32 5, %s4243_s11 }
  0x5f   : > { %s2193_s17 = sshra.s32 %s159_s26, 4  ;;  %s2194_s17 = int_to_ptr.hbm [resolvable:$true] %s2193_s17 }
  0x60   : > { %s2195_s1 = scalar_lea.hbm %s2194_s17, 1  ;;  %p2198_p10 = scmp.lt.s32.totalorder %s2194_s17, %s5229_s3 }
  0x61   : > { %p2196_p9 = scmp.ne.s32.totalorder %s2194_s17, %s2195_s1  ;;  %p2199_p11 = scmp.lt.s32.totalorder %s4274_s10, %s2195_s1 }
  0x63   : > { %p2200_p12 = por %p2199_p11, %p2198_p10 }
  0x64   : > { %s5263_s19 = int_to_ptr.vmem [resolvable:$true] %s5262_s28 }
  0x65   : > { %146 = dma.hbm_to_vmem [thread:$0]  %s142_s9, 16, %s5263_s19, [#allocation4 + $0x1] }
  0x66   : > { %p2201_p13 = pnand %p2200_p12, %p2196_p9 }
  0x68   : > { %2204 = shalt.err (!%p2201_p13)  }
  0x69   : > { %163 = dma.hbm_to_vmem [thread:$0]  %s159_s26, 16, %s161_s21, [#allocation4 + $0x1] }
  0x6a   : > { %s165_s9 = sld [smem:[#allocation7 + %s164_s16]]  ;;  %s4091_s18 = smov [#allocation3 + $0x5]  }
  0x6b   : > { %s177_s15 = sshll.u32 %s4091_s18, 4  ;;  %s181_s22 = sadd.s32 6, %s4243_s11  ;;  %s178_s15 = int_to_ptr.vmem [resolvable:$true] %s177_s15 }
  0x6c   : > { %s182_s5 = sld [smem:[#allocation7 + %s181_s22]]  ;;  %s198_s27 = sadd.s32 7, %s4243_s11 }
  0x6d   : > { %s4092_s13 = smov [#allocation3 + $0x6]   ;;  %s199_s28 = sld [smem:[#allocation7 + %s198_s27]] }
  0x6e   : > { %s4323_s12 = sshll.u32 %s4092_s13, 4  ;;  %s4093_s8 = smov [#allocation3 + $0x7]  }
  0x6f   : > { %5264 = sst [smem:[#allocation192_spill]] %s4323_s12  ;;  %s4329_s21 = sshll.u32 %s4093_s8, 4  ;;  %s212_s21 = int_to_ptr.vmem [resolvable:$true] %s4329_s21 }
  0x70   : > { %s166_s1 = scalar_lea.hbm %s5229_s3, %s165_s9 }
  0x71   : > { %s175_s26 = sshll.u32 %s166_s1, 4  ;;  %s176_s26 = int_to_ptr.hbm [resolvable:$true] %s175_s26 }
  0x72   : > { %s183_s18 = scalar_lea.hbm %s5229_s3, %s182_s5  ;;  %s2217_s22 = sshra.s32 %s176_s26, 4  ;;  %s2218_s22 = int_to_ptr.hbm [resolvable:$true] %s2217_s22 }
  0x73   : > { %s2219_s13 = scalar_lea.hbm %s2218_s22, 1  ;;  %p2222_p1 = scmp.lt.s32.totalorder %s2218_s22, %s5229_s3 }
  0x74   : > { %p2220_p0 = scmp.ne.s32.totalorder %s2218_s22, %s2219_s13  ;;  %p2223_p2 = scmp.lt.s32.totalorder %s4274_s10, %s2219_s13 }
  0x76   : > { %p2224_p3 = por %p2223_p2, %p2222_p1 }
  0x78   : > { %p2225_p5 = pnand %p2224_p3, %p2220_p0 }
  0x7a   : > { %2228 = shalt.err (!%p2225_p5)  }
  0x7b   : > { %180 = dma.hbm_to_vmem [thread:$0]  %s176_s26, 16, %s178_s15, [#allocation4 + $0x1] }
  0x7c   : > { %s192_s9 = sshll.u32 %s183_s18, 4  ;;  %s200_s1 = scalar_lea.hbm %s5229_s3, %s199_s28  ;;  %s193_s9 = int_to_ptr.hbm [resolvable:$true] %s192_s9 }
  0x7d   : > { %s209_s5 = sshll.u32 %s200_s1, 4  ;;  %s2241_s8 = sshra.s32 %s193_s9, 4  ;;  %s2242_s8 = int_to_ptr.hbm [resolvable:$true] %s2241_s8  ;;  %s210_s5 = int_to_ptr.hbm [resolvable:$true] %s209_s5 }
  0x7e   : > { %s2243_s16 = scalar_lea.hbm %s2242_s8, 1  ;;  %p2246_p8 = scmp.lt.s32.totalorder %s2242_s8, %s5229_s3 }
  0x7f   : > { %p2244_p7 = scmp.ne.s32.totalorder %s2242_s8, %s2243_s16  ;;  %p2247_p9 = scmp.lt.s32.totalorder %s4274_s10, %s2243_s16 }
  0x81   : > { %p2248_p10 = por %p2247_p9, %p2246_p8 }
  0x83   : > { %p2249_p11 = pnand %p2248_p10, %p2244_p7 }
  0x85   : > { %2252 = shalt.err (!%p2249_p11)  }
  0x86   : > { %s5265_s15 = sld [smem:[#allocation192_spill]]  ;;  %s215_s28 = sadd.s32 8, %s4243_s11 }
  0x87   : > { %s2265_s18 = sshra.s32 %s210_s5, 4  ;;  %s2266_s18 = int_to_ptr.hbm [resolvable:$true] %s2265_s18 }
  0x88   : > { %s2267_s22 = scalar_lea.hbm %s2266_s18, 1  ;;  %p2270_p13 = scmp.lt.s32.totalorder %s2266_s18, %s5229_s3 }
  0x89   : > { %p2268_p12 = scmp.ne.s32.totalorder %s2266_s18, %s2267_s22  ;;  %p2271_p0 = scmp.lt.s32.totalorder %s4274_s10, %s2267_s22 }
  0x8b   : > { %p2272_p1 = por %p2271_p0, %p2270_p13 }
  0x8c   : > { %s5266_s26 = int_to_ptr.vmem [resolvable:$true] %s5265_s15 }
  0x8d   : > { %197 = dma.hbm_to_vmem [thread:$0]  %s193_s9, 16, %s5266_s26, [#allocation4 + $0x1] }
  0x8e   : > { %p2273_p2 = pnand %p2272_p1, %p2268_p12 }
  0x90   : > { %2276 = shalt.err (!%p2273_p2)  }
  0x91   : > { %214 = dma.hbm_to_vmem [thread:$0]  %s210_s5, 16, %s212_s21, [#allocation4 + $0x1] }
  0x92   : > { %s216_s9 = sld [smem:[#allocation7 + %s215_s28]]  ;;  %s4094_s19 = smov [#allocation3 + $0x8]  }
  0x93   : > { %s228_s17 = sshll.u32 %s4094_s19, 4  ;;  %s232_s1 = sadd.s32 1, %s4235_s6  ;;  %s229_s17 = int_to_ptr.vmem [resolvable:$true] %s228_s17 }
  0x94   : > { %s233_s8 = sld [smem:[#allocation6 + %s232_s1]]  ;;  %s4357_s16 = sadd.s32 128, %s4243_s11 }
  0x95   : > { %s4095_s20 = smov [#allocation2 + $0x1]   ;;  %s250_s15 = sld [smem:[#allocation7 + %s4357_s16]] }
  0x96   : > { %s4359_s12 = sshll.u32 %s4095_s20, 4  ;;  %s4096_s5 = smov [#allocation3 + $0x10]  }
  0x97   : > { %5267 = sst [smem:[#allocation192_spill]] %s4359_s12  ;;  %s4366_s28 = sshll.u32 %s4096_s5, 4  ;;  %s263_s28 = int_to_ptr.vmem [resolvable:$true] %s4366_s28 }
  0x98   : > { %s217_s21 = scalar_lea.hbm %s5229_s3, %s216_s9 }
  0x99   : > { %s226_s22 = sshll.u32 %s217_s21, 4  ;;  %s227_s22 = int_to_ptr.hbm [resolvable:$true] %s226_s22 }
  0x9a   : > { %s234_s19 = scalar_lea.hbm %s5228_s2, %s233_s8  ;;  %s2289_s1 = sshra.s32 %s227_s22, 4  ;;  %s2290_s1 = int_to_ptr.hbm [resolvable:$true] %s2289_s1 }
  0x9b   : > { %s2291_s20 = scalar_lea.hbm %s2290_s1, 1  ;;  %p2294_p5 = scmp.lt.s32.totalorder %s2290_s1, %s5229_s3 }
  0x9c   : > { %p2292_p3 = scmp.ne.s32.totalorder %s2290_s1, %s2291_s20  ;;  %p2295_p7 = scmp.lt.s32.totalorder %s4274_s10, %s2291_s20 }
  0x9e   : > { %p2296_p8 = por %p2295_p7, %p2294_p5 }
  0xa0   : > { %p2297_p9 = pnand %p2296_p8, %p2292_p3 }
  0xa2   : > { %2300 = shalt.err (!%p2297_p9)  }
  0xa3   : > { %231 = dma.hbm_to_vmem [thread:$0]  %s227_s22, 16, %s229_s17, [#allocation4 + $0x1] }
  0xa4   : > { %s243_s9 = sshll.u32 %s234_s19, 4  ;;  %s251_s21 = scalar_lea.hbm %s5229_s3, %s250_s15  ;;  %s244_s9 = int_to_ptr.hbm [resolvable:$true] %s243_s9 }
  0xa5   : > { %s260_s8 = sshll.u32 %s251_s21, 4  ;;  %s2313_s5 = sshra.s32 %s244_s9, 4  ;;  %s2314_s5 = int_to_ptr.hbm [resolvable:$true] %s2313_s5  ;;  %s261_s8 = int_to_ptr.hbm [resolvable:$true] %s260_s8 }
  0xa6   : > { %s2315_s13 = scalar_lea.hbm %s2314_s5, 1  ;;  %p2318_p11 = scmp.lt.s32.totalorder %s2314_s5, %s5228_s2 }
  0xa7   : > { %p2316_p10 = scmp.ne.s32.totalorder %s2314_s5, %s2315_s13  ;;  %p2319_p12 = scmp.lt.s32.totalorder %s4258_s14, %s2315_s13 }
  0xa9   : > { %p2320_p13 = por %p2319_p12, %p2318_p11 }
  0xab   : > { %p2321_p0 = pnand %p2320_p13, %p2316_p10 }
  0xad   : > { %2324 = shalt.err (!%p2321_p0)  }
  0xae   : > { %s5268_s17 = sld [smem:[#allocation192_spill]]  ;;  %s266_s15 = sadd.s32 1, %s4357_s16 }
  0xaf   : > { %s2337_s22 = sshra.s32 %s261_s8, 4  ;;  %s2338_s22 = int_to_ptr.hbm [resolvable:$true] %s2337_s22 }
  0xb0   : > { %s2339_s19 = scalar_lea.hbm %s2338_s22, 1  ;;  %p2342_p2 = scmp.lt.s32.totalorder %s2338_s22, %s5229_s3 }
  0xb1   : > { %p2340_p1 = scmp.ne.s32.totalorder %s2338_s22, %s2339_s19  ;;  %p2343_p3 = scmp.lt.s32.totalorder %s4274_s10, %s2339_s19 }
  0xb3   : > { %p2344_p5 = por %p2343_p3, %p2342_p2 }
  0xb4   : > { %s5269_s12 = int_to_ptr.vmem [resolvable:$true] %s5268_s17 }
  0xb5   : > { %248 = dma.hbm_to_vmem [thread:$0]  %s244_s9, 16, %s5269_s12, [#allocation4] }
  0xb6   : > { %p2345_p7 = pnand %p2344_p5, %p2340_p1 }
  0xb8   : > { %2348 = shalt.err (!%p2345_p7)  }
  0xb9   : > { %265 = dma.hbm_to_vmem [thread:$0]  %s261_s8, 16, %s263_s28, [#allocation4 + $0x1] }
  0xba   : > { %s267_s9 = sld [smem:[#allocation7 + %s266_s15]]  ;;  %s4097_s26 = smov [#allocation3 + $0x11]  }
  0xbb   : > { %s279_s18 = sshll.u32 %s4097_s26, 4  ;;  %s283_s21 = sadd.s32 2, %s4357_s16  ;;  %s280_s18 = int_to_ptr.vmem [resolvable:$true] %s279_s18 }
  0xbc   : > { %s284_s5 = sld [smem:[#allocation7 + %s283_s21]]  ;;  %s300_s13 = sadd.s32 3, %s4357_s16 }
  0xbd   : > { %s4098_s27 = smov [#allocation3 + $0x12]   ;;  %s301_s17 = sld [smem:[#allocation7 + %s300_s13]] }
  0xbe   : > { %s4394_s25 = sshll.u32 %s4098_s27, 4  ;;  %s4099_s1 = smov [#allocation3 + $0x13]  }
  0xbf   : > { %5270 = sst [smem:[#allocation192_spill]] %s4394_s25  ;;  %s4400_s28 = sshll.u32 %s4099_s1, 4  ;;  %s314_s28 = int_to_ptr.vmem [resolvable:$true] %s4400_s28 }
  0xc0   : > { %s268_s19 = scalar_lea.hbm %s5229_s3, %s267_s9 }
  0xc1   : > { %s277_s8 = sshll.u32 %s268_s19, 4  ;;  %s278_s8 = int_to_ptr.hbm [resolvable:$true] %s277_s8 }
  0xc2   : > { %s285_s26 = scalar_lea.hbm %s5229_s3, %s284_s5  ;;  %s2361_s21 = sshra.s32 %s278_s8, 4  ;;  %s2362_s21 = int_to_ptr.hbm [resolvable:$true] %s2361_s21 }
  0xc3   : > { %s2363_s27 = scalar_lea.hbm %s2362_s21, 1  ;;  %p2366_p9 = scmp.lt.s32.totalorder %s2362_s21, %s5229_s3 }
  0xc4   : > { %p2364_p8 = scmp.ne.s32.totalorder %s2362_s21, %s2363_s27  ;;  %p2367_p10 = scmp.lt.s32.totalorder %s4274_s10, %s2363_s27 }
  0xc6   : > { %p2368_p11 = por %p2367_p10, %p2366_p9 }
  0xc8   : > { %p2369_p12 = pnand %p2368_p11, %p2364_p8 }
  0xca   : > { %2372 = shalt.err (!%p2369_p12)  }
  0xcb   : > { %282 = dma.hbm_to_vmem [thread:$0]  %s278_s8, 16, %s280_s18, [#allocation4 + $0x1] }
  0xcc   : > { %s294_s9 = sshll.u32 %s285_s26, 4  ;;  %s302_s19 = scalar_lea.hbm %s5229_s3, %s301_s17  ;;  %s295_s9 = int_to_ptr.hbm [resolvable:$true] %s294_s9 }
  0xcd   : > { %s311_s5 = sshll.u32 %s302_s19, 4  ;;  %s2385_s1 = sshra.s32 %s295_s9, 4  ;;  %s2386_s1 = int_to_ptr.hbm [resolvable:$true] %s2385_s1  ;;  %s312_s5 = int_to_ptr.hbm [resolvable:$true] %s311_s5 }
  0xce   : > { %s2387_s15 = scalar_lea.hbm %s2386_s1, 1  ;;  %p2390_p0 = scmp.lt.s32.totalorder %s2386_s1, %s5229_s3 }
  0xcf   : > { %p2388_p13 = scmp.ne.s32.totalorder %s2386_s1, %s2387_s15  ;;  %p2391_p1 = scmp.lt.s32.totalorder %s4274_s10, %s2387_s15 }
  0xd1   : > { %p2392_p2 = por %p2391_p1, %p2390_p0 }
  0xd3   : > { %p2393_p3 = pnand %p2392_p2, %p2388_p13 }
  0xd5   : > { %2396 = shalt.err (!%p2393_p3)  }
  0xd6   : > { %s5271_s18 = sld [smem:[#allocation192_spill]]  ;;  %s317_s17 = sadd.s32 4, %s4357_s16 }
  0xd7   : > { %s2409_s26 = sshra.s32 %s312_s5, 4  ;;  %s2410_s26 = int_to_ptr.hbm [resolvable:$true] %s2409_s26 }
  0xd8   : > { %s2411_s21 = scalar_lea.hbm %s2410_s26, 1  ;;  %p2414_p7 = scmp.lt.s32.totalorder %s2410_s26, %s5229_s3 }
  0xd9   : > { %p2412_p5 = scmp.ne.s32.totalorder %s2410_s26, %s2411_s21  ;;  %p2415_p8 = scmp.lt.s32.totalorder %s4274_s10, %s2411_s21 }
  0xdb   : > { %p2416_p9 = por %p2415_p8, %p2414_p7 }
  0xdc   : > { %s5272_s8 = int_to_ptr.vmem [resolvable:$true] %s5271_s18 }
  0xdd   : > { %299 = dma.hbm_to_vmem [thread:$0]  %s295_s9, 16, %s5272_s8, [#allocation4 + $0x1] }
  0xde   : > { %p2417_p10 = pnand %p2416_p9, %p2412_p5 }
  0xe0   : > { %2420 = shalt.err (!%p2417_p10)  }
  0xe1   : > { %316 = dma.hbm_to_vmem [thread:$0]  %s312_s5, 16, %s314_s28, [#allocation4 + $0x1] }
  0xe2   : > { %s318_s9 = sld [smem:[#allocation7 + %s317_s17]]  ;;  %s4100_s12 = smov [#allocation3 + $0x14]  }
  0xe3   : > { %s330_s22 = sshll.u32 %s4100_s12, 4  ;;  %s334_s19 = sadd.s32 5, %s4357_s16  ;;  %s331_s22 = int_to_ptr.vmem [resolvable:$true] %s330_s22 }
  0xe4   : > { %s335_s1 = sld [smem:[#allocation7 + %s334_s19]]  ;;  %s351_s15 = sadd.s32 6, %s4357_s16 }
  0xe5   : > { %s4101_s20 = smov [#allocation3 + $0x15]   ;;  %s352_s18 = sld [smem:[#allocation7 + %s351_s15]] }
  0xe6   : > { %s4428_s25 = sshll.u32 %s4101_s20, 4  ;;  %s4102_s27 = smov [#allocation3 + $0x16]  }
  0xe7   : > { %5273 = sst [smem:[#allocation192_spill]] %s4428_s25  ;;  %s4434_s28 = sshll.u32 %s4102_s27, 4  ;;  %s365_s28 = int_to_ptr.vmem [resolvable:$true] %s4434_s28 }
  0xe8   : > { %s319_s21 = scalar_lea.hbm %s5229_s3, %s318_s9 }
  0xe9   : > { %s328_s5 = sshll.u32 %s319_s21, 4  ;;  %s329_s5 = int_to_ptr.hbm [resolvable:$true] %s328_s5 }
  0xea   : > { %s336_s12 = scalar_lea.hbm %s5229_s3, %s335_s1  ;;  %s2433_s19 = sshra.s32 %s329_s5, 4  ;;  %s2434_s19 = int_to_ptr.hbm [resolvable:$true] %s2433_s19 }
  0xeb   : > { %s2435_s20 = scalar_lea.hbm %s2434_s19, 1  ;;  %p2438_p12 = scmp.lt.s32.totalorder %s2434_s19, %s5229_s3 }
  0xec   : > { %p2436_p11 = scmp.ne.s32.totalorder %s2434_s19, %s2435_s20  ;;  %p2439_p13 = scmp.lt.s32.totalorder %s4274_s10, %s2435_s20 }
  0xee   : > { %p2440_p0 = por %p2439_p13, %p2438_p12 }
  0xf0   : > { %p2441_p1 = pnand %p2440_p0, %p2436_p11 }
  0xf2   : > { %2444 = shalt.err (!%p2441_p1)  }
  0xf3   : > { %333 = dma.hbm_to_vmem [thread:$0]  %s329_s5, 16, %s331_s22, [#allocation4 + $0x1] }
  0xf4   : > { %s345_s9 = sshll.u32 %s336_s12, 4  ;;  %s353_s21 = scalar_lea.hbm %s5229_s3, %s352_s18  ;;  %s346_s9 = int_to_ptr.hbm [resolvable:$true] %s345_s9 }
  0xf5   : > { %s362_s1 = sshll.u32 %s353_s21, 4  ;;  %s2457_s27 = sshra.s32 %s346_s9, 4  ;;  %s2458_s27 = int_to_ptr.hbm [resolvable:$true] %s2457_s27  ;;  %s363_s1 = int_to_ptr.hbm [resolvable:$true] %s362_s1 }
  0xf6   : > { %s2459_s17 = scalar_lea.hbm %s2458_s27, 1  ;;  %p2462_p3 = scmp.lt.s32.totalorder %s2458_s27, %s5229_s3 }
  0xf7   : > { %p2460_p2 = scmp.ne.s32.totalorder %s2458_s27, %s2459_s17  ;;  %p2463_p5 = scmp.lt.s32.totalorder %s4274_s10, %s2459_s17 }
  0xf9   : > { %p2464_p7 = por %p2463_p5, %p2462_p3 }
  0xfb   : > { %p2465_p8 = pnand %p2464_p7, %p2460_p2 }
  0xfd   : > { %2468 = shalt.err (!%p2465_p8)  }
  0xfe   : > { %s5274_s22 = sld [smem:[#allocation192_spill]]  ;;  %s368_s18 = sadd.s32 7, %s4357_s16 }
  0xff   : > { %s2481_s12 = sshra.s32 %s363_s1, 4  ;;  %s2482_s12 = int_to_ptr.hbm [resolvable:$true] %s2481_s12 }
 0x100   : > { %s2483_s19 = scalar_lea.hbm %s2482_s12, 1  ;;  %p2486_p10 = scmp.lt.s32.totalorder %s2482_s12, %s5229_s3 }
 0x101   : > { %p2484_p9 = scmp.ne.s32.totalorder %s2482_s12, %s2483_s19  ;;  %p2487_p11 = scmp.lt.s32.totalorder %s4274_s10, %s2483_s19 }
 0x103   : > { %p2488_p12 = por %p2487_p11, %p2486_p10 }
 0x104   : > { %s5275_s5 = int_to_ptr.vmem [resolvable:$true] %s5274_s22 }
 0x105   : > { %350 = dma.hbm_to_vmem [thread:$0]  %s346_s9, 16, %s5275_s5, [#allocation4 + $0x1] }
 0x106   : > { %p2489_p13 = pnand %p2488_p12, %p2484_p9 }
 0x108   : > { %2492 = shalt.err (!%p2489_p13)  }
 0x109   : > { %367 = dma.hbm_to_vmem [thread:$0]  %s363_s1, 16, %s365_s28, [#allocation4 + $0x1] }
 0x10a   : > { %s369_s9 = sld [smem:[#allocation7 + %s368_s18]]  ;;  %s4103_s8 = smov [#allocation3 + $0x17]  }
 0x10b   : > { %s381_s26 = sshll.u32 %s4103_s8, 4  ;;  %s385_s21 = sadd.s32 8, %s4357_s16  ;;  %s382_s26 = int_to_ptr.vmem [resolvable:$true] %s381_s26 }
 0x10c   : > { %s386_s27 = sld [smem:[#allocation7 + %s385_s21]]  ;;  %s402_s17 = sadd.s32 2, %s4235_s6 }
 0x10d   : > { %s4104_s13 = smov [#allocation3 + $0x18]   ;;  %s403_s22 = sld [smem:[#allocation6 + %s402_s17]] }
 0x10e   : > { %s4462_s25 = sshll.u32 %s4104_s13, 4  ;;  %s4105_s20 = smov [#allocation2 + $0x2]   ;;  %s399_s25 = int_to_ptr.vmem [resolvable:$true] %s4462_s25 }
 0x10f   : > { %s4468_s28 = sshll.u32 %s4105_s20, 4  ;;  %s416_s28 = int_to_ptr.vmem [resolvable:$true] %s4468_s28 }
 0x110   : > { %s370_s19 = scalar_lea.hbm %s5229_s3, %s369_s9 }
 0x111   : > { %s379_s1 = sshll.u32 %s370_s19, 4  ;;  %s380_s1 = int_to_ptr.hbm [resolvable:$true] %s379_s1 }
 0x112   : > { %s387_s15 = scalar_lea.hbm %s5229_s3, %s386_s27  ;;  %s2505_s8 = sshra.s32 %s380_s1, 4  ;;  %s2506_s8 = int_to_ptr.hbm [resolvable:$true] %s2505_s8 }
 0x113   : > { %s2507_s21 = scalar_lea.hbm %s2506_s8, 1  ;;  %p2510_p1 = scmp.lt.s32.totalorder %s2506_s8, %s5229_s3 }
 0x114   : > { %p2508_p0 = scmp.ne.s32.totalorder %s2506_s8, %s2507_s21  ;;  %p2511_p2 = scmp.lt.s32.totalorder %s4274_s10, %s2507_s21 }
 0x116   : > { %p2512_p3 = por %p2511_p2, %p2510_p1 }
 0x118   : > { %p2513_p5 = pnand %p2512_p3, %p2508_p0 }
 0x11a   : > { %2516 = shalt.err (!%p2513_p5)  }
 0x11b   : > { %384 = dma.hbm_to_vmem [thread:$0]  %s380_s1, 16, %s382_s26, [#allocation4 + $0x1] }
 0x11c   : > { %s396_s9 = sshll.u32 %s387_s15, 4  ;;  %s404_s19 = scalar_lea.hbm %s5228_s2, %s403_s22  ;;  %s397_s9 = int_to_ptr.hbm [resolvable:$true] %s396_s9 }
 0x11d   : > { %s413_s27 = sshll.u32 %s404_s19, 4  ;;  %s2529_s20 = sshra.s32 %s397_s9, 4  ;;  %s2530_s20 = int_to_ptr.hbm [resolvable:$true] %s2529_s20  ;;  %s414_s27 = int_to_ptr.hbm [resolvable:$true] %s413_s27 }
 0x11e   : > { %s2531_s16 = scalar_lea.hbm %s2530_s20, 1  ;;  %p2534_p8 = scmp.lt.s32.totalorder %s2530_s20, %s5229_s3 }
 0x11f   : > { %p2532_p7 = scmp.ne.s32.totalorder %s2530_s20, %s2531_s16  ;;  %p2535_p9 = scmp.lt.s32.totalorder %s4274_s10, %s2531_s16 }
 0x121   : > { %p2536_p10 = por %p2535_p9, %p2534_p8 }
 0x123   : > { %p2537_p11 = pnand %p2536_p10, %p2532_p7 }
 0x125   : > { %2540 = shalt.err (!%p2537_p11)  }
 0x126   : > { %401 = dma.hbm_to_vmem [thread:$0]  %s397_s9, 16, %s399_s25, [#allocation4 + $0x1] }
 0x127   : > { %s4488_s26 = sadd.s32 256, %s4243_s11  ;;  %s2553_s22 = sshra.s32 %s414_s27, 4  ;;  %s2554_s22 = int_to_ptr.hbm [resolvable:$true] %s2553_s22 }
 0x128   : > { %s2555_s1 = scalar_lea.hbm %s2554_s22, 1  ;;  %p2558_p13 = scmp.lt.s32.totalorder %s2554_s22, %s5228_s2 }
 0x129   : > { %p2556_p12 = scmp.ne.s32.totalorder %s2554_s22, %s2555_s1  ;;  %p2559_p0 = scmp.lt.s32.totalorder %s4258_s14, %s2555_s1 }
 0x12b   : > { %p2560_p1 = por %p2559_p0, %p2558_p13 }
 0x12d   : > { %p2561_p2 = pnand %p2560_p1, %p2556_p12 }
 0x12f   : > { %2564 = shalt.err (!%p2561_p2)  }
 0x130   : > { %418 = dma.hbm_to_vmem [thread:$0]  %s414_s27, 16, %s416_s28, [#allocation4] }
 0x131   : > { %s420_s25 = sld [smem:[#allocation7 + %s4488_s26]]  ;;  %s4106_s21 = smov [#allocation3 + $0x20]  }
 0x132   : > { %s432_s13 = sshll.u32 %s4106_s21, 4  ;;  %s436_s9 = sadd.s32 1, %s4488_s26  ;;  %s433_s13 = int_to_ptr.vmem [resolvable:$true] %s432_s13 }
 0x133   : > { %s437_s5 = sld [smem:[#allocation7 + %s436_s9]]  ;;  %s453_s12 = sadd.s32 2, %s4488_s26 }
 0x134   : > { %s4107_s19 = smov [#allocation3 + $0x21]   ;;  %s454_s16 = sld [smem:[#allocation7 + %s453_s12]] }
 0x135   : > { %s4499_s20 = sshll.u32 %s4107_s19, 4  ;;  %s4108_s1 = smov [#allocation3 + $0x22]  }
 0x136   : > { %5276 = sst [smem:[#allocation192_spill]] %s4499_s20  ;;  %s4505_s28 = sshll.u32 %s4108_s1, 4  ;;  %s467_s28 = int_to_ptr.vmem [resolvable:$true] %s4505_s28 }
 0x137   : > { %s421_s22 = scalar_lea.hbm %s5229_s3, %s420_s25 }
 0x138   : > { %s430_s27 = sshll.u32 %s421_s22, 4  ;;  %s431_s27 = int_to_ptr.hbm [resolvable:$true] %s430_s27 }
 0x139   : > { %s438_s21 = scalar_lea.hbm %s5229_s3, %s437_s5  ;;  %s2577_s9 = sshra.s32 %s431_s27, 4  ;;  %s2578_s9 = int_to_ptr.hbm [resolvable:$true] %s2577_s9 }
 0x13a   : > { %s2579_s19 = scalar_lea.hbm %s2578_s9, 1  ;;  %p2582_p5 = scmp.lt.s32.totalorder %s2578_s9, %s5229_s3 }
 0x13b   : > { %p2580_p3 = scmp.ne.s32.totalorder %s2578_s9, %s2579_s19  ;;  %p2583_p7 = scmp.lt.s32.totalorder %s4274_s10, %s2579_s19 }
 0x13d   : > { %p2584_p8 = por %p2583_p7, %p2582_p5 }
 0x13f   : > { %p2585_p9 = pnand %p2584_p8, %p2580_p3 }
 0x141   : > { %2588 = shalt.err (!%p2585_p9)  }
 0x142   : > { %435 = dma.hbm_to_vmem [thread:$0]  %s431_s27, 16, %s433_s13, [#allocation4 + $0x1] }
 0x143   : > { %s447_s25 = sshll.u32 %s438_s21, 4  ;;  %s455_s22 = scalar_lea.hbm %s5229_s3, %s454_s16  ;;  %s448_s25 = int_to_ptr.hbm [resolvable:$true] %s447_s25 }
 0x144   : > { %s464_s5 = sshll.u32 %s455_s22, 4  ;;  %s2601_s1 = sshra.s32 %s448_s25, 4  ;;  %s2602_s1 = int_to_ptr.hbm [resolvable:$true] %s2601_s1  ;;  %s465_s5 = int_to_ptr.hbm [resolvable:$true] %s464_s5 }
 0x145   : > { %s2603_s15 = scalar_lea.hbm %s2602_s1, 1  ;;  %p2606_p11 = scmp.lt.s32.totalorder %s2602_s1, %s5229_s3 }
 0x146   : > { %p2604_p10 = scmp.ne.s32.totalorder %s2602_s1, %s2603_s15  ;;  %p2607_p12 = scmp.lt.s32.totalorder %s4274_s10, %s2603_s15 }
 0x148   : > { %p2608_p13 = por %p2607_p12, %p2606_p11 }
 0x14a   : > { %p2609_p0 = pnand %p2608_p13, %p2604_p10 }
 0x14c   : > { %2612 = shalt.err (!%p2609_p0)  }
 0x14d   : > { %s5277_s13 = sld [smem:[#allocation192_spill]]  ;;  %s470_s16 = sadd.s32 3, %s4488_s26 }
 0x14e   : > { %s2625_s21 = sshra.s32 %s465_s5, 4  ;;  %s2626_s21 = int_to_ptr.hbm [resolvable:$true] %s2625_s21 }
 0x14f   : > { %s2627_s9 = scalar_lea.hbm %s2626_s21, 1  ;;  %p2630_p2 = scmp.lt.s32.totalorder %s2626_s21, %s5229_s3 }
 0x150   : > { %p2628_p1 = scmp.ne.s32.totalorder %s2626_s21, %s2627_s9  ;;  %p2631_p3 = scmp.lt.s32.totalorder %s4274_s10, %s2627_s9 }
 0x152   : > { %p2632_p5 = por %p2631_p3, %p2630_p2 }
 0x153   : > { %s5278_s27 = int_to_ptr.vmem [resolvable:$true] %s5277_s13 }
 0x154   : > { %452 = dma.hbm_to_vmem [thread:$0]  %s448_s25, 16, %s5278_s27, [#allocation4 + $0x1] }
 0x155   : > { %p2633_p7 = pnand %p2632_p5, %p2628_p1 }
 0x157   : > { %2636 = shalt.err (!%p2633_p7)  }
 0x158   : > { %469 = dma.hbm_to_vmem [thread:$0]  %s465_s5, 16, %s467_s28, [#allocation4 + $0x1] }
 0x159   : > { %s471_s25 = sld [smem:[#allocation7 + %s470_s16]]  ;;  %s4109_s18 = smov [#allocation3 + $0x23]  }
 0x15a   : > { %s483_s17 = sshll.u32 %s4109_s18, 4  ;;  %s487_s22 = sadd.s32 4, %s4488_s26  ;;  %s484_s17 = int_to_ptr.vmem [resolvable:$true] %s483_s17 }
 0x15b   : > { %s488_s1 = sld [smem:[#allocation7 + %s487_s22]]  ;;  %s504_s15 = sadd.s32 5, %s4488_s26 }
 0x15c   : > { %s4110_s8 = smov [#allocation3 + $0x24]   ;;  %s505_s13 = sld [smem:[#allocation7 + %s504_s15]] }
 0x15d   : > { %s4533_s20 = sshll.u32 %s4110_s8, 4  ;;  %s4111_s19 = smov [#allocation3 + $0x25]  }
 0x15e   : > { %5279 = sst [smem:[#allocation192_spill]] %s4533_s20  ;;  %s4539_s28 = sshll.u32 %s4111_s19, 4  ;;  %s518_s28 = int_to_ptr.vmem [resolvable:$true] %s4539_s28 }
 0x15f   : > { %s472_s9 = scalar_lea.hbm %s5229_s3, %s471_s25 }
 0x160   : > { %s481_s5 = sshll.u32 %s472_s9, 4  ;;  %s482_s5 = int_to_ptr.hbm [resolvable:$true] %s481_s5 }
 0x161   : > { %s489_s18 = scalar_lea.hbm %s5229_s3, %s488_s1  ;;  %s2649_s22 = sshra.s32 %s482_s5, 4  ;;  %s2650_s22 = int_to_ptr.hbm [resolvable:$true] %s2649_s22 }
 0x162   : > { %s2651_s8 = scalar_lea.hbm %s2650_s22, 1  ;;  %p2654_p9 = scmp.lt.s32.totalorder %s2650_s22, %s5229_s3 }
 0x163   : > { %p2652_p8 = scmp.ne.s32.totalorder %s2650_s22, %s2651_s8  ;;  %p2655_p10 = scmp.lt.s32.totalorder %s4274_s10, %s2651_s8 }
 0x165   : > { %p2656_p11 = por %p2655_p10, %p2654_p9 }
 0x167   : > { %p2657_p12 = pnand %p2656_p11, %p2652_p8 }
 0x169   : > { %2660 = shalt.err (!%p2657_p12)  }
 0x16a   : > { %486 = dma.hbm_to_vmem [thread:$0]  %s482_s5, 16, %s484_s17, [#allocation4 + $0x1] }
 0x16b   : > { %s498_s25 = sshll.u32 %s489_s18, 4  ;;  %s506_s9 = scalar_lea.hbm %s5229_s3, %s505_s13  ;;  %s499_s25 = int_to_ptr.hbm [resolvable:$true] %s498_s25 }
 0x16c   : > { %s515_s1 = sshll.u32 %s506_s9, 4  ;;  %s2673_s19 = sshra.s32 %s499_s25, 4  ;;  %s2674_s19 = int_to_ptr.hbm [resolvable:$true] %s2673_s19  ;;  %s516_s1 = int_to_ptr.hbm [resolvable:$true] %s515_s1 }
 0x16d   : > { %s2675_s16 = scalar_lea.hbm %s2674_s19, 1  ;;  %p2678_p0 = scmp.lt.s32.totalorder %s2674_s19, %s5229_s3 }
 0x16e   : > { %p2676_p13 = scmp.ne.s32.totalorder %s2674_s19, %s2675_s16  ;;  %p2679_p1 = scmp.lt.s32.totalorder %s4274_s10, %s2675_s16 }
 0x170   : > { %p2680_p2 = por %p2679_p1, %p2678_p0 }
 0x172   : > { %p2681_p3 = pnand %p2680_p2, %p2676_p13 }
 0x174   : > { %2684 = shalt.err (!%p2681_p3)  }
 0x175   : > { %s5280_s17 = sld [smem:[#allocation192_spill]]  ;;  %s521_s13 = sadd.s32 6, %s4488_s26 }
 0x176   : > { %s2697_s18 = sshra.s32 %s516_s1, 4  ;;  %s2698_s18 = int_to_ptr.hbm [resolvable:$true] %s2697_s18 }
 0x177   : > { %s2699_s22 = scalar_lea.hbm %s2698_s18, 1  ;;  %p2702_p7 = scmp.lt.s32.totalorder %s2698_s18, %s5229_s3 }
 0x178   : > { %p2700_p5 = scmp.ne.s32.totalorder %s2698_s18, %s2699_s22  ;;  %p2703_p8 = scmp.lt.s32.totalorder %s4274_s10, %s2699_s22 }
 0x17a   : > { %p2704_p9 = por %p2703_p8, %p2702_p7 }
 0x17b   : > { %s5281_s5 = int_to_ptr.vmem [resolvable:$true] %s5280_s17 }
 0x17c   : > { %503 = dma.hbm_to_vmem [thread:$0]  %s499_s25, 16, %s5281_s5, [#allocation4 + $0x1] }
 0x17d   : > { %p2705_p10 = pnand %p2704_p9, %p2700_p5 }
 0x17f   : > { %2708 = shalt.err (!%p2705_p10)  }
 0x180   : > { %520 = dma.hbm_to_vmem [thread:$0]  %s516_s1, 16, %s518_s28, [#allocation4 + $0x1] }
 0x181   : > { %s522_s25 = sld [smem:[#allocation7 + %s521_s13]]  ;;  %s4112_s27 = smov [#allocation3 + $0x26]  }
 0x182   : > { %s534_s21 = sshll.u32 %s4112_s27, 4  ;;  %s538_s9 = sadd.s32 7, %s4488_s26  ;;  %s535_s21 = int_to_ptr.vmem [resolvable:$true] %s534_s21 }
 0x183   : > { %s539_s19 = sld [smem:[#allocation7 + %s538_s9]]  ;;  %s555_s16 = sadd.s32 8, %s4488_s26 }
 0x184   : > { %s4113_s12 = smov [#allocation3 + $0x27]   ;;  %s556_s17 = sld [smem:[#allocation7 + %s555_s16]] }
 0x185   : > { %s4567_s20 = sshll.u32 %s4113_s12, 4  ;;  %s4114_s8 = smov [#allocation3 + $0x28]   ;;  %s552_s20 = int_to_ptr.vmem [resolvable:$true] %s4567_s20 }
 0x186   : > { %s4573_s28 = sshll.u32 %s4114_s8, 4  ;;  %s569_s28 = int_to_ptr.vmem [resolvable:$true] %s4573_s28 }
 0x187   : > { %s523_s22 = scalar_lea.hbm %s5229_s3, %s522_s25 }
 0x188   : > { %s532_s1 = sshll.u32 %s523_s22, 4  ;;  %s533_s1 = int_to_ptr.hbm [resolvable:$true] %s532_s1 }
 0x189   : > { %s540_s15 = scalar_lea.hbm %s5229_s3, %s539_s19  ;;  %s2721_s27 = sshra.s32 %s533_s1, 4  ;;  %s2722_s27 = int_to_ptr.hbm [resolvable:$true] %s2721_s27 }
 0x18a   : > { %s2723_s9 = scalar_lea.hbm %s2722_s27, 1  ;;  %p2726_p12 = scmp.lt.s32.totalorder %s2722_s27, %s5229_s3 }
 0x18b   : > { %p2724_p11 = scmp.ne.s32.totalorder %s2722_s27, %s2723_s9  ;;  %p2727_p13 = scmp.lt.s32.totalorder %s4274_s10, %s2723_s9 }
 0x18d   : > { %p2728_p0 = por %p2727_p13, %p2726_p12 }
 0x18f   : > { %p2729_p1 = pnand %p2728_p0, %p2724_p11 }
 0x191   : > { %2732 = shalt.err (!%p2729_p1)  }
 0x192   : > { %537 = dma.hbm_to_vmem [thread:$0]  %s533_s1, 16, %s535_s21, [#allocation4 + $0x1] }
 0x193   : > { %s549_s25 = sshll.u32 %s540_s15, 4  ;;  %s557_s22 = scalar_lea.hbm %s5229_s3, %s556_s17  ;;  %s550_s25 = int_to_ptr.hbm [resolvable:$true] %s549_s25 }
 0x194   : > { %s566_s19 = sshll.u32 %s557_s22, 4  ;;  %s2745_s8 = sshra.s32 %s550_s25, 4  ;;  %s2746_s8 = int_to_ptr.hbm [resolvable:$true] %s2745_s8  ;;  %s567_s19 = int_to_ptr.hbm [resolvable:$true] %s566_s19 }
 0x195   : > { %s2747_s13 = scalar_lea.hbm %s2746_s8, 1  ;;  %p2750_p3 = scmp.lt.s32.totalorder %s2746_s8, %s5229_s3 }
 0x196   : > { %p2748_p2 = scmp.ne.s32.totalorder %s2746_s8, %s2747_s13  ;;  %p2751_p5 = scmp.lt.s32.totalorder %s4274_s10, %s2747_s13 }
 0x198   : > { %p2752_p7 = por %p2751_p5, %p2750_p3 }
 0x19a   : > { %p2753_p8 = pnand %p2752_p7, %p2748_p2 }
 0x19c   : > { %2756 = shalt.err (!%p2753_p8)  }
 0x19d   : > { %554 = dma.hbm_to_vmem [thread:$0]  %s550_s25, 16, %s552_s20, [#allocation4 + $0x1] }
 0x19e   : > { %s572_s21 = sadd.s32 3, %s4235_s6  ;;  %s2769_s17 = sshra.s32 %s567_s19, 4  ;;  %s2770_s17 = int_to_ptr.hbm [resolvable:$true] %s2769_s17 }
 0x19f   : > { %s2771_s1 = scalar_lea.hbm %s2770_s17, 1  ;;  %p2774_p10 = scmp.lt.s32.totalorder %s2770_s17, %s5229_s3 }
 0x1a0   : > { %p2772_p9 = scmp.ne.s32.totalorder %s2770_s17, %s2771_s1  ;;  %p2775_p11 = scmp.lt.s32.totalorder %s4274_s10, %s2771_s1 }
 0x1a2   : > { %p2776_p12 = por %p2775_p11, %p2774_p10 }
 0x1a4   : > { %p2777_p13 = pnand %p2776_p12, %p2772_p9 }
 0x1a6   : > { %2780 = shalt.err (!%p2777_p13)  }
 0x1a7   : > { %571 = dma.hbm_to_vmem [thread:$0]  %s567_s19, 16, %s569_s28, [#allocation4 + $0x1] }
 0x1a8   : > { %s573_s9 = sld [smem:[#allocation6 + %s572_s21]]  ;;  %s4115_s20 = smov [#allocation2 + $0x3]  }
 0x1a9   : > { %s585_s12 = sshll.u32 %s4115_s20, 4  ;;  %s4600_s25 = sadd.s32 384, %s4243_s11  ;;  %s586_s12 = int_to_ptr.vmem [resolvable:$true] %s585_s12 }
 0x1aa   : > { %s590_s5 = sld [smem:[#allocation7 + %s4600_s25]]  ;;  %s606_s18 = sadd.s32 1, %s4600_s25 }
 0x1ab   : > { %s4116_s22 = smov [#allocation3 + $0x30]   ;;  %s607_s13 = sld [smem:[#allocation7 + %s606_s18]] }
 0x1ac   : > { %s4604_s8 = sshll.u32 %s4116_s22, 4  ;;  %s4117_s19 = smov [#allocation3 + $0x31]  }
 0x1ad   : > { %5282 = sst [smem:[#allocation192_spill]] %s4604_s8  ;;  %s4610_s21 = sshll.u32 %s4117_s19, 4  ;;  %s620_s21 = int_to_ptr.vmem [resolvable:$true] %s4610_s21 }
 0x1ae   : > { %s574_s28 = scalar_lea.hbm %s5228_s2, %s573_s9 }
 0x1af   : > { %s583_s17 = sshll.u32 %s574_s28, 4  ;;  %s584_s17 = int_to_ptr.hbm [resolvable:$true] %s583_s17 }
 0x1b0   : > { %s591_s27 = scalar_lea.hbm %s5229_s3, %s590_s5  ;;  %s2793_s20 = sshra.s32 %s584_s17, 4  ;;  %s2794_s20 = int_to_ptr.hbm [resolvable:$true] %s2793_s20 }
 0x1b1   : > { %s2795_s22 = scalar_lea.hbm %s2794_s20, 1  ;;  %p2798_p1 = scmp.lt.s32.totalorder %s2794_s20, %s5228_s2 }
 0x1b2   : > { %p2796_p0 = scmp.ne.s32.totalorder %s2794_s20, %s2795_s22  ;;  %p2799_p2 = scmp.lt.s32.totalorder %s4258_s14, %s2795_s22 }
 0x1b4   : > { %p2800_p3 = por %p2799_p2, %p2798_p1 }
 0x1b6   : > { %p2801_p5 = pnand %p2800_p3, %p2796_p0 }
 0x1b8   : > { %2804 = shalt.err (!%p2801_p5)  }
 0x1b9   : > { %588 = dma.hbm_to_vmem [thread:$0]  %s584_s17, 16, %s586_s12, [#allocation4] }
 0x1ba   : > { %s600_s9 = sshll.u32 %s591_s27, 4  ;;  %s608_s28 = scalar_lea.hbm %s5229_s3, %s607_s13  ;;  %s601_s9 = int_to_ptr.hbm [resolvable:$true] %s600_s9 }
 0x1bb   : > { %s617_s5 = sshll.u32 %s608_s28, 4  ;;  %s2817_s19 = sshra.s32 %s601_s9, 4  ;;  %s2818_s19 = int_to_ptr.hbm [resolvable:$true] %s2817_s19  ;;  %s618_s5 = int_to_ptr.hbm [resolvable:$true] %s617_s5 }
 0x1bc   : > { %s2819_s1 = scalar_lea.hbm %s2818_s19, 1  ;;  %p2822_p8 = scmp.lt.s32.totalorder %s2818_s19, %s5229_s3 }
 0x1bd   : > { %p2820_p7 = scmp.ne.s32.totalorder %s2818_s19, %s2819_s1  ;;  %p2823_p9 = scmp.lt.s32.totalorder %s4274_s10, %s2819_s1 }
 0x1bf   : > { %p2824_p10 = por %p2823_p9, %p2822_p8 }
 0x1c1   : > { %p2825_p11 = pnand %p2824_p10, %p2820_p7 }
 0x1c3   : > { %2828 = shalt.err (!%p2825_p11)  }
 0x1c4   : > { %s5283_s12 = sld [smem:[#allocation192_spill]]  ;;  %s623_s13 = sadd.s32 2, %s4600_s25 }
 0x1c5   : > { %s2841_s27 = sshra.s32 %s618_s5, 4  ;;  %s2842_s27 = int_to_ptr.hbm [resolvable:$true] %s2841_s27 }
 0x1c6   : > { %s2843_s20 = scalar_lea.hbm %s2842_s27, 1  ;;  %p2846_p13 = scmp.lt.s32.totalorder %s2842_s27, %s5229_s3 }
 0x1c7   : > { %p2844_p12 = scmp.ne.s32.totalorder %s2842_s27, %s2843_s20  ;;  %p2847_p0 = scmp.lt.s32.totalorder %s4274_s10, %s2843_s20 }
 0x1c9   : > { %p2848_p1 = por %p2847_p0, %p2846_p13 }
 0x1ca   : > { %s5284_s17 = int_to_ptr.vmem [resolvable:$true] %s5283_s12 }
 0x1cb   : > { %605 = dma.hbm_to_vmem [thread:$0]  %s601_s9, 16, %s5284_s17, [#allocation4 + $0x1] }
 0x1cc   : > { %p2849_p2 = pnand %p2848_p1, %p2844_p12 }
 0x1ce   : > { %2852 = shalt.err (!%p2849_p2)  }
 0x1cf   : > { %622 = dma.hbm_to_vmem [thread:$0]  %s618_s5, 16, %s620_s21, [#allocation4 + $0x1] }
 0x1d0   : > { %s624_s9 = sld [smem:[#allocation7 + %s623_s13]]  ;;  %s4118_s26 = smov [#allocation3 + $0x32]  }
 0x1d1   : > { %s636_s16 = sshll.u32 %s4118_s26, 4  ;;  %s640_s28 = sadd.s32 3, %s4600_s25  ;;  %s637_s16 = int_to_ptr.vmem [resolvable:$true] %s636_s16 }
 0x1d2   : > { %s641_s19 = sld [smem:[#allocation7 + %s640_s28]]  ;;  %s657_s1 = sadd.s32 4, %s4600_s25 }
 0x1d3   : > { %s4119_s15 = smov [#allocation3 + $0x33]   ;;  %s658_s12 = sld [smem:[#allocation7 + %s657_s1]] }
 0x1d4   : > { %s4638_s8 = sshll.u32 %s4119_s15, 4  ;;  %s4120_s22 = smov [#allocation3 + $0x34]  }
 0x1d5   : > { %5285 = sst [smem:[#allocation192_spill]] %s4638_s8  ;;  %s4644_s21 = sshll.u32 %s4120_s22, 4  ;;  %s671_s21 = int_to_ptr.vmem [resolvable:$true] %s4644_s21 }
 0x1d6   : > { %s625_s20 = scalar_lea.hbm %s5229_s3, %s624_s9 }
 0x1d7   : > { %s634_s5 = sshll.u32 %s625_s20, 4  ;;  %s635_s5 = int_to_ptr.hbm [resolvable:$true] %s634_s5 }
 0x1d8   : > { %s642_s26 = scalar_lea.hbm %s5229_s3, %s641_s19  ;;  %s2865_s28 = sshra.s32 %s635_s5, 4  ;;  %s2866_s28 = int_to_ptr.hbm [resolvable:$true] %s2865_s28 }
 0x1d9   : > { %s2867_s15 = scalar_lea.hbm %s2866_s28, 1  ;;  %p2870_p5 = scmp.lt.s32.totalorder %s2866_s28, %s5229_s3 }
 0x1da   : > { %p2868_p3 = scmp.ne.s32.totalorder %s2866_s28, %s2867_s15  ;;  %p2871_p7 = scmp.lt.s32.totalorder %s4274_s10, %s2867_s15 }
 0x1dc   : > { %p2872_p8 = por %p2871_p7, %p2870_p5 }
 0x1de   : > { %p2873_p9 = pnand %p2872_p8, %p2868_p3 }
 0x1e0   : > { %2876 = shalt.err (!%p2873_p9)  }
 0x1e1   : > { %639 = dma.hbm_to_vmem [thread:$0]  %s635_s5, 16, %s637_s16, [#allocation4 + $0x1] }
 0x1e2   : > { %s651_s9 = sshll.u32 %s642_s26, 4  ;;  %s659_s20 = scalar_lea.hbm %s5229_s3, %s658_s12  ;;  %s652_s9 = int_to_ptr.hbm [resolvable:$true] %s651_s9 }
 0x1e3   : > { %s668_s19 = sshll.u32 %s659_s20, 4  ;;  %s2889_s22 = sshra.s32 %s652_s9, 4  ;;  %s2890_s22 = int_to_ptr.hbm [resolvable:$true] %s2889_s22  ;;  %s669_s19 = int_to_ptr.hbm [resolvable:$true] %s668_s19 }
 0x1e4   : > { %s2891_s13 = scalar_lea.hbm %s2890_s22, 1  ;;  %p2894_p11 = scmp.lt.s32.totalorder %s2890_s22, %s5229_s3 }
 0x1e5   : > { %p2892_p10 = scmp.ne.s32.totalorder %s2890_s22, %s2891_s13  ;;  %p2895_p12 = scmp.lt.s32.totalorder %s4274_s10, %s2891_s13 }
 0x1e7   : > { %p2896_p13 = por %p2895_p12, %p2894_p11 }
 0x1e9   : > { %p2897_p0 = pnand %p2896_p13, %p2892_p10 }
 0x1eb   : > { %2900 = shalt.err (!%p2897_p0)  }
 0x1ec   : > { %s5286_s16 = sld [smem:[#allocation192_spill]]  ;;  %s674_s12 = sadd.s32 5, %s4600_s25 }
 0x1ed   : > { %s2913_s26 = sshra.s32 %s669_s19, 4  ;;  %s2914_s26 = int_to_ptr.hbm [resolvable:$true] %s2913_s26 }
 0x1ee   : > { %s2915_s28 = scalar_lea.hbm %s2914_s26, 1  ;;  %p2918_p2 = scmp.lt.s32.totalorder %s2914_s26, %s5229_s3 }
 0x1ef   : > { %p2916_p1 = scmp.ne.s32.totalorder %s2914_s26, %s2915_s28  ;;  %p2919_p3 = scmp.lt.s32.totalorder %s4274_s10, %s2915_s28 }
 0x1f1   : > { %p2920_p5 = por %p2919_p3, %p2918_p2 }
 0x1f2   : > { %s5287_s5 = int_to_ptr.vmem [resolvable:$true] %s5286_s16 }
 0x1f3   : > { %656 = dma.hbm_to_vmem [thread:$0]  %s652_s9, 16, %s5287_s5, [#allocation4 + $0x1] }
 0x1f4   : > { %p2921_p7 = pnand %p2920_p5, %p2916_p1 }
 0x1f6   : > { %2924 = shalt.err (!%p2921_p7)  }
 0x1f7   : > { %673 = dma.hbm_to_vmem [thread:$0]  %s669_s19, 16, %s671_s21, [#allocation4 + $0x1] }
 0x1f8   : > { %s675_s9 = sld [smem:[#allocation7 + %s674_s12]]  ;;  %s4121_s17 = smov [#allocation3 + $0x35]  }
 0x1f9   : > { %s687_s27 = sshll.u32 %s4121_s17, 4  ;;  %s691_s20 = sadd.s32 6, %s4600_s25  ;;  %s688_s27 = int_to_ptr.vmem [resolvable:$true] %s687_s27 }
 0x1fa   : > { %s692_s22 = sld [smem:[#allocation7 + %s691_s20]]  ;;  %s708_s13 = sadd.s32 7, %s4600_s25 }
 0x1fb   : > { %s4122_s18 = smov [#allocation3 + $0x36]   ;;  %s709_s16 = sld [smem:[#allocation7 + %s708_s13]] }
 0x1fc   : > { %s4672_s8 = sshll.u32 %s4122_s18, 4  ;;  %s4123_s15 = smov [#allocation3 + $0x37]  }
 0x1fd   : > { %5288 = sst [smem:[#allocation192_spill]] %s4672_s8  ;;  %s4678_s21 = sshll.u32 %s4123_s15, 4  ;;  %s722_s21 = int_to_ptr.vmem [resolvable:$true] %s4678_s21 }
 0x1fe   : > { %s676_s28 = scalar_lea.hbm %s5229_s3, %s675_s9 }
 0x1ff   : > { %s685_s19 = sshll.u32 %s676_s28, 4  ;;  %s686_s19 = int_to_ptr.hbm [resolvable:$true] %s685_s19 }
 0x200   : > { %s693_s17 = scalar_lea.hbm %s5229_s3, %s692_s22  ;;  %s2937_s20 = sshra.s32 %s686_s19, 4  ;;  %s2938_s20 = int_to_ptr.hbm [resolvable:$true] %s2937_s20 }
 0x201   : > { %s2939_s18 = scalar_lea.hbm %s2938_s20, 1  ;;  %p2942_p9 = scmp.lt.s32.totalorder %s2938_s20, %s5229_s3 }
 0x202   : > { %p2940_p8 = scmp.ne.s32.totalorder %s2938_s20, %s2939_s18  ;;  %p2943_p10 = scmp.lt.s32.totalorder %s4274_s10, %s2939_s18 }
 0x204   : > { %p2944_p11 = por %p2943_p10, %p2942_p9 }
 0x206   : > { %p2945_p12 = pnand %p2944_p11, %p2940_p8 }
 0x208   : > { %2948 = shalt.err (!%p2945_p12)  }
 0x209   : > { %690 = dma.hbm_to_vmem [thread:$0]  %s686_s19, 16, %s688_s27, [#allocation4 + $0x1] }
 0x20a   : > { %s702_s9 = sshll.u32 %s693_s17, 4  ;;  %s710_s28 = scalar_lea.hbm %s5229_s3, %s709_s16  ;;  %s703_s9 = int_to_ptr.hbm [resolvable:$true] %s702_s9 }
 0x20b   : > { %s719_s22 = sshll.u32 %s710_s28, 4  ;;  %s2961_s15 = sshra.s32 %s703_s9, 4  ;;  %s2962_s15 = int_to_ptr.hbm [resolvable:$true] %s2961_s15  ;;  %s720_s22 = int_to_ptr.hbm [resolvable:$true] %s719_s22 }
 0x20c   : > { %s2963_s12 = scalar_lea.hbm %s2962_s15, 1  ;;  %p2966_p0 = scmp.lt.s32.totalorder %s2962_s15, %s5229_s3 }
 0x20d   : > { %p2964_p13 = scmp.ne.s32.totalorder %s2962_s15, %s2963_s12  ;;  %p2967_p1 = scmp.lt.s32.totalorder %s4274_s10, %s2963_s12 }
 0x20f   : > { %p2968_p2 = por %p2967_p1, %p2966_p0 }
 0x211   : > { %p2969_p3 = pnand %p2968_p2, %p2964_p13 }
 0x213   : > { %2972 = shalt.err (!%p2969_p3)  }
 0x214   : > { %s5289_s27 = sld [smem:[#allocation192_spill]]  ;;  %s725_s16 = sadd.s32 8, %s4600_s25 }
 0x215   : > { %s2985_s17 = sshra.s32 %s720_s22, 4  ;;  %s2986_s17 = int_to_ptr.hbm [resolvable:$true] %s2985_s17 }
 0x216   : > { %s2987_s20 = scalar_lea.hbm %s2986_s17, 1  ;;  %p2990_p7 = scmp.lt.s32.totalorder %s2986_s17, %s5229_s3 }
 0x217   : > { %p2988_p5 = scmp.ne.s32.totalorder %s2986_s17, %s2987_s20  ;;  %p2991_p8 = scmp.lt.s32.totalorder %s4274_s10, %s2987_s20 }
 0x219   : > { %p2992_p9 = por %p2991_p8, %p2990_p7 }
 0x21a   : > { %s5290_s19 = int_to_ptr.vmem [resolvable:$true] %s5289_s27 }
 0x21b   : > { %707 = dma.hbm_to_vmem [thread:$0]  %s703_s9, 16, %s5290_s19, [#allocation4 + $0x1] }
 0x21c   : > { %p2993_p10 = pnand %p2992_p9, %p2988_p5 }
 0x21e   : > { %2996 = shalt.err (!%p2993_p10)  }
 0x21f   : > { %724 = dma.hbm_to_vmem [thread:$0]  %s720_s22, 16, %s722_s21, [#allocation4 + $0x1] }
 0x220   : > { %s726_s9 = sld [smem:[#allocation7 + %s725_s16]]  ;;  %s4124_s5 = smov [#allocation3 + $0x38]  }
 0x221   : > { %s738_s25 = sshll.u32 %s4124_s5, 4  ;;  %s742_s26 = sadd.s32 4, %s4235_s6  ;;  %s739_s25 = int_to_ptr.vmem [resolvable:$true] %s738_s25 }
 0x222   : > { %s743_s28 = sld [smem:[#allocation6 + %s742_s26]]  ;;  %s4706_s15 = sadd.s32 512, %s4243_s11 }
 0x223   : > { %s4125_s12 = smov [#allocation2 + $0x4]   ;;  %s760_s8 = sld [smem:[#allocation7 + %s4706_s15]] }
 0x224   : > { %s4708_s1 = sshll.u32 %s4125_s12, 4  ;;  %s4126_s22 = smov [#allocation3 + $0x40]  }
 0x225   : > { %5291 = sst [smem:[#allocation192_spill]] %s4708_s1  ;;  %s4715_s16 = sshll.u32 %s4126_s22, 4  ;;  %s773_s16 = int_to_ptr.vmem [resolvable:$true] %s4715_s16 }
 0x226   : > { %s727_s21 = scalar_lea.hbm %s5229_s3, %s726_s9 }
 0x227   : > { %s736_s17 = sshll.u32 %s727_s21, 4  ;;  %s737_s17 = int_to_ptr.hbm [resolvable:$true] %s736_s17 }
 0x228   : > { %s744_s13 = scalar_lea.hbm %s5228_s2, %s743_s28  ;;  %s3009_s5 = sshra.s32 %s737_s17, 4  ;;  %s3010_s5 = int_to_ptr.hbm [resolvable:$true] %s3009_s5 }
 0x229   : > { %s3011_s26 = scalar_lea.hbm %s3010_s5, 1  ;;  %p3014_p12 = scmp.lt.s32.totalorder %s3010_s5, %s5229_s3 }
 0x22a   : > { %p3012_p11 = scmp.ne.s32.totalorder %s3010_s5, %s3011_s26  ;;  %p3015_p13 = scmp.lt.s32.totalorder %s4274_s10, %s3011_s26 }
 0x22c   : > { %p3016_p0 = por %p3015_p13, %p3014_p12 }
 0x22e   : > { %p3017_p1 = pnand %p3016_p0, %p3012_p11 }
 0x230   : > { %3020 = shalt.err (!%p3017_p1)  }
 0x231   : > { %741 = dma.hbm_to_vmem [thread:$0]  %s737_s17, 16, %s739_s25, [#allocation4 + $0x1] }
 0x232   : > { %s753_s9 = sshll.u32 %s744_s13, 4  ;;  %s761_s21 = scalar_lea.hbm %s5229_s3, %s760_s8  ;;  %s754_s9 = int_to_ptr.hbm [resolvable:$true] %s753_s9 }
 0x233   : > { %s770_s28 = sshll.u32 %s761_s21, 4  ;;  %s3033_s22 = sshra.s32 %s754_s9, 4  ;;  %s3034_s22 = int_to_ptr.hbm [resolvable:$true] %s3033_s22  ;;  %s771_s28 = int_to_ptr.hbm [resolvable:$true] %s770_s28 }
 0x234   : > { %s3035_s20 = scalar_lea.hbm %s3034_s22, 1  ;;  %p3038_p3 = scmp.lt.s32.totalorder %s3034_s22, %s5228_s2 }
 0x235   : > { %p3036_p2 = scmp.ne.s32.totalorder %s3034_s22, %s3035_s20  ;;  %p3039_p5 = scmp.lt.s32.totalorder %s4258_s14, %s3035_s20 }
 0x237   : > { %p3040_p7 = por %p3039_p5, %p3038_p3 }
 0x239   : > { %p3041_p8 = pnand %p3040_p7, %p3036_p2 }
 0x23b   : > { %3044 = shalt.err (!%p3041_p8)  }
 0x23c   : > { %s5292_s25 = sld [smem:[#allocation192_spill]]  ;;  %s776_s8 = sadd.s32 1, %s4706_s15 }
 0x23d   : > { %s3057_s13 = sshra.s32 %s771_s28, 4  ;;  %s3058_s13 = int_to_ptr.hbm [resolvable:$true] %s3057_s13 }
 0x23e   : > { %s3059_s5 = scalar_lea.hbm %s3058_s13, 1  ;;  %p3062_p10 = scmp.lt.s32.totalorder %s3058_s13, %s5229_s3 }
 0x23f   : > { %p3060_p9 = scmp.ne.s32.totalorder %s3058_s13, %s3059_s5  ;;  %p3063_p11 = scmp.lt.s32.totalorder %s4274_s10, %s3059_s5 }
 0x241   : > { %p3064_p12 = por %p3063_p11, %p3062_p10 }
 0x242   : > { %s5293_s17 = int_to_ptr.vmem [resolvable:$true] %s5292_s25 }
 0x243   : > { %758 = dma.hbm_to_vmem [thread:$0]  %s754_s9, 16, %s5293_s17, [#allocation4] }
 0x244   : > { %p3065_p13 = pnand %p3064_p12, %p3060_p9 }
 0x246   : > { %3068 = shalt.err (!%p3065_p13)  }
 0x247   : > { %775 = dma.hbm_to_vmem [thread:$0]  %s771_s28, 16, %s773_s16, [#allocation4 + $0x1] }
 0x248   : > { %s777_s9 = sld [smem:[#allocation7 + %s776_s8]]  ;;  %s4127_s27 = smov [#allocation3 + $0x41]  }
 0x249   : > { %s789_s19 = sshll.u32 %s4127_s27, 4  ;;  %s793_s21 = sadd.s32 2, %s4706_s15  ;;  %s790_s19 = int_to_ptr.vmem [resolvable:$true] %s789_s19 }
 0x24a   : > { %s794_s22 = sld [smem:[#allocation7 + %s793_s21]]  ;;  %s810_s20 = sadd.s32 3, %s4706_s15 }
 0x24b   : > { %s4128_s18 = smov [#allocation3 + $0x42]   ;;  %s811_s25 = sld [smem:[#allocation7 + %s810_s20]] }
 0x24c   : > { %s4743_s1 = sshll.u32 %s4128_s18, 4  ;;  %s4129_s26 = smov [#allocation3 + $0x43]  }
 0x24d   : > { %5294 = sst [smem:[#allocation192_spill]] %s4743_s1  ;;  %s4749_s16 = sshll.u32 %s4129_s26, 4  ;;  %s824_s16 = int_to_ptr.vmem [resolvable:$true] %s4749_s16 }
 0x24e   : > { %s778_s5 = scalar_lea.hbm %s5229_s3, %s777_s9 }
 0x24f   : > { %s787_s28 = sshll.u32 %s778_s5, 4  ;;  %s788_s28 = int_to_ptr.hbm [resolvable:$true] %s787_s28 }
 0x250   : > { %s795_s27 = scalar_lea.hbm %s5229_s3, %s794_s22  ;;  %s3081_s21 = sshra.s32 %s788_s28, 4  ;;  %s3082_s21 = int_to_ptr.hbm [resolvable:$true] %s3081_s21 }
 0x251   : > { %s3083_s18 = scalar_lea.hbm %s3082_s21, 1  ;;  %p3086_p1 = scmp.lt.s32.totalorder %s3082_s21, %s5229_s3 }
 0x252   : > { %p3084_p0 = scmp.ne.s32.totalorder %s3082_s21, %s3083_s18  ;;  %p3087_p2 = scmp.lt.s32.totalorder %s4274_s10, %s3083_s18 }
 0x254   : > { %p3088_p3 = por %p3087_p2, %p3086_p1 }
 0x256   : > { %p3089_p5 = pnand %p3088_p3, %p3084_p0 }
 0x258   : > { %3092 = shalt.err (!%p3089_p5)  }
 0x259   : > { %792 = dma.hbm_to_vmem [thread:$0]  %s788_s28, 16, %s790_s19, [#allocation4 + $0x1] }
 0x25a   : > { %s804_s9 = sshll.u32 %s795_s27, 4  ;;  %s812_s5 = scalar_lea.hbm %s5229_s3, %s811_s25  ;;  %s805_s9 = int_to_ptr.hbm [resolvable:$true] %s804_s9 }
 0x25b   : > { %s821_s22 = sshll.u32 %s812_s5, 4  ;;  %s3105_s26 = sshra.s32 %s805_s9, 4  ;;  %s3106_s26 = int_to_ptr.hbm [resolvable:$true] %s3105_s26  ;;  %s822_s22 = int_to_ptr.hbm [resolvable:$true] %s821_s22 }
 0x25c   : > { %s3107_s8 = scalar_lea.hbm %s3106_s26, 1  ;;  %p3110_p8 = scmp.lt.s32.totalorder %s3106_s26, %s5229_s3 }
 0x25d   : > { %p3108_p7 = scmp.ne.s32.totalorder %s3106_s26, %s3107_s8  ;;  %p3111_p9 = scmp.lt.s32.totalorder %s4274_s10, %s3107_s8 }
 0x25f   : > { %p3112_p10 = por %p3111_p9, %p3110_p8 }
 0x261   : > { %p3113_p11 = pnand %p3112_p10, %p3108_p7 }
 0x263   : > { %3116 = shalt.err (!%p3113_p11)  }
 0x264   : > { %s5295_s19 = sld [smem:[#allocation192_spill]]  ;;  %s827_s25 = sadd.s32 4, %s4706_s15 }
 0x265   : > { %s3129_s27 = sshra.s32 %s822_s22, 4  ;;  %s3130_s27 = int_to_ptr.hbm [resolvable:$true] %s3129_s27 }
 0x266   : > { %s3131_s21 = scalar_lea.hbm %s3130_s27, 1  ;;  %p3134_p13 = scmp.lt.s32.totalorder %s3130_s27, %s5229_s3 }
 0x267   : > { %p3132_p12 = scmp.ne.s32.totalorder %s3130_s27, %s3131_s21  ;;  %p3135_p0 = scmp.lt.s32.totalorder %s4274_s10, %s3131_s21 }
 0x269   : > { %p3136_p1 = por %p3135_p0, %p3134_p13 }
 0x26a   : > { %s5296_s28 = int_to_ptr.vmem [resolvable:$true] %s5295_s19 }
 0x26b   : > { %809 = dma.hbm_to_vmem [thread:$0]  %s805_s9, 16, %s5296_s28, [#allocation4 + $0x1] }
 0x26c   : > { %p3137_p2 = pnand %p3136_p1, %p3132_p12 }
 0x26e   : > { %3140 = shalt.err (!%p3137_p2)  }
 0x26f   : > { %826 = dma.hbm_to_vmem [thread:$0]  %s822_s22, 16, %s824_s16, [#allocation4 + $0x1] }
 0x270   : > { %s828_s9 = sld [smem:[#allocation7 + %s827_s25]]  ;;  %s4130_s17 = smov [#allocation3 + $0x44]  }
 0x271   : > { %s840_s13 = sshll.u32 %s4130_s17, 4  ;;  %s844_s5 = sadd.s32 5, %s4706_s15  ;;  %s841_s13 = int_to_ptr.vmem [resolvable:$true] %s840_s13 }
 0x272   : > { %s845_s26 = sld [smem:[#allocation7 + %s844_s5]]  ;;  %s861_s8 = sadd.s32 6, %s4706_s15 }
 0x273   : > { %s4131_s12 = smov [#allocation3 + $0x45]   ;;  %s862_s19 = sld [smem:[#allocation7 + %s861_s8]] }
 0x274   : > { %s4777_s1 = sshll.u32 %s4131_s12, 4  ;;  %s4132_s18 = smov [#allocation3 + $0x46]  }
 0x275   : > { %5297 = sst [smem:[#allocation192_spill]] %s4777_s1  ;;  %s4783_s16 = sshll.u32 %s4132_s18, 4  ;;  %s875_s16 = int_to_ptr.vmem [resolvable:$true] %s4783_s16 }
 0x276   : > { %s829_s21 = scalar_lea.hbm %s5229_s3, %s828_s9 }
 0x277   : > { %s838_s22 = sshll.u32 %s829_s21, 4  ;;  %s839_s22 = int_to_ptr.hbm [resolvable:$true] %s838_s22 }
 0x278   : > { %s846_s17 = scalar_lea.hbm %s5229_s3, %s845_s26  ;;  %s3153_s5 = sshra.s32 %s839_s22, 4  ;;  %s3154_s5 = int_to_ptr.hbm [resolvable:$true] %s3153_s5 }
 0x279   : > { %s3155_s12 = scalar_lea.hbm %s3154_s5, 1  ;;  %p3158_p5 = scmp.lt.s32.totalorder %s3154_s5, %s5229_s3 }
 0x27a   : > { %p3156_p3 = scmp.ne.s32.totalorder %s3154_s5, %s3155_s12  ;;  %p3159_p7 = scmp.lt.s32.totalorder %s4274_s10, %s3155_s12 }
 0x27c   : > { %p3160_p8 = por %p3159_p7, %p3158_p5 }
 0x27e   : > { %p3161_p9 = pnand %p3160_p8, %p3156_p3 }
 0x280   : > { %3164 = shalt.err (!%p3161_p9)  }
 0x281   : > { %843 = dma.hbm_to_vmem [thread:$0]  %s839_s22, 16, %s841_s13, [#allocation4 + $0x1] }
 0x282   : > { %s855_s9 = sshll.u32 %s846_s17, 4  ;;  %s863_s21 = scalar_lea.hbm %s5229_s3, %s862_s19  ;;  %s856_s9 = int_to_ptr.hbm [resolvable:$true] %s855_s9 }
 0x283   : > { %s872_s26 = sshll.u32 %s863_s21, 4  ;;  %s3177_s18 = sshra.s32 %s856_s9, 4  ;;  %s3178_s18 = int_to_ptr.hbm [resolvable:$true] %s3177_s18  ;;  %s873_s26 = int_to_ptr.hbm [resolvable:$true] %s872_s26 }
 0x284   : > { %s3179_s25 = scalar_lea.hbm %s3178_s18, 1  ;;  %p3182_p11 = scmp.lt.s32.totalorder %s3178_s18, %s5229_s3 }
 0x285   : > { %p3180_p10 = scmp.ne.s32.totalorder %s3178_s18, %s3179_s25  ;;  %p3183_p12 = scmp.lt.s32.totalorder %s4274_s10, %s3179_s25 }
 0x287   : > { %p3184_p13 = por %p3183_p12, %p3182_p11 }
 0x289   : > { %p3185_p0 = pnand %p3184_p13, %p3180_p10 }
 0x28b   : > { %3188 = shalt.err (!%p3185_p0)  }
 0x28c   : > { %s5298_s13 = sld [smem:[#allocation192_spill]]  ;;  %s878_s19 = sadd.s32 7, %s4706_s15 }
 0x28d   : > { %s3201_s17 = sshra.s32 %s873_s26, 4  ;;  %s3202_s17 = int_to_ptr.hbm [resolvable:$true] %s3201_s17 }
 0x28e   : > { %s3203_s5 = scalar_lea.hbm %s3202_s17, 1  ;;  %p3206_p2 = scmp.lt.s32.totalorder %s3202_s17, %s5229_s3 }
 0x28f   : > { %p3204_p1 = scmp.ne.s32.totalorder %s3202_s17, %s3203_s5  ;;  %p3207_p3 = scmp.lt.s32.totalorder %s4274_s10, %s3203_s5 }
 0x291   : > { %p3208_p5 = por %p3207_p3, %p3206_p2 }
 0x292   : > { %s5299_s22 = int_to_ptr.vmem [resolvable:$true] %s5298_s13 }
 0x293   : > { %860 = dma.hbm_to_vmem [thread:$0]  %s856_s9, 16, %s5299_s22, [#allocation4 + $0x1] }
 0x294   : > { %p3209_p7 = pnand %p3208_p5, %p3204_p1 }
 0x296   : > { %3212 = shalt.err (!%p3209_p7)  }
 0x297   : > { %877 = dma.hbm_to_vmem [thread:$0]  %s873_s26, 16, %s875_s16, [#allocation4 + $0x1] }
 0x298   : > { %s879_s9 = sld [smem:[#allocation7 + %s878_s19]]  ;;  %s4133_s28 = smov [#allocation3 + $0x47]  }
 0x299   : > { %s891_s27 = sshll.u32 %s4133_s28, 4  ;;  %s895_s21 = sadd.s32 8, %s4706_s15  ;;  %s892_s27 = int_to_ptr.vmem [resolvable:$true] %s891_s27 }
 0x29a   : > { %s896_s18 = sld [smem:[#allocation7 + %s895_s21]]  ;;  %s912_s25 = sadd.s32 5, %s4235_s6 }
 0x29b   : > { %s4134_s20 = smov [#allocation3 + $0x48]   ;;  %s913_s13 = sld [smem:[#allocation6 + %s912_s25]] }
 0x29c   : > { %s4811_s1 = sshll.u32 %s4134_s20, 4  ;;  %s4135_s12 = smov [#allocation2 + $0x5]   ;;  %s909_s1 = int_to_ptr.vmem [resolvable:$true] %s4811_s1 }
 0x29d   : > { %s4817_s16 = sshll.u32 %s4135_s12, 4  ;;  %s926_s16 = int_to_ptr.vmem [resolvable:$true] %s4817_s16 }
 0x29e   : > { %s880_s5 = scalar_lea.hbm %s5229_s3, %s879_s9 }
 0x29f   : > { %s889_s26 = sshll.u32 %s880_s5, 4  ;;  %s890_s26 = int_to_ptr.hbm [resolvable:$true] %s889_s26 }
 0x2a0   : > { %s897_s8 = scalar_lea.hbm %s5229_s3, %s896_s18  ;;  %s3225_s28 = sshra.s32 %s890_s26, 4  ;;  %s3226_s28 = int_to_ptr.hbm [resolvable:$true] %s3225_s28 }
 0x2a1   : > { %s3227_s21 = scalar_lea.hbm %s3226_s28, 1  ;;  %p3230_p9 = scmp.lt.s32.totalorder %s3226_s28, %s5229_s3 }
 0x2a2   : > { %p3228_p8 = scmp.ne.s32.totalorder %s3226_s28, %s3227_s21  ;;  %p3231_p10 = scmp.lt.s32.totalorder %s4274_s10, %s3227_s21 }
 0x2a4   : > { %p3232_p11 = por %p3231_p10, %p3230_p9 }
 0x2a6   : > { %p3233_p12 = pnand %p3232_p11, %p3228_p8 }
 0x2a8   : > { %3236 = shalt.err (!%p3233_p12)  }
 0x2a9   : > { %894 = dma.hbm_to_vmem [thread:$0]  %s890_s26, 16, %s892_s27, [#allocation4 + $0x1] }
 0x2aa   : > { %s906_s9 = sshll.u32 %s897_s8, 4  ;;  %s914_s5 = scalar_lea.hbm %s5228_s2, %s913_s13  ;;  %s907_s9 = int_to_ptr.hbm [resolvable:$true] %s906_s9 }
 0x2ab   : > { %s923_s18 = sshll.u32 %s914_s5, 4  ;;  %s3249_s12 = sshra.s32 %s907_s9, 4  ;;  %s3250_s12 = int_to_ptr.hbm [resolvable:$true] %s3249_s12  ;;  %s924_s18 = int_to_ptr.hbm [resolvable:$true] %s923_s18 }
 0x2ac   : > { %s3251_s15 = scalar_lea.hbm %s3250_s12, 1  ;;  %p3254_p0 = scmp.lt.s32.totalorder %s3250_s12, %s5229_s3 }
 0x2ad   : > { %p3252_p13 = scmp.ne.s32.totalorder %s3250_s12, %s3251_s15  ;;  %p3255_p1 = scmp.lt.s32.totalorder %s4274_s10, %s3251_s15 }
 0x2af   : > { %p3256_p2 = por %p3255_p1, %p3254_p0 }
 0x2b1   : > { %p3257_p3 = pnand %p3256_p2, %p3252_p13 }
 0x2b3   : > { %3260 = shalt.err (!%p3257_p3)  }
 0x2b4   : > { %911 = dma.hbm_to_vmem [thread:$0]  %s907_s9, 16, %s909_s1, [#allocation4 + $0x1] }
 0x2b5   : > { %s4837_s27 = sadd.s32 640, %s4243_s11  ;;  %s3273_s13 = sshra.s32 %s924_s18, 4  ;;  %s3274_s13 = int_to_ptr.hbm [resolvable:$true] %s3273_s13 }
 0x2b6   : > { %s3275_s26 = scalar_lea.hbm %s3274_s13, 1  ;;  %p3278_p7 = scmp.lt.s32.totalorder %s3274_s13, %s5228_s2 }
 0x2b7   : > { %p3276_p5 = scmp.ne.s32.totalorder %s3274_s13, %s3275_s26  ;;  %p3279_p8 = scmp.lt.s32.totalorder %s4258_s14, %s3275_s26 }
 0x2b9   : > { %p3280_p9 = por %p3279_p8, %p3278_p7 }
 0x2bb   : > { %p3281_p10 = pnand %p3280_p9, %p3276_p5 }
 0x2bd   : > { %3284 = shalt.err (!%p3281_p10)  }
 0x2be   : > { %928 = dma.hbm_to_vmem [thread:$0]  %s924_s18, 16, %s926_s16, [#allocation4] }
 0x2bf   : > { %s930_s1 = sld [smem:[#allocation7 + %s4837_s27]]  ;;  %s4136_s21 = smov [#allocation3 + $0x50]  }
 0x2c0   : > { %s942_s20 = sshll.u32 %s4136_s21, 4  ;;  %s946_s9 = sadd.s32 1, %s4837_s27  ;;  %s943_s20 = int_to_ptr.vmem [resolvable:$true] %s942_s20 }
 0x2c1   : > { %s947_s22 = sld [smem:[#allocation7 + %s946_s9]]  ;;  %s963_s17 = sadd.s32 2, %s4837_s27 }
 0x2c2   : > { %s4137_s5 = smov [#allocation3 + $0x51]   ;;  %s964_s15 = sld [smem:[#allocation7 + %s963_s17]] }
 0x2c3   : > { %s4848_s12 = sshll.u32 %s4137_s5, 4  ;;  %s4138_s26 = smov [#allocation3 + $0x52]  }
 0x2c4   : > { %5300 = sst [smem:[#allocation192_spill]] %s4848_s12  ;;  %s4854_s16 = sshll.u32 %s4138_s26, 4  ;;  %s977_s16 = int_to_ptr.vmem [resolvable:$true] %s4854_s16 }
 0x2c5   : > { %s931_s13 = scalar_lea.hbm %s5229_s3, %s930_s1 }
 0x2c6   : > { %s940_s18 = sshll.u32 %s931_s13, 4  ;;  %s941_s18 = int_to_ptr.hbm [resolvable:$true] %s940_s18 }
 0x2c7   : > { %s948_s21 = scalar_lea.hbm %s5229_s3, %s947_s22  ;;  %s3297_s9 = sshra.s32 %s941_s18, 4  ;;  %s3298_s9 = int_to_ptr.hbm [resolvable:$true] %s3297_s9 }
 0x2c8   : > { %s3299_s5 = scalar_lea.hbm %s3298_s9, 1  ;;  %p3302_p12 = scmp.lt.s32.totalorder %s3298_s9, %s5229_s3 }
 0x2c9   : > { %p3300_p11 = scmp.ne.s32.totalorder %s3298_s9, %s3299_s5  ;;  %p3303_p13 = scmp.lt.s32.totalorder %s4274_s10, %s3299_s5 }
 0x2cb   : > { %p3304_p0 = por %p3303_p13, %p3302_p12 }
 0x2cd   : > { %p3305_p1 = pnand %p3304_p0, %p3300_p11 }
 0x2cf   : > { %3308 = shalt.err (!%p3305_p1)  }
 0x2d0   : > { %945 = dma.hbm_to_vmem [thread:$0]  %s941_s18, 16, %s943_s20, [#allocation4 + $0x1] }
 0x2d1   : > { %s957_s1 = sshll.u32 %s948_s21, 4  ;;  %s965_s13 = scalar_lea.hbm %s5229_s3, %s964_s15  ;;  %s958_s1 = int_to_ptr.hbm [resolvable:$true] %s957_s1 }
 0x2d2   : > { %s974_s22 = sshll.u32 %s965_s13, 4  ;;  %s3321_s26 = sshra.s32 %s958_s1, 4  ;;  %s3322_s26 = int_to_ptr.hbm [resolvable:$true] %s3321_s26  ;;  %s975_s22 = int_to_ptr.hbm [resolvable:$true] %s974_s22 }
 0x2d3   : > { %s3323_s8 = scalar_lea.hbm %s3322_s26, 1  ;;  %p3326_p3 = scmp.lt.s32.totalorder %s3322_s26, %s5229_s3 }
 0x2d4   : > { %p3324_p2 = scmp.ne.s32.totalorder %s3322_s26, %s3323_s8  ;;  %p3327_p5 = scmp.lt.s32.totalorder %s4274_s10, %s3323_s8 }
 0x2d6   : > { %p3328_p7 = por %p3327_p5, %p3326_p3 }
 0x2d8   : > { %p3329_p8 = pnand %p3328_p7, %p3324_p2 }
 0x2da   : > { %3332 = shalt.err (!%p3329_p8)  }
 0x2db   : > { %s5301_s20 = sld [smem:[#allocation192_spill]]  ;;  %s980_s15 = sadd.s32 3, %s4837_s27 }
 0x2dc   : > { %s3345_s21 = sshra.s32 %s975_s22, 4  ;;  %s3346_s21 = int_to_ptr.hbm [resolvable:$true] %s3345_s21 }
 0x2dd   : > { %s3347_s9 = scalar_lea.hbm %s3346_s21, 1  ;;  %p3350_p10 = scmp.lt.s32.totalorder %s3346_s21, %s5229_s3 }
 0x2de   : > { %p3348_p9 = scmp.ne.s32.totalorder %s3346_s21, %s3347_s9  ;;  %p3351_p11 = scmp.lt.s32.totalorder %s4274_s10, %s3347_s9 }
 0x2e0   : > { %p3352_p12 = por %p3351_p11, %p3350_p10 }
 0x2e1   : > { %s5302_s18 = int_to_ptr.vmem [resolvable:$true] %s5301_s20 }
 0x2e2   : > { %962 = dma.hbm_to_vmem [thread:$0]  %s958_s1, 16, %s5302_s18, [#allocation4 + $0x1] }
 0x2e3   : > { %p3353_p13 = pnand %p3352_p12, %p3348_p9 }
 0x2e5   : > { %3356 = shalt.err (!%p3353_p13)  }
 0x2e6   : > { %979 = dma.hbm_to_vmem [thread:$0]  %s975_s22, 16, %s977_s16, [#allocation4 + $0x1] }
 0x2e7   : > { %s981_s1 = sld [smem:[#allocation7 + %s980_s15]]  ;;  %s4139_s19 = smov [#allocation3 + $0x53]  }
 0x2e8   : > { %s993_s25 = sshll.u32 %s4139_s19, 4  ;;  %s997_s13 = sadd.s32 4, %s4837_s27  ;;  %s994_s25 = int_to_ptr.vmem [resolvable:$true] %s993_s25 }
 0x2e9   : > { %s998_s26 = sld [smem:[#allocation7 + %s997_s13]]  ;;  %s1014_s8 = sadd.s32 5, %s4837_s27 }
 0x2ea   : > { %s4140_s28 = smov [#allocation3 + $0x54]   ;;  %s1015_s20 = sld [smem:[#allocation7 + %s1014_s8]] }
 0x2eb   : > { %s4882_s12 = sshll.u32 %s4140_s28, 4  ;;  %s4141_s5 = smov [#allocation3 + $0x55]  }
 0x2ec   : > { %5303 = sst [smem:[#allocation192_spill]] %s4882_s12  ;;  %s4888_s16 = sshll.u32 %s4141_s5, 4  ;;  %s1028_s16 = int_to_ptr.vmem [resolvable:$true] %s4888_s16 }
 0x2ed   : > { %s982_s9 = scalar_lea.hbm %s5229_s3, %s981_s1 }
 0x2ee   : > { %s991_s22 = sshll.u32 %s982_s9, 4  ;;  %s992_s22 = int_to_ptr.hbm [resolvable:$true] %s991_s22 }
 0x2ef   : > { %s999_s19 = scalar_lea.hbm %s5229_s3, %s998_s26  ;;  %s3369_s13 = sshra.s32 %s992_s22, 4  ;;  %s3370_s13 = int_to_ptr.hbm [resolvable:$true] %s3369_s13 }
 0x2f0   : > { %s3371_s28 = scalar_lea.hbm %s3370_s13, 1  ;;  %p3374_p1 = scmp.lt.s32.totalorder %s3370_s13, %s5229_s3 }
 0x2f1   : > { %p3372_p0 = scmp.ne.s32.totalorder %s3370_s13, %s3371_s28  ;;  %p3375_p2 = scmp.lt.s32.totalorder %s4274_s10, %s3371_s28 }
 0x2f3   : > { %p3376_p3 = por %p3375_p2, %p3374_p1 }
 0x2f5   : > { %p3377_p5 = pnand %p3376_p3, %p3372_p0 }
 0x2f7   : > { %3380 = shalt.err (!%p3377_p5)  }
 0x2f8   : > { %996 = dma.hbm_to_vmem [thread:$0]  %s992_s22, 16, %s994_s25, [#allocation4 + $0x1] }
 0x2f9   : > { %s1008_s1 = sshll.u32 %s999_s19, 4  ;;  %s1016_s9 = scalar_lea.hbm %s5229_s3, %s1015_s20  ;;  %s1009_s1 = int_to_ptr.hbm [resolvable:$true] %s1008_s1 }
 0x2fa   : > { %s1025_s26 = sshll.u32 %s1016_s9, 4  ;;  %s3393_s5 = sshra.s32 %s1009_s1, 4  ;;  %s3394_s5 = int_to_ptr.hbm [resolvable:$true] %s3393_s5  ;;  %s1026_s26 = int_to_ptr.hbm [resolvable:$true] %s1025_s26 }
 0x2fb   : > { %s3395_s15 = scalar_lea.hbm %s3394_s5, 1  ;;  %p3398_p8 = scmp.lt.s32.totalorder %s3394_s5, %s5229_s3 }
 0x2fc   : > { %p3396_p7 = scmp.ne.s32.totalorder %s3394_s5, %s3395_s15  ;;  %p3399_p9 = scmp.lt.s32.totalorder %s4274_s10, %s3395_s15 }
 0x2fe   : > { %p3400_p10 = por %p3399_p9, %p3398_p8 }
 0x300   : > { %p3401_p11 = pnand %p3400_p10, %p3396_p7 }
 0x302   : > { %3404 = shalt.err (!%p3401_p11)  }
 0x303   : > { %s5304_s25 = sld [smem:[#allocation192_spill]]  ;;  %s1031_s20 = sadd.s32 6, %s4837_s27 }
 0x304   : > { %s3417_s19 = sshra.s32 %s1026_s26, 4  ;;  %s3418_s19 = int_to_ptr.hbm [resolvable:$true] %s3417_s19 }
 0x305   : > { %s3419_s13 = scalar_lea.hbm %s3418_s19, 1  ;;  %p3422_p13 = scmp.lt.s32.totalorder %s3418_s19, %s5229_s3 }
 0x306   : > { %p3420_p12 = scmp.ne.s32.totalorder %s3418_s19, %s3419_s13  ;;  %p3423_p0 = scmp.lt.s32.totalorder %s4274_s10, %s3419_s13 }
 0x308   : > { %p3424_p1 = por %p3423_p0, %p3422_p13 }
 0x309   : > { %s5305_s22 = int_to_ptr.vmem [resolvable:$true] %s5304_s25 }
 0x30a   : > { %1013 = dma.hbm_to_vmem [thread:$0]  %s1009_s1, 16, %s5305_s22, [#allocation4 + $0x1] }
 0x30b   : > { %p3425_p2 = pnand %p3424_p1, %p3420_p12 }
 0x30d   : > { %3428 = shalt.err (!%p3425_p2)  }
 0x30e   : > { %1030 = dma.hbm_to_vmem [thread:$0]  %s1026_s26, 16, %s1028_s16, [#allocation4 + $0x1] }
 0x30f   : > { %s1032_s1 = sld [smem:[#allocation7 + %s1031_s20]]  ;;  %s4142_s18 = smov [#allocation3 + $0x56]  }
 0x310   : > { %s1044_s21 = sshll.u32 %s4142_s18, 4  ;;  %s1048_s9 = sadd.s32 7, %s4837_s27  ;;  %s1045_s21 = int_to_ptr.vmem [resolvable:$true] %s1044_s21 }
 0x311   : > { %s1049_s5 = sld [smem:[#allocation7 + %s1048_s9]]  ;;  %s1065_s15 = sadd.s32 8, %s4837_s27 }
 0x312   : > { %s4143_s17 = smov [#allocation3 + $0x57]   ;;  %s1066_s25 = sld [smem:[#allocation7 + %s1065_s15]] }
 0x313   : > { %s4916_s12 = sshll.u32 %s4143_s17, 4  ;;  %s4144_s28 = smov [#allocation3 + $0x58]   ;;  %s1062_s12 = int_to_ptr.vmem [resolvable:$true] %s4916_s12 }
 0x314   : > { %s4922_s16 = sshll.u32 %s4144_s28, 4  ;;  %s1079_s16 = int_to_ptr.vmem [resolvable:$true] %s4922_s16 }
 0x315   : > { %s1033_s13 = scalar_lea.hbm %s5229_s3, %s1032_s1 }
 0x316   : > { %s1042_s26 = sshll.u32 %s1033_s13, 4  ;;  %s1043_s26 = int_to_ptr.hbm [resolvable:$true] %s1042_s26 }
 0x317   : > { %s1050_s8 = scalar_lea.hbm %s5229_s3, %s1049_s5  ;;  %s3441_s18 = sshra.s32 %s1043_s26, 4  ;;  %s3442_s18 = int_to_ptr.hbm [resolvable:$true] %s3441_s18 }
 0x318   : > { %s3443_s9 = scalar_lea.hbm %s3442_s18, 1  ;;  %p3446_p5 = scmp.lt.s32.totalorder %s3442_s18, %s5229_s3 }
 0x319   : > { %p3444_p3 = scmp.ne.s32.totalorder %s3442_s18, %s3443_s9  ;;  %p3447_p7 = scmp.lt.s32.totalorder %s4274_s10, %s3443_s9 }
 0x31b   : > { %p3448_p8 = por %p3447_p7, %p3446_p5 }
 0x31d   : > { %p3449_p9 = pnand %p3448_p8, %p3444_p3 }
 0x31f   : > { %3452 = shalt.err (!%p3449_p9)  }
 0x320   : > { %1047 = dma.hbm_to_vmem [thread:$0]  %s1043_s26, 16, %s1045_s21, [#allocation4 + $0x1] }
 0x321   : > { %s1059_s1 = sshll.u32 %s1050_s8, 4  ;;  %s1067_s13 = scalar_lea.hbm %s5229_s3, %s1066_s25  ;;  %s1060_s1 = int_to_ptr.hbm [resolvable:$true] %s1059_s1 }
 0x322   : > { %s1076_s5 = sshll.u32 %s1067_s13, 4  ;;  %s3465_s28 = sshra.s32 %s1060_s1, 4  ;;  %s3466_s28 = int_to_ptr.hbm [resolvable:$true] %s3465_s28  ;;  %s1077_s5 = int_to_ptr.hbm [resolvable:$true] %s1076_s5 }
 0x323   : > { %s3467_s20 = scalar_lea.hbm %s3466_s28, 1  ;;  %p3470_p11 = scmp.lt.s32.totalorder %s3466_s28, %s5229_s3 }
 0x324   : > { %p3468_p10 = scmp.ne.s32.totalorder %s3466_s28, %s3467_s20  ;;  %p3471_p12 = scmp.lt.s32.totalorder %s4274_s10, %s3467_s20 }
 0x326   : > { %p3472_p13 = por %p3471_p12, %p3470_p11 }
 0x328   : > { %p3473_p0 = pnand %p3472_p13, %p3468_p10 }
 0x32a   : > { %3476 = shalt.err (!%p3473_p0)  }
 0x32b   : > { %1064 = dma.hbm_to_vmem [thread:$0]  %s1060_s1, 16, %s1062_s12, [#allocation4 + $0x1] }
 0x32c   : > { %s1082_s21 = sadd.s32 6, %s4235_s6  ;;  %s3489_s25 = sshra.s32 %s1077_s5, 4  ;;  %s3490_s25 = int_to_ptr.hbm [resolvable:$true] %s3489_s25 }
 0x32d   : > { %s3491_s26 = scalar_lea.hbm %s3490_s25, 1  ;;  %p3494_p2 = scmp.lt.s32.totalorder %s3490_s25, %s5229_s3 }
 0x32e   : > { %p3492_p1 = scmp.ne.s32.totalorder %s3490_s25, %s3491_s26  ;;  %p3495_p3 = scmp.lt.s32.totalorder %s4274_s10, %s3491_s26 }
 0x330   : > { %p3496_p5 = por %p3495_p3, %p3494_p2 }
 0x332   : > { %p3497_p7 = pnand %p3496_p5, %p3492_p1 }
 0x334   : > { %3500 = shalt.err (!%p3497_p7)  }
 0x335   : > { %1081 = dma.hbm_to_vmem [thread:$0]  %s1077_s5, 16, %s1079_s16, [#allocation4 + $0x1] }
 0x336   : > { %s1083_s9 = sld [smem:[#allocation6 + %s1082_s21]]  ;;  %s4145_s12 = smov [#allocation2 + $0x6]  }
 0x337   : > { %s1095_s17 = sshll.u32 %s4145_s12, 4  ;;  %s4949_s1 = sadd.s32 768, %s4243_s11  ;;  %s1096_s17 = int_to_ptr.vmem [resolvable:$true] %s1095_s17 }
 0x338   : > { %s1100_s22 = sld [smem:[#allocation7 + %s4949_s1]]  ;;  %s1116_s19 = sadd.s32 1, %s4949_s1 }
 0x339   : > { %s4146_s13 = smov [#allocation3 + $0x60]   ;;  %s1117_s20 = sld [smem:[#allocation7 + %s1116_s19]] }
 0x33a   : > { %s4953_s28 = sshll.u32 %s4146_s13, 4  ;;  %s4147_s5 = smov [#allocation3 + $0x61]  }
 0x33b   : > { %5306 = sst [smem:[#allocation192_spill]] %s4953_s28  ;;  %s4959_s21 = sshll.u32 %s4147_s5, 4  ;;  %s1130_s21 = int_to_ptr.vmem [resolvable:$true] %s4959_s21 }
 0x33c   : > { %s1084_s16 = scalar_lea.hbm %s5228_s2, %s1083_s9 }
 0x33d   : > { %s1093_s25 = sshll.u32 %s1084_s16, 4  ;;  %s1094_s25 = int_to_ptr.hbm [resolvable:$true] %s1093_s25 }
 0x33e   : > { %s1101_s18 = scalar_lea.hbm %s5229_s3, %s1100_s22  ;;  %s3513_s12 = sshra.s32 %s1094_s25, 4  ;;  %s3514_s12 = int_to_ptr.hbm [resolvable:$true] %s3513_s12 }
 0x33f   : > { %s3515_s13 = scalar_lea.hbm %s3514_s12, 1  ;;  %p3518_p9 = scmp.lt.s32.totalorder %s3514_s12, %s5228_s2 }
 0x340   : > { %p3516_p8 = scmp.ne.s32.totalorder %s3514_s12, %s3515_s13  ;;  %p3519_p10 = scmp.lt.s32.totalorder %s4258_s14, %s3515_s13 }
 0x342   : > { %p3520_p11 = por %p3519_p10, %p3518_p9 }
 0x344   : > { %p3521_p12 = pnand %p3520_p11, %p3516_p8 }
 0x346   : > { %3524 = shalt.err (!%p3521_p12)  }
 0x347   : > { %1098 = dma.hbm_to_vmem [thread:$0]  %s1094_s25, 16, %s1096_s17, [#allocation4] }
 0x348   : > { %s1110_s9 = sshll.u32 %s1101_s18, 4  ;;  %s1118_s16 = scalar_lea.hbm %s5229_s3, %s1117_s20  ;;  %s1111_s9 = int_to_ptr.hbm [resolvable:$true] %s1110_s9 }
 0x349   : > { %s1127_s22 = sshll.u32 %s1118_s16, 4  ;;  %s3537_s5 = sshra.s32 %s1111_s9, 4  ;;  %s3538_s5 = int_to_ptr.hbm [resolvable:$true] %s3537_s5  ;;  %s1128_s22 = int_to_ptr.hbm [resolvable:$true] %s1127_s22 }
 0x34a   : > { %s3539_s26 = scalar_lea.hbm %s3538_s5, 1  ;;  %p3542_p0 = scmp.lt.s32.totalorder %s3538_s5, %s5229_s3 }
 0x34b   : > { %p3540_p13 = scmp.ne.s32.totalorder %s3538_s5, %s3539_s26  ;;  %p3543_p1 = scmp.lt.s32.totalorder %s4274_s10, %s3539_s26 }
 0x34d   : > { %p3544_p2 = por %p3543_p1, %p3542_p0 }
 0x34f   : > { %p3545_p3 = pnand %p3544_p2, %p3540_p13 }
 0x351   : > { %3548 = shalt.err (!%p3545_p3)  }
 0x352   : > { %s5307_s17 = sld [smem:[#allocation192_spill]]  ;;  %s1133_s20 = sadd.s32 2, %s4949_s1 }
 0x353   : > { %s3561_s18 = sshra.s32 %s1128_s22, 4  ;;  %s3562_s18 = int_to_ptr.hbm [resolvable:$true] %s3561_s18 }
 0x354   : > { %s3563_s12 = scalar_lea.hbm %s3562_s18, 1  ;;  %p3566_p7 = scmp.lt.s32.totalorder %s3562_s18, %s5229_s3 }
 0x355   : > { %p3564_p5 = scmp.ne.s32.totalorder %s3562_s18, %s3563_s12  ;;  %p3567_p8 = scmp.lt.s32.totalorder %s4274_s10, %s3563_s12 }
 0x357   : > { %p3568_p9 = por %p3567_p8, %p3566_p7 }
 0x358   : > { %s5308_s25 = int_to_ptr.vmem [resolvable:$true] %s5307_s17 }
 0x359   : > { %1115 = dma.hbm_to_vmem [thread:$0]  %s1111_s9, 16, %s5308_s25, [#allocation4 + $0x1] }
 0x35a   : > { %p3569_p10 = pnand %p3568_p9, %p3564_p5 }
 0x35c   : > { %3572 = shalt.err (!%p3569_p10)  }
 0x35d   : > { %1132 = dma.hbm_to_vmem [thread:$0]  %s1128_s22, 16, %s1130_s21, [#allocation4 + $0x1] }
 0x35e   : > { %s1134_s9 = sld [smem:[#allocation7 + %s1133_s20]]  ;;  %s4148_s27 = smov [#allocation3 + $0x62]  }
 0x35f   : > { %s1146_s15 = sshll.u32 %s4148_s27, 4  ;;  %s1150_s16 = sadd.s32 3, %s4949_s1  ;;  %s1147_s15 = int_to_ptr.vmem [resolvable:$true] %s1146_s15 }
 0x360   : > { %s1151_s5 = sld [smem:[#allocation7 + %s1150_s16]]  ;;  %s1167_s26 = sadd.s32 4, %s4949_s1 }
 0x361   : > { %s4149_s8 = smov [#allocation3 + $0x63]   ;;  %s1168_s17 = sld [smem:[#allocation7 + %s1167_s26]] }
 0x362   : > { %s4987_s28 = sshll.u32 %s4149_s8, 4  ;;  %s4150_s13 = smov [#allocation3 + $0x64]  }
 0x363   : > { %5309 = sst [smem:[#allocation192_spill]] %s4987_s28  ;;  %s4993_s21 = sshll.u32 %s4150_s13, 4  ;;  %s1181_s21 = int_to_ptr.vmem [resolvable:$true] %s4993_s21 }
 0x364   : > { %s1135_s12 = scalar_lea.hbm %s5229_s3, %s1134_s9 }
 0x365   : > { %s1144_s22 = sshll.u32 %s1135_s12, 4  ;;  %s1145_s22 = int_to_ptr.hbm [resolvable:$true] %s1144_s22 }
 0x366   : > { %s1152_s27 = scalar_lea.hbm %s5229_s3, %s1151_s5  ;;  %s3585_s16 = sshra.s32 %s1145_s22, 4  ;;  %s3586_s16 = int_to_ptr.hbm [resolvable:$true] %s3585_s16 }
 0x367   : > { %s3587_s8 = scalar_lea.hbm %s3586_s16, 1  ;;  %p3590_p12 = scmp.lt.s32.totalorder %s3586_s16, %s5229_s3 }
 0x368   : > { %p3588_p11 = scmp.ne.s32.totalorder %s3586_s16, %s3587_s8  ;;  %p3591_p13 = scmp.lt.s32.totalorder %s4274_s10, %s3587_s8 }
 0x36a   : > { %p3592_p0 = por %p3591_p13, %p3590_p12 }
 0x36c   : > { %p3593_p1 = pnand %p3592_p0, %p3588_p11 }
 0x36e   : > { %3596 = shalt.err (!%p3593_p1)  }
 0x36f   : > { %1149 = dma.hbm_to_vmem [thread:$0]  %s1145_s22, 16, %s1147_s15, [#allocation4 + $0x1] }
 0x370   : > { %s1161_s9 = sshll.u32 %s1152_s27, 4  ;;  %s1169_s12 = scalar_lea.hbm %s5229_s3, %s1168_s17  ;;  %s1162_s9 = int_to_ptr.hbm [resolvable:$true] %s1161_s9 }
 0x371   : > { %s1178_s5 = sshll.u32 %s1169_s12, 4  ;;  %s3609_s13 = sshra.s32 %s1162_s9, 4  ;;  %s3610_s13 = int_to_ptr.hbm [resolvable:$true] %s3609_s13  ;;  %s1179_s5 = int_to_ptr.hbm [resolvable:$true] %s1178_s5 }
 0x372   : > { %s3611_s20 = scalar_lea.hbm %s3610_s13, 1  ;;  %p3614_p3 = scmp.lt.s32.totalorder %s3610_s13, %s5229_s3 }
 0x373   : > { %p3612_p2 = scmp.ne.s32.totalorder %s3610_s13, %s3611_s20  ;;  %p3615_p5 = scmp.lt.s32.totalorder %s4274_s10, %s3611_s20 }
 0x375   : > { %p3616_p7 = por %p3615_p5, %p3614_p3 }
 0x377   : > { %p3617_p8 = pnand %p3616_p7, %p3612_p2 }
 0x379   : > { %3620 = shalt.err (!%p3617_p8)  }
 0x37a   : > { %s5310_s15 = sld [smem:[#allocation192_spill]]  ;;  %s1184_s17 = sadd.s32 5, %s4949_s1 }
 0x37b   : > { %s3633_s27 = sshra.s32 %s1179_s5, 4  ;;  %s3634_s27 = int_to_ptr.hbm [resolvable:$true] %s3633_s27 }
 0x37c   : > { %s3635_s16 = scalar_lea.hbm %s3634_s27, 1  ;;  %p3638_p10 = scmp.lt.s32.totalorder %s3634_s27, %s5229_s3 }
 0x37d   : > { %p3636_p9 = scmp.ne.s32.totalorder %s3634_s27, %s3635_s16  ;;  %p3639_p11 = scmp.lt.s32.totalorder %s4274_s10, %s3635_s16 }
 0x37f   : > { %p3640_p12 = por %p3639_p11, %p3638_p10 }
 0x380   : > { %s5311_s22 = int_to_ptr.vmem [resolvable:$true] %s5310_s15 }
 0x381   : > { %1166 = dma.hbm_to_vmem [thread:$0]  %s1162_s9, 16, %s5311_s22, [#allocation4 + $0x1] }
 0x382   : > { %p3641_p13 = pnand %p3640_p12, %p3636_p9 }
 0x384   : > { %3644 = shalt.err (!%p3641_p13)  }
 0x385   : > { %1183 = dma.hbm_to_vmem [thread:$0]  %s1179_s5, 16, %s1181_s21, [#allocation4 + $0x1] }
 0x386   : > { %s1185_s9 = sld [smem:[#allocation7 + %s1184_s17]]  ;;  %s4151_s25 = smov [#allocation3 + $0x65]  }
 0x387   : > { %s1197_s18 = sshll.u32 %s4151_s25, 4  ;;  %s1201_s12 = sadd.s32 6, %s4949_s1  ;;  %s1198_s18 = int_to_ptr.vmem [resolvable:$true] %s1197_s18 }
 0x388   : > { %s1202_s13 = sld [smem:[#allocation7 + %s1201_s12]]  ;;  %s1218_s20 = sadd.s32 7, %s4949_s1 }
 0x389   : > { %s4152_s19 = smov [#allocation3 + $0x66]   ;;  %s1219_s15 = sld [smem:[#allocation7 + %s1218_s20]] }
 0x38a   : > { %s5021_s28 = sshll.u32 %s4152_s19, 4  ;;  %s4153_s8 = smov [#allocation3 + $0x67]  }
 0x38b   : > { %5312 = sst [smem:[#allocation192_spill]] %s5021_s28  ;;  %s5027_s21 = sshll.u32 %s4153_s8, 4  ;;  %s1232_s21 = int_to_ptr.vmem [resolvable:$true] %s5027_s21 }
 0x38c   : > { %s1186_s16 = scalar_lea.hbm %s5229_s3, %s1185_s9 }
 0x38d   : > { %s1195_s5 = sshll.u32 %s1186_s16, 4  ;;  %s1196_s5 = int_to_ptr.hbm [resolvable:$true] %s1195_s5 }
 0x38e   : > { %s1203_s25 = scalar_lea.hbm %s5229_s3, %s1202_s13  ;;  %s3657_s12 = sshra.s32 %s1196_s5, 4  ;;  %s3658_s12 = int_to_ptr.hbm [resolvable:$true] %s3657_s12 }
 0x38f   : > { %s3659_s19 = scalar_lea.hbm %s3658_s12, 1  ;;  %p3662_p1 = scmp.lt.s32.totalorder %s3658_s12, %s5229_s3 }
 0x390   : > { %p3660_p0 = scmp.ne.s32.totalorder %s3658_s12, %s3659_s19  ;;  %p3663_p2 = scmp.lt.s32.totalorder %s4274_s10, %s3659_s19 }
 0x392   : > { %p3664_p3 = por %p3663_p2, %p3662_p1 }
 0x394   : > { %p3665_p5 = pnand %p3664_p3, %p3660_p0 }
 0x396   : > { %3668 = shalt.err (!%p3665_p5)  }
 0x397   : > { %1200 = dma.hbm_to_vmem [thread:$0]  %s1196_s5, 16, %s1198_s18, [#allocation4 + $0x1] }
 0x398   : > { %s1212_s9 = sshll.u32 %s1203_s25, 4  ;;  %s1220_s16 = scalar_lea.hbm %s5229_s3, %s1219_s15  ;;  %s1213_s9 = int_to_ptr.hbm [resolvable:$true] %s1212_s9 }
 0x399   : > { %s1229_s13 = sshll.u32 %s1220_s16, 4  ;;  %s3681_s8 = sshra.s32 %s1213_s9, 4  ;;  %s3682_s8 = int_to_ptr.hbm [resolvable:$true] %s3681_s8  ;;  %s1230_s13 = int_to_ptr.hbm [resolvable:$true] %s1229_s13 }
 0x39a   : > { %s3683_s17 = scalar_lea.hbm %s3682_s8, 1  ;;  %p3686_p8 = scmp.lt.s32.totalorder %s3682_s8, %s5229_s3 }
 0x39b   : > { %p3684_p7 = scmp.ne.s32.totalorder %s3682_s8, %s3683_s17  ;;  %p3687_p9 = scmp.lt.s32.totalorder %s4274_s10, %s3683_s17 }
 0x39d   : > { %p3688_p10 = por %p3687_p9, %p3686_p8 }
 0x39f   : > { %p3689_p11 = pnand %p3688_p10, %p3684_p7 }
 0x3a1   : > { %3692 = shalt.err (!%p3689_p11)  }
 0x3a2   : > { %s5313_s18 = sld [smem:[#allocation192_spill]]  ;;  %s1235_s15 = sadd.s32 8, %s4949_s1 }
 0x3a3   : > { %s3705_s25 = sshra.s32 %s1230_s13, 4  ;;  %s3706_s25 = int_to_ptr.hbm [resolvable:$true] %s3705_s25 }
 0x3a4   : > { %s3707_s12 = scalar_lea.hbm %s3706_s25, 1  ;;  %p3710_p13 = scmp.lt.s32.totalorder %s3706_s25, %s5229_s3 }
 0x3a5   : > { %p3708_p12 = scmp.ne.s32.totalorder %s3706_s25, %s3707_s12  ;;  %p3711_p0 = scmp.lt.s32.totalorder %s4274_s10, %s3707_s12 }
 0x3a7   : > { %p3712_p1 = por %p3711_p0, %p3710_p13 }
 0x3a8   : > { %s5314_s5 = int_to_ptr.vmem [resolvable:$true] %s5313_s18 }
 0x3a9   : > { %1217 = dma.hbm_to_vmem [thread:$0]  %s1213_s9, 16, %s5314_s5, [#allocation4 + $0x1] }
 0x3aa   : > { %p3713_p2 = pnand %p3712_p1, %p3708_p12 }
 0x3ac   : > { %3716 = shalt.err (!%p3713_p2)  }
 0x3ad   : > { %1234 = dma.hbm_to_vmem [thread:$0]  %s1230_s13, 16, %s1232_s21, [#allocation4 + $0x1] }
 0x3ae   : > { %s1236_s9 = sld [smem:[#allocation7 + %s1235_s15]]  ;;  %s4154_s22 = smov [#allocation3 + $0x68]  }
 0x3af   : > { %s1248_s1 = sshll.u32 %s4154_s22, 4  ;;  %s1252_s27 = sadd.s32 7, %s4235_s6  ;;  %s1249_s1 = int_to_ptr.vmem [resolvable:$true] %s1248_s1 }
 0x3b0   : > { %s1253_s16 = sld [smem:[#allocation6 + %s1252_s27]]  ;;  %s5055_s8 = sadd.s32 896, %s4243_s11 }
 0x3b1   : > { %s4155_s17 = smov [#allocation2 + $0x7]   ;;  %s1270_s28 = sld [smem:[#allocation7 + %s5055_s8]] }
 0x3b2   : > { %s5057_s26 = sshll.u32 %s4155_s17, 4  ;;  %s4156_s13 = smov [#allocation3 + $0x70]   ;;  %s1266_s26 = int_to_ptr.vmem [resolvable:$true] %s5057_s26 }
 0x3b3   : > { %s5064_s15 = sshll.u32 %s4156_s13, 4  ;;  %s1283_s15 = int_to_ptr.vmem [resolvable:$true] %s5064_s15 }
 0x3b4   : > { %s1237_s21 = scalar_lea.hbm %s5229_s3, %s1236_s9 }
 0x3b5   : > { %s1246_s25 = sshll.u32 %s1237_s21, 4  ;;  %s1247_s25 = int_to_ptr.hbm [resolvable:$true] %s1246_s25 }
 0x3b6   : > { %s1254_s19 = scalar_lea.hbm %s5228_s2, %s1253_s16  ;;  %s3729_s20 = sshra.s32 %s1247_s25, 4  ;;  %s3730_s20 = int_to_ptr.hbm [resolvable:$true] %s3729_s20 }
 0x3b7   : > { %s3731_s22 = scalar_lea.hbm %s3730_s20, 1  ;;  %p3734_p5 = scmp.lt.s32.totalorder %s3730_s20, %s5229_s3 }
 0x3b8   : > { %p3732_p3 = scmp.ne.s32.totalorder %s3730_s20, %s3731_s22  ;;  %p3735_p7 = scmp.lt.s32.totalorder %s4274_s10, %s3731_s22 }
 0x3ba   : > { %p3736_p8 = por %p3735_p7, %p3734_p5 }
 0x3bc   : > { %p3737_p9 = pnand %p3736_p8, %p3732_p3 }
 0x3be   : > { %3740 = shalt.err (!%p3737_p9)  }
 0x3bf   : > { %1251 = dma.hbm_to_vmem [thread:$0]  %s1247_s25, 16, %s1249_s1, [#allocation4 + $0x1] }
 0x3c0   : > { %s1263_s9 = sshll.u32 %s1254_s19, 4  ;;  %s1271_s21 = scalar_lea.hbm %s5229_s3, %s1270_s28  ;;  %s1264_s9 = int_to_ptr.hbm [resolvable:$true] %s1263_s9 }
 0x3c1   : > { %s1280_s16 = sshll.u32 %s1271_s21, 4  ;;  %s3753_s13 = sshra.s32 %s1264_s9, 4  ;;  %s3754_s13 = int_to_ptr.hbm [resolvable:$true] %s3753_s13  ;;  %s1281_s16 = int_to_ptr.hbm [resolvable:$true] %s1280_s16 }
 0x3c2   : > { %s3755_s11 = scalar_lea.hbm %s3754_s13, 1  ;;  %p3758_p11 = scmp.lt.s32.totalorder %s3754_s13, %s5228_s2 }
 0x3c3   : > { %p3756_p10 = scmp.ne.s32.totalorder %s3754_s13, %s3755_s11  ;;  %p3759_p12 = scmp.lt.s32.totalorder %s4258_s14, %s3755_s11 }
 0x3c5   : > { %p3760_p13 = por %p3759_p12, %p3758_p11 }
 0x3c7   : > { %p3761_p0 = pnand %p3760_p13, %p3756_p10 }
 0x3c9   : > { %3764 = shalt.err (!%p3761_p0)  }
 0x3ca   : > { %1268 = dma.hbm_to_vmem [thread:$0]  %s1264_s9, 16, %s1266_s26, [#allocation4] }
 0x3cb   : > { %s1286_s1 = sadd.s32 1, %s5055_s8  ;;  %s3777_s28 = sshra.s32 %s1281_s16, 4  ;;  %s3778_s28 = int_to_ptr.hbm [resolvable:$true] %s3777_s28 }
 0x3cc   : > { %s3779_s25 = scalar_lea.hbm %s3778_s28, 1  ;;  %p3782_p2 = scmp.lt.s32.totalorder %s3778_s28, %s5229_s3 }
 0x3cd   : > { %p3780_p1 = scmp.ne.s32.totalorder %s3778_s28, %s3779_s25  ;;  %p3783_p3 = scmp.lt.s32.totalorder %s4274_s10, %s3779_s25 }
 0x3cf   : > { %p3784_p5 = por %p3783_p3, %p3782_p2 }
 0x3d1   : > { %p3785_p7 = pnand %p3784_p5, %p3780_p1 }
 0x3d3   : > { %3788 = shalt.err (!%p3785_p7)  }
 0x3d4   : > { %1285 = dma.hbm_to_vmem [thread:$0]  %s1281_s16, 16, %s1283_s15, [#allocation4 + $0x1] }
 0x3d5   : > { %s1287_s14 = sld [smem:[#allocation7 + %s1286_s1]]  ;;  %s4157_s26 = smov [#allocation3 + $0x71]  }
 0x3d6   : > { %s1299_s22 = sshll.u32 %s4157_s26, 4  ;;  %s1303_s17 = sadd.s32 2, %s5055_s8  ;;  %s1300_s22 = int_to_ptr.vmem [resolvable:$true] %s1299_s22 }
 0x3d7   : > { %s1304_s9 = sld [smem:[#allocation7 + %s1303_s17]]  ;;  %s1320_s18 = sadd.s32 3, %s5055_s8 }
 0x3d8   : > { %s4158_s5 = smov [#allocation3 + $0x72]   ;;  %s1321_s13 = sld [smem:[#allocation7 + %s1320_s18]] }
 0x3d9   : > { %s5092_s21 = sshll.u32 %s4158_s5, 4  ;;  %s4159_s28 = smov [#allocation3 + $0x73]   ;;  %s1317_s21 = int_to_ptr.vmem [resolvable:$true] %s5092_s21 }
 0x3da   : > { %s5098_s15 = sshll.u32 %s4159_s28, 4  ;;  %s1334_s15 = int_to_ptr.vmem [resolvable:$true] %s5098_s15 }
 0x3db   : > { %s1288_s27 = scalar_lea.hbm %s5229_s3, %s1287_s14 }
 0x3dc   : > { %s1297_s16 = sshll.u32 %s1288_s27, 4  ;;  %s1298_s16 = int_to_ptr.hbm [resolvable:$true] %s1297_s16 }
 0x3dd   : > { %s1305_s19 = scalar_lea.hbm %s5229_s3, %s1304_s9  ;;  %s3801_s20 = sshra.s32 %s1298_s16, 4  ;;  %s3802_s20 = int_to_ptr.hbm [resolvable:$true] %s3801_s20 }
 0x3de   : > { %s3803_s26 = scalar_lea.hbm %s3802_s20, 1  ;;  %p3806_p9 = scmp.lt.s32.totalorder %s3802_s20, %s5229_s3 }
 0x3df   : > { %p3804_p8 = scmp.ne.s32.totalorder %s3802_s20, %s3803_s26  ;;  %p3807_p10 = scmp.lt.s32.totalorder %s4274_s10, %s3803_s26 }
 0x3e1   : > { %p3808_p11 = por %p3807_p10, %p3806_p9 }
 0x3e3   : > { %p3809_p12 = pnand %p3808_p11, %p3804_p8 }
 0x3e5   : > { %3812 = shalt.err (!%p3809_p12)  }
 0x3e6   : > { %1302 = dma.hbm_to_vmem [thread:$0]  %s1298_s16, 16, %s1300_s22, [#allocation4 + $0x1] }
 0x3e7   : > { %s1314_s14 = sshll.u32 %s1305_s19, 4  ;;  %s1322_s12 = scalar_lea.hbm %s5229_s3, %s1321_s13  ;;  %s1315_s14 = int_to_ptr.hbm [resolvable:$true] %s1314_s14 }
 0x3e8   : > { %s1331_s9 = sshll.u32 %s1322_s12, 4  ;;  %s3825_s27 = sshra.s32 %s1315_s14, 4  ;;  %s3826_s27 = int_to_ptr.hbm [resolvable:$true] %s3825_s27  ;;  %s1332_s9 = int_to_ptr.hbm [resolvable:$true] %s1331_s9 }
 0x3e9   : > { %s3827_s28 = scalar_lea.hbm %s3826_s27, 1  ;;  %p3830_p0 = scmp.lt.s32.totalorder %s3826_s27, %s5229_s3 }
 0x3ea   : > { %p3828_p13 = scmp.ne.s32.totalorder %s3826_s27, %s3827_s28  ;;  %p3831_p1 = scmp.lt.s32.totalorder %s4274_s10, %s3827_s28 }
 0x3ec   : > { %p3832_p2 = por %p3831_p1, %p3830_p0 }
 0x3ee   : > { %p3833_p3 = pnand %p3832_p2, %p3828_p13 }
 0x3f0   : > { %3836 = shalt.err (!%p3833_p3)  }
 0x3f1   : > { %1319 = dma.hbm_to_vmem [thread:$0]  %s1315_s14, 16, %s1317_s21, [#allocation4 + $0x1] }
 0x3f2   : > { %s1337_s22 = sadd.s32 4, %s5055_s8  ;;  %s3849_s13 = sshra.s32 %s1332_s9, 4  ;;  %s3850_s13 = int_to_ptr.hbm [resolvable:$true] %s3849_s13 }
 0x3f3   : > { %s3851_s16 = scalar_lea.hbm %s3850_s13, 1  ;;  %p3854_p7 = scmp.lt.s32.totalorder %s3850_s13, %s5229_s3 }
 0x3f4   : > { %p3852_p5 = scmp.ne.s32.totalorder %s3850_s13, %s3851_s16  ;;  %p3855_p8 = scmp.lt.s32.totalorder %s4274_s10, %s3851_s16 }
 0x3f6   : > { %p3856_p9 = por %p3855_p8, %p3854_p7 }
 0x3f8   : > { %p3857_p10 = pnand %p3856_p9, %p3852_p5 }
 0x3fa   : > { %3860 = shalt.err (!%p3857_p10)  }
 0x3fb   : > { %1336 = dma.hbm_to_vmem [thread:$0]  %s1332_s9, 16, %s1334_s15, [#allocation4 + $0x1] }
 0x3fc   : > { %s1338_s21 = sld [smem:[#allocation7 + %s1337_s22]]  ;;  %s4160_s26 = smov [#allocation3 + $0x74]  }
 0x3fd   : > { %s1350_s17 = sshll.u32 %s4160_s26, 4  ;;  %s1354_s18 = sadd.s32 5, %s5055_s8  ;;  %s1351_s17 = int_to_ptr.vmem [resolvable:$true] %s1350_s17 }
 0x3fe   : > { %s1355_s14 = sld [smem:[#allocation7 + %s1354_s18]]  ;;  %s1371_s5 = sadd.s32 6, %s5055_s8 }
 0x3ff   : > { %s4161_s11 = smov [#allocation3 + $0x75]   ;;  %s1372_s27 = sld [smem:[#allocation7 + %s1371_s5]] }
 0x400   : > { %s5126_s12 = sshll.u32 %s4161_s11, 4  ;;  %s4162_s13 = smov [#allocation3 + $0x76]   ;;  %s1368_s12 = int_to_ptr.vmem [resolvable:$true] %s5126_s12 }
 0x401   : > { %s5132_s15 = sshll.u32 %s4162_s13, 4  ;;  %s1385_s15 = int_to_ptr.vmem [resolvable:$true] %s5132_s15 }
 0x402   : > { %s1339_s25 = scalar_lea.hbm %s5229_s3, %s1338_s21 }
 0x403   : > { %s1348_s9 = sshll.u32 %s1339_s25, 4  ;;  %s1349_s9 = int_to_ptr.hbm [resolvable:$true] %s1348_s9 }
 0x404   : > { %s1356_s19 = scalar_lea.hbm %s5229_s3, %s1355_s14  ;;  %s3873_s20 = sshra.s32 %s1349_s9, 4  ;;  %s3874_s20 = int_to_ptr.hbm [resolvable:$true] %s3873_s20 }
 0x405   : > { %s3875_s26 = scalar_lea.hbm %s3874_s20, 1  ;;  %p3878_p12 = scmp.lt.s32.totalorder %s3874_s20, %s5229_s3 }
 0x406   : > { %p3876_p11 = scmp.ne.s32.totalorder %s3874_s20, %s3875_s26  ;;  %p3879_p13 = scmp.lt.s32.totalorder %s4274_s10, %s3875_s26 }
 0x408   : > { %p3880_p0 = por %p3879_p13, %p3878_p12 }
 0x40a   : > { %p3881_p1 = pnand %p3880_p0, %p3876_p11 }
 0x40c   : > { %3884 = shalt.err (!%p3881_p1)  }
 0x40d   : > { %1353 = dma.hbm_to_vmem [thread:$0]  %s1349_s9, 16, %s1351_s17, [#allocation4 + $0x1] }
 0x40e   : > { %s1365_s21 = sshll.u32 %s1356_s19, 4  ;;  %s1373_s1 = scalar_lea.hbm %s5229_s3, %s1372_s27  ;;  %s1366_s21 = int_to_ptr.hbm [resolvable:$true] %s1365_s21 }
 0x40f   : > { %s1382_s14 = sshll.u32 %s1373_s1, 4  ;;  %s3897_s25 = sshra.s32 %s1366_s21, 4  ;;  %s3898_s25 = int_to_ptr.hbm [resolvable:$true] %s3897_s25  ;;  %s1383_s14 = int_to_ptr.hbm [resolvable:$true] %s1382_s14 }
 0x410   : > { %s3899_s13 = scalar_lea.hbm %s3898_s25, 1  ;;  %p3902_p3 = scmp.lt.s32.totalorder %s3898_s25, %s5229_s3 }
 0x411   : > { %p3900_p2 = scmp.ne.s32.totalorder %s3898_s25, %s3899_s13  ;;  %p3903_p5 = scmp.lt.s32.totalorder %s4274_s10, %s3899_s13 }
 0x413   : > { %p3904_p7 = por %p3903_p5, %p3902_p3 }
 0x415   : > { %p3905_p8 = pnand %p3904_p7, %p3900_p2 }
 0x417   : > { %3908 = shalt.err (!%p3905_p8)  }
 0x418   : > { %1370 = dma.hbm_to_vmem [thread:$0]  %s1366_s21, 16, %s1368_s12, [#allocation4 + $0x1] }
 0x419   : > { %s1388_s17 = sadd.s32 7, %s5055_s8  ;;  %s3921_s27 = sshra.s32 %s1383_s14, 4  ;;  %s3922_s27 = int_to_ptr.hbm [resolvable:$true] %s3921_s27 }
 0x41a   : > { %s3923_s9 = scalar_lea.hbm %s3922_s27, 1  ;;  %p3926_p10 = scmp.lt.s32.totalorder %s3922_s27, %s5229_s3 }
 0x41b   : > { %p3924_p9 = scmp.ne.s32.totalorder %s3922_s27, %s3923_s9  ;;  %p3927_p11 = scmp.lt.s32.totalorder %s4274_s10, %s3923_s9 }
 0x41d   : > { %p3928_p12 = por %p3927_p11, %p3926_p10 }
 0x41f   : > { %p3929_p13 = pnand %p3928_p12, %p3924_p9 }
 0x421   : > { %3932 = shalt.err (!%p3929_p13)  }
 0x422   : > { %1387 = dma.hbm_to_vmem [thread:$0]  %s1383_s14, 16, %s1385_s15, [#allocation4 + $0x1] }
 0x423   : > { %s1389_s26 = sld [smem:[#allocation7 + %s1388_s17]]  ;;  %s1405_s12 = sadd.s32 8, %s5055_s8 }
 0x424   : > { %s1406_s18 = sld [smem:[#allocation7 + %s1405_s12]]  ;;  %s4163_s5 = smov [#allocation3 + $0x77]  }
 0x425   : > { %s1401_s21 = sshll.u32 %s4163_s5, 4  ;;  %s4164_s11 = smov [#allocation3 + $0x78]   ;;  %s1402_s21 = int_to_ptr.vmem [resolvable:$true] %s1401_s21 }
 0x426   : > { %s5159_s28 = sshll.u32 %s4164_s11, 4  ;;  %s1419_s28 = int_to_ptr.vmem [resolvable:$true] %s5159_s28 }
 0x429   : > { %s1390_s13 = scalar_lea.hbm %s5229_s3, %s1389_s26 }
 0x42a   : > { %s1399_s22 = sshll.u32 %s1390_s13, 4  ;;  %s1407_s8 = scalar_lea.hbm %s5229_s3, %s1406_s18  ;;  %s1400_s22 = int_to_ptr.hbm [resolvable:$true] %s1399_s22 }
 0x42b   : > { %s3945_s14 = sshra.s32 %s1400_s22, 4  ;;  %s3946_s14 = int_to_ptr.hbm [resolvable:$true] %s3945_s14 }
 0x42c   : > { %s3947_s17 = scalar_lea.hbm %s3946_s14, 1  ;;  %p3950_p1 = scmp.lt.s32.totalorder %s3946_s14, %s5229_s3 }
 0x42d   : > { %p3948_p0 = scmp.ne.s32.totalorder %s3946_s14, %s3947_s17  ;;  %p3951_p2 = scmp.lt.s32.totalorder %s4274_s10, %s3947_s17 }
 0x42f   : > { %p3952_p3 = por %p3951_p2, %p3950_p1 }
 0x431   : > { %p3953_p5 = pnand %p3952_p3, %p3948_p0 }
 0x433   : > { %3956 = shalt.err (!%p3953_p5)  }
 0x434   : > { %1404 = dma.hbm_to_vmem [thread:$0]  %s1400_s22, 16, %s1402_s21, [#allocation4 + $0x1] }
 0x435   : > { %s1416_s19 = sshll.u32 %s1407_s8, 4  ;;  %s1417_s19 = int_to_ptr.hbm [resolvable:$true] %s1416_s19 }
 0x436   : > { %s3969_s20 = sshra.s32 %s1417_s19, 4  ;;  %s3970_s20 = int_to_ptr.hbm [resolvable:$true] %s3969_s20 }
 0x437   : > { %s3971_s26 = scalar_lea.hbm %s3970_s20, 1  ;;  %p3974_p8 = scmp.lt.s32.totalorder %s3970_s20, %s5229_s3 }
 0x438   : > { %p3972_p7 = scmp.ne.s32.totalorder %s3970_s20, %s3971_s26  ;;  %p3975_p9 = scmp.lt.s32.totalorder %s4274_s10, %s3971_s26 }
 0x43a   : > { %p3976_p10 = por %p3975_p9, %p3974_p8 }
 0x43c   : > { %p3977_p11 = pnand %p3976_p10, %p3972_p7 }
 0x43e   : > { %3980 = shalt.err (!%p3977_p11)  }
 0x43f   : > { %1421 = dma.hbm_to_vmem [thread:$0]  %s1417_s19, 16, %s1419_s28, [#allocation4 + $0x1] }
 0x440   : > { %s62_s5 = scalar_lea.vmem [#allocation8], %s4239_s7 }
 0x441   : > { %4035 = dma.done.wait [#allocation4], 16 }
 0x442   : > { %4036 = vsyncadd [#allocation4], 4294967280 }
 0x443   : > { %4037 = dma.done.wait [#allocation4 + $0x1], 144 }
 0x444   : > { %4038 = vsyncadd [#allocation4 + $0x1], 4294967152 }
 0x445   : > { %4039 = dma.done.wait [#allocation4], 16 }
 0x446   : > { %4040 = vsyncadd [#allocation4], 4294967280 }
 0x447   : > { %4041 = dma.done.wait [#allocation4 + $0x1], 144 }
 0x448   : > { %4042 = vsyncadd [#allocation4 + $0x1], 4294967152 }
 0x449   : > { %4043 = dma.done.wait [#allocation4], 16 }
 0x44a   : > { %4044 = vsyncadd [#allocation4], 4294967280 }
 0x44b   : > { %4045 = dma.done.wait [#allocation4 + $0x1], 144 }
 0x44c   : > { %4046 = vsyncadd [#allocation4 + $0x1], 4294967152 }
 0x44d   : > { %4047 = dma.done.wait [#allocation4], 16 }
 0x44e   : > { %4048 = vsyncadd [#allocation4], 4294967280 }
 0x44f   : > { %4049 = dma.done.wait [#allocation4 + $0x1], 144 }
 0x450   : > { %4050 = vsyncadd [#allocation4 + $0x1], 4294967152 }
 0x451   : > { %4051 = dma.done.wait [#allocation4], 16 }
 0x452   : > { %4052 = vsyncadd [#allocation4], 4294967280 }
 0x453   : > { %4053 = dma.done.wait [#allocation4 + $0x1], 144 }
 0x454   : > { %4054 = vsyncadd [#allocation4 + $0x1], 4294967152 }
 0x455   : > { %4055 = dma.done.wait [#allocation4], 16 }
 0x456   : > { %4056 = vsyncadd [#allocation4], 4294967280 }
 0x457   : > { %4057 = dma.done.wait [#allocation4 + $0x1], 144 }
 0x458   : > { %4058 = vsyncadd [#allocation4 + $0x1], 4294967152 }
 0x459   : > { %4059 = dma.done.wait [#allocation4], 16 }
 0x45a   : > { %4060 = vsyncadd [#allocation4], 4294967280 }
 0x45b   : > { %4061 = dma.done.wait [#allocation4 + $0x1], 144 }
 0x45c   : > { %4062 = vsyncadd [#allocation4 + $0x1], 4294967152 }
 0x45d   : > { %4063 = dma.done.wait [#allocation4], 16 }
 0x45e   : > { %4064 = vsyncadd [#allocation4], 4294967280 }
 0x45f   : > { %4065 = dma.done.wait [#allocation4 + $0x1], 144 }
 0x460   : > { %4066 = vsyncadd [#allocation4 + $0x1], 4294967152  ;;  %v1583_v0 = vld [vmem:[#allocation2] sm:$0xff]  ;;  %v1584_v1 = vld [vmem:[#allocation3] sm:$0xff]  ;;  %vm1642_vm0 = vcmask 1040384   ;;  %vm1702_vm1 = vcmask 130112   ;;  %s1754_s11 = scalar_lea.hbm %s5230_s4, %s4235_s6 }
 0x461   : > { %v1608_v2 = vperm.slane %v1583_v0, 0  ;;  %v1602_v3 = vrot.slane %v1583_v0, 2  ;;  %v1601_v4 = vrot.slane %v1583_v0, 1  ;;  %v1588_v5 = vld [vmem:[#allocation3 + $0x20] sm:$0xff]  ;;  %v1586_v6 = vld [vmem:[#allocation3 + $0x10] sm:$0xff]  ;;  %v1603_v18 = vrot.slane %v1583_v0, 3 }
 0x462   : > { %v1585_v10 = vld [vmem:[#allocation3 + $0x8] sm:$0x1]  ;;  %v1587_v14 = vld [vmem:[#allocation3 + $0x18] sm:$0x1]  ;;  %v1604_v20 = vrot.slane %v1583_v0, 4  ;;  %v1590_v25 = vld [vmem:[#allocation3 + $0x30] sm:$0xff] }
 0x463   : > { %v1624_v7 = vmul.f32 %v1608_v2, %v1584_v1  ;;  %v1610_v8 = vperm.slane %v1602_v3, 0  ;;  %v1609_v9 = vperm.slane %v1601_v4, 0  ;;  %v1589_v13 = vld [vmem:[#allocation3 + $0x28] sm:$0x1]  ;;  %v1625_v15 = vmul.f32 %v1608_v2, %v1585_v10  ;;  %v1591_v24 = vld [vmem:[#allocation3 + $0x38] sm:$0x1] }
 0x464   : > { %v1611_v23 = vperm.slane %v1603_v18, 0  ;;  %v1612_v26 = vperm.slane %v1604_v20, 0  ;;  %v1592_v27 = vld [vmem:[#allocation3 + $0x40] sm:$0xff]  ;;  %v1605_v29 = vrot.slane %v1583_v0, 5  ;;  %v1593_v32 = vld [vmem:[#allocation3 + $0x48] sm:$0x1]  ;;  %v1697_v1 = vlaneseq }
 0x465   : > { %1640 = vadd.xlane.f32.xlu0 %v1624_v7  ;;  %v1628_v11 = vmul.f32 %v1610_v8, %v1588_v5  ;;  %v1626_v12 = vmul.f32 %v1609_v9, %v1586_v6  ;;  %v1629_v16 = vmul.f32 %v1610_v8, %v1589_v13  ;;  %v1627_v17 = vmul.f32 %v1609_v9, %v1587_v14  ;;  %v1595_v35 = vld [vmem:[#allocation3 + $0x58] sm:$0x1]  ;;  %v1594_v38 = vld [vmem:[#allocation3 + $0x50] sm:$0xff]  ;;  %v1597_v45 = vld [vmem:[#allocation3 + $0x68] sm:$0x1]  ;;  %s1756_s28 = sshll.u32 %s62_s5, 4  ;;  %s1757_s28 = int_to_ptr.vmem [resolvable:$true] %s1756_s28 }
 0x466   : > { %v1643_v19 = vsel %vm1642_vm0, %v1625_v15, 0.0  ;;  %v1631_v28 = vmul.f32 %v1611_v23, %v1591_v24  ;;  %v1630_v30 = vmul.f32 %v1611_v23, %v1590_v25  ;;  %v1632_v31 = vmul.f32 %v1612_v26, %v1592_v27  ;;  %v1596_v46 = vld [vmem:[#allocation3 + $0x60] sm:$0xff]  ;;  %v1598_v49 = vld [vmem:[#allocation3 + $0x70] sm:$0xff]  ;;  %v1599_v51 = vld [vmem:[#allocation3 + $0x78] sm:$0x1]  ;;  %s1758_s1 = sshll.u32 %s1754_s11, 4  ;;  %s1759_s1 = int_to_ptr.hbm [resolvable:$true] %s1758_s1 }
 0x467   : > { %1651 = vadd.xlane.f32.xlu2 %v1628_v11  ;;  %1646 = vadd.xlane.f32.xlu1 %v1626_v12  ;;  %v1653_v21 = vsel %vm1642_vm0, %v1629_v16, 0.0  ;;  %v1648_v22 = vsel %vm1642_vm0, %v1627_v17, 0.0  ;;  %v1613_v34 = vperm.slane %v1605_v29, 0  ;;  %v1633_v36 = vmul.f32 %v1612_v26, %v1593_v32  ;;  %s5315_s6 = sand.u32 1, %s4077_s24   ;;  %s4007_s13 = sshra.s32 %s1759_s1, 4  ;;  %s4008_s13 = int_to_ptr.hbm [resolvable:$true] %s4007_s13 }
 0x468   : > { %v1658_v33 = vsel %vm1642_vm0, %v1631_v28, 0.0  ;;  %v1606_v39 = vrot.slane %v1583_v0, 6  ;;  %v1607_v42 = vrot.slane %v1583_v0, 7  ;;  %v1698_v2 = vand.u32 127, %v1697_v1  ;;  %s1744_s25 = scalar_lea.sflag [#allocation9], %s5315_s6  ;;  %s4009_s22 = scalar_lea.hbm %s4008_s13, 8 }
 0x469   : > { %v1635_v37 = vmul.f32 %v1613_v34, %v1595_v35  ;;  %v1663_v40 = vsel %vm1642_vm0, %v1633_v36, 0.0  ;;  %v1634_v41 = vmul.f32 %v1613_v34, %v1594_v38  ;;  %vm1725_vm2 = vcmask 1041409   ;;  %p4010_p12 = scmp.ne.s32.totalorder %s4008_s13, %s4009_s22  ;;  %s4013_s8 = scalar_lea.hbm %s5230_s4, 16 }
 0x46a   : > { %v1614_v44 = vperm.slane %v1606_v39, 0  ;;  %v1615_v47 = vperm.slane %v1607_v42, 0  ;;  %v1700_v4 = vadd.s32 4294967288, %v1698_v2  ;;  %vm1727_vm3 = vcmask 1042434   ;;  %p4014_p1 = scmp.lt.s32.totalorder %s4008_s13, %s5230_s4  ;;  %p4015_p2 = scmp.lt.s32.totalorder %s4013_s8, %s4009_s22 }
 0x46b   : > { %v1668_v43 = vsel %vm1642_vm0, %v1635_v37, 0.0  ;;  %vm1729_vm4 = vcmask 1043459   ;;  %vm1731_vm5 = vcmask 1044484   ;;  %vm1733_vm6 = vcmask 1045509   ;;  %p4011_p13 = pnand %p4010_p12, %p4224_p4 }
 0x46c   : > { %v1637_v48 = vmul.f32 %v1614_v44, %v1597_v45  ;;  %v1636_v50 = vmul.f32 %v1614_v44, %v1596_v46  ;;  %v1638_v52 = vmul.f32 %v1615_v47, %v1598_v49  ;;  %v1639_v54 = vmul.f32 %v1615_v47, %v1599_v51  ;;  %p4016_p3 = por %p4015_p2, %p4014_p1 }
 0x46d   : > { %1644 = vadd.xlane.f32.xlu0 %v1643_v19  ;;  %vm1735_vm7 = vcmask 1046534   ;;  %vm1737_vm8 = vcmask 1047559   ;;  %vm1740_vm9 = vcmask 72704   ;;  %p4012_p0 = pneg %p4011_p13 }
 0x46e   : > { %v1673_v53 = vsel %vm1642_vm0, %v1637_v48, 0.0  ;;  %v1678_v55 = vsel %vm1642_vm0, %v1639_v54, 0.0 }
 0x46f   : > { %1654 = vadd.xlane.f32.xlu2 %v1653_v21  ;;  %1649 = vadd.xlane.f32.xlu1 %v1648_v22  ;;  %p4017_p5 = pnand %p4016_p3, %p4012_p0 }
 0x475   : > { %1656 = vadd.xlane.f32.xlu0 %v1630_v30 }
 0x477   : > { %1661 = vadd.xlane.f32.xlu2 %v1632_v31  ;;  %1659 = vadd.xlane.f32.xlu1 %v1658_v33 }
 0x47d   : > { %1664 = vadd.xlane.f32.xlu0 %v1663_v40 }
 0x47f   : > { %1669 = vadd.xlane.f32.xlu2 %v1668_v43  ;;  %1666 = vadd.xlane.f32.xlu1 %v1634_v41 }
 0x485   : > { %1671 = vadd.xlane.f32.xlu0 %v1636_v50 }
 0x487   : > { %1674 = vadd.xlane.f32.xlu1 %v1673_v53  ;;  %1676 = vadd.xlane.f32.xlu2 %v1638_v52 }
 0x48d   : > { %1679 = vadd.xlane.f32.xlu0 %v1678_v55 }
 0x4d8   : > { %v1641_v56 = vpop.xlane.xlu0 %1640 }
 0x4d9   : > { %v1699_v11 = vperm.slane %v1641_v56, %v1698_v2 }
 0x4da   : > { %v1652_v57 = vpop.xlane.xlu2 %1651  ;;  %v1647_v58 = vpop.xlane.xlu1 %1646 }
 0x4db   : > { %v1704_v8 = vperm.slane %v1647_v58, %v1698_v2  ;;  %v1707_v14 = vperm.slane %v1652_v57, %v1698_v2 }
 0x4e0   : > { %v1645_v59 = vpop.xlane.xlu0 %1644 }
 0x4e1   : > { %v1701_v9 = vperm.slane %v1645_v59, %v1700_v4 }
 0x4e2   : > { %v1655_v60 = vpop.xlane.xlu2 %1654  ;;  %v1650_v61 = vpop.xlane.xlu1 %1649 }
 0x4e3   : > { %v1705_v6 = vperm.slane %v1650_v61, %v1700_v4  ;;  %v1708_v10 = vperm.slane %v1655_v60, %v1700_v4  ;;  %v1703_v18 = vsel %vm1702_vm1, %v1701_v9, %v1699_v11 }
 0x4e5   : > { %v1706_v12 = vsel %vm1702_vm1, %v1705_v6, %v1704_v8  ;;  %v1709_v20 = vsel %vm1702_vm1, %v1708_v10, %v1707_v14 }
 0x4e6   : > { %v1726_v21 = vsel %vm1725_vm2, %v1706_v12, %v1703_v18 }
 0x4e7   : > { %v1728_v29 = vsel %vm1727_vm3, %v1709_v20, %v1726_v21 }
 0x4e8   : > { %v1657_v62 = vpop.xlane.xlu0 %1656 }
 0x4e9   : > { %v1710_v19 = vperm.slane %v1657_v62, %v1698_v2 }
 0x4ea   : > { %v1662_v63 = vpop.xlane.xlu2 %1661  ;;  %v1660_v0 = vpop.xlane.xlu1 %1659 }
 0x4eb   : > { %v1711_v13 = vperm.slane %v1660_v0, %v1700_v4  ;;  %v1713_v15 = vperm.slane %v1662_v63, %v1698_v2 }
 0x4ed   : > { %v1712_v23 = vsel %vm1702_vm1, %v1711_v13, %v1710_v19 }
 0x4ee   : > { %v1730_v30 = vsel %vm1729_vm4, %v1712_v23, %v1728_v29 }
 0x4f0   : > { %v1665_v3 = vpop.xlane.xlu0 %1664 }
 0x4f1   : > { %v1714_v16 = vperm.slane %v1665_v3, %v1700_v4 }
 0x4f2   : > { %v1667_v5 = vpop.xlane.xlu1 %1666  ;;  %v1670_v7 = vpop.xlane.xlu2 %1669 }
 0x4f3   : > { %v1717_v24 = vperm.slane %v1670_v7, %v1700_v4  ;;  %v1716_v25 = vperm.slane %v1667_v5, %v1698_v2  ;;  %v1715_v26 = vsel %vm1702_vm1, %v1714_v16, %v1713_v15 }
 0x4f4   : > { %v1732_v32 = vsel %vm1731_vm5, %v1715_v26, %v1730_v30 }
 0x4f5   : > { %v1718_v33 = vsel %vm1702_vm1, %v1717_v24, %v1716_v25 }
 0x4f6   : > { %v1734_v38 = vsel %vm1733_vm6, %v1718_v33, %v1732_v32 }
 0x4f8   : > { %v1672_v17 = vpop.xlane.xlu0 %1671 }
 0x4f9   : > { %v1719_v31 = vperm.slane %v1672_v17, %v1698_v2 }
 0x4fa   : > { %v1675_v22 = vpop.xlane.xlu1 %1674  ;;  %v1677_v28 = vpop.xlane.xlu2 %1676 }
 0x4fb   : > { %v1720_v27 = vperm.slane %v1675_v22, %v1700_v4  ;;  %v1722_v34 = vperm.slane %v1677_v28, %v1698_v2 }
 0x4fd   : > { %v1721_v35 = vsel %vm1702_vm1, %v1720_v27, %v1719_v31 }
 0x4fe   : > { %v1736_v39 = vsel %vm1735_vm7, %v1721_v35, %v1734_v38 }
 0x500   : > { %v1680_v36 = vpop.xlane.xlu0 %1679 }
 0x501   : > { %v1723_v37 = vperm.slane %v1680_v36, %v1700_v4 }
 0x503   : > { %v1724_v40 = vsel %vm1702_vm1, %v1723_v37, %v1722_v34 }
 0x504   : > { %v1738_v41 = vsel %vm1737_vm8, %v1724_v40, %v1736_v39 }
 0x505   : > { %v1741_v42 = vsel %vm1740_vm9, %v1738_v41, 0.0 }
 0x506   : > { %1742 = vst [vmem:[%s62_s5] sm:$0xff] %v1741_v42 }
 0x507   : > { %4020 = shalt.err (!%p4017_p5)
}
 0x508   : > { %1936 = dma.vmem_to_hbm [thread:$0]  (%p4224_p4), %s1757_s28, 128, %s1759_s1, %s1744_s25  }
 0x509 PF: > { %p1942_p7 = scmp.ge.s32.totalorder %s4081_s0, 1  ;;  %s1770_s7 = sand.u32 1, %s4073_s23  }
 0x50a   : > { %s1771_s27 = scalar_lea.sflag [#allocation9], %s1770_s7 }
 0x50b   : > { %p1939_p8 = pnand %p1942_p7, %p4228_p6 }
 0x50d   : > { %p1940_p9 = pneg %p1939_p8 }
 0x50f   : > { %4068 = dma.done.wait (%p1940_p9), %s1771_s27, 128  }
 0x510   : > { %4070 = vsyncadd (%p1940_p9), %s1771_s27, 4294967168  ;;  %s5316_s0 = sld [smem:[#allocation190_spill]]  ;;  %s5318_s23 = smov %s4077_s24 }
 0x511   : > { %s5317_s9 = sld [smem:[#allocation191_spill]] }
 0x516   : > { %p27_p10 = scmp.ge.s32.totalorder %s5316_s0, 3  }
 0x517   : > { %s5319_s24 = smov %s5317_s9 }
 0x518   :  { %29 = sbr.rel (!%p27_p10) target bundleno = 10 (0xa), region = 524 }
 0x51d   :  { %1777 = vsyncpa [#allocation9], 1 }
 0x51e   :  { %1779 = vsyncpa [#allocation9 + $0x1], 1 }
 0x51f   :  { %1780 = vsyncmov [#allocation4] }
 0x522   :  { %s1781_s29 = vpop.sfrf %1780 }
 0x523   :  { %p1912_p4 = scmp.ne.s32.totalorder %s1781_s29, 0 }
 0x525   :  { %1785 = shalt.err (%p1912_p4)  }
 0x526   :  { %1787 = vsyncmov [#allocation4 + $0x1] }
 0x529   :  { %s1788_s30 = vpop.sfrf %1787 }
 0x52a   :  { %p1913_p6 = scmp.ne.s32.totalorder %s1788_s30, 0 }
 0x52c   :  { %1792 = shalt.err (%p1913_p6)  }

</bundles_post_ra>
